<compile_context>
chip_gen: v7x
topology: tpu7x:2x2x1
jax: 0.10.0
libtpu: 0.0.40
codegen_flags: <defaults>
</compile_context>

<pallas_src>
from functools import partial

import jax
import jax.numpy as jnp
from jax.experimental import pallas as pl
from jax.experimental.pallas import tpu as pltpu


# parity -> input row/col shifts contributing to that output parity
# (sub-pixel decomposition of ConvTranspose2d(k=4, stride=2, padding=1)).
_PARITY_SHIFTS = {0: (0, -1), 1: (0, 1)}


def _deconv_up_kernel(x_ref, w_ref, b_ref, o_ref, pad_ref, *, H, W):
    """ConvTranspose2d(k=4, s=2, p=1) for one batch element.

    x_ref:   (1, H*W, Cin)        spatially-flattened input, channels on lanes
    w_ref:   (2, 2, 4, Cin, Cout) per-output-parity 2x2 sub-kernels (tap-stacked)
    b_ref:   (1, Cout)
    o_ref:   (1, 2, 2, H*W, Cout) parity planes: o[ph, pw, i*W+j] = out[2i+ph, 2j+pw]
    pad_ref: (H*W + 2*W + 8, Cin) VMEM scratch (zero-padded copy of the input)
    """
    HW = H * W
    cout = o_ref.shape[-1]
    base = W + 1

    pad_ref[...] = jnp.zeros_like(pad_ref)
    pad_ref[pl.ds(base, HW), :] = x_ref[0]

    col = jax.lax.broadcasted_iota(jnp.int32, (HW, 1), 0) % W
    m_left = col >= 1           # left neighbour exists  (dw = -1)
    m_right = col <= W - 2      # right neighbour exists (dw = +1)

    for ph in range(2):
        for pw in range(2):
            acc = jnp.zeros((HW, cout), jnp.float32)
            t = 0
            for dh in _PARITY_SHIFTS[ph]:
                for dw in _PARITY_SHIFTS[pw]:
                    patch = pad_ref[pl.ds(base + dh * W + dw, HW), :]
                    if dw == -1:
                        patch = jnp.where(m_left, patch, 0.0)
                    elif dw == 1:
                        patch = jnp.where(m_right, patch, 0.0)
                    acc = acc + jnp.dot(patch, w_ref[ph, pw, t],
                                        preferred_element_type=jnp.float32)
                    t += 1
            o_ref[0, ph, pw] = (acc + b_ref[...]).astype(o_ref.dtype)


def _conv3x3_relu_kernel(*args, H, W, n_src):
    """3x3 / stride-1 / pad-1 conv + bias + ReLU over `n_src` channel groups.

    Consuming the channel groups separately fuses torch.cat into the conv.

    args = (x_0..x_{n-1}, w_0..w_{n-1}, b, o, pad_0..pad_{n-1})
      x_s:   (1, H*W, Cin_s)
      w_s:   (9, Cin_s, Cout)          taps ordered kh*3 + kw
      b:     (1, Cout)
      o:     (1, H*W, Cout)
      pad_s: (H*W + 2*W + 8, Cin_s)    VMEM scratch
    """
    xs = args[:n_src]
    ws = args[n_src:2 * n_src]
    b_ref = args[2 * n_src]
    o_ref = args[2 * n_src + 1]
    pads = args[2 * n_src + 2:]

    HW = H * W
    cout = o_ref.shape[-1]
    base = W + 1

    col = jax.lax.broadcasted_iota(jnp.int32, (HW, 1), 0) % W
    m_left = col >= 1
    m_right = col <= W - 2

    for s in range(n_src):
        pads[s][...] = jnp.zeros_like(pads[s])
        pads[s][pl.ds(base, HW), :] = xs[s][0]

    acc = jnp.zeros((HW, cout), jnp.float32)
    for s in range(n_src):
        for kh, dh in enumerate((-1, 0, 1)):
            for kw, dw in enumerate((-1, 0, 1)):
                patch = pads[s][pl.ds(base + dh * W + dw, HW), :]
                if dw == -1:
                    patch = jnp.where(m_left, patch, 0.0)
                elif dw == 1:
                    patch = jnp.where(m_right, patch, 0.0)
                acc = acc + jnp.dot(patch, ws[s][3 * kh + kw],
                                    preferred_element_type=jnp.float32)

    o_ref[0] = jnp.maximum(acc + b_ref[...], 0.0).astype(o_ref.dtype)


def _deconv_up(x_nchw, wt, bt):
    """nn.ConvTranspose2d(Cin, Cout, 4, stride=2, padding=1), NHWC-flat output."""
    N, cin, H0, W0 = x_nchw.shape
    cout = wt.shape[1]
    HW = H0 * W0

    x = jnp.transpose(x_nchw, (0, 2, 3, 1)).reshape(N, HW, cin)

    # Stack the 4 contributing (Cin, Cout) taps per output parity (ph, pw):
    # output row 2i+ph reads input row i+dh through kernel row kh = ph + 1 - 2*dh.
    par = []
    for ph in range(2):
        row = []
        for pw in range(2):
            taps = []
            for dh in _PARITY_SHIFTS[ph]:
                for dw in _PARITY_SHIFTS[pw]:
                    kh = ph + 1 - 2 * dh
                    kw = pw + 1 - 2 * dw
                    taps.append(wt[:, :, kh, kw])          # (Cin, Cout)
            row.append(jnp.stack(taps, 0))                 # (4, Cin, Cout)
        par.append(jnp.stack(row, 0))
    w_par = jnp.stack(par, 0)                              # (2, 2, 4, Cin, Cout)

    out = pl.pallas_call(
        partial(_deconv_up_kernel, H=H0, W=W0),
        out_shape=jax.ShapeDtypeStruct((N, 2, 2, HW, cout), jnp.float32),
        grid=(N,),
        in_specs=[
            pl.BlockSpec((1, HW, cin), lambda n: (n, 0, 0)),
            pl.BlockSpec((2, 2, 4, cin, cout), lambda n: (0, 0, 0, 0, 0)),
            pl.BlockSpec((1, cout), lambda n: (0, 0)),
        ],
        out_specs=pl.BlockSpec((1, 2, 2, HW, cout), lambda n: (n, 0, 0, 0, 0)),
        scratch_shapes=[pltpu.VMEM((HW + 2 * W0 + 8, cin), jnp.float32)],
        compiler_params=pltpu.CompilerParams(dimension_semantics=("parallel",)),
        cost_estimate=pl.CostEstimate(
            flops=2 * N * HW * 16 * cin * cout, transcendentals=0,
            bytes_accessed=4 * (N * HW * cin + 4 * N * HW * cout + 16 * cin * cout)),
    )(x, w_par, bt.reshape(1, cout))

    # Interleave parity planes -> NHWC (reshapes are metadata-only; the
    # transpose is the only XLA data movement between kernels and it is tiny).
    up = out.reshape(N, 2, 2, H0, W0, cout)
    up = jnp.transpose(up, (0, 3, 1, 4, 2, 5)).reshape(N, 2 * H0, 2 * W0, cout)
    return up


def _conv3x3_relu(xs, ws, b, H, W):
    """Fused (concat +) Conv2d(3x3, s=1, p=1) + bias + ReLU.

    xs: list of (N, H*W, Cin_s) channel groups (the torch.cat operands)
    ws: list of (9, Cin_s, Cout) tap-major weights for each group
    """
    n_src = len(xs)
    N, HW, _ = xs[0].shape
    cout = ws[0].shape[-1]
    cin_total = sum(x.shape[-1] for x in xs)

    in_specs = [pl.BlockSpec((1, HW, x.shape[-1]), lambda n: (n, 0, 0)) for x in xs]
    in_specs += [pl.BlockSpec(w.shape, lambda n: (0, 0, 0)) for w in ws]
    in_specs.append(pl.BlockSpec((1, cout), lambda n: (0, 0)))

    return pl.pallas_call(
        partial(_conv3x3_relu_kernel, H=H, W=W, n_src=n_src),
        out_shape=jax.ShapeDtypeStruct((N, HW, cout), jnp.float32),
        grid=(N,),
        in_specs=in_specs,
        out_specs=pl.BlockSpec((1, HW, cout), lambda n: (n, 0, 0)),
        scratch_shapes=[pltpu.VMEM((HW + 2 * W + 8, x.shape[-1]), jnp.float32)
                        for x in xs],
        compiler_params=pltpu.CompilerParams(dimension_semantics=("parallel",)),
        cost_estimate=pl.CostEstimate(
            flops=2 * N * HW * 9 * cin_total * cout, transcendentals=0,
            bytes_accessed=4 * (N * HW * (cin_total + cout) + 9 * cin_total * cout)),
    )(*xs, *ws, b.reshape(1, cout))


def unet_up_origin_forward(inputs0, skip, params):
    """unetUp_origin.forward(inputs0, skip) with is_deconv=True, n_concat=2."""
    up_nhwc = _deconv_up(inputs0, params["up_w"], params["up_b"])     # (N,H1,W1,Cup)
    N, H1, W1, cup = up_nhwc.shape

    skip_nhwc = jnp.transpose(skip, (0, 2, 3, 1))
    cskip = skip_nhwc.shape[-1]
    HW = H1 * W1
    up_flat = up_nhwc.reshape(N, HW, cup)
    skip_flat = skip_nhwc.reshape(N, HW, cskip)

    # conv1: split the concatenated-channel weight into [up | skip] groups, so
    # torch.cat never materializes in HBM.
    w1 = params["conv1_w"]                                            # (C1, cup+cskip, 3, 3)
    c1 = w1.shape[0]
    w1_t = jnp.transpose(w1, (2, 3, 1, 0)).reshape(9, cup + cskip, c1)
    y1 = _conv3x3_relu([up_flat, skip_flat],
                       [w1_t[:, :cup, :], w1_t[:, cup:, :]],
                       params["conv1_b"], H1, W1)

    w2 = params["conv2_w"]                                            # (C2, C1, 3, 3)
    c2 = w2.shape[0]
    w2_t = jnp.transpose(w2, (2, 3, 1, 0)).reshape(9, c1, c2)
    y2 = _conv3x3_relu([y1], [w2_t], params["conv2_b"], H1, W1)

    return jnp.transpose(y2.reshape(N, H1, W1, c2), (0, 3, 1, 2))     # back to NCHW


def _reference_forward(inputs0, skip, params):
    """Pure-JAX/XLA mirror of the PyTorch module (verification only)."""
    wt, bt = params["up_w"], params["up_b"]
    w_conv = jnp.transpose(jnp.flip(wt, axis=(2, 3)), (1, 0, 2, 3))   # OIHW
    up = jax.lax.conv_general_dilated(
        inputs0, w_conv, window_strides=(1, 1), padding=((2, 2), (2, 2)),
        lhs_dilation=(2, 2), dimension_numbers=("NCHW", "OIHW", "NCHW"),
        precision=jax.lax.Precision.HIGHEST)
    up = up + bt[None, :, None, None]
    x = jnp.concatenate([up, skip], axis=1)

    def conv_relu(x, w, b):
        y = jax.lax.conv_general_dilated(
            x, w, (1, 1), ((1, 1), (1, 1)),
            dimension_numbers=("NCHW", "OIHW", "NCHW"),
            precision=jax.lax.Precision.HIGHEST)
        return jnp.maximum(y + b[None, :, None, None], 0.0)

    x = conv_relu(x, params["conv1_w"], params["conv1_b"])
    return conv_relu(x, params["conv2_w"], params["conv2_b"])


if __name__ == "__main__":
    key = jax.random.PRNGKey(0)
    ks = jax.random.split(key, 8)

    # unetUp_origin(in_size=32, out_size=16, is_deconv=True, n_concat=2):
    # inputs0 has in_size channels at (H0, W0); one skip tensor with out_size
    # channels at (2H0, 2W0); output has out_size channels at (2H0, 2W0).
    N, in_size, out_size, H0, W0 = 2, 32, 16, 8, 8
    s = 0.15
    inputs0 = jax.random.normal(ks[0], (N, in_size, H0, W0), jnp.float32)
    skip = jax.random.normal(ks[1], (N, out_size, 2 * H0, 2 * W0), jnp.float32)
    params = {
        # TODO(synk): kaiming init_weights is parameter initialization (not part
        # of forward()); random weights stand in for it here.
        "up_w": s * jax.random.normal(ks[2], (in_size, out_size, 4, 4), jnp.float32),
        "up_b": s * jax.random.normal(ks[3], (out_size,), jnp.float32),
        "conv1_w": s * jax.random.normal(ks[4], (out_size, 2 * out_size, 3, 3), jnp.float32),
        "conv1_b": s * jax.random.normal(ks[5], (out_size,), jnp.float32),
        "conv2_w": s * jax.random.normal(ks[6], (out_size, out_size, 3, 3), jnp.float32),
        "conv2_b": s * jax.random.normal(ks[7], (out_size,), jnp.float32),
    }

    fwd = jax.jit(unet_up_origin_forward)
    out = jax.block_until_ready(fwd(inputs0, skip, params))

    ref = jax.block_until_ready(_reference_forward(inputs0, skip, params))
    assert out.shape == (N, out_size, 2 * H0, 2 * W0), out.shape
    max_err = float(jnp.max(jnp.abs(out - ref)))
    assert jnp.allclose(out, ref, atol=5e-2, rtol=5e-2), max_err

    print("KERNEL_OK")
</pallas_src>

<mosaic_0001>
module attributes {stable_mosaic.version = 11 : i64} {
  func.func @_deconv_up_kernel(%arg0: i32, %arg1: memref<1x64x32xf32, #tpu.memory_space<vmem>>, %arg2: memref<2x2x4x32x16xf32, #tpu.memory_space<vmem>>, %arg3: memref<1x16xf32, #tpu.memory_space<vmem>>, %arg4: memref<1x2x2x64x16xf32, #tpu.memory_space<vmem>>, %arg5: memref<88x32xf32, #tpu.memory_space<vmem>>) attributes {dimension_semantics = [#tpu.dimension_semantics<parallel>], iteration_bounds = array<i64: 2>, scalar_prefetch = 0 : i64, scratch_operands = 1 : i64, tpu.core_type = #tpu.core_type<tc>, window_params = [{transform_indices = @transform_0, window_bounds = array<i64: 1, 64, 32>}, {pipeline_mode = #tpu.pipeline_mode<synchronous>, transform_indices = @transform_1, window_bounds = array<i64: 2, 2, 4, 32, 16>}, {pipeline_mode = #tpu.pipeline_mode<synchronous>, transform_indices = @transform_2, window_bounds = array<i64: 1, 16>}, {transform_indices = @transform_3, window_bounds = array<i64: 1, 2, 2, 64, 16>}]} {
    %cst = arith.constant 0.000000e+00 : f32
    %0 = vector.broadcast %cst : f32 to vector<88x32xf32>
    %c0 = arith.constant 0 : index
    %c0_0 = arith.constant 0 : index
    %1 = vector.load %arg5[%c0, %c0_0] : memref<88x32xf32, #tpu.memory_space<vmem>>, vector<88x32xf32>
    tpu.vector_store %arg5[%c0, %c0_0], %0 {strides = array<i32>} : memref<88x32xf32, #tpu.memory_space<vmem>>, vector<88x32xf32>,
    %c0_1 = arith.constant 0 : index
    %c0_2 = arith.constant 0 : index
    %c0_3 = arith.constant 0 : index
    %2 = vector.load %arg1[%c0_1, %c0_2, %c0_3] : memref<1x64x32xf32, #tpu.memory_space<vmem>>, vector<1x64x32xf32>
    %3 = vector.shape_cast %2 : vector<1x64x32xf32> to vector<64x32xf32>
    %c9 = arith.constant 9 : index
    %c0_4 = arith.constant 0 : index
    %4 = vector.load %arg5[%c9, %c0_4] : memref<88x32xf32, #tpu.memory_space<vmem>>, vector<64x32xf32>
    tpu.vector_store %arg5[%c9, %c0_4], %3 {strides = array<i32>} : memref<88x32xf32, #tpu.memory_space<vmem>>, vector<64x32xf32>,
    %5 = tpu.iota {dimensions = array<i32: 0>} : vector<64x1xi32>
    %c8_i32 = arith.constant 8 : i32
    %c0_i32 = arith.constant 0 : i32
    %6 = arith.cmpi eq, %c8_i32, %c0_i32 : i32
    %c1_i32 = arith.constant 1 : i32
    %7 = arith.select %6, %c1_i32, %c8_i32 : i32
    %8 = vector.broadcast %7 : i32 to vector<64x1xi32>
    %9 = arith.remsi %5, %8 : vector<64x1xi32>
    %c0_i32_5 = arith.constant 0 : i32
    %10 = vector.broadcast %c0_i32_5 : i32 to vector<64x1xi32>
    %11 = arith.cmpi ne, %9, %10 : vector<64x1xi32>
    %c0_i32_6 = arith.constant 0 : i32
    %12 = vector.broadcast %c0_i32_6 : i32 to vector<64x1xi32>
    %13 = arith.cmpi slt, %9, %12 : vector<64x1xi32>
    %c0_i32_7 = arith.constant 0 : i32
    %14 = arith.cmpi slt, %7, %c0_i32_7 : i32
    %15 = vector.broadcast %14 : i1 to vector<64x1xi1>
    %16 = vector.broadcast %15 : vector<64x1xi1> to vector<64x1xi1>
    %17 = arith.xori %13, %16 : vector<64x1xi1>
    %18 = arith.andi %17, %11 : vector<64x1xi1>
    %19 = vector.broadcast %7 : i32 to vector<64x1xi32>
    %20 = arith.addi %9, %19 : vector<64x1xi32>
    %21 = arith.select %18, %20, %9 : vector<64x1xi1>, vector<64x1xi32>
    %c1_i32_8 = arith.constant 1 : i32
    %22 = vector.broadcast %c1_i32_8 : i32 to vector<64x1xi32>
    %23 = arith.cmpi sge, %21, %22 : vector<64x1xi32>
    %c6_i32 = arith.constant 6 : i32
    %24 = vector.broadcast %c6_i32 : i32 to vector<64x1xi32>
    %25 = arith.cmpi sle, %21, %24 : vector<64x1xi32>
    %cst_9 = arith.constant 0.000000e+00 : f32
    %26 = vector.broadcast %cst_9 : f32 to vector<64x16xf32>
    %c9_10 = arith.constant 9 : index
    %c0_11 = arith.constant 0 : index
    %27 = vector.load %arg5[%c9_10, %c0_11] : memref<88x32xf32, #tpu.memory_space<vmem>>, vector<64x32xf32>
    %c0_12 = arith.constant 0 : index
    %c0_13 = arith.constant 0 : index
    %c0_14 = arith.constant 0 : index
    %c0_15 = arith.constant 0 : index
    %c0_16 = arith.constant 0 : index
    %28 = vector.load %arg2[%c0_12, %c0_13, %c0_14, %c0_15, %c0_16] : memref<2x2x4x32x16xf32, #tpu.memory_space<vmem>>, vector<1x1x1x32x16xf32>
    %29 = vector.shape_cast %28 : vector<1x1x1x32x16xf32> to vector<32x16xf32>
    %cst_17 = arith.constant dense<0.000000e+00> : vector<64x16xf32>
    %30 = tpu.matmul %27, %29, %cst_17 {dimension_numbers = #tpu.dot_dimension_numbers<[1], [0], [0], [1], [0, 0, 1, 1], [], []>} : vector<64x32xf32>, vector<32x16xf32>, vector<64x16xf32> -> vector<64x16xf32>
    %31 = arith.addf %26, %30 : vector<64x16xf32>
    %c8 = arith.constant 8 : index
    %c0_18 = arith.constant 0 : index
    %32 = vector.load %arg5[%c8, %c0_18] : memref<88x32xf32, #tpu.memory_space<vmem>>, vector<64x32xf32>
    %cst_19 = arith.constant 0.000000e+00 : f32
    %33 = vector.shape_cast %23 : vector<64x1xi1> to vector<64x1xi1>
    %34 = vector.broadcast %33 : vector<64x1xi1> to vector<64x32xi1>
    %35 = vector.broadcast %cst_19 : f32 to vector<64x32xf32>
    %36 = arith.select %34, %32, %35 : vector<64x32xi1>, vector<64x32xf32>
    %c0_20 = arith.constant 0 : index
    %c0_21 = arith.constant 0 : index
    %c1 = arith.constant 1 : index
    %c0_22 = arith.constant 0 : index
    %c0_23 = arith.constant 0 : index
    %37 = vector.load %arg2[%c0_20, %c0_21, %c1, %c0_22, %c0_23] : memref<2x2x4x32x16xf32, #tpu.memory_space<vmem>>, vector<1x1x1x32x16xf32>
    %38 = vector.shape_cast %37 : vector<1x1x1x32x16xf32> to vector<32x16xf32>
    %cst_24 = arith.constant dense<0.000000e+00> : vector<64x16xf32>
    %39 = tpu.matmul %36, %38, %cst_24 {dimension_numbers = #tpu.dot_dimension_numbers<[1], [0], [0], [1], [0, 0, 1, 1], [], []>} : vector<64x32xf32>, vector<32x16xf32>, vector<64x16xf32> -> vector<64x16xf32>
    %40 = arith.addf %31, %39 : vector<64x16xf32>
    %c1_25 = arith.constant 1 : index
    %c0_26 = arith.constant 0 : index
    %41 = vector.load %arg5[%c1_25, %c0_26] : memref<88x32xf32, #tpu.memory_space<vmem>>, vector<64x32xf32>
    %c0_27 = arith.constant 0 : index
    %c0_28 = arith.constant 0 : index
    %c2 = arith.constant 2 : index
    %c0_29 = arith.constant 0 : index
    %c0_30 = arith.constant 0 : index
    %42 = vector.load %arg2[%c0_27, %c0_28, %c2, %c0_29, %c0_30] : memref<2x2x4x32x16xf32, #tpu.memory_space<vmem>>, vector<1x1x1x32x16xf32>
    %43 = vector.shape_cast %42 : vector<1x1x1x32x16xf32> to vector<32x16xf32>
    %cst_31 = arith.constant dense<0.000000e+00> : vector<64x16xf32>
    %44 = tpu.matmul %41, %43, %cst_31 {dimension_numbers = #tpu.dot_dimension_numbers<[1], [0], [0], [1], [0, 0, 1, 1], [], []>} : vector<64x32xf32>, vector<32x16xf32>, vector<64x16xf32> -> vector<64x16xf32>
    %45 = arith.addf %40, %44 : vector<64x16xf32>
    %c0_32 = arith.constant 0 : index
    %c0_33 = arith.constant 0 : index
    %46 = vector.load %arg5[%c0_32, %c0_33] : memref<88x32xf32, #tpu.memory_space<vmem>>, vector<64x32xf32>
    %cst_34 = arith.constant 0.000000e+00 : f32
    %47 = vector.shape_cast %23 : vector<64x1xi1> to vector<64x1xi1>
    %48 = vector.broadcast %47 : vector<64x1xi1> to vector<64x32xi1>
    %49 = vector.broadcast %cst_34 : f32 to vector<64x32xf32>
    %50 = arith.select %48, %46, %49 : vector<64x32xi1>, vector<64x32xf32>
    %c0_35 = arith.constant 0 : index
    %c0_36 = arith.constant 0 : index
    %c3 = arith.constant 3 : index
    %c0_37 = arith.constant 0 : index
    %c0_38 = arith.constant 0 : index
    %51 = vector.load %arg2[%c0_35, %c0_36, %c3, %c0_37, %c0_38] : memref<2x2x4x32x16xf32, #tpu.memory_space<vmem>>, vector<1x1x1x32x16xf32>
    %52 = vector.shape_cast %51 : vector<1x1x1x32x16xf32> to vector<32x16xf32>
    %cst_39 = arith.constant dense<0.000000e+00> : vector<64x16xf32>
    %53 = tpu.matmul %50, %52, %cst_39 {dimension_numbers = #tpu.dot_dimension_numbers<[1], [0], [0], [1], [0, 0, 1, 1], [], []>} : vector<64x32xf32>, vector<32x16xf32>, vector<64x16xf32> -> vector<64x16xf32>
    %54 = arith.addf %45, %53 : vector<64x16xf32>
    %c0_40 = arith.constant 0 : index
    %c0_41 = arith.constant 0 : index
    %55 = vector.load %arg3[%c0_40, %c0_41] : memref<1x16xf32, #tpu.memory_space<vmem>>, vector<1x16xf32>
    %56 = vector.broadcast %55 : vector<1x16xf32> to vector<64x16xf32>
    %57 = arith.addf %54, %56 : vector<64x16xf32>
    %c0_42 = arith.constant 0 : index
    %c0_43 = arith.constant 0 : index
    %c0_44 = arith.constant 0 : index
    %c0_45 = arith.constant 0 : index
    %c0_46 = arith.constant 0 : index
    %58 = vector.load %arg4[%c0_42, %c0_43, %c0_44, %c0_45, %c0_46] : memref<1x2x2x64x16xf32, #tpu.memory_space<vmem>>, vector<1x1x1x64x16xf32>
    %59 = vector.shape_cast %58 : vector<1x1x1x64x16xf32> to vector<64x16xf32>
    %60 = vector.shape_cast %57 : vector<64x16xf32> to vector<1x1x1x64x16xf32>
    tpu.vector_store %arg4[%c0_42, %c0_43, %c0_44, %c0_45, %c0_46], %60 {strides = array<i32>} : memref<1x2x2x64x16xf32, #tpu.memory_space<vmem>>, vector<1x1x1x64x16xf32>,
    %cst_47 = arith.constant 0.000000e+00 : f32
    %61 = vector.broadcast %cst_47 : f32 to vector<64x16xf32>
    %c9_48 = arith.constant 9 : index
    %c0_49 = arith.constant 0 : index
    %62 = vector.load %arg5[%c9_48, %c0_49] : memref<88x32xf32, #tpu.memory_space<vmem>>, vector<64x32xf32>
    %c0_50 = arith.constant 0 : index
    %c1_51 = arith.constant 1 : index
    %c0_52 = arith.constant 0 : index
    %c0_53 = arith.constant 0 : index
    %c0_54 = arith.constant 0 : index
    %63 = vector.load %arg2[%c0_50, %c1_51, %c0_52, %c0_53, %c0_54] : memref<2x2x4x32x16xf32, #tpu.memory_space<vmem>>, vector<1x1x1x32x16xf32>
    %64 = vector.shape_cast %63 : vector<1x1x1x32x16xf32> to vector<32x16xf32>
    %cst_55 = arith.constant dense<0.000000e+00> : vector<64x16xf32>
    %65 = tpu.matmul %62, %64, %cst_55 {dimension_numbers = #tpu.dot_dimension_numbers<[1], [0], [0], [1], [0, 0, 1, 1], [], []>} : vector<64x32xf32>, vector<32x16xf32>, vector<64x16xf32> -> vector<64x16xf32>
    %66 = arith.addf %61, %65 : vector<64x16xf32>
    %c10 = arith.constant 10 : index
    %c0_56 = arith.constant 0 : index
    %67 = vector.load %arg5[%c10, %c0_56] : memref<88x32xf32, #tpu.memory_space<vmem>>, vector<64x32xf32>
    %cst_57 = arith.constant 0.000000e+00 : f32
    %68 = vector.shape_cast %25 : vector<64x1xi1> to vector<64x1xi1>
    %69 = vector.broadcast %68 : vector<64x1xi1> to vector<64x32xi1>
    %70 = vector.broadcast %cst_57 : f32 to vector<64x32xf32>
    %71 = arith.select %69, %67, %70 : vector<64x32xi1>, vector<64x32xf32>
    %c0_58 = arith.constant 0 : index
    %c1_59 = arith.constant 1 : index
    %c1_60 = arith.constant 1 : index
    %c0_61 = arith.constant 0 : index
    %c0_62 = arith.constant 0 : index
    %72 = vector.load %arg2[%c0_58, %c1_59, %c1_60, %c0_61, %c0_62] : memref<2x2x4x32x16xf32, #tpu.memory_space<vmem>>, vector<1x1x1x32x16xf32>
    %73 = vector.shape_cast %72 : vector<1x1x1x32x16xf32> to vector<32x16xf32>
    %cst_63 = arith.constant dense<0.000000e+00> : vector<64x16xf32>
    %74 = tpu.matmul %71, %73, %cst_63 {dimension_numbers = #tpu.dot_dimension_numbers<[1], [0], [0], [1], [0, 0, 1, 1], [], []>} : vector<64x32xf32>, vector<32x16xf32>, vector<64x16xf32> -> vector<64x16xf32>
    %75 = arith.addf %66, %74 : vector<64x16xf32>
    %c1_64 = arith.constant 1 : index
    %c0_65 = arith.constant 0 : index
    %76 = vector.load %arg5[%c1_64, %c0_65] : memref<88x32xf32, #tpu.memory_space<vmem>>, vector<64x32xf32>
    %c0_66 = arith.constant 0 : index
    %c1_67 = arith.constant 1 : index
    %c2_68 = arith.constant 2 : index
    %c0_69 = arith.constant 0 : index
    %c0_70 = arith.constant 0 : index
    %77 = vector.load %arg2[%c0_66, %c1_67, %c2_68, %c0_69, %c0_70] : memref<2x2x4x32x16xf32, #tpu.memory_space<vmem>>, vector<1x1x1x32x16xf32>
    %78 = vector.shape_cast %77 : vector<1x1x1x32x16xf32> to vector<32x16xf32>
    %cst_71 = arith.constant dense<0.000000e+00> : vector<64x16xf32>
    %79 = tpu.matmul %76, %78, %cst_71 {dimension_numbers = #tpu.dot_dimension_numbers<[1], [0], [0], [1], [0, 0, 1, 1], [], []>} : vector<64x32xf32>, vector<32x16xf32>, vector<64x16xf32> -> vector<64x16xf32>
    %80 = arith.addf %75, %79 : vector<64x16xf32>
    %c2_72 = arith.constant 2 : index
    %c0_73 = arith.constant 0 : index
    %81 = vector.load %arg5[%c2_72, %c0_73] : memref<88x32xf32, #tpu.memory_space<vmem>>, vector<64x32xf32>
    %cst_74 = arith.constant 0.000000e+00 : f32
    %82 = vector.shape_cast %25 : vector<64x1xi1> to vector<64x1xi1>
    %83 = vector.broadcast %82 : vector<64x1xi1> to vector<64x32xi1>
    %84 = vector.broadcast %cst_74 : f32 to vector<64x32xf32>
    %85 = arith.select %83, %81, %84 : vector<64x32xi1>, vector<64x32xf32>
    %c0_75 = arith.constant 0 : index
    %c1_76 = arith.constant 1 : index
    %c3_77 = arith.constant 3 : index
    %c0_78 = arith.constant 0 : index
    %c0_79 = arith.constant 0 : index
    %86 = vector.load %arg2[%c0_75, %c1_76, %c3_77, %c0_78, %c0_79] : memref<2x2x4x32x16xf32, #tpu.memory_space<vmem>>, vector<1x1x1x32x16xf32>
    %87 = vector.shape_cast %86 : vector<1x1x1x32x16xf32> to vector<32x16xf32>
    %cst_80 = arith.constant dense<0.000000e+00> : vector<64x16xf32>
    %88 = tpu.matmul %85, %87, %cst_80 {dimension_numbers = #tpu.dot_dimension_numbers<[1], [0], [0], [1], [0, 0, 1, 1], [], []>} : vector<64x32xf32>, vector<32x16xf32>, vector<64x16xf32> -> vector<64x16xf32>
    %89 = arith.addf %80, %88 : vector<64x16xf32>
    %c0_81 = arith.constant 0 : index
    %c0_82 = arith.constant 0 : index
    %90 = vector.load %arg3[%c0_81, %c0_82] : memref<1x16xf32, #tpu.memory_space<vmem>>, vector<1x16xf32>
    %91 = vector.broadcast %90 : vector<1x16xf32> to vector<64x16xf32>
    %92 = arith.addf %89, %91 : vector<64x16xf32>
    %c0_83 = arith.constant 0 : index
    %c0_84 = arith.constant 0 : index
    %c1_85 = arith.constant 1 : index
    %c0_86 = arith.constant 0 : index
    %c0_87 = arith.constant 0 : index
    %93 = vector.load %arg4[%c0_83, %c0_84, %c1_85, %c0_86, %c0_87] : memref<1x2x2x64x16xf32, #tpu.memory_space<vmem>>, vector<1x1x1x64x16xf32>
    %94 = vector.shape_cast %93 : vector<1x1x1x64x16xf32> to vector<64x16xf32>
    %95 = vector.shape_cast %92 : vector<64x16xf32> to vector<1x1x1x64x16xf32>
    tpu.vector_store %arg4[%c0_83, %c0_84, %c1_85, %c0_86, %c0_87], %95 {strides = array<i32>} : memref<1x2x2x64x16xf32, #tpu.memory_space<vmem>>, vector<1x1x1x64x16xf32>,
    %cst_88 = arith.constant 0.000000e+00 : f32
    %96 = vector.broadcast %cst_88 : f32 to vector<64x16xf32>
    %c9_89 = arith.constant 9 : index
    %c0_90 = arith.constant 0 : index
    %97 = vector.load %arg5[%c9_89, %c0_90] : memref<88x32xf32, #tpu.memory_space<vmem>>, vector<64x32xf32>
    %c1_91 = arith.constant 1 : index
    %c0_92 = arith.constant 0 : index
    %c0_93 = arith.constant 0 : index
    %c0_94 = arith.constant 0 : index
    %c0_95 = arith.constant 0 : index
    %98 = vector.load %arg2[%c1_91, %c0_92, %c0_93, %c0_94, %c0_95] : memref<2x2x4x32x16xf32, #tpu.memory_space<vmem>>, vector<1x1x1x32x16xf32>
    %99 = vector.shape_cast %98 : vector<1x1x1x32x16xf32> to vector<32x16xf32>
    %cst_96 = arith.constant dense<0.000000e+00> : vector<64x16xf32>
    %100 = tpu.matmul %97, %99, %cst_96 {dimension_numbers = #tpu.dot_dimension_numbers<[1], [0], [0], [1], [0, 0, 1, 1], [], []>} : vector<64x32xf32>, vector<32x16xf32>, vector<64x16xf32> -> vector<64x16xf32>
    %101 = arith.addf %96, %100 : vector<64x16xf32>
    %c8_97 = arith.constant 8 : index
    %c0_98 = arith.constant 0 : index
    %102 = vector.load %arg5[%c8_97, %c0_98] : memref<88x32xf32, #tpu.memory_space<vmem>>, vector<64x32xf32>
    %cst_99 = arith.constant 0.000000e+00 : f32
    %103 = vector.shape_cast %23 : vector<64x1xi1> to vector<64x1xi1>
    %104 = vector.broadcast %103 : vector<64x1xi1> to vector<64x32xi1>
    %105 = vector.broadcast %cst_99 : f32 to vector<64x32xf32>
    %106 = arith.select %104, %102, %105 : vector<64x32xi1>, vector<64x32xf32>
    %c1_100 = arith.constant 1 : index
    %c0_101 = arith.constant 0 : index
    %c1_102 = arith.constant 1 : index
    %c0_103 = arith.constant 0 : index
    %c0_104 = arith.constant 0 : index
    %107 = vector.load %arg2[%c1_100, %c0_101, %c1_102, %c0_103, %c0_104] : memref<2x2x4x32x16xf32, #tpu.memory_space<vmem>>, vector<1x1x1x32x16xf32>
    %108 = vector.shape_cast %107 : vector<1x1x1x32x16xf32> to vector<32x16xf32>
    %cst_105 = arith.constant dense<0.000000e+00> : vector<64x16xf32>
    %109 = tpu.matmul %106, %108, %cst_105 {dimension_numbers = #tpu.dot_dimension_numbers<[1], [0], [0], [1], [0, 0, 1, 1], [], []>} : vector<64x32xf32>, vector<32x16xf32>, vector<64x16xf32> -> vector<64x16xf32>
    %110 = arith.addf %101, %109 : vector<64x16xf32>
    %c17 = arith.constant 17 : index
    %c0_106 = arith.constant 0 : index
    %111 = vector.load %arg5[%c17, %c0_106] : memref<88x32xf32, #tpu.memory_space<vmem>>, vector<64x32xf32>
    %c1_107 = arith.constant 1 : index
    %c0_108 = arith.constant 0 : index
    %c2_109 = arith.constant 2 : index
    %c0_110 = arith.constant 0 : index
    %c0_111 = arith.constant 0 : index
    %112 = vector.load %arg2[%c1_107, %c0_108, %c2_109, %c0_110, %c0_111] : memref<2x2x4x32x16xf32, #tpu.memory_space<vmem>>, vector<1x1x1x32x16xf32>
    %113 = vector.shape_cast %112 : vector<1x1x1x32x16xf32> to vector<32x16xf32>
    %cst_112 = arith.constant dense<0.000000e+00> : vector<64x16xf32>
    %114 = tpu.matmul %111, %113, %cst_112 {dimension_numbers = #tpu.dot_dimension_numbers<[1], [0], [0], [1], [0, 0, 1, 1], [], []>} : vector<64x32xf32>, vector<32x16xf32>, vector<64x16xf32> -> vector<64x16xf32>
    %115 = arith.addf %110, %114 : vector<64x16xf32>
    %c16 = arith.constant 16 : index
    %c0_113 = arith.constant 0 : index
    %116 = vector.load %arg5[%c16, %c0_113] : memref<88x32xf32, #tpu.memory_space<vmem>>, vector<64x32xf32>
    %cst_114 = arith.constant 0.000000e+00 : f32
    %117 = vector.shape_cast %23 : vector<64x1xi1> to vector<64x1xi1>
    %118 = vector.broadcast %117 : vector<64x1xi1> to vector<64x32xi1>
    %119 = vector.broadcast %cst_114 : f32 to vector<64x32xf32>
    %120 = arith.select %118, %116, %119 : vector<64x32xi1>, vector<64x32xf32>
    %c1_115 = arith.constant 1 : index
    %c0_116 = arith.constant 0 : index
    %c3_117 = arith.constant 3 : index
    %c0_118 = arith.constant 0 : index
    %c0_119 = arith.constant 0 : index
    %121 = vector.load %arg2[%c1_115, %c0_116, %c3_117, %c0_118, %c0_119] : memref<2x2x4x32x16xf32, #tpu.memory_space<vmem>>, vector<1x1x1x32x16xf32>
    %122 = vector.shape_cast %121 : vector<1x1x1x32x16xf32> to vector<32x16xf32>
    %cst_120 = arith.constant dense<0.000000e+00> : vector<64x16xf32>
    %123 = tpu.matmul %120, %122, %cst_120 {dimension_numbers = #tpu.dot_dimension_numbers<[1], [0], [0], [1], [0, 0, 1, 1], [], []>} : vector<64x32xf32>, vector<32x16xf32>, vector<64x16xf32> -> vector<64x16xf32>
    %124 = arith.addf %115, %123 : vector<64x16xf32>
    %c0_121 = arith.constant 0 : index
    %c0_122 = arith.constant 0 : index
    %125 = vector.load %arg3[%c0_121, %c0_122] : memref<1x16xf32, #tpu.memory_space<vmem>>, vector<1x16xf32>
    %126 = vector.broadcast %125 : vector<1x16xf32> to vector<64x16xf32>
    %127 = arith.addf %124, %126 : vector<64x16xf32>
    %c0_123 = arith.constant 0 : index
    %c1_124 = arith.constant 1 : index
    %c0_125 = arith.constant 0 : index
    %c0_126 = arith.constant 0 : index
    %c0_127 = arith.constant 0 : index
    %128 = vector.load %arg4[%c0_123, %c1_124, %c0_125, %c0_126, %c0_127] : memref<1x2x2x64x16xf32, #tpu.memory_space<vmem>>, vector<1x1x1x64x16xf32>
    %129 = vector.shape_cast %128 : vector<1x1x1x64x16xf32> to vector<64x16xf32>
    %130 = vector.shape_cast %127 : vector<64x16xf32> to vector<1x1x1x64x16xf32>
    tpu.vector_store %arg4[%c0_123, %c1_124, %c0_125, %c0_126, %c0_127], %130 {strides = array<i32>} : memref<1x2x2x64x16xf32, #tpu.memory_space<vmem>>, vector<1x1x1x64x16xf32>,
    %cst_128 = arith.constant 0.000000e+00 : f32
    %131 = vector.broadcast %cst_128 : f32 to vector<64x16xf32>
    %c9_129 = arith.constant 9 : index
    %c0_130 = arith.constant 0 : index
    %132 = vector.load %arg5[%c9_129, %c0_130] : memref<88x32xf32, #tpu.memory_space<vmem>>, vector<64x32xf32>
    %c1_131 = arith.constant 1 : index
    %c1_132 = arith.constant 1 : index
    %c0_133 = arith.constant 0 : index
    %c0_134 = arith.constant 0 : index
    %c0_135 = arith.constant 0 : index
    %133 = vector.load %arg2[%c1_131, %c1_132, %c0_133, %c0_134, %c0_135] : memref<2x2x4x32x16xf32, #tpu.memory_space<vmem>>, vector<1x1x1x32x16xf32>
    %134 = vector.shape_cast %133 : vector<1x1x1x32x16xf32> to vector<32x16xf32>
    %cst_136 = arith.constant dense<0.000000e+00> : vector<64x16xf32>
    %135 = tpu.matmul %132, %134, %cst_136 {dimension_numbers = #tpu.dot_dimension_numbers<[1], [0], [0], [1], [0, 0, 1, 1], [], []>} : vector<64x32xf32>, vector<32x16xf32>, vector<64x16xf32> -> vector<64x16xf32>
    %136 = arith.addf %131, %135 : vector<64x16xf32>
    %c10_137 = arith.constant 10 : index
    %c0_138 = arith.constant 0 : index
    %137 = vector.load %arg5[%c10_137, %c0_138] : memref<88x32xf32, #tpu.memory_space<vmem>>, vector<64x32xf32>
    %cst_139 = arith.constant 0.000000e+00 : f32
    %138 = vector.shape_cast %25 : vector<64x1xi1> to vector<64x1xi1>
    %139 = vector.broadcast %138 : vector<64x1xi1> to vector<64x32xi1>
    %140 = vector.broadcast %cst_139 : f32 to vector<64x32xf32>
    %141 = arith.select %139, %137, %140 : vector<64x32xi1>, vector<64x32xf32>
    %c1_140 = arith.constant 1 : index
    %c1_141 = arith.constant 1 : index
    %c1_142 = arith.constant 1 : index
    %c0_143 = arith.constant 0 : index
    %c0_144 = arith.constant 0 : index
    %142 = vector.load %arg2[%c1_140, %c1_141, %c1_142, %c0_143, %c0_144] : memref<2x2x4x32x16xf32, #tpu.memory_space<vmem>>, vector<1x1x1x32x16xf32>
    %143 = vector.shape_cast %142 : vector<1x1x1x32x16xf32> to vector<32x16xf32>
    %cst_145 = arith.constant dense<0.000000e+00> : vector<64x16xf32>
    %144 = tpu.matmul %141, %143, %cst_145 {dimension_numbers = #tpu.dot_dimension_numbers<[1], [0], [0], [1], [0, 0, 1, 1], [], []>} : vector<64x32xf32>, vector<32x16xf32>, vector<64x16xf32> -> vector<64x16xf32>
    %145 = arith.addf %136, %144 : vector<64x16xf32>
    %c17_146 = arith.constant 17 : index
    %c0_147 = arith.constant 0 : index
    %146 = vector.load %arg5[%c17_146, %c0_147] : memref<88x32xf32, #tpu.memory_space<vmem>>, vector<64x32xf32>
    %c1_148 = arith.constant 1 : index
    %c1_149 = arith.constant 1 : index
    %c2_150 = arith.constant 2 : index
    %c0_151 = arith.constant 0 : index
    %c0_152 = arith.constant 0 : index
    %147 = vector.load %arg2[%c1_148, %c1_149, %c2_150, %c0_151, %c0_152] : memref<2x2x4x32x16xf32, #tpu.memory_space<vmem>>, vector<1x1x1x32x16xf32>
    %148 = vector.shape_cast %147 : vector<1x1x1x32x16xf32> to vector<32x16xf32>
    %cst_153 = arith.constant dense<0.000000e+00> : vector<64x16xf32>
    %149 = tpu.matmul %146, %148, %cst_153 {dimension_numbers = #tpu.dot_dimension_numbers<[1], [0], [0], [1], [0, 0, 1, 1], [], []>} : vector<64x32xf32>, vector<32x16xf32>, vector<64x16xf32> -> vector<64x16xf32>
    %150 = arith.addf %145, %149 : vector<64x16xf32>
    %c18 = arith.constant 18 : index
    %c0_154 = arith.constant 0 : index
    %151 = vector.load %arg5[%c18, %c0_154] : memref<88x32xf32, #tpu.memory_space<vmem>>, vector<64x32xf32>
    %cst_155 = arith.constant 0.000000e+00 : f32
    %152 = vector.shape_cast %25 : vector<64x1xi1> to vector<64x1xi1>
    %153 = vector.broadcast %152 : vector<64x1xi1> to vector<64x32xi1>
    %154 = vector.broadcast %cst_155 : f32 to vector<64x32xf32>
    %155 = arith.select %153, %151, %154 : vector<64x32xi1>, vector<64x32xf32>
    %c1_156 = arith.constant 1 : index
    %c1_157 = arith.constant 1 : index
    %c3_158 = arith.constant 3 : index
    %c0_159 = arith.constant 0 : index
    %c0_160 = arith.constant 0 : index
    %156 = vector.load %arg2[%c1_156, %c1_157, %c3_158, %c0_159, %c0_160] : memref<2x2x4x32x16xf32, #tpu.memory_space<vmem>>, vector<1x1x1x32x16xf32>
    %157 = vector.shape_cast %156 : vector<1x1x1x32x16xf32> to vector<32x16xf32>
    %cst_161 = arith.constant dense<0.000000e+00> : vector<64x16xf32>
    %158 = tpu.matmul %155, %157, %cst_161 {dimension_numbers = #tpu.dot_dimension_numbers<[1], [0], [0], [1], [0, 0, 1, 1], [], []>} : vector<64x32xf32>, vector<32x16xf32>, vector<64x16xf32> -> vector<64x16xf32>
    %159 = arith.addf %150, %158 : vector<64x16xf32>
    %c0_162 = arith.constant 0 : index
    %c0_163 = arith.constant 0 : index
    %160 = vector.load %arg3[%c0_162, %c0_163] : memref<1x16xf32, #tpu.memory_space<vmem>>, vector<1x16xf32>
    %161 = vector.broadcast %160 : vector<1x16xf32> to vector<64x16xf32>
    %162 = arith.addf %159, %161 : vector<64x16xf32>
    %c0_164 = arith.constant 0 : index
    %c1_165 = arith.constant 1 : index
    %c1_166 = arith.constant 1 : index
    %c0_167 = arith.constant 0 : index
    %c0_168 = arith.constant 0 : index
    %163 = vector.load %arg4[%c0_164, %c1_165, %c1_166, %c0_167, %c0_168] : memref<1x2x2x64x16xf32, #tpu.memory_space<vmem>>, vector<1x1x1x64x16xf32>
    %164 = vector.shape_cast %163 : vector<1x1x1x64x16xf32> to vector<64x16xf32>
    %165 = vector.shape_cast %162 : vector<64x16xf32> to vector<1x1x1x64x16xf32>
    tpu.vector_store %arg4[%c0_164, %c1_165, %c1_166, %c0_167, %c0_168], %165 {strides = array<i32>} : memref<1x2x2x64x16xf32, #tpu.memory_space<vmem>>, vector<1x1x1x64x16xf32>,
    return
  }
  func.func @transform_0(%arg0: i32) -> (i32, i32, i32) {
    %c0_i32 = arith.constant 0 : i32
    %c0_i32_0 = arith.constant 0 : i32
    %c0_i32_1 = arith.constant 0 : i32
    return %arg0, %c0_i32, %c0_i32_0 : i32, i32, i32
  }
  func.func @transform_1(%arg0: i32) -> (i32, i32, i32, i32, i32) {
    %c0_i32 = arith.constant 0 : i32
    %c0_i32_0 = arith.constant 0 : i32
    %c0_i32_1 = arith.constant 0 : i32
    %c0_i32_2 = arith.constant 0 : i32
    %c0_i32_3 = arith.constant 0 : i32
    %c0_i32_4 = arith.constant 0 : i32
    return %c0_i32, %c0_i32_0, %c0_i32_1, %c0_i32_2, %c0_i32_3 : i32, i32, i32, i32, i32
  }
  func.func @transform_2(%arg0: i32) -> (i32, i32) {
    %c0_i32 = arith.constant 0 : i32
    %c0_i32_0 = arith.constant 0 : i32
    %c0_i32_1 = arith.constant 0 : i32
    return %c0_i32, %c0_i32_0 : i32, i32
  }
  func.func @transform_3(%arg0: i32) -> (i32, i32, i32, i32, i32) {
    %c0_i32 = arith.constant 0 : i32
    %c0_i32_0 = arith.constant 0 : i32
    %c0_i32_1 = arith.constant 0 : i32
    %c0_i32_2 = arith.constant 0 : i32
    %c0_i32_3 = arith.constant 0 : i32
    return %arg0, %c0_i32, %c0_i32_0, %c0_i32_1, %c0_i32_2 : i32, i32, i32, i32, i32
  }
}

module attributes {stable_mosaic.version = 11 : i64} {
  func.func @_conv3x3_relu_kernel(%arg0: i32, %arg1: memref<1x256x16xf32, #tpu.memory_space<vmem>>, %arg2: memref<1x256x16xf32, #tpu.memory_space<vmem>>, %arg3: memref<9x16x16xf32, #tpu.memory_space<vmem>>, %arg4: memref<9x16x16xf32, #tpu.memory_space<vmem>>, %arg5: memref<1x16xf32, #tpu.memory_space<vmem>>, %arg6: memref<1x256x16xf32, #tpu.memory_space<vmem>>, %arg7: memref<296x16xf32, #tpu.memory_space<vmem>>, %arg8: memref<296x16xf32, #tpu.memory_space<vmem>>) attributes {dimension_semantics = [#tpu.dimension_semantics<parallel>], iteration_bounds = array<i64: 2>, scalar_prefetch = 0 : i64, scratch_operands = 2 : i64, tpu.core_type = #tpu.core_type<tc>, window_params = [{transform_indices = @transform_0, window_bounds = array<i64: 1, 256, 16>}, {transform_indices = @transform_1, window_bounds = array<i64: 1, 256, 16>}, {pipeline_mode = #tpu.pipeline_mode<synchronous>, transform_indices = @transform_2, window_bounds = array<i64: 9, 16, 16>}, {pipeline_mode = #tpu.pipeline_mode<synchronous>, transform_indices = @transform_3, window_bounds = array<i64: 9, 16, 16>}, {pipeline_mode = #tpu.pipeline_mode<synchronous>, transform_indices = @transform_4, window_bounds = array<i64: 1, 16>}, {transform_indices = @transform_5, window_bounds = array<i64: 1, 256, 16>}]} {
    %0 = tpu.iota {dimensions = array<i32: 0>} : vector<256x1xi32>
    %c16_i32 = arith.constant 16 : i32
    %c0_i32 = arith.constant 0 : i32
    %1 = arith.cmpi eq, %c16_i32, %c0_i32 : i32
    %c1_i32 = arith.constant 1 : i32
    %2 = arith.select %1, %c1_i32, %c16_i32 : i32
    %3 = vector.broadcast %2 : i32 to vector<256x1xi32>
    %4 = arith.remsi %0, %3 : vector<256x1xi32>
    %c0_i32_0 = arith.constant 0 : i32
    %5 = vector.broadcast %c0_i32_0 : i32 to vector<256x1xi32>
    %6 = arith.cmpi ne, %4, %5 : vector<256x1xi32>
    %c0_i32_1 = arith.constant 0 : i32
    %7 = vector.broadcast %c0_i32_1 : i32 to vector<256x1xi32>
    %8 = arith.cmpi slt, %4, %7 : vector<256x1xi32>
    %c0_i32_2 = arith.constant 0 : i32
    %9 = arith.cmpi slt, %2, %c0_i32_2 : i32
    %10 = vector.broadcast %9 : i1 to vector<256x1xi1>
    %11 = vector.broadcast %10 : vector<256x1xi1> to vector<256x1xi1>
    %12 = arith.xori %8, %11 : vector<256x1xi1>
    %13 = arith.andi %12, %6 : vector<256x1xi1>
    %14 = vector.broadcast %2 : i32 to vector<256x1xi32>
    %15 = arith.addi %4, %14 : vector<256x1xi32>
    %16 = arith.select %13, %15, %4 : vector<256x1xi1>, vector<256x1xi32>
    %c1_i32_3 = arith.constant 1 : i32
    %17 = vector.broadcast %c1_i32_3 : i32 to vector<256x1xi32>
    %18 = arith.cmpi sge, %16, %17 : vector<256x1xi32>
    %c14_i32 = arith.constant 14 : i32
    %19 = vector.broadcast %c14_i32 : i32 to vector<256x1xi32>
    %20 = arith.cmpi sle, %16, %19 : vector<256x1xi32>
    %cst = arith.constant 0.000000e+00 : f32
    %21 = vector.broadcast %cst : f32 to vector<296x16xf32>
    %c0 = arith.constant 0 : index
    %c0_4 = arith.constant 0 : index
    %22 = vector.load %arg7[%c0, %c0_4] : memref<296x16xf32, #tpu.memory_space<vmem>>, vector<296x16xf32>
    tpu.vector_store %arg7[%c0, %c0_4], %21 {strides = array<i32>} : memref<296x16xf32, #tpu.memory_space<vmem>>, vector<296x16xf32>,
    %c0_5 = arith.constant 0 : index
    %c0_6 = arith.constant 0 : index
    %c0_7 = arith.constant 0 : index
    %23 = vector.load %arg1[%c0_5, %c0_6, %c0_7] : memref<1x256x16xf32, #tpu.memory_space<vmem>>, vector<1x256x16xf32>
    %24 = vector.shape_cast %23 : vector<1x256x16xf32> to vector<256x16xf32>
    %c17 = arith.constant 17 : index
    %c0_8 = arith.constant 0 : index
    %25 = vector.load %arg7[%c17, %c0_8] : memref<296x16xf32, #tpu.memory_space<vmem>>, vector<256x16xf32>
    tpu.vector_store %arg7[%c17, %c0_8], %24 {strides = array<i32>} : memref<296x16xf32, #tpu.memory_space<vmem>>, vector<256x16xf32>,
    %cst_9 = arith.constant 0.000000e+00 : f32
    %26 = vector.broadcast %cst_9 : f32 to vector<296x16xf32>
    %c0_10 = arith.constant 0 : index
    %c0_11 = arith.constant 0 : index
    %27 = vector.load %arg8[%c0_10, %c0_11] : memref<296x16xf32, #tpu.memory_space<vmem>>, vector<296x16xf32>
    tpu.vector_store %arg8[%c0_10, %c0_11], %26 {strides = array<i32>} : memref<296x16xf32, #tpu.memory_space<vmem>>, vector<296x16xf32>,
    %c0_12 = arith.constant 0 : index
    %c0_13 = arith.constant 0 : index
    %c0_14 = arith.constant 0 : index
    %28 = vector.load %arg2[%c0_12, %c0_13, %c0_14] : memref<1x256x16xf32, #tpu.memory_space<vmem>>, vector<1x256x16xf32>
    %29 = vector.shape_cast %28 : vector<1x256x16xf32> to vector<256x16xf32>
    %c17_15 = arith.constant 17 : index
    %c0_16 = arith.constant 0 : index
    %30 = vector.load %arg8[%c17_15, %c0_16] : memref<296x16xf32, #tpu.memory_space<vmem>>, vector<256x16xf32>
    tpu.vector_store %arg8[%c17_15, %c0_16], %29 {strides = array<i32>} : memref<296x16xf32, #tpu.memory_space<vmem>>, vector<256x16xf32>,
    %cst_17 = arith.constant 0.000000e+00 : f32
    %31 = vector.broadcast %cst_17 : f32 to vector<256x16xf32>
    %c0_18 = arith.constant 0 : index
    %c0_19 = arith.constant 0 : index
    %32 = vector.load %arg7[%c0_18, %c0_19] : memref<296x16xf32, #tpu.memory_space<vmem>>, vector<256x16xf32>
    %cst_20 = arith.constant 0.000000e+00 : f32
    %33 = vector.shape_cast %18 : vector<256x1xi1> to vector<256x1xi1>
    %34 = vector.broadcast %33 : vector<256x1xi1> to vector<256x16xi1>
    %35 = vector.broadcast %cst_20 : f32 to vector<256x16xf32>
    %36 = arith.select %34, %32, %35 : vector<256x16xi1>, vector<256x16xf32>
    %c0_21 = arith.constant 0 : index
    %c0_22 = arith.constant 0 : index
    %c0_23 = arith.constant 0 : index
    %37 = vector.load %arg3[%c0_21, %c0_22, %c0_23] : memref<9x16x16xf32, #tpu.memory_space<vmem>>, vector<1x16x16xf32>
    %38 = vector.shape_cast %37 : vector<1x16x16xf32> to vector<16x16xf32>
    %cst_24 = arith.constant dense<0.000000e+00> : vector<256x16xf32>
    %39 = tpu.matmul %36, %38, %cst_24 {dimension_numbers = #tpu.dot_dimension_numbers<[1], [0], [0], [1], [0, 0, 1, 1], [], []>} : vector<256x16xf32>, vector<16x16xf32>, vector<256x16xf32> -> vector<256x16xf32>
    %40 = arith.addf %31, %39 : vector<256x16xf32>
    %c1 = arith.constant 1 : index
    %c0_25 = arith.constant 0 : index
    %41 = vector.load %arg7[%c1, %c0_25] : memref<296x16xf32, #tpu.memory_space<vmem>>, vector<256x16xf32>
    %c1_26 = arith.constant 1 : index
    %c0_27 = arith.constant 0 : index
    %c0_28 = arith.constant 0 : index
    %42 = vector.load %arg3[%c1_26, %c0_27, %c0_28] : memref<9x16x16xf32, #tpu.memory_space<vmem>>, vector<1x16x16xf32>
    %43 = vector.shape_cast %42 : vector<1x16x16xf32> to vector<16x16xf32>
    %cst_29 = arith.constant dense<0.000000e+00> : vector<256x16xf32>
    %44 = tpu.matmul %41, %43, %cst_29 {dimension_numbers = #tpu.dot_dimension_numbers<[1], [0], [0], [1], [0, 0, 1, 1], [], []>} : vector<256x16xf32>, vector<16x16xf32>, vector<256x16xf32> -> vector<256x16xf32>
    %45 = arith.addf %40, %44 : vector<256x16xf32>
    %c2 = arith.constant 2 : index
    %c0_30 = arith.constant 0 : index
    %46 = vector.load %arg7[%c2, %c0_30] : memref<296x16xf32, #tpu.memory_space<vmem>>, vector<256x16xf32>
    %cst_31 = arith.constant 0.000000e+00 : f32
    %47 = vector.shape_cast %20 : vector<256x1xi1> to vector<256x1xi1>
    %48 = vector.broadcast %47 : vector<256x1xi1> to vector<256x16xi1>
    %49 = vector.broadcast %cst_31 : f32 to vector<256x16xf32>
    %50 = arith.select %48, %46, %49 : vector<256x16xi1>, vector<256x16xf32>
    %c2_32 = arith.constant 2 : index
    %c0_33 = arith.constant 0 : index
    %c0_34 = arith.constant 0 : index
    %51 = vector.load %arg3[%c2_32, %c0_33, %c0_34] : memref<9x16x16xf32, #tpu.memory_space<vmem>>, vector<1x16x16xf32>
    %52 = vector.shape_cast %51 : vector<1x16x16xf32> to vector<16x16xf32>
    %cst_35 = arith.constant dense<0.000000e+00> : vector<256x16xf32>
    %53 = tpu.matmul %50, %52, %cst_35 {dimension_numbers = #tpu.dot_dimension_numbers<[1], [0], [0], [1], [0, 0, 1, 1], [], []>} : vector<256x16xf32>, vector<16x16xf32>, vector<256x16xf32> -> vector<256x16xf32>
    %54 = arith.addf %45, %53 : vector<256x16xf32>
    %c16 = arith.constant 16 : index
    %c0_36 = arith.constant 0 : index
    %55 = vector.load %arg7[%c16, %c0_36] : memref<296x16xf32, #tpu.memory_space<vmem>>, vector<256x16xf32>
    %cst_37 = arith.constant 0.000000e+00 : f32
    %56 = vector.shape_cast %18 : vector<256x1xi1> to vector<256x1xi1>
    %57 = vector.broadcast %56 : vector<256x1xi1> to vector<256x16xi1>
    %58 = vector.broadcast %cst_37 : f32 to vector<256x16xf32>
    %59 = arith.select %57, %55, %58 : vector<256x16xi1>, vector<256x16xf32>
    %c3 = arith.constant 3 : index
    %c0_38 = arith.constant 0 : index
    %c0_39 = arith.constant 0 : index
    %60 = vector.load %arg3[%c3, %c0_38, %c0_39] : memref<9x16x16xf32, #tpu.memory_space<vmem>>, vector<1x16x16xf32>
    %61 = vector.shape_cast %60 : vector<1x16x16xf32> to vector<16x16xf32>
    %cst_40 = arith.constant dense<0.000000e+00> : vector<256x16xf32>
    %62 = tpu.matmul %59, %61, %cst_40 {dimension_numbers = #tpu.dot_dimension_numbers<[1], [0], [0], [1], [0, 0, 1, 1], [], []>} : vector<256x16xf32>, vector<16x16xf32>, vector<256x16xf32> -> vector<256x16xf32>
    %63 = arith.addf %54, %62 : vector<256x16xf32>
    %c17_41 = arith.constant 17 : index
    %c0_42 = arith.constant 0 : index
    %64 = vector.load %arg7[%c17_41, %c0_42] : memref<296x16xf32, #tpu.memory_space<vmem>>, vector<256x16xf32>
    %c4 = arith.constant 4 : index
    %c0_43 = arith.constant 0 : index
    %c0_44 = arith.constant 0 : index
    %65 = vector.load %arg3[%c4, %c0_43, %c0_44] : memref<9x16x16xf32, #tpu.memory_space<vmem>>, vector<1x16x16xf32>
    %66 = vector.shape_cast %65 : vector<1x16x16xf32> to vector<16x16xf32>
    %cst_45 = arith.constant dense<0.000000e+00> : vector<256x16xf32>
    %67 = tpu.matmul %64, %66, %cst_45 {dimension_numbers = #tpu.dot_dimension_numbers<[1], [0], [0], [1], [0, 0, 1, 1], [], []>} : vector<256x16xf32>, vector<16x16xf32>, vector<256x16xf32> -> vector<256x16xf32>
    %68 = arith.addf %63, %67 : vector<256x16xf32>
    %c18 = arith.constant 18 : index
    %c0_46 = arith.constant 0 : index
    %69 = vector.load %arg7[%c18, %c0_46] : memref<296x16xf32, #tpu.memory_space<vmem>>, vector<256x16xf32>
    %cst_47 = arith.constant 0.000000e+00 : f32
    %70 = vector.shape_cast %20 : vector<256x1xi1> to vector<256x1xi1>
    %71 = vector.broadcast %70 : vector<256x1xi1> to vector<256x16xi1>
    %72 = vector.broadcast %cst_47 : f32 to vector<256x16xf32>
    %73 = arith.select %71, %69, %72 : vector<256x16xi1>, vector<256x16xf32>
    %c5 = arith.constant 5 : index
    %c0_48 = arith.constant 0 : index
    %c0_49 = arith.constant 0 : index
    %74 = vector.load %arg3[%c5, %c0_48, %c0_49] : memref<9x16x16xf32, #tpu.memory_space<vmem>>, vector<1x16x16xf32>
    %75 = vector.shape_cast %74 : vector<1x16x16xf32> to vector<16x16xf32>
    %cst_50 = arith.constant dense<0.000000e+00> : vector<256x16xf32>
    %76 = tpu.matmul %73, %75, %cst_50 {dimension_numbers = #tpu.dot_dimension_numbers<[1], [0], [0], [1], [0, 0, 1, 1], [], []>} : vector<256x16xf32>, vector<16x16xf32>, vector<256x16xf32> -> vector<256x16xf32>
    %77 = arith.addf %68, %76 : vector<256x16xf32>
    %c32 = arith.constant 32 : index
    %c0_51 = arith.constant 0 : index
    %78 = vector.load %arg7[%c32, %c0_51] : memref<296x16xf32, #tpu.memory_space<vmem>>, vector<256x16xf32>
    %cst_52 = arith.constant 0.000000e+00 : f32
    %79 = vector.shape_cast %18 : vector<256x1xi1> to vector<256x1xi1>
    %80 = vector.broadcast %79 : vector<256x1xi1> to vector<256x16xi1>
    %81 = vector.broadcast %cst_52 : f32 to vector<256x16xf32>
    %82 = arith.select %80, %78, %81 : vector<256x16xi1>, vector<256x16xf32>
    %c6 = arith.constant 6 : index
    %c0_53 = arith.constant 0 : index
    %c0_54 = arith.constant 0 : index
    %83 = vector.load %arg3[%c6, %c0_53, %c0_54] : memref<9x16x16xf32, #tpu.memory_space<vmem>>, vector<1x16x16xf32>
    %84 = vector.shape_cast %83 : vector<1x16x16xf32> to vector<16x16xf32>
    %cst_55 = arith.constant dense<0.000000e+00> : vector<256x16xf32>
    %85 = tpu.matmul %82, %84, %cst_55 {dimension_numbers = #tpu.dot_dimension_numbers<[1], [0], [0], [1], [0, 0, 1, 1], [], []>} : vector<256x16xf32>, vector<16x16xf32>, vector<256x16xf32> -> vector<256x16xf32>
    %86 = arith.addf %77, %85 : vector<256x16xf32>
    %c33 = arith.constant 33 : index
    %c0_56 = arith.constant 0 : index
    %87 = vector.load %arg7[%c33, %c0_56] : memref<296x16xf32, #tpu.memory_space<vmem>>, vector<256x16xf32>
    %c7 = arith.constant 7 : index
    %c0_57 = arith.constant 0 : index
    %c0_58 = arith.constant 0 : index
    %88 = vector.load %arg3[%c7, %c0_57, %c0_58] : memref<9x16x16xf32, #tpu.memory_space<vmem>>, vector<1x16x16xf32>
    %89 = vector.shape_cast %88 : vector<1x16x16xf32> to vector<16x16xf32>
    %cst_59 = arith.constant dense<0.000000e+00> : vector<256x16xf32>
    %90 = tpu.matmul %87, %89, %cst_59 {dimension_numbers = #tpu.dot_dimension_numbers<[1], [0], [0], [1], [0, 0, 1, 1], [], []>} : vector<256x16xf32>, vector<16x16xf32>, vector<256x16xf32> -> vector<256x16xf32>
    %91 = arith.addf %86, %90 : vector<256x16xf32>
    %c34 = arith.constant 34 : index
    %c0_60 = arith.constant 0 : index
    %92 = vector.load %arg7[%c34, %c0_60] : memref<296x16xf32, #tpu.memory_space<vmem>>, vector<256x16xf32>
    %cst_61 = arith.constant 0.000000e+00 : f32
    %93 = vector.shape_cast %20 : vector<256x1xi1> to vector<256x1xi1>
    %94 = vector.broadcast %93 : vector<256x1xi1> to vector<256x16xi1>
    %95 = vector.broadcast %cst_61 : f32 to vector<256x16xf32>
    %96 = arith.select %94, %92, %95 : vector<256x16xi1>, vector<256x16xf32>
    %c8 = arith.constant 8 : index
    %c0_62 = arith.constant 0 : index
    %c0_63 = arith.constant 0 : index
    %97 = vector.load %arg3[%c8, %c0_62, %c0_63] : memref<9x16x16xf32, #tpu.memory_space<vmem>>, vector<1x16x16xf32>
    %98 = vector.shape_cast %97 : vector<1x16x16xf32> to vector<16x16xf32>
    %cst_64 = arith.constant dense<0.000000e+00> : vector<256x16xf32>
    %99 = tpu.matmul %96, %98, %cst_64 {dimension_numbers = #tpu.dot_dimension_numbers<[1], [0], [0], [1], [0, 0, 1, 1], [], []>} : vector<256x16xf32>, vector<16x16xf32>, vector<256x16xf32> -> vector<256x16xf32>
    %100 = arith.addf %91, %99 : vector<256x16xf32>
    %c0_65 = arith.constant 0 : index
    %c0_66 = arith.constant 0 : index
    %101 = vector.load %arg8[%c0_65, %c0_66] : memref<296x16xf32, #tpu.memory_space<vmem>>, vector<256x16xf32>
    %cst_67 = arith.constant 0.000000e+00 : f32
    %102 = vector.shape_cast %18 : vector<256x1xi1> to vector<256x1xi1>
    %103 = vector.broadcast %102 : vector<256x1xi1> to vector<256x16xi1>
    %104 = vector.broadcast %cst_67 : f32 to vector<256x16xf32>
    %105 = arith.select %103, %101, %104 : vector<256x16xi1>, vector<256x16xf32>
    %c0_68 = arith.constant 0 : index
    %c0_69 = arith.constant 0 : index
    %c0_70 = arith.constant 0 : index
    %106 = vector.load %arg4[%c0_68, %c0_69, %c0_70] : memref<9x16x16xf32, #tpu.memory_space<vmem>>, vector<1x16x16xf32>
    %107 = vector.shape_cast %106 : vector<1x16x16xf32> to vector<16x16xf32>
    %cst_71 = arith.constant dense<0.000000e+00> : vector<256x16xf32>
    %108 = tpu.matmul %105, %107, %cst_71 {dimension_numbers = #tpu.dot_dimension_numbers<[1], [0], [0], [1], [0, 0, 1, 1], [], []>} : vector<256x16xf32>, vector<16x16xf32>, vector<256x16xf32> -> vector<256x16xf32>
    %109 = arith.addf %100, %108 : vector<256x16xf32>
    %c1_72 = arith.constant 1 : index
    %c0_73 = arith.constant 0 : index
    %110 = vector.load %arg8[%c1_72, %c0_73] : memref<296x16xf32, #tpu.memory_space<vmem>>, vector<256x16xf32>
    %c1_74 = arith.constant 1 : index
    %c0_75 = arith.constant 0 : index
    %c0_76 = arith.constant 0 : index
    %111 = vector.load %arg4[%c1_74, %c0_75, %c0_76] : memref<9x16x16xf32, #tpu.memory_space<vmem>>, vector<1x16x16xf32>
    %112 = vector.shape_cast %111 : vector<1x16x16xf32> to vector<16x16xf32>
    %cst_77 = arith.constant dense<0.000000e+00> : vector<256x16xf32>
    %113 = tpu.matmul %110, %112, %cst_77 {dimension_numbers = #tpu.dot_dimension_numbers<[1], [0], [0], [1], [0, 0, 1, 1], [], []>} : vector<256x16xf32>, vector<16x16xf32>, vector<256x16xf32> -> vector<256x16xf32>
    %114 = arith.addf %109, %113 : vector<256x16xf32>
    %c2_78 = arith.constant 2 : index
    %c0_79 = arith.constant 0 : index
    %115 = vector.load %arg8[%c2_78, %c0_79] : memref<296x16xf32, #tpu.memory_space<vmem>>, vector<256x16xf32>
    %cst_80 = arith.constant 0.000000e+00 : f32
    %116 = vector.shape_cast %20 : vector<256x1xi1> to vector<256x1xi1>
    %117 = vector.broadcast %116 : vector<256x1xi1> to vector<256x16xi1>
    %118 = vector.broadcast %cst_80 : f32 to vector<256x16xf32>
    %119 = arith.select %117, %115, %118 : vector<256x16xi1>, vector<256x16xf32>
    %c2_81 = arith.constant 2 : index
    %c0_82 = arith.constant 0 : index
    %c0_83 = arith.constant 0 : index
    %120 = vector.load %arg4[%c2_81, %c0_82, %c0_83] : memref<9x16x16xf32, #tpu.memory_space<vmem>>, vector<1x16x16xf32>
    %121 = vector.shape_cast %120 : vector<1x16x16xf32> to vector<16x16xf32>
    %cst_84 = arith.constant dense<0.000000e+00> : vector<256x16xf32>
    %122 = tpu.matmul %119, %121, %cst_84 {dimension_numbers = #tpu.dot_dimension_numbers<[1], [0], [0], [1], [0, 0, 1, 1], [], []>} : vector<256x16xf32>, vector<16x16xf32>, vector<256x16xf32> -> vector<256x16xf32>
    %123 = arith.addf %114, %122 : vector<256x16xf32>
    %c16_85 = arith.constant 16 : index
    %c0_86 = arith.constant 0 : index
    %124 = vector.load %arg8[%c16_85, %c0_86] : memref<296x16xf32, #tpu.memory_space<vmem>>, vector<256x16xf32>
    %cst_87 = arith.constant 0.000000e+00 : f32
    %125 = vector.shape_cast %18 : vector<256x1xi1> to vector<256x1xi1>
    %126 = vector.broadcast %125 : vector<256x1xi1> to vector<256x16xi1>
    %127 = vector.broadcast %cst_87 : f32 to vector<256x16xf32>
    %128 = arith.select %126, %124, %127 : vector<256x16xi1>, vector<256x16xf32>
    %c3_88 = arith.constant 3 : index
    %c0_89 = arith.constant 0 : index
    %c0_90 = arith.constant 0 : index
    %129 = vector.load %arg4[%c3_88, %c0_89, %c0_90] : memref<9x16x16xf32, #tpu.memory_space<vmem>>, vector<1x16x16xf32>
    %130 = vector.shape_cast %129 : vector<1x16x16xf32> to vector<16x16xf32>
    %cst_91 = arith.constant dense<0.000000e+00> : vector<256x16xf32>
    %131 = tpu.matmul %128, %130, %cst_91 {dimension_numbers = #tpu.dot_dimension_numbers<[1], [0], [0], [1], [0, 0, 1, 1], [], []>} : vector<256x16xf32>, vector<16x16xf32>, vector<256x16xf32> -> vector<256x16xf32>
    %132 = arith.addf %123, %131 : vector<256x16xf32>
    %c17_92 = arith.constant 17 : index
    %c0_93 = arith.constant 0 : index
    %133 = vector.load %arg8[%c17_92, %c0_93] : memref<296x16xf32, #tpu.memory_space<vmem>>, vector<256x16xf32>
    %c4_94 = arith.constant 4 : index
    %c0_95 = arith.constant 0 : index
    %c0_96 = arith.constant 0 : index
    %134 = vector.load %arg4[%c4_94, %c0_95, %c0_96] : memref<9x16x16xf32, #tpu.memory_space<vmem>>, vector<1x16x16xf32>
    %135 = vector.shape_cast %134 : vector<1x16x16xf32> to vector<16x16xf32>
    %cst_97 = arith.constant dense<0.000000e+00> : vector<256x16xf32>
    %136 = tpu.matmul %133, %135, %cst_97 {dimension_numbers = #tpu.dot_dimension_numbers<[1], [0], [0], [1], [0, 0, 1, 1], [], []>} : vector<256x16xf32>, vector<16x16xf32>, vector<256x16xf32> -> vector<256x16xf32>
    %137 = arith.addf %132, %136 : vector<256x16xf32>
    %c18_98 = arith.constant 18 : index
    %c0_99 = arith.constant 0 : index
    %138 = vector.load %arg8[%c18_98, %c0_99] : memref<296x16xf32, #tpu.memory_space<vmem>>, vector<256x16xf32>
    %cst_100 = arith.constant 0.000000e+00 : f32
    %139 = vector.shape_cast %20 : vector<256x1xi1> to vector<256x1xi1>
    %140 = vector.broadcast %139 : vector<256x1xi1> to vector<256x16xi1>
    %141 = vector.broadcast %cst_100 : f32 to vector<256x16xf32>
    %142 = arith.select %140, %138, %141 : vector<256x16xi1>, vector<256x16xf32>
    %c5_101 = arith.constant 5 : index
    %c0_102 = arith.constant 0 : index
    %c0_103 = arith.constant 0 : index
    %143 = vector.load %arg4[%c5_101, %c0_102, %c0_103] : memref<9x16x16xf32, #tpu.memory_space<vmem>>, vector<1x16x16xf32>
    %144 = vector.shape_cast %143 : vector<1x16x16xf32> to vector<16x16xf32>
    %cst_104 = arith.constant dense<0.000000e+00> : vector<256x16xf32>
    %145 = tpu.matmul %142, %144, %cst_104 {dimension_numbers = #tpu.dot_dimension_numbers<[1], [0], [0], [1], [0, 0, 1, 1], [], []>} : vector<256x16xf32>, vector<16x16xf32>, vector<256x16xf32> -> vector<256x16xf32>
    %146 = arith.addf %137, %145 : vector<256x16xf32>
    %c32_105 = arith.constant 32 : index
    %c0_106 = arith.constant 0 : index
    %147 = vector.load %arg8[%c32_105, %c0_106] : memref<296x16xf32, #tpu.memory_space<vmem>>, vector<256x16xf32>
    %cst_107 = arith.constant 0.000000e+00 : f32
    %148 = vector.shape_cast %18 : vector<256x1xi1> to vector<256x1xi1>
    %149 = vector.broadcast %148 : vector<256x1xi1> to vector<256x16xi1>
    %150 = vector.broadcast %cst_107 : f32 to vector<256x16xf32>
    %151 = arith.select %149, %147, %150 : vector<256x16xi1>, vector<256x16xf32>
    %c6_108 = arith.constant 6 : index
    %c0_109 = arith.constant 0 : index
    %c0_110 = arith.constant 0 : index
    %152 = vector.load %arg4[%c6_108, %c0_109, %c0_110] : memref<9x16x16xf32, #tpu.memory_space<vmem>>, vector<1x16x16xf32>
    %153 = vector.shape_cast %152 : vector<1x16x16xf32> to vector<16x16xf32>
    %cst_111 = arith.constant dense<0.000000e+00> : vector<256x16xf32>
    %154 = tpu.matmul %151, %153, %cst_111 {dimension_numbers = #tpu.dot_dimension_numbers<[1], [0], [0], [1], [0, 0, 1, 1], [], []>} : vector<256x16xf32>, vector<16x16xf32>, vector<256x16xf32> -> vector<256x16xf32>
    %155 = arith.addf %146, %154 : vector<256x16xf32>
    %c33_112 = arith.constant 33 : index
    %c0_113 = arith.constant 0 : index
    %156 = vector.load %arg8[%c33_112, %c0_113] : memref<296x16xf32, #tpu.memory_space<vmem>>, vector<256x16xf32>
    %c7_114 = arith.constant 7 : index
    %c0_115 = arith.constant 0 : index
    %c0_116 = arith.constant 0 : index
    %157 = vector.load %arg4[%c7_114, %c0_115, %c0_116] : memref<9x16x16xf32, #tpu.memory_space<vmem>>, vector<1x16x16xf32>
    %158 = vector.shape_cast %157 : vector<1x16x16xf32> to vector<16x16xf32>
    %cst_117 = arith.constant dense<0.000000e+00> : vector<256x16xf32>
    %159 = tpu.matmul %156, %158, %cst_117 {dimension_numbers = #tpu.dot_dimension_numbers<[1], [0], [0], [1], [0, 0, 1, 1], [], []>} : vector<256x16xf32>, vector<16x16xf32>, vector<256x16xf32> -> vector<256x16xf32>
    %160 = arith.addf %155, %159 : vector<256x16xf32>
    %c34_118 = arith.constant 34 : index
    %c0_119 = arith.constant 0 : index
    %161 = vector.load %arg8[%c34_118, %c0_119] : memref<296x16xf32, #tpu.memory_space<vmem>>, vector<256x16xf32>
    %cst_120 = arith.constant 0.000000e+00 : f32
    %162 = vector.shape_cast %20 : vector<256x1xi1> to vector<256x1xi1>
    %163 = vector.broadcast %162 : vector<256x1xi1> to vector<256x16xi1>
    %164 = vector.broadcast %cst_120 : f32 to vector<256x16xf32>
    %165 = arith.select %163, %161, %164 : vector<256x16xi1>, vector<256x16xf32>
    %c8_121 = arith.constant 8 : index
    %c0_122 = arith.constant 0 : index
    %c0_123 = arith.constant 0 : index
    %166 = vector.load %arg4[%c8_121, %c0_122, %c0_123] : memref<9x16x16xf32, #tpu.memory_space<vmem>>, vector<1x16x16xf32>
    %167 = vector.shape_cast %166 : vector<1x16x16xf32> to vector<16x16xf32>
    %cst_124 = arith.constant dense<0.000000e+00> : vector<256x16xf32>
    %168 = tpu.matmul %165, %167, %cst_124 {dimension_numbers = #tpu.dot_dimension_numbers<[1], [0], [0], [1], [0, 0, 1, 1], [], []>} : vector<256x16xf32>, vector<16x16xf32>, vector<256x16xf32> -> vector<256x16xf32>
    %169 = arith.addf %160, %168 : vector<256x16xf32>
    %c0_125 = arith.constant 0 : index
    %c0_126 = arith.constant 0 : index
    %170 = vector.load %arg5[%c0_125, %c0_126] : memref<1x16xf32, #tpu.memory_space<vmem>>, vector<1x16xf32>
    %171 = vector.broadcast %170 : vector<1x16xf32> to vector<256x16xf32>
    %172 = arith.addf %169, %171 : vector<256x16xf32>
    %cst_127 = arith.constant 0.000000e+00 : f32
    %173 = vector.broadcast %cst_127 : f32 to vector<256x16xf32>
    %174 = arith.maximumf %172, %173 : vector<256x16xf32>
    %c0_128 = arith.constant 0 : index
    %c0_129 = arith.constant 0 : index
    %c0_130 = arith.constant 0 : index
    %175 = vector.load %arg6[%c0_128, %c0_129, %c0_130] : memref<1x256x16xf32, #tpu.memory_space<vmem>>, vector<1x256x16xf32>
    %176 = vector.shape_cast %175 : vector<1x256x16xf32> to vector<256x16xf32>
    %177 = vector.shape_cast %174 : vector<256x16xf32> to vector<1x256x16xf32>
    tpu.vector_store %arg6[%c0_128, %c0_129, %c0_130], %177 {strides = array<i32>} : memref<1x256x16xf32, #tpu.memory_space<vmem>>, vector<1x256x16xf32>,
    return
  }
  func.func @transform_0(%arg0: i32) -> (i32, i32, i32) {
    %c0_i32 = arith.constant 0 : i32
    %c0_i32_0 = arith.constant 0 : i32
    %c0_i32_1 = arith.constant 0 : i32
    return %arg0, %c0_i32, %c0_i32_0 : i32, i32, i32
  }
  func.func @transform_1(%arg0: i32) -> (i32, i32, i32) {
    %c0_i32 = arith.constant 0 : i32
    %c0_i32_0 = arith.constant 0 : i32
    %c0_i32_1 = arith.constant 0 : i32
    return %arg0, %c0_i32, %c0_i32_0 : i32, i32, i32
  }
  func.func @transform_2(%arg0: i32) -> (i32, i32, i32) {
    %c0_i32 = arith.constant 0 : i32
    %c0_i32_0 = arith.constant 0 : i32
    %c0_i32_1 = arith.constant 0 : i32
    %c0_i32_2 = arith.constant 0 : i32
    return %c0_i32, %c0_i32_0, %c0_i32_1 : i32, i32, i32
  }
  func.func @transform_3(%arg0: i32) -> (i32, i32, i32) {
    %c0_i32 = arith.constant 0 : i32
    %c0_i32_0 = arith.constant 0 : i32
    %c0_i32_1 = arith.constant 0 : i32
    %c0_i32_2 = arith.constant 0 : i32
    return %c0_i32, %c0_i32_0, %c0_i32_1 : i32, i32, i32
  }
  func.func @transform_4(%arg0: i32) -> (i32, i32) {
    %c0_i32 = arith.constant 0 : i32
    %c0_i32_0 = arith.constant 0 : i32
    %c0_i32_1 = arith.constant 0 : i32
    return %c0_i32, %c0_i32_0 : i32, i32
  }
  func.func @transform_5(%arg0: i32) -> (i32, i32, i32) {
    %c0_i32 = arith.constant 0 : i32
    %c0_i32_0 = arith.constant 0 : i32
    %c0_i32_1 = arith.constant 0 : i32
    return %arg0, %c0_i32, %c0_i32_0 : i32, i32, i32
  }
}

module attributes {stable_mosaic.version = 11 : i64} {
  func.func @_conv3x3_relu_kernel(%arg0: i32, %arg1: memref<1x256x16xf32, #tpu.memory_space<vmem>>, %arg2: memref<9x16x16xf32, #tpu.memory_space<vmem>>, %arg3: memref<1x16xf32, #tpu.memory_space<vmem>>, %arg4: memref<1x256x16xf32, #tpu.memory_space<vmem>>, %arg5: memref<296x16xf32, #tpu.memory_space<vmem>>) attributes {dimension_semantics = [#tpu.dimension_semantics<parallel>], iteration_bounds = array<i64: 2>, scalar_prefetch = 0 : i64, scratch_operands = 1 : i64, tpu.core_type = #tpu.core_type<tc>, window_params = [{transform_indices = @transform_0, window_bounds = array<i64: 1, 256, 16>}, {pipeline_mode = #tpu.pipeline_mode<synchronous>, transform_indices = @transform_1, window_bounds = array<i64: 9, 16, 16>}, {pipeline_mode = #tpu.pipeline_mode<synchronous>, transform_indices = @transform_2, window_bounds = array<i64: 1, 16>}, {transform_indices = @transform_3, window_bounds = array<i64: 1, 256, 16>}]} {
    %0 = tpu.iota {dimensions = array<i32: 0>} : vector<256x1xi32>
    %c16_i32 = arith.constant 16 : i32
    %c0_i32 = arith.constant 0 : i32
    %1 = arith.cmpi eq, %c16_i32, %c0_i32 : i32
    %c1_i32 = arith.constant 1 : i32
    %2 = arith.select %1, %c1_i32, %c16_i32 : i32
    %3 = vector.broadcast %2 : i32 to vector<256x1xi32>
    %4 = arith.remsi %0, %3 : vector<256x1xi32>
    %c0_i32_0 = arith.constant 0 : i32
    %5 = vector.broadcast %c0_i32_0 : i32 to vector<256x1xi32>
    %6 = arith.cmpi ne, %4, %5 : vector<256x1xi32>
    %c0_i32_1 = arith.constant 0 : i32
    %7 = vector.broadcast %c0_i32_1 : i32 to vector<256x1xi32>
    %8 = arith.cmpi slt, %4, %7 : vector<256x1xi32>
    %c0_i32_2 = arith.constant 0 : i32
    %9 = arith.cmpi slt, %2, %c0_i32_2 : i32
    %10 = vector.broadcast %9 : i1 to vector<256x1xi1>
    %11 = vector.broadcast %10 : vector<256x1xi1> to vector<256x1xi1>
    %12 = arith.xori %8, %11 : vector<256x1xi1>
    %13 = arith.andi %12, %6 : vector<256x1xi1>
    %14 = vector.broadcast %2 : i32 to vector<256x1xi32>
    %15 = arith.addi %4, %14 : vector<256x1xi32>
    %16 = arith.select %13, %15, %4 : vector<256x1xi1>, vector<256x1xi32>
    %c1_i32_3 = arith.constant 1 : i32
    %17 = vector.broadcast %c1_i32_3 : i32 to vector<256x1xi32>
    %18 = arith.cmpi sge, %16, %17 : vector<256x1xi32>
    %c14_i32 = arith.constant 14 : i32
    %19 = vector.broadcast %c14_i32 : i32 to vector<256x1xi32>
    %20 = arith.cmpi sle, %16, %19 : vector<256x1xi32>
    %cst = arith.constant 0.000000e+00 : f32
    %21 = vector.broadcast %cst : f32 to vector<296x16xf32>
    %c0 = arith.constant 0 : index
    %c0_4 = arith.constant 0 : index
    %22 = vector.load %arg5[%c0, %c0_4] : memref<296x16xf32, #tpu.memory_space<vmem>>, vector<296x16xf32>
    tpu.vector_store %arg5[%c0, %c0_4], %21 {strides = array<i32>} : memref<296x16xf32, #tpu.memory_space<vmem>>, vector<296x16xf32>,
    %c0_5 = arith.constant 0 : index
    %c0_6 = arith.constant 0 : index
    %c0_7 = arith.constant 0 : index
    %23 = vector.load %arg1[%c0_5, %c0_6, %c0_7] : memref<1x256x16xf32, #tpu.memory_space<vmem>>, vector<1x256x16xf32>
    %24 = vector.shape_cast %23 : vector<1x256x16xf32> to vector<256x16xf32>
    %c17 = arith.constant 17 : index
    %c0_8 = arith.constant 0 : index
    %25 = vector.load %arg5[%c17, %c0_8] : memref<296x16xf32, #tpu.memory_space<vmem>>, vector<256x16xf32>
    tpu.vector_store %arg5[%c17, %c0_8], %24 {strides = array<i32>} : memref<296x16xf32, #tpu.memory_space<vmem>>, vector<256x16xf32>,
    %cst_9 = arith.constant 0.000000e+00 : f32
    %26 = vector.broadcast %cst_9 : f32 to vector<256x16xf32>
    %c0_10 = arith.constant 0 : index
    %c0_11 = arith.constant 0 : index
    %27 = vector.load %arg5[%c0_10, %c0_11] : memref<296x16xf32, #tpu.memory_space<vmem>>, vector<256x16xf32>
    %cst_12 = arith.constant 0.000000e+00 : f32
    %28 = vector.shape_cast %18 : vector<256x1xi1> to vector<256x1xi1>
    %29 = vector.broadcast %28 : vector<256x1xi1> to vector<256x16xi1>
    %30 = vector.broadcast %cst_12 : f32 to vector<256x16xf32>
    %31 = arith.select %29, %27, %30 : vector<256x16xi1>, vector<256x16xf32>
    %c0_13 = arith.constant 0 : index
    %c0_14 = arith.constant 0 : index
    %c0_15 = arith.constant 0 : index
    %32 = vector.load %arg2[%c0_13, %c0_14, %c0_15] : memref<9x16x16xf32, #tpu.memory_space<vmem>>, vector<1x16x16xf32>
    %33 = vector.shape_cast %32 : vector<1x16x16xf32> to vector<16x16xf32>
    %cst_16 = arith.constant dense<0.000000e+00> : vector<256x16xf32>
    %34 = tpu.matmul %31, %33, %cst_16 {dimension_numbers = #tpu.dot_dimension_numbers<[1], [0], [0], [1], [0, 0, 1, 1], [], []>} : vector<256x16xf32>, vector<16x16xf32>, vector<256x16xf32> -> vector<256x16xf32>
    %35 = arith.addf %26, %34 : vector<256x16xf32>
    %c1 = arith.constant 1 : index
    %c0_17 = arith.constant 0 : index
    %36 = vector.load %arg5[%c1, %c0_17] : memref<296x16xf32, #tpu.memory_space<vmem>>, vector<256x16xf32>
    %c1_18 = arith.constant 1 : index
    %c0_19 = arith.constant 0 : index
    %c0_20 = arith.constant 0 : index
    %37 = vector.load %arg2[%c1_18, %c0_19, %c0_20] : memref<9x16x16xf32, #tpu.memory_space<vmem>>, vector<1x16x16xf32>
    %38 = vector.shape_cast %37 : vector<1x16x16xf32> to vector<16x16xf32>
    %cst_21 = arith.constant dense<0.000000e+00> : vector<256x16xf32>
    %39 = tpu.matmul %36, %38, %cst_21 {dimension_numbers = #tpu.dot_dimension_numbers<[1], [0], [0], [1], [0, 0, 1, 1], [], []>} : vector<256x16xf32>, vector<16x16xf32>, vector<256x16xf32> -> vector<256x16xf32>
    %40 = arith.addf %35, %39 : vector<256x16xf32>
    %c2 = arith.constant 2 : index
    %c0_22 = arith.constant 0 : index
    %41 = vector.load %arg5[%c2, %c0_22] : memref<296x16xf32, #tpu.memory_space<vmem>>, vector<256x16xf32>
    %cst_23 = arith.constant 0.000000e+00 : f32
    %42 = vector.shape_cast %20 : vector<256x1xi1> to vector<256x1xi1>
    %43 = vector.broadcast %42 : vector<256x1xi1> to vector<256x16xi1>
    %44 = vector.broadcast %cst_23 : f32 to vector<256x16xf32>
    %45 = arith.select %43, %41, %44 : vector<256x16xi1>, vector<256x16xf32>
    %c2_24 = arith.constant 2 : index
    %c0_25 = arith.constant 0 : index
    %c0_26 = arith.constant 0 : index
    %46 = vector.load %arg2[%c2_24, %c0_25, %c0_26] : memref<9x16x16xf32, #tpu.memory_space<vmem>>, vector<1x16x16xf32>
    %47 = vector.shape_cast %46 : vector<1x16x16xf32> to vector<16x16xf32>
    %cst_27 = arith.constant dense<0.000000e+00> : vector<256x16xf32>
    %48 = tpu.matmul %45, %47, %cst_27 {dimension_numbers = #tpu.dot_dimension_numbers<[1], [0], [0], [1], [0, 0, 1, 1], [], []>} : vector<256x16xf32>, vector<16x16xf32>, vector<256x16xf32> -> vector<256x16xf32>
    %49 = arith.addf %40, %48 : vector<256x16xf32>
    %c16 = arith.constant 16 : index
    %c0_28 = arith.constant 0 : index
    %50 = vector.load %arg5[%c16, %c0_28] : memref<296x16xf32, #tpu.memory_space<vmem>>, vector<256x16xf32>
    %cst_29 = arith.constant 0.000000e+00 : f32
    %51 = vector.shape_cast %18 : vector<256x1xi1> to vector<256x1xi1>
    %52 = vector.broadcast %51 : vector<256x1xi1> to vector<256x16xi1>
    %53 = vector.broadcast %cst_29 : f32 to vector<256x16xf32>
    %54 = arith.select %52, %50, %53 : vector<256x16xi1>, vector<256x16xf32>
    %c3 = arith.constant 3 : index
    %c0_30 = arith.constant 0 : index
    %c0_31 = arith.constant 0 : index
    %55 = vector.load %arg2[%c3, %c0_30, %c0_31] : memref<9x16x16xf32, #tpu.memory_space<vmem>>, vector<1x16x16xf32>
    %56 = vector.shape_cast %55 : vector<1x16x16xf32> to vector<16x16xf32>
    %cst_32 = arith.constant dense<0.000000e+00> : vector<256x16xf32>
    %57 = tpu.matmul %54, %56, %cst_32 {dimension_numbers = #tpu.dot_dimension_numbers<[1], [0], [0], [1], [0, 0, 1, 1], [], []>} : vector<256x16xf32>, vector<16x16xf32>, vector<256x16xf32> -> vector<256x16xf32>
    %58 = arith.addf %49, %57 : vector<256x16xf32>
    %c17_33 = arith.constant 17 : index
    %c0_34 = arith.constant 0 : index
    %59 = vector.load %arg5[%c17_33, %c0_34] : memref<296x16xf32, #tpu.memory_space<vmem>>, vector<256x16xf32>
    %c4 = arith.constant 4 : index
    %c0_35 = arith.constant 0 : index
    %c0_36 = arith.constant 0 : index
    %60 = vector.load %arg2[%c4, %c0_35, %c0_36] : memref<9x16x16xf32, #tpu.memory_space<vmem>>, vector<1x16x16xf32>
    %61 = vector.shape_cast %60 : vector<1x16x16xf32> to vector<16x16xf32>
    %cst_37 = arith.constant dense<0.000000e+00> : vector<256x16xf32>
    %62 = tpu.matmul %59, %61, %cst_37 {dimension_numbers = #tpu.dot_dimension_numbers<[1], [0], [0], [1], [0, 0, 1, 1], [], []>} : vector<256x16xf32>, vector<16x16xf32>, vector<256x16xf32> -> vector<256x16xf32>
    %63 = arith.addf %58, %62 : vector<256x16xf32>
    %c18 = arith.constant 18 : index
    %c0_38 = arith.constant 0 : index
    %64 = vector.load %arg5[%c18, %c0_38] : memref<296x16xf32, #tpu.memory_space<vmem>>, vector<256x16xf32>
    %cst_39 = arith.constant 0.000000e+00 : f32
    %65 = vector.shape_cast %20 : vector<256x1xi1> to vector<256x1xi1>
    %66 = vector.broadcast %65 : vector<256x1xi1> to vector<256x16xi1>
    %67 = vector.broadcast %cst_39 : f32 to vector<256x16xf32>
    %68 = arith.select %66, %64, %67 : vector<256x16xi1>, vector<256x16xf32>
    %c5 = arith.constant 5 : index
    %c0_40 = arith.constant 0 : index
    %c0_41 = arith.constant 0 : index
    %69 = vector.load %arg2[%c5, %c0_40, %c0_41] : memref<9x16x16xf32, #tpu.memory_space<vmem>>, vector<1x16x16xf32>
    %70 = vector.shape_cast %69 : vector<1x16x16xf32> to vector<16x16xf32>
    %cst_42 = arith.constant dense<0.000000e+00> : vector<256x16xf32>
    %71 = tpu.matmul %68, %70, %cst_42 {dimension_numbers = #tpu.dot_dimension_numbers<[1], [0], [0], [1], [0, 0, 1, 1], [], []>} : vector<256x16xf32>, vector<16x16xf32>, vector<256x16xf32> -> vector<256x16xf32>
    %72 = arith.addf %63, %71 : vector<256x16xf32>
    %c32 = arith.constant 32 : index
    %c0_43 = arith.constant 0 : index
    %73 = vector.load %arg5[%c32, %c0_43] : memref<296x16xf32, #tpu.memory_space<vmem>>, vector<256x16xf32>
    %cst_44 = arith.constant 0.000000e+00 : f32
    %74 = vector.shape_cast %18 : vector<256x1xi1> to vector<256x1xi1>
    %75 = vector.broadcast %74 : vector<256x1xi1> to vector<256x16xi1>
    %76 = vector.broadcast %cst_44 : f32 to vector<256x16xf32>
    %77 = arith.select %75, %73, %76 : vector<256x16xi1>, vector<256x16xf32>
    %c6 = arith.constant 6 : index
    %c0_45 = arith.constant 0 : index
    %c0_46 = arith.constant 0 : index
    %78 = vector.load %arg2[%c6, %c0_45, %c0_46] : memref<9x16x16xf32, #tpu.memory_space<vmem>>, vector<1x16x16xf32>
    %79 = vector.shape_cast %78 : vector<1x16x16xf32> to vector<16x16xf32>
    %cst_47 = arith.constant dense<0.000000e+00> : vector<256x16xf32>
    %80 = tpu.matmul %77, %79, %cst_47 {dimension_numbers = #tpu.dot_dimension_numbers<[1], [0], [0], [1], [0, 0, 1, 1], [], []>} : vector<256x16xf32>, vector<16x16xf32>, vector<256x16xf32> -> vector<256x16xf32>
    %81 = arith.addf %72, %80 : vector<256x16xf32>
    %c33 = arith.constant 33 : index
    %c0_48 = arith.constant 0 : index
    %82 = vector.load %arg5[%c33, %c0_48] : memref<296x16xf32, #tpu.memory_space<vmem>>, vector<256x16xf32>
    %c7 = arith.constant 7 : index
    %c0_49 = arith.constant 0 : index
    %c0_50 = arith.constant 0 : index
    %83 = vector.load %arg2[%c7, %c0_49, %c0_50] : memref<9x16x16xf32, #tpu.memory_space<vmem>>, vector<1x16x16xf32>
    %84 = vector.shape_cast %83 : vector<1x16x16xf32> to vector<16x16xf32>
    %cst_51 = arith.constant dense<0.000000e+00> : vector<256x16xf32>
    %85 = tpu.matmul %82, %84, %cst_51 {dimension_numbers = #tpu.dot_dimension_numbers<[1], [0], [0], [1], [0, 0, 1, 1], [], []>} : vector<256x16xf32>, vector<16x16xf32>, vector<256x16xf32> -> vector<256x16xf32>
    %86 = arith.addf %81, %85 : vector<256x16xf32>
    %c34 = arith.constant 34 : index
    %c0_52 = arith.constant 0 : index
    %87 = vector.load %arg5[%c34, %c0_52] : memref<296x16xf32, #tpu.memory_space<vmem>>, vector<256x16xf32>
    %cst_53 = arith.constant 0.000000e+00 : f32
    %88 = vector.shape_cast %20 : vector<256x1xi1> to vector<256x1xi1>
    %89 = vector.broadcast %88 : vector<256x1xi1> to vector<256x16xi1>
    %90 = vector.broadcast %cst_53 : f32 to vector<256x16xf32>
    %91 = arith.select %89, %87, %90 : vector<256x16xi1>, vector<256x16xf32>
    %c8 = arith.constant 8 : index
    %c0_54 = arith.constant 0 : index
    %c0_55 = arith.constant 0 : index
    %92 = vector.load %arg2[%c8, %c0_54, %c0_55] : memref<9x16x16xf32, #tpu.memory_space<vmem>>, vector<1x16x16xf32>
    %93 = vector.shape_cast %92 : vector<1x16x16xf32> to vector<16x16xf32>
    %cst_56 = arith.constant dense<0.000000e+00> : vector<256x16xf32>
    %94 = tpu.matmul %91, %93, %cst_56 {dimension_numbers = #tpu.dot_dimension_numbers<[1], [0], [0], [1], [0, 0, 1, 1], [], []>} : vector<256x16xf32>, vector<16x16xf32>, vector<256x16xf32> -> vector<256x16xf32>
    %95 = arith.addf %86, %94 : vector<256x16xf32>
    %c0_57 = arith.constant 0 : index
    %c0_58 = arith.constant 0 : index
    %96 = vector.load %arg3[%c0_57, %c0_58] : memref<1x16xf32, #tpu.memory_space<vmem>>, vector<1x16xf32>
    %97 = vector.broadcast %96 : vector<1x16xf32> to vector<256x16xf32>
    %98 = arith.addf %95, %97 : vector<256x16xf32>
    %cst_59 = arith.constant 0.000000e+00 : f32
    %99 = vector.broadcast %cst_59 : f32 to vector<256x16xf32>
    %100 = arith.maximumf %98, %99 : vector<256x16xf32>
    %c0_60 = arith.constant 0 : index
    %c0_61 = arith.constant 0 : index
    %c0_62 = arith.constant 0 : index
    %101 = vector.load %arg4[%c0_60, %c0_61, %c0_62] : memref<1x256x16xf32, #tpu.memory_space<vmem>>, vector<1x256x16xf32>
    %102 = vector.shape_cast %101 : vector<1x256x16xf32> to vector<256x16xf32>
    %103 = vector.shape_cast %100 : vector<256x16xf32> to vector<1x256x16xf32>
    tpu.vector_store %arg4[%c0_60, %c0_61, %c0_62], %103 {strides = array<i32>} : memref<1x256x16xf32, #tpu.memory_space<vmem>>, vector<1x256x16xf32>,
    return
  }
  func.func @transform_0(%arg0: i32) -> (i32, i32, i32) {
    %c0_i32 = arith.constant 0 : i32
    %c0_i32_0 = arith.constant 0 : i32
    %c0_i32_1 = arith.constant 0 : i32
    return %arg0, %c0_i32, %c0_i32_0 : i32, i32, i32
  }
  func.func @transform_1(%arg0: i32) -> (i32, i32, i32) {
    %c0_i32 = arith.constant 0 : i32
    %c0_i32_0 = arith.constant 0 : i32
    %c0_i32_1 = arith.constant 0 : i32
    %c0_i32_2 = arith.constant 0 : i32
    return %c0_i32, %c0_i32_0, %c0_i32_1 : i32, i32, i32
  }
  func.func @transform_2(%arg0: i32) -> (i32, i32) {
    %c0_i32 = arith.constant 0 : i32
    %c0_i32_0 = arith.constant 0 : i32
    %c0_i32_1 = arith.constant 0 : i32
    return %c0_i32, %c0_i32_0 : i32, i32
  }
  func.func @transform_3(%arg0: i32) -> (i32, i32, i32) {
    %c0_i32 = arith.constant 0 : i32
    %c0_i32_0 = arith.constant 0 : i32
    %c0_i32_1 = arith.constant 0 : i32
    return %arg0, %c0_i32, %c0_i32_0 : i32, i32, i32
  }
}

</mosaic_0001>

<bundles_post_ra>
// kernel: unet_up_origin_forward.3
= control target key start
LH: loop header
LB: loop body
LE: loop exit
PB: predicated region body
PF: predicated region fallthrough
CT: control target
= control target key end

     0   :  { %s3905_s12 = smov 0   ;;  %s4828_s0 = inlined_call_operand.vmem [shape: f32[2,64,32], index: 0, kind: input, shape index: {}]   ;;  %s4829_s1 = inlined_call_operand.vmem [shape: f32[2,2,4,32,16], index: 1, kind: input, shape index: {}]   ;;  %s4830_s2 = inlined_call_operand.vmem [shape: f32[1,16], index: 2, kind: input, shape index: {}]   ;;  %s4831_s3 = inlined_call_operand.vmem [shape: f32[2,2,2,64,16], index: 3, kind: output, shape index: {}]  }
   0x1 LB: > { %s2902_s13 = sadd.s32 4294967295, %s3882_s12   ;;  %p2906_p0 = scmp.ge.s32.totalorder %s3882_s12, 1  ;;  %s3882_s12 = sphi %s3905_s12, %s13_s12  }
   0x2   : > { %p137_p1 = scmp.lt.s32.totalorder %s3882_s12, 3 }
   0x4   : > { %p138_p2 = pnand %p2906_p0, %p137_p1 }
   0x6   : > { %141 = sbr.rel (%p138_p2) target bundleno = 371 (0x173), region = 32 }
   0xd   : > { %v2911_v0 = vld [vmem:[%s4829_s1 + $0x20] sm:$0xff]  ;;  %v2912_v1 = vld [vmem:[%s4829_s1 + $0x28] sm:$0xff]  ;;  %p3924_p3 = scmp.lt.s32.totalorder %s2902_s13, 1  ;;  %vm4832_vm0 = vcmask 261120   ;;  %v199_v3 = vlaneseq  ;;  %v2913_v6 = vld [vmem:[%s4829_s1 + $0x30] sm:$0xff]  ;;  %v3884_v8 = vmov 0.0  }
   0xe   : > { %v2960_v2 = vld [vmem:[%s4829_s1 + $0xa0] sm:$0xff]  ;;  %v3643_v4 = vpack.c.bf16 %v2912_v1, %v2911_v0  ;;  %v2961_v5 = vld [vmem:[%s4829_s1 + $0xa8] sm:$0xff]  ;;  %v2914_v7 = vld [vmem:[%s4829_s1 + $0x38] sm:$0xff]  ;;  %173 = vst.msk [vmem:[#allocation2 + $0x8] sm:$0xff] %vm4832_vm0, %v3884_v8  ;;  %v4853_v40 = vmov 0  ;;  %v4856_v41 = vmov 0 }
   0xf   : > { %174 = vst.msk [vmem:[#allocation2 + $0x10] sm:$0xff] %vm4832_vm0, %v3884_v8  ;;  %172 = vst.msk [vmem:[#allocation2] sm:$0xff] %vm4832_vm0, %v3884_v8  ;;  %v3675_v9 = vpack.c.bf16 %v2961_v5, %v2960_v2  ;;  %v3647_v10 = vpack.c.bf16 %v2914_v7, %v2913_v6  ;;  %v2962_v11 = vld [vmem:[%s4829_s1 + $0xb0] sm:$0xff]  ;;  %v2963_v12 = vld [vmem:[%s4829_s1 + $0xb8] sm:$0xff]  ;;  %s5025_s13 = smov (!%p3924_p3, %s2902_s13), 1  ;;  %v3960_v13 = vshrl.u32 %v199_v3, 7 }
  0x10   : > { %175 = vst.msk [vmem:[#allocation2 + $0x18] sm:$0xff] %vm4832_vm0, %v3884_v8  ;;  %176 = vst.msk [vmem:[#allocation2 + $0x20] sm:$0xff] %vm4832_vm0, %v3884_v8  ;;  %v328_v14 = vld [vmem:[%s4829_s1] sm:$0xff]  ;;  %3644 = vmatprep.subr.bf16.mxu0 %v3643_v4  ;;  %v3679_v15 = vpack.c.bf16 %v2963_v12, %v2962_v11  ;;  %v329_v16 = vld [vmem:[%s4829_s1 + $0x8] sm:$0xff]  ;;  %s3129_s14 = sshll.u32 %s5025_s13, 6  ;;  %v4873_v51 = vmov 0 }
  0x11   : > { %177 = vst.msk [vmem:[#allocation2 + $0x28] sm:$0xff] %vm4832_vm0, %v3884_v8  ;;  %178 = vst.msk [vmem:[#allocation2 + $0x30] sm:$0xff] %vm4832_vm0, %v3884_v8  ;;  %v2956_v17 = vld [vmem:[%s4829_s1 + $0x80] sm:$0xff]  ;;  %v2957_v18 = vld [vmem:[%s4829_s1 + $0x88] sm:$0xff]  ;;  %3676 = vmatprep.subr.bf16.mxu1 %v3675_v9  ;;  %3646 = vmatpush3.bf16.msra.mxu0 %v3643_v4  ;;  %v201_v19 = vadd.s32 8, %v3960_v13  ;;  %s165_s17 = scalar_lea.vmem %s4828_s0, %s3129_s14  ;;  %v3979_v20 = vpack.c.bf16 %v329_v16, %v328_v14  ;;  %v202_v21 = vadd.s32 16, %v3960_v13 }
  0x12   : > { %179 = vst.msk [vmem:[#allocation2 + $0x38] sm:$0xff] %vm4832_vm0, %v3884_v8  ;;  %180 = vst.msk [vmem:[#allocation2 + $0x40] sm:$0xff] %vm4832_vm0, %v3884_v8  ;;  %3678 = vmatpush3.bf16.msra.mxu1 %v3675_v9  ;;  %3648 = vmatprep.subr.bf16.mxu0 %v3647_v10  ;;  %v203_v22 = vadd.s32 24, %v3960_v13  ;;  %v204_v23 = vadd.s32 32, %v3960_v13  ;;  %v183_v24 = vld [vmem:[%s165_s17] sm:$0xff]  ;;  %v184_v25 = vld [vmem:[%s165_s17 + $0x8] sm:$0xff]  ;;  %v3984_v26 = vpack.c.bf16 %v2957_v18, %v2956_v17 }
  0x13   : > { %181 = vst.msk [vmem:[#allocation2 + $0x48] sm:$0xff] %vm4832_vm0, %v3884_v8  ;;  %182 = vst.msk [vmem:[#allocation2 + $0x50] sm:$0xff] %vm4832_vm0, %v3884_v8  ;;  %3680 = vmatprep.subr.bf16.mxu1 %v3679_v15  ;;  %v185_v27 = vld [vmem:[%s165_s17 + $0x10] sm:$0xff]  ;;  %v212_v28 = vand.u32 7, %v3960_v13  ;;  %v186_v29 = vld [vmem:[%s165_s17 + $0x18] sm:$0xff]  ;;  %v219_v32 = vand.u32 7, %v201_v19 }
  0x14   : > { %191 = vst.msk [vmem:[#allocation2 + $0x9] sm:$0xff] %vm4832_vm0, %v183_v24  ;;  %192 = vst.msk [vmem:[#allocation2 + $0x11] sm:$0xff] %vm4832_vm0, %v184_v25  ;;  %v187_v30 = vld [vmem:[%s165_s17 + $0x20] sm:$0xff]  ;;  %v188_v31 = vld [vmem:[%s165_s17 + $0x28] sm:$0xff]  ;;  %v226_v33 = vand.u32 7, %v202_v21  ;;  %v233_v36 = vand.u32 7, %v203_v22 }
  0x15   : > { %193 = vst.msk [vmem:[#allocation2 + $0x19] sm:$0xff] %vm4832_vm0, %v185_v27  ;;  %3650 = vmatpush3.bf16.msra.mxu0 %v3647_v10  ;;  %194 = vst.msk [vmem:[#allocation2 + $0x21] sm:$0xff] %vm4832_vm0, %v186_v29  ;;  %v189_v34 = vld [vmem:[%s165_s17 + $0x30] sm:$0xff]  ;;  %v190_v35 = vld [vmem:[%s165_s17 + $0x38] sm:$0xff]  ;;  %v240_v37 = vand.u32 7, %v204_v23  ;;  %v205_v38 = vadd.s32 40, %v3960_v13 }
  0x16   : > { %195 = vst.msk [vmem:[#allocation2 + $0x29] sm:$0xff] %vm4832_vm0, %v187_v30  ;;  %196 = vst.msk [vmem:[#allocation2 + $0x31] sm:$0xff] %vm4832_vm0, %v188_v31  ;;  %3682 = vmatpush3.bf16.msra.mxu1 %v3679_v15  ;;  %3652 = vmatprep.subr.bf16.mxu0 %v3979_v20  ;;  %v206_v39 = vadd.s32 48, %v3960_v13  ;;  %vm3999_vm1 = vcmp.ge.s32.totalorder %v212_v28, 1  ;;  %vm4003_vm2 = vcmp.le.s32.totalorder %v212_v28, 6  ;;  %vm4007_vm3 = vcmp.ge.s32.totalorder %v219_v32, 1 }
  0x17   : > { %197 = vst.msk [vmem:[#allocation2 + $0x39] sm:$0xff] %vm4832_vm0, %v189_v34  ;;  %198 = vst.msk [vmem:[#allocation2 + $0x41] sm:$0xff] %vm4832_vm0, %v190_v35  ;;  %3684 = vmatprep.subr.bf16.mxu1 %v3984_v26  ;;  %v4854_v40 = vsel %vm3999_vm1, 4294967295, %v4853_v40  ;;  %v4857_v41 = vsel %vm4003_vm2, 4294967295, %v4856_v41  ;;  %vm4011_vm4 = vcmp.le.s32.totalorder %v219_v32, 6  ;;  %vm4015_vm5 = vcmp.ge.s32.totalorder %v226_v33, 1 }
  0x18   : > { %4855 = vst [vmem:[#allocation3_spill] sm:$0xff] %v4854_v40  ;;  %4858 = vst [vmem:[#allocation4_spill] sm:$0xff] %v4857_v41  ;;  %vm4019_vm6 = vcmp.le.s32.totalorder %v226_v33, 6  ;;  %v330_v46 = vld [vmem:[%s4829_s1 + $0x10] sm:$0xff]  ;;  %v331_v47 = vld [vmem:[%s4829_s1 + $0x18] sm:$0xff]  ;;  %vm4029_vm7 = vcmp.ge.s32.totalorder %v233_v36, 1 }
  0x19   : > { %vm4033_vm8 = vcmp.le.s32.totalorder %v233_v36, 6  ;;  %vm4037_vm9 = vcmp.ge.s32.totalorder %v240_v37, 1  ;;  %vm4041_vm10 = vcmp.le.s32.totalorder %v240_v37, 6  ;;  %v2958_v52 = vld [vmem:[%s4829_s1 + $0x90] sm:$0xff]  ;;  %v2959_v53 = vld [vmem:[%s4829_s1 + $0x98] sm:$0xff]  ;;  %v247_v57 = vand.u32 7, %v205_v38 }
  0x1a   : > { %v4874_v51 = vsel %vm4041_vm10, 4294967295, %v4873_v51  ;;  %v254_v58 = vand.u32 7, %v206_v39  ;;  %v207_v59 = vadd.s32 56, %v3960_v13  ;;  %v3655_v2 = vpack.c.bf16 %v331_v47, %v330_v46  ;;  %v2931_v3 = vld [vmem:[%s4829_s1 + $0x40] sm:$0xff]  ;;  %v2932_v4 = vld [vmem:[%s4829_s1 + $0x48] sm:$0xff]  ;;  %s3130_s22 = sshll.u32 %s5025_s13, 8 }
  0x1b   : > { %v4051_v54 = vld [vmem:[#allocation2 + $0x8] sm:$0xff]  ;;  %v4055_v56 = vld [vmem:[#allocation2 + $0x10] sm:$0xff]  ;;  %v3687_v11 = vpack.c.bf16 %v2959_v53, %v2958_v52  ;;  %v2980_v13 = vld [vmem:[%s4829_s1 + $0xc0] sm:$0xff]  ;;  %vm4148_vm11 = vcmp.ge.s32.totalorder %v247_v57, 1  ;;  %vm4154_vm12 = vcmp.le.s32.totalorder %v247_v57, 6  ;;  %v4877_v22 = vmov 0  ;;  %s4727_s27 = scalar_lea.vmem %s4831_s3, %s3130_s22 }
  0x1c   : > { %v4053_v55 = vld [vmem:[#allocation2 + $0xa] sm:$0xff]  ;;  %v4061_v60 = vsel %vm3999_vm1, %v4051_v54, 0.0  ;;  %v4071_v62 = vsel %vm4007_vm3, %v4055_v56, 0.0  ;;  %v4073_v63 = vld [vmem:[#allocation2 + $0x12] sm:$0xff]  ;;  %v4077_v1 = vld [vmem:[#allocation2 + $0x1a] sm:$0xff]  ;;  %v261_v17 = vand.u32 7, %v207_v59  ;;  %v3659_v28 = vpack.c.bf16 %v2932_v4, %v2931_v3 }
  0x1d   : > { %v4066_v61 = vsel %vm4003_vm2, %v4053_v55, 0.0  ;;  %v4075_v0 = vld [vmem:[#allocation2 + $0x18] sm:$0xff]  ;;  %3331 = vmatprep.mubr.msk.f32.mxu0 %vm4832_vm0, %v4061_v60  ;;  %v4092_v5 = vsel %vm4011_vm4, %v4073_v63, 0.0  ;;  %v4102_v7 = vsel %vm4019_vm6, %v4077_v1, 0.0  ;;  %v4104_v8 = vld [vmem:[#allocation2 + $0x20] sm:$0xff]  ;;  %v4108_v10 = vld [vmem:[#allocation2 + $0x28] sm:$0xff] }
  0x1e   : > { %3411 = vmatprep.mubr.msk.f32.mxu1 %vm4832_vm0, %v4066_v61  ;;  %v4097_v6 = vsel %vm4015_vm5, %v4075_v0, 0.0  ;;  %v4106_v9 = vld [vmem:[#allocation2 + $0x22] sm:$0xff]  ;;  %3332 = vmatmul.mubr.msk.f32.vlgmr.msra.gmra.mrb[0].mxu0 %vm4832_vm0, %v4071_v62  ;;  %v4114_v12 = vld [vmem:[#allocation2 + $0x2a] sm:$0xff]  ;;  %v4127_v15 = vsel %vm4029_vm7, %v4104_v8, 0.0  ;;  %v4141_v18 = vsel %vm4037_vm9, %v4108_v10, 0.0  ;;  %v4878_v22 = vsel %vm4154_vm12, 4294967295, %v4877_v22 }
  0x1f   : > { %3412 = vmatmul.mubr.msk.f32.vlgmr.msra.gmra.mrb[0].mxu1 %vm4832_vm0, %v4092_v5  ;;  %v2981_v14 = vld [vmem:[%s4829_s1 + $0xc8] sm:$0xff]  ;;  %3654 = vmatpush3.bf16.msra.mxu0 %v3979_v20  ;;  %v4132_v16 = vsel %vm4033_vm8, %v4106_v9, 0.0  ;;  %v4146_v19 = vsel %vm4041_vm10, %v4114_v12, 0.0  ;;  %v4875_v20 = vmov 0  ;;  %v4152_v21 = vld [vmem:[#allocation2 + $0x30] sm:$0xff]  ;;  %vm4160_vm13 = vcmp.ge.s32.totalorder %v254_v58, 1 }
  0x20   : > { %3686 = vmatpush3.bf16.msra.mxu1 %v3984_v26  ;;  %3334 = vmatprep.mubr.msk.f32.mxu0 %vm4832_vm0, %v4097_v6  ;;  %v4876_v20 = vsel %vm4148_vm11, 4294967295, %v4875_v20  ;;  %v4158_v23 = vld [vmem:[#allocation2 + $0x32] sm:$0xff]  ;;  %v4879_v24 = vmov 0  ;;  %vm4166_vm14 = vcmp.le.s32.totalorder %v254_v58, 6  ;;  %v4881_v26 = vmov 0  ;;  %v4170_v27 = vld [vmem:[#allocation2 + $0x3a] sm:$0xff] }
  0x21   : > { %3414 = vmatprep.mubr.msk.f32.mxu1 %vm4832_vm0, %v4102_v7  ;;  %3656 = vmatprep.subr.bf16.mxu0 %v3655_v2  ;;  %v4880_v24 = vsel %vm4160_vm13, 4294967295, %v4879_v24  ;;  %v4164_v25 = vld [vmem:[#allocation2 + $0x38] sm:$0xff]  ;;  %v4882_v26 = vsel %vm4166_vm14, 4294967295, %v4881_v26  ;;  %v3691_v29 = vpack.c.bf16 %v2981_v14, %v2980_v13  ;;  %v4183_v30 = vsel %vm4148_vm11, %v4152_v21, 0.0  ;;  %v4194_v33 = vld [vmem:[#allocation2 + $0x40] sm:$0xff]  ;;  %v4239_v53 = vld [vmem:[#allocation2 + $0x9] sm:$0xff] }
  0x22   : > { %3688 = vmatprep.subr.bf16.mxu1 %v3687_v11  ;;  %3335 = vmatmul.mubr.msk.f32.gmra.mrb[2].mxu0 %vm4832_vm0, %v4127_v15  ;;  %v4188_v31 = vsel %vm4154_vm12, %v4158_v23, 0.0  ;;  %vm4190_vm15 = vcmp.ge.s32.totalorder %v261_v17, 1  ;;  %v4883_v32 = vmov 0  ;;  %4885 = vst [vmem:[#allocation5_spill] sm:$0xff] %v4194_v33  ;;  %v4199_v34 = vsel %vm4160_vm13, %v4164_v25, 0.0  ;;  %v4210_v37 = vld [vmem:[#allocation2 + $0x42] sm:$0xff] }
  0x23   : > { %3415 = vmatmul.mubr.msk.f32.gmra.mrb[2].mxu1 %vm4832_vm0, %v4132_v16  ;;  %3337 = vmatprep.mubr.msk.f32.mxu0 %vm4832_vm0, %v4141_v18  ;;  %v4884_v32 = vsel %vm4190_vm15, 4294967295, %v4883_v32  ;;  %v4204_v35 = vsel %vm4166_vm14, %v4170_v27, 0.0  ;;  %v4886_v36 = vmov 0  ;;  %4888 = vst [vmem:[#allocation6_spill] sm:$0xff] %v4210_v37  ;;  %vm4889_vm12 = vcmask 261120   ;;  %v2933_v59 = vld [vmem:[%s4829_s1 + $0x50] sm:$0xff] }
  0x24   : > { %3417 = vmatprep.mubr.msk.f32.mxu1 %vm4832_vm0, %v4146_v19  ;;  %3658 = vmatpush3.bf16.msra.mxu0 %v3655_v2  ;;  %vm4206_vm0 = vcmp.le.s32.totalorder %v261_v17, 6  ;;  %vm4890_vm11 = vmmov %vm4889_vm12  ;;  %v4219_v38 = vsel %vm4190_vm15, %v4194_v33, 0.0  ;;  %v2982_v13 = vld [vmem:[%s4829_s1 + $0xd0] sm:$0xff]  ;;  %v2983_v14 = vld [vmem:[%s4829_s1 + $0xd8] sm:$0xff]  ;;  %v1427_v41 = vsel %vm4019_vm6, %v4073_v63, 0.0  ;;  %v4996_v42 = vsel %vm4019_vm6, %v4106_v9, 0.0 }
  0x25   : > { %3690 = vmatpush3.bf16.msra.mxu1 %v3687_v11  ;;  %v4887_v36 = vsel %vm4206_vm0, 4294967295, %v4886_v36  ;;  %3660 = vmatprep.subr.bf16.mxu0 %v3659_v28  ;;  %vm4891_vm14 = vmmov %vm4890_vm11  ;;  %v4228_v39 = vsel %vm4206_vm0, %v4210_v37, 0.0  ;;  %v2934_v11 = vld [vmem:[%s4829_s1 + $0x58] sm:$0xff]  ;;  %v3695_v47 = vpack.c.bf16 %v2983_v14, %v2982_v13  ;;  %v2943_v2 = vld [vmem:[%s4829_s1 + $0x60] sm:$0xff]  ;;  %v4998_v43 = vsel %vm4029_vm7, %v4108_v10, 0.0 }
  0x26   : > { %3692 = vmatprep.subr.bf16.mxu1 %v3691_v29  ;;  %3338 = vmatmul.mubr.msk.f32.gmra.mrb[4].mxu0 %vm4889_vm12, %v4183_v30  ;;  %vm4892_vm13 = vmmov %vm4890_vm11  ;;  %v4282_v3 = vld [vmem:[#allocation2 + $0x11] sm:$0xff]  ;;  %v4296_v57 = vld [vmem:[#allocation2 + $0x19] sm:$0xff]  ;;  %v3663_v52 = vpack.c.bf16 %v2934_v11, %v2933_v59  ;;  %v5000_v44 = vsel %vm4033_vm8, %v4114_v12, 0.0  ;;  %v5002_v45 = vsel %vm4037_vm9, %v4152_v21, 0.0  ;;  %vm5004_vm6 = vnez %v4874_v51 }
  0x27   : > { %3418 = vmatmul.mubr.msk.f32.gmra.mrb[4].mxu1 %vm4890_vm11, %v4188_v31  ;;  %3340 = vmatprep.mubr.msk.f32.mxu0 %vm4891_vm14, %v4199_v34  ;;  %vm4893_vm12 = vmmov %vm4890_vm11  ;;  %v2944_v4 = vld [vmem:[%s4829_s1 + $0x68] sm:$0xff]  ;;  %v2992_v58 = vld [vmem:[%s4829_s1 + $0xe0] sm:$0xff]  ;;  %v5005_v48 = vsel %vm5004_vm6, %v4158_v23, 0.0 }
  0x28   : > { %3420 = vmatprep.mubr.msk.f32.mxu1 %vm4892_vm13, %v4204_v35  ;;  %vm4894_vm13 = vmmov %vm4890_vm11  ;;  %v2993_v59 = vld [vmem:[%s4829_s1 + $0xe8] sm:$0xff]  ;;  %v3667_v14 = vpack.c.bf16 %v2944_v4, %v2943_v2  ;;  %v2946_v2 = vld [vmem:[%s4829_s1 + $0x78] sm:$0xff] }
  0x29   : > { %vm4895_vm14 = vmmov %vm4890_vm11  ;;  %v4314_v11 = vld [vmem:[#allocation2 + $0x21] sm:$0xff]  ;;  %v4320_v13 = vld [vmem:[#allocation2 + $0x29] sm:$0xff]  ;;  %v3699_v17 = vpack.c.bf16 %v2993_v59, %v2992_v58 }
  0x2a   : > { %3341 = vmatmul.mubr.msk.f32.gmra.mrb[6].mxu0 %vm4890_vm11, %v4219_v38  ;;  %vm4900_vm15 = vmmov %vm4895_vm14  ;;  %v4342_v58 = vld [vmem:[#allocation2 + $0x41] sm:$0xff]  ;;  %v2994_v4 = vld [vmem:[%s4829_s1 + $0xf0] sm:$0xff] }
  0x2b   : > { %3421 = vmatmul.mubr.msk.f32.gmra.mrb[6].mxu1 %vm4893_vm12, %v4228_v39  ;;  %3351 = vmatprep.mubr.msk.f32.mxu0 %vm4894_vm13, %v4239_v53  ;;  %vm4902_vm13 = vmmov %vm4895_vm14  ;;  %4909 = vst [vmem:[#allocation7_spill] sm:$0xff] %v4342_v58  ;;  %v2995_v59 = vld [vmem:[%s4829_s1 + $0xf8] sm:$0xff]  ;;  %v3017_v33 = vld [vmem:[%s4829_s1 + $0x120] sm:$0xff] }
  0x2c   : > { %3431 = vmatprep.mubr.msk.f32.mxu1 %vm4895_vm14, %v4239_v53  ;;  %vm4903_vm0 = vmmov %vm4902_vm13  ;;  %v3703_v37 = vpack.c.bf16 %v2995_v59, %v2994_v4  ;;  %v3076_v59 = vld [vmem:[%s4829_s1 + $0x1b0] sm:$0xff]  ;;  %v5014_v51 = vld [vmem:[#allocation5_spill] sm:$0xff] }
  0x2d   : > { %vm4904_vm12 = vmmov %vm4903_vm0 }
  0x2e   : > { %3352 = vmatmul.mubr.msk.f32.vlgmr.msra.gmra.mrb[0].mxu0 %vm4895_vm14, %v4282_v3  ;;  %vm4919_vm11 = vmmov %vm4903_vm0 }
  0x2f   : > { %3432 = vmatmul.mubr.msk.f32.vlgmr.msra.gmra.mrb[0].mxu1 %vm4900_vm15, %v4282_v3  ;;  %3662 = vmatpush3.bf16.msra.mxu0 %v3659_v28  ;;  %vm4901_vm15 = vmmov %vm4895_vm14  ;;  %v4330_v28 = vld [vmem:[#allocation2 + $0x31] sm:$0xff] }
  0x30   : > { %3694 = vmatpush3.bf16.msra.mxu1 %v3691_v29  ;;  %3354 = vmatprep.mubr.msk.f32.mxu0 %vm4895_vm14, %v4296_v57  ;;  %vm4905_vm14 = vmmov %vm4903_vm0  ;;  %v4332_v29 = vld [vmem:[#allocation2 + $0x39] sm:$0xff] }
  0x31   : > { %3434 = vmatprep.mubr.msk.f32.mxu1 %vm4901_vm15, %v4296_v57  ;;  %3664 = vmatprep.subr.bf16.mxu0 %v3663_v52  ;;  %vm4906_vm15 = vmmov %vm4903_vm0 }
  0x32   : > { %3696 = vmatprep.subr.bf16.mxu1 %v3695_v47  ;;  %3355 = vmatmul.mubr.msk.f32.gmra.mrb[2].mxu0 %vm4902_vm13, %v4314_v11  ;;  %vm4907_vm13 = vmmov %vm4903_vm0 }
  0x33   : > { %3435 = vmatmul.mubr.msk.f32.gmra.mrb[2].mxu1 %vm4903_vm0, %v4314_v11  ;;  %3357 = vmatprep.mubr.msk.f32.mxu0 %vm4904_vm12, %v4320_v13  ;;  %vm4908_vm12 = vmmov %vm4903_vm0 }
  0x34   : > { %3437 = vmatprep.mubr.msk.f32.mxu1 %vm4905_vm14, %v4320_v13  ;;  %3666 = vmatpush3.bf16.msra.mxu0 %v3663_v52  ;;  %v627_v52 = vld [vmem:[#allocation2 + $0x1] sm:$0xff]  ;;  %vm4910_vm14 = vmmov %vm4903_vm0 }
  0x35   : > { %3698 = vmatpush3.bf16.msra.mxu1 %v3695_v47  ;;  %3668 = vmatprep.subr.bf16.mxu0 %v3667_v14  ;;  %v2945_v47 = vld [vmem:[%s4829_s1 + $0x70] sm:$0xff] }
  0x36   : > { %3700 = vmatprep.subr.bf16.mxu1 %v3699_v17  ;;  %3358 = vmatmul.mubr.msk.f32.gmra.mrb[4].mxu0 %vm4906_vm15, %v4330_v28  ;;  %vm4911_vm15 = vmmov %vm4903_vm0  ;;  %v3671_v46 = vpack.c.bf16 %v2946_v2, %v2945_v47  ;;  %v3075_v47 = vld [vmem:[%s4829_s1 + $0x1a8] sm:$0xff] }
  0x37   : > { %3438 = vmatmul.mubr.msk.f32.gmra.mrb[4].mxu1 %vm4907_vm13, %v4330_v28  ;;  %3360 = vmatprep.mubr.msk.f32.mxu0 %vm4903_vm0, %v4332_v29  ;;  %vm4912_vm13 = vmmov %vm4903_vm0 }
  0x38   : > { %3440 = vmatprep.mubr.msk.f32.mxu1 %vm4908_vm12, %v4332_v29  ;;  %vm4913_vm12 = vmmov %vm4903_vm0 }
  0x3a   : > { %3361 = vmatmul.mubr.msk.f32.gmra.mrb[6].mxu0 %vm4910_vm14, %v4342_v58  ;;  %vm4914_vm14 = vmmov %vm4903_vm0 }
  0x3b   : > { %3441 = vmatmul.mubr.msk.f32.gmra.mrb[6].mxu1 %vm4911_vm15, %v4342_v58  ;;  %3371 = vmatprep.mubr.msk.f32.mxu0 %vm4912_vm13, %v627_v52  ;;  %v3018_v58 = vld [vmem:[%s4829_s1 + $0x128] sm:$0xff]  ;;  %vm4915_vm15 = vmmov %vm4903_vm0 }
  0x3c   : > { %3451 = vmatprep.mubr.msk.f32.mxu1 %vm4903_vm0, %v627_v52  ;;  %v3074_v52 = vld [vmem:[%s4829_s1 + $0x1a0] sm:$0xff]  ;;  %vm4916_vm13 = vmmov %vm4903_vm0  ;;  %v3707_v2 = vpack.c.bf16 %v3018_v58, %v3017_v33  ;;  %v3020_v58 = vld [vmem:[%s4829_s1 + $0x138] sm:$0xff] }
  0x3d   : > { %v3739_v4 = vpack.c.bf16 %v3075_v47, %v3074_v52  ;;  %v3077_v52 = vld [vmem:[%s4829_s1 + $0x1b8] sm:$0xff]  ;;  %v786_v47 = vsel %vm4007_vm3, %v4051_v54, 0.0  ;;  %v3014_v54 = vld [vmem:[%s4829_s1 + $0x108] sm:$0xff] }
  0x3e   : > { %3372 = vmatmul.mubr.msk.f32.vlgmr.msra.gmra.mrb[0].mxu0 %vm4913_vm12, %v4239_v53  ;;  %vm4917_vm12 = vmmov %vm4903_vm0 }
  0x3f   : > { %3452 = vmatmul.mubr.msk.f32.vlgmr.msra.gmra.mrb[0].mxu1 %vm4914_vm14, %v4239_v53  ;;  %3670 = vmatpush3.bf16.msra.mxu0 %v3667_v14  ;;  %vm4918_vm14 = vmmov %vm4903_vm0  ;;  %v1417_v14 = vld [vmem:[#allocation2 + $0x2] sm:$0xff] }
  0x40   : > { %3702 = vmatpush3.bf16.msra.mxu1 %v3699_v17  ;;  %3374 = vmatprep.mubr.msk.f32.mxu0 %vm4915_vm15, %v4282_v3  ;;  %v777_v17 = vld [vmem:[#allocation2] sm:$0xff]  ;;  %vm4920_vm15 = vmmov %vm4903_vm0 }
  0x41   : > { %3454 = vmatprep.mubr.msk.f32.mxu1 %vm4916_vm13, %v4282_v3  ;;  %3672 = vmatprep.subr.bf16.mxu0 %v3671_v46  ;;  %vm4921_vm13 = vmmov %vm4903_vm0  ;;  %v785_v33 = vsel %vm3999_vm1, %v777_v17, 0.0  ;;  %v1426_v17 = vsel %vm4011_vm4, %v4053_v55, 0.0  ;;  %v3070_v55 = vld [vmem:[%s4829_s1 + $0x180] sm:$0xff] }
  0x42   : > { %3704 = vmatprep.subr.bf16.mxu1 %v3703_v37  ;;  %3375 = vmatmul.mubr.msk.f32.gmra.mrb[2].mxu0 %vm4903_vm0, %v4296_v57 }
  0x43   : > { %3455 = vmatmul.mubr.msk.f32.gmra.mrb[2].mxu1 %vm4917_vm12, %v4296_v57  ;;  %3377 = vmatprep.mubr.msk.f32.mxu0 %vm4918_vm14, %v4314_v11  ;;  %vm4922_vm12 = vmmov %vm4903_vm0 }
  0x44   : > { %3457 = vmatprep.mubr.msk.f32.mxu1 %vm4919_vm11, %v4314_v11  ;;  %3674 = vmatpush3.bf16.msra.mxu0 %v3671_v46  ;;  %v3019_v46 = vld [vmem:[%s4829_s1 + $0x130] sm:$0xff]  ;;  %vm4923_vm11 = vmmov %vm4903_vm0 }
  0x45   : > { %3706 = vmatpush3.bf16.msra.mxu1 %v3703_v37  ;;  %3708 = vmatprep.subr.bf16.mxu0 %v3707_v2  ;;  %v1425_v37 = vsel %vm4003_vm2, %v1417_v14, 0.0  ;;  %vm4924_vm14 = vmmov %vm4903_vm0  ;;  %v787_v14 = vsel %vm4015_vm5, %v4055_v56, 0.0  ;;  %v3711_v40 = vpack.c.bf16 %v3020_v58, %v3019_v46  ;;  %v3071_v46 = vld [vmem:[%s4829_s1 + $0x188] sm:$0xff]  ;;  %v788_v58 = vsel %vm4029_vm7, %v4075_v0, 0.0 }
  0x46   : > { %3740 = vmatprep.subr.bf16.mxu1 %v3739_v4  ;;  %3378 = vmatmul.mubr.msk.f32.gmra.mrb[4].mxu0 %vm4920_vm15, %v4320_v13  ;;  %vm4925_vm15 = vmmov %vm4903_vm0  ;;  %vm5007_vm7 = vnez %v4876_v20 }
  0x47   : > { %3458 = vmatmul.mubr.msk.f32.gmra.mrb[4].mxu1 %vm4921_vm13, %v4320_v13  ;;  %3380 = vmatprep.mubr.msk.f32.mxu0 %vm4903_vm0, %v4330_v28  ;;  %vm4926_vm13 = vmmov %vm4903_vm0  ;;  %v5008_v49 = vsel %vm5007_vm7, %v4164_v25, 0.0 }
  0x48   : > { %3460 = vmatprep.mubr.msk.f32.mxu1 %vm4922_vm12, %v4330_v28  ;;  %vm4927_vm12 = vmmov %vm4903_vm0 }
  0x4a   : > { %3381 = vmatmul.mubr.msk.f32.gmra.mrb[6].mxu0 %vm4923_vm11, %v4332_v29  ;;  %vm4928_vm11 = vmmov %vm4903_vm0 }
  0x4b   : > { %3461 = vmatmul.mubr.msk.f32.gmra.mrb[6].mxu1 %vm4924_vm14, %v4332_v29  ;;  %3391 = vmatprep.mubr.msk.f32.mxu0 %vm4925_vm15, %v785_v33  ;;  %v3743_v33 = vpack.c.bf16 %v3077_v52, %v3076_v59  ;;  %v1428_v59 = vsel %vm4033_vm8, %v4077_v1, 0.0  ;;  %vm4929_vm14 = vmmov %vm4903_vm0  ;;  %v789_v52 = vsel %vm4037_vm9, %v4104_v8, 0.0 }
  0x4c   : > { %3471 = vmatprep.mubr.msk.f32.mxu1 %vm4926_vm13, %v1425_v37  ;;  %v3013_v37 = vld [vmem:[%s4829_s1 + $0x100] sm:$0xff]  ;;  %vm4930_vm15 = vmmov %vm4903_vm0 }
  0x4d   : > { %vm4931_vm13 = vmmov %vm4903_vm0 }
  0x4e   : > { %3392 = vmatmul.mubr.msk.f32.vlgmr.msra.gmra.mrb[0].mxu0 %vm4903_vm0, %v786_v47  ;;  %v3747_v47 = vpack.c.bf16 %v3071_v46, %v3070_v55  ;;  %v3016_v55 = vld [vmem:[%s4829_s1 + $0x118] sm:$0xff]  ;;  %v3072_v46 = vld [vmem:[%s4829_s1 + $0x190] sm:$0xff]  ;;  %vm5009_vm8 = vmmov %vm4903_vm0 }
  0x4f   : > { %3472 = vmatmul.mubr.msk.f32.vlgmr.msra.gmra.mrb[0].mxu1 %vm4927_vm12, %v1426_v17  ;;  %3710 = vmatpush3.bf16.msra.mxu0 %v3707_v2  ;;  %v1429_v2 = vsel %vm4041_vm10, %v4106_v9, 0.0  ;;  %vm4932_vm12 = vmmov %vm4903_vm0  ;;  %vm4935_vm10 = vnez %v4880_v24 }
  0x50   : > { %3742 = vmatpush3.bf16.msra.mxu1 %v3739_v4  ;;  %3394 = vmatprep.mubr.msk.f32.mxu0 %vm4928_vm11, %v787_v14  ;;  %v3715_v4 = vpack.c.bf16 %v3014_v54, %v3013_v37  ;;  %vm4933_vm11 = vnez %v4876_v20  ;;  %v791_v14 = vsel %vm4935_vm10, %v4152_v21, 0.0  ;;  %vm4941_vm10 = vnez %v4887_v36  ;;  %v3015_v54 = vld [vmem:[%s4829_s1 + $0x110] sm:$0xff]  ;;  %vm5012_vm9 = vmmov %vm4903_vm0  ;;  %v4722_v20 = vld [vmem:[%s4830_s2] ss:$0 sm:$0xff] }
  0x51   : > { %3474 = vmatprep.mubr.msk.f32.mxu1 %vm4929_vm14, %v1427_v41  ;;  %3712 = vmatprep.subr.bf16.mxu0 %v3711_v40  ;;  %v790_v41 = vsel %vm4933_vm11, %v4108_v10, 0.0  ;;  %vm4934_vm14 = vnez %v4878_v22  ;;  %vm4939_vm11 = vmmov %vm4903_vm0 }
  0x52   : > { %3744 = vmatprep.subr.bf16.mxu1 %v3743_v33  ;;  %3395 = vmatmul.mubr.msk.f32.gmra.mrb[2].mxu0 %vm4930_vm15, %v788_v58  ;;  %v1430_v17 = vsel %vm4934_vm14, %v4114_v12, 0.0  ;;  %vm4936_vm15 = vnez %v4882_v26  ;;  %vm4940_vm14 = vnez %v4884_v32  ;;  %v3073_v58 = vld [vmem:[%s4829_s1 + $0x198] sm:$0xff] }
  0x53   : > { %3475 = vmatmul.mubr.msk.f32.gmra.mrb[2].mxu1 %vm4931_vm13, %v1428_v59  ;;  %3397 = vmatprep.mubr.msk.f32.mxu0 %vm4903_vm0, %v789_v52  ;;  %v1431_v37 = vsel %vm4936_vm15, %v4158_v23, 0.0  ;;  %vm4937_vm13 = vmmov %vm4903_vm0  ;;  %v3719_v59 = vpack.c.bf16 %v3016_v55, %v3015_v54  ;;  %v3751_v52 = vpack.c.bf16 %v3073_v58, %v3072_v46 }
  0x54   : > { %3477 = vmatprep.mubr.msk.f32.mxu1 %vm4932_vm12, %v1429_v2  ;;  %3714 = vmatpush3.bf16.msra.mxu0 %v3711_v40  ;;  %vm4938_vm12 = vmmov %vm4903_vm0  ;;  %v792_v40 = vsel %vm4940_vm14, %v4164_v25, 0.0  ;;  %v3037_v2 = vld [vmem:[%s4829_s1 + $0x140] sm:$0xff] }
  0x55   : > { %3746 = vmatpush3.bf16.msra.mxu1 %v3743_v33  ;;  %3716 = vmatprep.subr.bf16.mxu0 %v3715_v4  ;;  %v1432_v33 = vsel %vm4941_vm10, %v4170_v27, 0.0  ;;  %vm4942_vm15 = vmmov %vm4903_vm0 }
  0x56   : > { %3748 = vmatprep.subr.bf16.mxu1 %v3747_v47  ;;  %3398 = vmatmul.mubr.msk.f32.gmra.mrb[4].mxu0 %vm4937_vm13, %v790_v41  ;;  %vm4943_vm13 = vmmov %vm4903_vm0  ;;  %v3038_v41 = vld [vmem:[%s4829_s1 + $0x148] sm:$0xff] }
  0x57   : > { %3478 = vmatmul.mubr.msk.f32.gmra.mrb[4].mxu1 %vm4903_vm0, %v1430_v17  ;;  %3400 = vmatprep.mubr.msk.f32.mxu0 %vm4938_vm12, %v791_v14  ;;  %vm4946_vm12 = vmmov %vm4903_vm0  ;;  %v3108_v17 = vld [vmem:[%s4829_s1 + $0x1f0] sm:$0xff]  ;;  %v3109_v14 = vld [vmem:[%s4829_s1 + $0x1f8] sm:$0xff] }
  0x58   : > { %3480 = vmatprep.mubr.msk.f32.mxu1 %vm4939_vm11, %v1431_v37  ;;  %vm4944_vm11 = vmmov %vm4903_vm0 }
  0x59   : > { %vm4951_vm10 = vmmov %vm4903_vm0 }
  0x5a   : > { %3401 = vmatmul.mubr.msk.f32.gmra.mrb[6].mxu0 %vm4942_vm15, %v792_v40  ;;  %vm4945_vm15 = vmmov %vm4903_vm0  ;;  %v3767_v40 = vpack.c.bf16 %v3109_v14, %v3108_v17 }
  0x5b   : > { %3481 = vmatmul.mubr.msk.f32.gmra.mrb[6].mxu1 %vm4943_vm13, %v1432_v33  ;;  %3491 = vmatprep.mubr.msk.f32.mxu0 %vm4944_vm11, %v4061_v60  ;;  %v3094_v60 = vld [vmem:[%s4829_s1 + $0x1c0] sm:$0xff]  ;;  %vm4947_vm13 = vmmov %vm4903_vm0  ;;  %v4992_v33 = vsel %vm4011_vm4, %v4077_v1, 0.0 }
  0x5c   : > { %3571 = vmatprep.mubr.msk.f32.mxu1 %vm4903_vm0, %v4066_v61  ;;  %v3095_v61 = vld [vmem:[%s4829_s1 + $0x1c8] sm:$0xff]  ;;  %vm4948_vm11 = vmmov %vm4903_vm0 }
  0x5d   : > { %vm4981_vm14 = vmmov %vm4903_vm0 }
  0x5e   : > { %3492 = vmatmul.mubr.msk.f32.vlgmr.msra.gmra.mrb[8].mxu0 %vm4945_vm15, %v4071_v62  ;;  %v3723_v62 = vpack.c.bf16 %v3038_v41, %v3037_v2  ;;  %vm4949_vm15 = vmmov %vm4903_vm0 }
  0x5f   : > { %3572 = vmatmul.mubr.msk.f32.vlgmr.msra.gmra.mrb[8].mxu1 %vm4946_vm12, %v4092_v5  ;;  %3718 = vmatpush3.bf16.msra.mxu0 %v3715_v4  ;;  %v3755_v5 = vpack.c.bf16 %v3095_v61, %v3094_v60  ;;  %vm4950_vm12 = vmmov %vm4903_vm0  ;;  %v4969_v4 = vld [vmem:[#allocation7_spill] sm:$0xff] }
  0x60   : > { %3750 = vmatpush3.bf16.msra.mxu1 %v3747_v47  ;;  %3494 = vmatprep.mubr.msk.f32.mxu0 %vm4947_vm13, %v4097_v6  ;;  %vm4952_vm13 = vmmov %vm4903_vm0  ;;  %v3039_v6 = vld [vmem:[%s4829_s1 + $0x150] sm:$0xff]  ;;  %v3052_v47 = vld [vmem:[%s4829_s1 + $0x178] sm:$0xff] }
  0x61   : > { %3574 = vmatprep.mubr.msk.f32.mxu1 %vm4948_vm11, %v4102_v7  ;;  %3720 = vmatprep.subr.bf16.mxu0 %v3719_v59  ;;  %vm4953_vm11 = vmmov %vm4903_vm0  ;;  %v3040_v7 = vld [vmem:[%s4829_s1 + $0x158] sm:$0xff] }
  0x62   : > { %3752 = vmatprep.subr.bf16.mxu1 %v3751_v52  ;;  %3495 = vmatmul.mubr.msk.f32.gmra.mrb[10].mxu0 %vm4903_vm0, %v4127_v15  ;;  %v3096_v15 = vld [vmem:[%s4829_s1 + $0x1d0] sm:$0xff]  ;;  %vm5001_vm4 = vmmov %vm4903_vm0 }
  0x63   : > { %3575 = vmatmul.mubr.msk.f32.gmra.mrb[10].mxu1 %vm4949_vm15, %v4132_v16  ;;  %3497 = vmatprep.mubr.msk.f32.mxu0 %vm4950_vm12, %v4141_v18  ;;  %vm4954_vm15 = vmmov %vm4903_vm0  ;;  %v3097_v16 = vld [vmem:[%s4829_s1 + $0x1d8] sm:$0xff]  ;;  %v3727_v18 = vpack.c.bf16 %v3040_v7, %v3039_v6 }
  0x64   : > { %3577 = vmatprep.mubr.msk.f32.mxu1 %vm4951_vm10, %v4146_v19  ;;  %3722 = vmatpush3.bf16.msra.mxu0 %v3719_v59  ;;  %vm4955_vm10 = vmmov %vm4903_vm0  ;;  %v3759_v19 = vpack.c.bf16 %v3097_v16, %v3096_v15 }
  0x65   : > { %3754 = vmatpush3.bf16.msra.mxu1 %v3751_v52  ;;  %3724 = vmatprep.subr.bf16.mxu0 %v3723_v62  ;;  %vm4956_vm12 = vmmov %vm4903_vm0 }
  0x66   : > { %3756 = vmatprep.subr.bf16.mxu1 %v3755_v5  ;;  %3498 = vmatmul.mubr.msk.f32.gmra.mrb[12].mxu0 %vm4952_vm13, %v4183_v30  ;;  %vm4957_vm13 = vmmov %vm4903_vm0  ;;  %v3049_v30 = vld [vmem:[%s4829_s1 + $0x160] sm:$0xff] }
  0x67   : > { %3578 = vmatmul.mubr.msk.f32.gmra.mrb[12].mxu1 %vm4953_vm11, %v4188_v31  ;;  %3500 = vmatprep.mubr.msk.f32.mxu0 %vm4903_vm0, %v4199_v34  ;;  %vm4958_vm11 = vmmov %vm4903_vm0  ;;  %v3050_v31 = vld [vmem:[%s4829_s1 + $0x168] sm:$0xff]  ;;  %v3106_v34 = vld [vmem:[%s4829_s1 + $0x1e0] sm:$0xff] }
  0x68   : > { %3580 = vmatprep.mubr.msk.f32.mxu1 %vm4954_vm15, %v4204_v35  ;;  %vm4959_vm15 = vmmov %vm4903_vm0  ;;  %v3107_v35 = vld [vmem:[%s4829_s1 + $0x1e8] sm:$0xff] }
  0x6a   : > { %3501 = vmatmul.mubr.msk.f32.gmra.mrb[14].mxu0 %vm4955_vm10, %v4219_v38  ;;  %vm4960_vm10 = vmmov %vm4903_vm0  ;;  %v3731_v38 = vpack.c.bf16 %v3050_v31, %v3049_v30 }
  0x6b   : > { %3581 = vmatmul.mubr.msk.f32.gmra.mrb[14].mxu1 %vm4956_vm12, %v4228_v39  ;;  %3511 = vmatprep.mubr.msk.f32.mxu0 %vm4957_vm13, %v4239_v53  ;;  %vm4961_vm12 = vmmov %vm4903_vm0  ;;  %v3763_v39 = vpack.c.bf16 %v3107_v35, %v3106_v34 }
  0x6c   : > { %3591 = vmatprep.mubr.msk.f32.mxu1 %vm4958_vm11, %v4239_v53  ;;  %vm4962_vm13 = vmmov %vm4903_vm0  ;;  %v3051_v53 = vld [vmem:[%s4829_s1 + $0x170] sm:$0xff] }
  0x6d   : > { %vm4963_vm11 = vmmov %vm4903_vm0  ;;  %v3735_v37 = vpack.c.bf16 %v3052_v47, %v3051_v53 }
  0x6e   : > { %3512 = vmatmul.mubr.msk.f32.vlgmr.msra.gmra.mrb[8].mxu0 %vm4903_vm0, %v4282_v3 }
  0x6f   : > { %3592 = vmatmul.mubr.msk.f32.vlgmr.msra.gmra.mrb[8].mxu1 %vm4959_vm15, %v4282_v3  ;;  %3726 = vmatpush3.bf16.msra.mxu0 %v3723_v62  ;;  %vm4964_vm15 = vmmov %vm4903_vm0 }
  0x70   : > { %3758 = vmatpush3.bf16.msra.mxu1 %v3755_v5  ;;  %3514 = vmatprep.mubr.msk.f32.mxu0 %vm4960_vm10, %v4296_v57  ;;  %vm4965_vm10 = vmmov %vm4903_vm0 }
  0x71   : > { %3594 = vmatprep.mubr.msk.f32.mxu1 %vm4961_vm12, %v4296_v57  ;;  %3728 = vmatprep.subr.bf16.mxu0 %v3727_v18  ;;  %vm4966_vm12 = vmmov %vm4903_vm0 }
  0x72   : > { %3760 = vmatprep.subr.bf16.mxu1 %v3759_v19  ;;  %3515 = vmatmul.mubr.msk.f32.gmra.mrb[10].mxu0 %vm4962_vm13, %v4314_v11  ;;  %vm4967_vm13 = vmmov %vm4903_vm0 }
  0x73   : > { %3595 = vmatmul.mubr.msk.f32.gmra.mrb[10].mxu1 %vm4963_vm11, %v4314_v11  ;;  %3517 = vmatprep.mubr.msk.f32.mxu0 %vm4903_vm0, %v4320_v13  ;;  %vm4968_vm11 = vmmov %vm4903_vm0 }
  0x74   : > { %3597 = vmatprep.mubr.msk.f32.mxu1 %vm4964_vm15, %v4320_v13  ;;  %3730 = vmatpush3.bf16.msra.mxu0 %v3727_v18  ;;  %vm4970_vm15 = vmmov %vm4903_vm0 }
  0x75   : > { %3762 = vmatpush3.bf16.msra.mxu1 %v3759_v19  ;;  %3732 = vmatprep.subr.bf16.mxu0 %v3731_v38 }
  0x76   : > { %3764 = vmatprep.subr.bf16.mxu1 %v3763_v39  ;;  %3518 = vmatmul.mubr.msk.f32.gmra.mrb[12].mxu0 %vm4965_vm10, %v4330_v28  ;;  %vm4971_vm10 = vmmov %vm4903_vm0 }
  0x77   : > { %3598 = vmatmul.mubr.msk.f32.gmra.mrb[12].mxu1 %vm4966_vm12, %v4330_v28  ;;  %3520 = vmatprep.mubr.msk.f32.mxu0 %vm4967_vm13, %v4332_v29  ;;  %vm4972_vm12 = vmmov %vm4903_vm0 }
  0x78   : > { %3600 = vmatprep.mubr.msk.f32.mxu1 %vm4968_vm11, %v4332_v29  ;;  %vm4973_vm13 = vmmov %vm4903_vm0 }
  0x79   : > { %vm4974_vm11 = vmmov %vm4903_vm0 }
  0x7a   : > { %3521 = vmatmul.mubr.msk.f32.gmra.mrb[14].mxu0 %vm4903_vm0, %v4969_v4 }
  0x7b   : > { %3601 = vmatmul.mubr.msk.f32.gmra.mrb[14].mxu1 %vm4970_vm15, %v4969_v4  ;;  %3531 = vmatprep.mubr.msk.f32.mxu0 %vm4971_vm10, %v4282_v3  ;;  %vm4975_vm15 = vmmov %vm4903_vm0 }
  0x7c   : > { %3611 = vmatprep.mubr.msk.f32.mxu1 %vm4972_vm12, %v4282_v3  ;;  %vm4976_vm10 = vmmov %vm4903_vm0 }
  0x7d   : > { %vm4977_vm12 = vmmov %vm4903_vm0 }
  0x7e   : > { %3532 = vmatmul.mubr.msk.f32.vlgmr.msra.gmra.mrb[8].mxu0 %vm4973_vm13, %v4296_v57  ;;  %vm4978_vm13 = vmmov %vm4903_vm0 }
  0x7f   : > { %3612 = vmatmul.mubr.msk.f32.vlgmr.msra.gmra.mrb[8].mxu1 %vm4974_vm11, %v4296_v57  ;;  %3734 = vmatpush3.bf16.msra.mxu0 %v3731_v38  ;;  %vm4979_vm11 = vmmov %vm4903_vm0  ;;  %v1898_v57 = vld [vmem:[#allocation2 + $0x49] sm:$0xff] }
  0x80   : > { %3766 = vmatpush3.bf16.msra.mxu1 %v3763_v39  ;;  %3534 = vmatprep.mubr.msk.f32.mxu0 %vm4903_vm0, %v4314_v11 }
  0x81   : > { %3614 = vmatprep.mubr.msk.f32.mxu1 %vm4975_vm15, %v4314_v11  ;;  %3736 = vmatprep.subr.bf16.mxu0 %v3735_v37  ;;  %vm4980_vm15 = vmmov %vm4903_vm0  ;;  %v4986_v11 = vsel %vm3999_vm1, %v4055_v56, 0.0  ;;  %v4994_v56 = vsel %vm4015_vm5, %v4104_v8, 0.0  ;;  %v5018_v8 = vld [vmem:[#allocation6_spill] sm:$0xff] }
  0x82   : > { %3768 = vmatprep.subr.bf16.mxu1 %v3767_v40  ;;  %3535 = vmatmul.mubr.msk.f32.gmra.mrb[10].mxu0 %vm4976_vm10, %v4320_v13  ;;  %vm4982_vm10 = vmmov %vm4903_vm0 }
  0x83   : > { %3615 = vmatmul.mubr.msk.f32.gmra.mrb[10].mxu1 %vm4977_vm12, %v4320_v13  ;;  %3537 = vmatprep.mubr.msk.f32.mxu0 %vm4978_vm13, %v4330_v28  ;;  %vm4983_vm12 = vmmov %vm4903_vm0 }
  0x84   : > { %3617 = vmatprep.mubr.msk.f32.mxu1 %vm4979_vm11, %v4330_v28  ;;  %3738 = vmatpush3.bf16.msra.mxu0 %v3735_v37  ;;  %vm4984_vm13 = vmmov %vm4903_vm0  ;;  %v4989_v28 = vsel %vm4003_vm2, %v4073_v63, 0.0  ;;  %v2048_v63 = vld [vmem:[#allocation2 + $0x48] sm:$0xff] }
  0x85   : > { %3770 = vmatpush3.bf16.msra.mxu1 %v3767_v40  ;;  %vm4987_vm11 = vmmov %vm4903_vm0 }
  0x86   : > { %3538 = vmatmul.mubr.msk.f32.gmra.mrb[12].mxu0 %vm4903_vm0, %v4332_v29  ;;  %vm4995_vm1 = vmmov %vm4903_vm0 }
  0x87   : > { %3618 = vmatmul.mubr.msk.f32.gmra.mrb[12].mxu1 %vm4980_vm15, %v4332_v29  ;;  %3540 = vmatprep.mubr.msk.f32.mxu0 %vm4981_vm14, %v4969_v4  ;;  %v4990_v29 = vsel %vm4007_vm3, %v4075_v0, 0.0  ;;  %vm4991_vm14 = vmmov %vm4903_vm0  ;;  %v2672_v0 = vld [vmem:[#allocation2 + $0x4a] sm:$0xff] }
  0x88   : > { %3620 = vmatprep.mubr.msk.f32.mxu1 %vm4982_vm10, %v4969_v4  ;;  %vm4993_vm15 = vmmov %vm4903_vm0 }
  0x89   : > { %vm4997_vm2 = vmmov %vm4903_vm0 }
  0x8a   : > { %3541 = vmatmul.mubr.msk.f32.gmra.mrb[14].mxu0 %vm4983_vm12, %v1898_v57  ;;  %vm4999_vm3 = vmmov %vm4903_vm0  ;;  %vm5010_vm12 = vnez %v4878_v22 }
  0x8b   : > { %3621 = vmatmul.mubr.msk.f32.gmra.mrb[14].mxu1 %vm4984_vm13, %v1898_v57  ;;  %3551 = vmatprep.mubr.msk.f32.mxu0 %vm4987_vm11, %v4986_v11  ;;  %vm5003_vm5 = vmmov %vm4903_vm0  ;;  %v5011_v50 = vsel %vm5010_vm12, %v4170_v27, 0.0  ;;  %vm5013_vm13 = vnez %v4880_v24 }
  0x8c   : > { %3631 = vmatprep.mubr.msk.f32.mxu1 %vm4903_vm0, %v4989_v28  ;;  %vm5006_vm10 = vmmov %vm4903_vm0  ;;  %v5015_v1 = vsel %vm5013_vm13, %v5014_v51, 0.0 }
  0x8d   : > { %vm5016_vm11 = vmmov %vm4903_vm0  ;;  %vm5017_vm0 = vnez %v4882_v26 }
  0x8e   : > { %3552 = vmatmul.mubr.msk.f32.vlgmr.msra.gmra.mrb[8].mxu0 %vm4991_vm14, %v4990_v29  ;;  %v5019_v9 = vsel %vm5017_vm0, %v5018_v8, 0.0  ;;  %vm5020_vm14 = vmmov %vm4995_vm1 }
  0x8f   : > { %3632 = vmatmul.mubr.msk.f32.vlgmr.msra.gmra.mrb[8].mxu1 %vm4993_vm15, %v4992_v33  ;;  %3554 = vmatprep.mubr.msk.f32.mxu0 %vm4995_vm1, %v4994_v56  ;;  %vm5021_vm15 = vnez %v4884_v32  ;;  %vm5022_vm1 = vnez %v4887_v36 }
  0x90   : > { %3634 = vmatprep.mubr.msk.f32.mxu1 %vm4997_vm2, %v4996_v42  ;;  %v2056_v10 = vsel %vm5021_vm15, %v2048_v63, 0.0  ;;  %v2680_v12 = vsel %vm5022_vm1, %v2672_v0, 0.0 }
  0x92   : > { %3555 = vmatmul.mubr.msk.f32.gmra.mrb[10].mxu0 %vm4999_vm3, %v4998_v43  ;;  %vm5023_vm3 = vmmov %vm4997_vm2 }
  0x93   : > { %3635 = vmatmul.mubr.msk.f32.gmra.mrb[10].mxu1 %vm5001_vm4, %v5000_v44  ;;  %3557 = vmatprep.mubr.msk.f32.mxu0 %vm5003_vm5, %v5002_v45  ;;  %vm950_vm4 = vcmask 130048  }
  0x94   : > { %3637 = vmatprep.mubr.msk.f32.mxu1 %vm5006_vm10, %v5005_v48 }
  0x96   : > { %3558 = vmatmul.mubr.msk.f32.gmra.mrb[12].mxu0 %vm5009_vm8, %v5008_v49 }
  0x97   : > { %3638 = vmatmul.mubr.msk.f32.gmra.mrb[12].mxu1 %vm5012_vm9, %v5011_v50  ;;  %3560 = vmatprep.mubr.msk.f32.mxu0 %vm5016_vm11, %v5015_v1 }
  0x98   : > { %3640 = vmatprep.mubr.msk.f32.mxu1 %vm5020_vm14, %v5019_v9 }
  0x9a   : > { %3561 = vmatmul.mubr.msk.f32.gmra.mrb[14].mxu0 %vm4997_vm2, %v2056_v10 }
  0x9b   : > { %3641 = vmatmul.mubr.msk.f32.gmra.mrb[14].mxu1 %vm5023_vm3, %v2680_v12 }
 0x121   : > { %v3393_v21 = vpop.f32.mrb[0].mxu0 }
 0x122   : > { %v3473_v22 = vpop.f32.mrb[0].mxu1  ;;  %v943_v23 = vadd.f32 %v3393_v21, %v4722_v20  ;;  %v888_v25 = vpop.f32.mrb[1].mxu0 }
 0x123   : > { %v1583_v24 = vadd.f32 %v3473_v22, %v4722_v20  ;;  %v1528_v26 = vpop.f32.mrb[1].mxu1  ;;  %v942_v27 = vadd.f32 %v4722_v20, %v888_v25 }
 0x124   : > { %v1582_v32 = vadd.f32 %v4722_v20, %v1528_v26  ;;  %952 = vst.msk [vmem:[%s4727_s27 + $0x8] sm:$0xff] %vm950_vm4, %v943_v23 }
 0x125   : > { %3006 = vst.msk [vmem:[%s4727_s27 + $0x48] sm:$0xff] %vm950_vm4, %v1583_v24  ;;  %951 = vst.msk [vmem:[%s4727_s27] sm:$0xff] %vm950_vm4, %v942_v27  ;;  %v3396_v36 = vpop.f32.mrb[2].mxu0 }
 0x126   : > { %3005 = vst.msk [vmem:[%s4727_s27 + $0x40] sm:$0xff] %vm950_vm4, %v1582_v32  ;;  %v3476_v54 = vpop.f32.mrb[2].mxu1  ;;  %v945_v55 = vadd.f32 %v3396_v36, %v4722_v20  ;;  %v898_v58 = vpop.f32.mrb[3].mxu0 }
 0x127   : > { %v1585_v46 = vadd.f32 %v3476_v54, %v4722_v20  ;;  %v1538_v59 = vpop.f32.mrb[3].mxu1  ;;  %v944_v52 = vadd.f32 %v4722_v20, %v898_v58 }
 0x128   : > { %v1584_v2 = vadd.f32 %v4722_v20, %v1538_v59  ;;  %954 = vst.msk [vmem:[%s4727_s27 + $0x18] sm:$0xff] %vm950_vm4, %v945_v55 }
 0x129   : > { %3008 = vst.msk [vmem:[%s4727_s27 + $0x58] sm:$0xff] %vm950_vm4, %v1585_v46  ;;  %953 = vst.msk [vmem:[%s4727_s27 + $0x10] sm:$0xff] %vm950_vm4, %v944_v52  ;;  %v3399_v41 = vpop.f32.mrb[4].mxu0 }
 0x12a   : > { %3007 = vst.msk [vmem:[%s4727_s27 + $0x50] sm:$0xff] %vm950_vm4, %v1584_v2  ;;  %v3479_v60 = vpop.f32.mrb[4].mxu1  ;;  %v947_v61 = vadd.f32 %v3399_v41, %v4722_v20  ;;  %v908_v5 = vpop.f32.mrb[5].mxu0 }
 0x12b   : > { %v1587_v62 = vadd.f32 %v3479_v60, %v4722_v20  ;;  %v1548_v6 = vpop.f32.mrb[5].mxu1  ;;  %v946_v7 = vadd.f32 %v4722_v20, %v908_v5 }
 0x12c   : > { %v1586_v15 = vadd.f32 %v4722_v20, %v1548_v6  ;;  %956 = vst.msk [vmem:[%s4727_s27 + $0x28] sm:$0xff] %vm950_vm4, %v947_v61 }
 0x12d   : > { %3010 = vst.msk [vmem:[%s4727_s27 + $0x68] sm:$0xff] %vm950_vm4, %v1587_v62  ;;  %955 = vst.msk [vmem:[%s4727_s27 + $0x20] sm:$0xff] %vm950_vm4, %v946_v7  ;;  %v3402_v16 = vpop.f32.mrb[6].mxu0 }
 0x12e   : > { %3009 = vst.msk [vmem:[%s4727_s27 + $0x60] sm:$0xff] %vm950_vm4, %v1586_v15  ;;  %v3482_v18 = vpop.f32.mrb[6].mxu1  ;;  %v949_v19 = vadd.f32 %v3402_v16, %v4722_v20  ;;  %v918_v31 = vpop.f32.mrb[7].mxu0 }
 0x12f   : > { %v1589_v30 = vadd.f32 %v3482_v18, %v4722_v20  ;;  %v1558_v34 = vpop.f32.mrb[7].mxu1  ;;  %v948_v35 = vadd.f32 %v4722_v20, %v918_v31 }
 0x130   : > { %v1588_v38 = vadd.f32 %v4722_v20, %v1558_v34  ;;  %958 = vst.msk [vmem:[%s4727_s27 + $0x38] sm:$0xff] %vm950_vm4, %v949_v19 }
 0x131   : > { %3012 = vst.msk [vmem:[%s4727_s27 + $0x78] sm:$0xff] %vm950_vm4, %v1589_v30  ;;  %957 = vst.msk [vmem:[%s4727_s27 + $0x30] sm:$0xff] %vm950_vm4, %v948_v35 }
 0x132   : > { %3011 = vst.msk [vmem:[%s4727_s27 + $0x70] sm:$0xff] %vm950_vm4, %v1588_v38 }
 0x161   : > { %v3553_v39 = vpop.f32.mrb[8].mxu0 }
 0x162   : > { %v3633_v53 = vpop.f32.mrb[8].mxu1  ;;  %v2207_v4 = vadd.f32 %v3553_v39, %v4722_v20  ;;  %v2152_v17 = vpop.f32.mrb[9].mxu0 }
 0x163   : > { %v2831_v47 = vadd.f32 %v3633_v53, %v4722_v20  ;;  %v2776_v14 = vpop.f32.mrb[9].mxu1  ;;  %v2206_v37 = vadd.f32 %v4722_v20, %v2152_v17 }
 0x164   : > { %v2830_v40 = vadd.f32 %v4722_v20, %v2776_v14  ;;  %3063 = vst.msk [vmem:[%s4727_s27 + $0x88] sm:$0xff] %vm950_vm4, %v2207_v4 }
 0x165   : > { %3120 = vst.msk [vmem:[%s4727_s27 + $0xc8] sm:$0xff] %vm950_vm4, %v2831_v47  ;;  %3062 = vst.msk [vmem:[%s4727_s27 + $0x80] sm:$0xff] %vm950_vm4, %v2206_v37  ;;  %v3556_v57 = vpop.f32.mrb[10].mxu0 }
 0x166   : > { %3119 = vst.msk [vmem:[%s4727_s27 + $0xc0] sm:$0xff] %vm950_vm4, %v2830_v40  ;;  %v3636_v3 = vpop.f32.mrb[10].mxu1  ;;  %v2209_v11 = vadd.f32 %v3556_v57, %v4722_v20  ;;  %v2162_v28 = vpop.f32.mrb[11].mxu0 }
 0x167   : > { %v2833_v13 = vadd.f32 %v3636_v3, %v4722_v20  ;;  %v2786_v29 = vpop.f32.mrb[11].mxu1  ;;  %v2208_v33 = vadd.f32 %v4722_v20, %v2162_v28 }
 0x168   : > { %v2832_v56 = vadd.f32 %v4722_v20, %v2786_v29  ;;  %3065 = vst.msk [vmem:[%s4727_s27 + $0x98] sm:$0xff] %vm950_vm4, %v2209_v11 }
 0x169   : > { %3122 = vst.msk [vmem:[%s4727_s27 + $0xd8] sm:$0xff] %vm950_vm4, %v2833_v13  ;;  %3064 = vst.msk [vmem:[%s4727_s27 + $0x90] sm:$0xff] %vm950_vm4, %v2208_v33  ;;  %v3559_v42 = vpop.f32.mrb[12].mxu0 }
 0x16a   : > { %3121 = vst.msk [vmem:[%s4727_s27 + $0xd0] sm:$0xff] %vm950_vm4, %v2832_v56  ;;  %v3639_v43 = vpop.f32.mrb[12].mxu1  ;;  %v2211_v44 = vadd.f32 %v3559_v42, %v4722_v20  ;;  %v2172_v48 = vpop.f32.mrb[13].mxu0 }
 0x16b   : > { %v2835_v45 = vadd.f32 %v3639_v43, %v4722_v20  ;;  %v2796_v63 = vpop.f32.mrb[13].mxu1  ;;  %v2210_v0 = vadd.f32 %v4722_v20, %v2172_v48 }
 0x16c   : > { %v2834_v49 = vadd.f32 %v4722_v20, %v2796_v63  ;;  %3067 = vst.msk [vmem:[%s4727_s27 + $0xa8] sm:$0xff] %vm950_vm4, %v2211_v44 }
 0x16d   : > { %3124 = vst.msk [vmem:[%s4727_s27 + $0xe8] sm:$0xff] %vm950_vm4, %v2835_v45  ;;  %3066 = vst.msk [vmem:[%s4727_s27 + $0xa0] sm:$0xff] %vm950_vm4, %v2210_v0  ;;  %v3562_v50 = vpop.f32.mrb[14].mxu0 }
 0x16e   : > { %3123 = vst.msk [vmem:[%s4727_s27 + $0xe0] sm:$0xff] %vm950_vm4, %v2834_v49  ;;  %v3642_v51 = vpop.f32.mrb[14].mxu1  ;;  %v2213_v1 = vadd.f32 %v3562_v50, %v4722_v20  ;;  %v2182_v9 = vpop.f32.mrb[15].mxu0 }
 0x16f   : > { %v2837_v8 = vadd.f32 %v3642_v51, %v4722_v20  ;;  %v2806_v10 = vpop.f32.mrb[15].mxu1  ;;  %v2212_v12 = vadd.f32 %v4722_v20, %v2182_v9 }
 0x170   : > { %v2836_v21 = vadd.f32 %v4722_v20, %v2806_v10  ;;  %3069 = vst.msk [vmem:[%s4727_s27 + $0xb8] sm:$0xff] %vm950_vm4, %v2213_v1 }
 0x171   : > { %3126 = vst.msk [vmem:[%s4727_s27 + $0xf8] sm:$0xff] %vm950_vm4, %v2837_v8  ;;  %3068 = vst.msk [vmem:[%s4727_s27 + $0xb0] sm:$0xff] %vm950_vm4, %v2212_v12 }
 0x172   : > { %3125 = vst.msk [vmem:[%s4727_s27 + $0xf0] sm:$0xff] %vm950_vm4, %v2836_v21 }
 0x173 PF: > { %s13_s12 = sadd.s32 1, %s3882_s12  }
 0x174   : > { %p10_p4 = scmp.ge.s32.totalorder %s13_s12, 4  }
 0x176   :  { %12 = sbr.rel (!%p10_p4) target bundleno = 1 (0x1), region = 80 }

// kernel: unet_up_origin_forward.5
= control target key start
LH: loop header
LB: loop body
LE: loop exit
PB: predicated region body
PF: predicated region fallthrough
CT: control target
= control target key end

     0   :  { %s6083_s12 = smov 0   ;;  %s7455_s0 = inlined_call_operand.vmem [shape: f32[2,256,16], index: 0, kind: input, shape index: {}]   ;;  %s7456_s1 = inlined_call_operand.vmem [shape: f32[9,16,16], index: 1, kind: input, shape index: {}]   ;;  %s7457_s2 = inlined_call_operand.vmem [shape: f32[1,16], index: 2, kind: input, shape index: {}]   ;;  %s7458_s3 = inlined_call_operand.vmem [shape: f32[2,256,16], index: 3, kind: output, shape index: {}]  }
   0x1 LB: > { %s4659_s13 = sadd.s32 4294967295, %s6060_s12   ;;  %p4663_p0 = scmp.ge.s32.totalorder %s6060_s12, 1  ;;  %s6060_s12 = sphi %s6083_s12, %s13_s12  }
   0x2   : > { %p137_p1 = scmp.lt.s32.totalorder %s6060_s12, 3 }
   0x4   : > { %p138_p2 = pnand %p4663_p0, %p137_p1 }
   0x6   : > { %141 = sbr.rel (%p138_p2) target bundleno = 545 (0x221), region = 32 }
   0xd   : > { %v4668_v0 = vld [vmem:[%s7456_s1 + $0x10] sm:$0xff]  ;;  %v4669_v1 = vld [vmem:[%s7456_s1 + $0x18] sm:$0xff]  ;;  %vm7459_vm0 = vcmask 130048   ;;  %v4802_v2 = vld [vmem:[%s7456_s1 + $0x40] sm:$0xff]  ;;  %p6102_p3 = scmp.lt.s32.totalorder %s4659_s13, 1  ;;  %v6062_v4 = vmov 0.0   ;;  %v171_v56 = vlaneseq }
   0xe   : > { %v5751_v3 = vpack.c.bf16 %v4669_v1, %v4668_v0  ;;  %653 = vst.msk [vmem:[#allocation2] sm:$0xff] %vm7459_vm0, %v6062_v4  ;;  %654 = vst.msk [vmem:[#allocation2 + $0x8] sm:$0xff] %vm7459_vm0, %v6062_v4  ;;  %v4803_v5 = vld [vmem:[%s7456_s1 + $0x48] sm:$0xff]  ;;  %v882_v6 = vld [vmem:[%s7456_s1] sm:$0xff] }
   0xf   : > { %655 = vst.msk [vmem:[#allocation2 + $0x10] sm:$0xff] %vm7459_vm0, %v6062_v4  ;;  %656 = vst.msk [vmem:[#allocation2 + $0x18] sm:$0xff] %vm7459_vm0, %v6062_v4  ;;  %v883_v7 = vld [vmem:[%s7456_s1 + $0x8] sm:$0xff]  ;;  %v6152_v8 = vpack.c.bf16 %v4803_v5, %v4802_v2  ;;  %s7994_s13 = smov (!%p6102_p3, %s4659_s13), 1  ;;  %v4836_v10 = vld [vmem:[%s7456_s1 + $0x50] sm:$0xff]  ;;  %v6278_v63 = vshrl.u32 %v171_v56, 7 }
  0x10   : > { %657 = vst.msk [vmem:[#allocation2 + $0x20] sm:$0xff] %vm7459_vm0, %v6062_v4  ;;  %658 = vst.msk [vmem:[#allocation2 + $0x28] sm:$0xff] %vm7459_vm0, %v6062_v4  ;;  %v5755_v9 = vpack.c.bf16 %v883_v7, %v882_v6  ;;  %v4837_v11 = vld [vmem:[%s7456_s1 + $0x58] sm:$0xff]  ;;  %5752 = vmatprep.subr.bf16.mxu1 %v5751_v3  ;;  %s4975_s4 = sshll.u32 %s7994_s13, 8  ;;  %v4734_v13 = vld [vmem:[%s7456_s1 + $0x20] sm:$0xff] }
  0x11   : > { %659 = vst.msk [vmem:[#allocation2 + $0x30] sm:$0xff] %vm7459_vm0, %v6062_v4  ;;  %660 = vst.msk [vmem:[#allocation2 + $0x38] sm:$0xff] %vm7459_vm0, %v6062_v4  ;;  %v6166_v12 = vpack.c.bf16 %v4837_v11, %v4836_v10  ;;  %5754 = vmatpush3.bf16.msra.mxu1 %v5751_v3  ;;  %5768 = vmatprep.subr.bf16.mxu0 %v6152_v8  ;;  %s6176_s7 = scalar_lea.vmem %s7455_s0, %s4975_s4  ;;  %v4735_v14 = vld [vmem:[%s7456_s1 + $0x28] sm:$0xff]  ;;  %v4870_v28 = vld [vmem:[%s7456_s1 + $0x60] sm:$0xff]  ;;  %v173_v2 = vadd.s32 8, %v6278_v63  ;;  %v175_v6 = vadd.s32 24, %v6278_v63  ;;  %s7351_s8 = scalar_lea.vmem %s7458_s3, %s4975_s4 }
  0x12   : > { %661 = vst.msk [vmem:[#allocation2 + $0x40] sm:$0xff] %vm7459_vm0, %v6062_v4  ;;  %662 = vst.msk [vmem:[#allocation2 + $0x48] sm:$0xff] %vm7459_vm0, %v6062_v4  ;;  %5770 = vmatpush3.bf16.msra.mxu0 %v6152_v8  ;;  %5756 = vmatprep.subr.bf16.mxu1 %v5755_v9  ;;  %v690_v15 = vld [vmem:[%s6176_s7] sm:$0xff]  ;;  %v691_v16 = vld [vmem:[%s6176_s7 + $0x8] sm:$0xff]  ;;  %v6198_v24 = vpack.c.bf16 %v4735_v14, %v4734_v13 }
  0x13   : > { %663 = vst.msk [vmem:[#allocation2 + $0x50] sm:$0xff] %vm7459_vm0, %v6062_v4  ;;  %664 = vst.msk [vmem:[#allocation2 + $0x58] sm:$0xff] %vm7459_vm0, %v6062_v4  ;;  %5772 = vmatprep.subr.bf16.mxu0 %v6166_v12  ;;  %v692_v17 = vld [vmem:[%s6176_s7 + $0x10] sm:$0xff]  ;;  %v693_v18 = vld [vmem:[%s6176_s7 + $0x18] sm:$0xff]  ;;  %v215_v5 = vand.u32 15, %v173_v2  ;;  %v229_v14 = vand.u32 15, %v175_v6 }
  0x14   : > { %665 = vst.msk [vmem:[#allocation2 + $0x60] sm:$0xff] %vm7459_vm0, %v6062_v4  ;;  %666 = vst.msk [vmem:[#allocation2 + $0x68] sm:$0xff] %vm7459_vm0, %v6062_v4  ;;  %v694_v19 = vld [vmem:[%s6176_s7 + $0x20] sm:$0xff]  ;;  %v695_v20 = vld [vmem:[%s6176_s7 + $0x28] sm:$0xff] }
  0x15   : > { %667 = vst.msk [vmem:[#allocation2 + $0x70] sm:$0xff] %vm7459_vm0, %v6062_v4  ;;  %668 = vst.msk [vmem:[#allocation2 + $0x78] sm:$0xff] %vm7459_vm0, %v6062_v4  ;;  %v884_v21 = vld [vmem:[#allocation2 + $0x1] sm:$0xff]  ;;  %v696_v23 = vld [vmem:[%s6176_s7 + $0x30] sm:$0xff]  ;;  %vm6297_vm1 = vcmp.le.s32.totalorder %v215_v5, 14  ;;  %vm6321_vm2 = vcmp.le.s32.totalorder %v229_v14, 14 }
  0x16   : > { %669 = vst.msk [vmem:[#allocation2 + $0x80] sm:$0xff] %vm7459_vm0, %v6062_v4  ;;  %670 = vst.msk [vmem:[#allocation2 + $0x88] sm:$0xff] %vm7459_vm0, %v6062_v4  ;;  %v885_v22 = vld [vmem:[#allocation2 + $0x9] sm:$0xff]  ;;  %5287 = vmatprep.mubr.msk.f32.mxu1 %vm7459_vm0, %v884_v21  ;;  %v697_v25 = vld [vmem:[%s6176_s7 + $0x38] sm:$0xff] }
  0x17   : > { %671 = vst.msk [vmem:[#allocation2 + $0x90] sm:$0xff] %vm7459_vm0, %v6062_v4  ;;  %672 = vst.msk [vmem:[#allocation2 + $0x98] sm:$0xff] %vm7459_vm0, %v6062_v4  ;;  %v698_v26 = vld [vmem:[%s6176_s7 + $0x40] sm:$0xff]  ;;  %v699_v27 = vld [vmem:[%s6176_s7 + $0x48] sm:$0xff]  ;;  %5288 = vmatmul.mubr.msk.f32.vlgmr.msra.gmra.mrb[0].mxu1 %vm7459_vm0, %v885_v22  ;;  %v7565_v22 = vmov 0 }
  0x18   : > { %673 = vst.msk [vmem:[#allocation2 + $0xa0] sm:$0xff] %vm7459_vm0, %v6062_v4  ;;  %674 = vst.msk [vmem:[#allocation2 + $0xa8] sm:$0xff] %vm7459_vm0, %v6062_v4  ;;  %v4871_v29 = vld [vmem:[%s7456_s1 + $0x68] sm:$0xff]  ;;  %v700_v30 = vld [vmem:[%s6176_s7 + $0x50] sm:$0xff]  ;;  %5758 = vmatpush3.bf16.msra.mxu1 %v5755_v9  ;;  %v7566_v22 = vsel %vm6321_vm2, 4294967295, %v7565_v22 }
  0x19   : > { %675 = vst.msk [vmem:[#allocation2 + $0xb0] sm:$0xff] %vm7459_vm0, %v6062_v4  ;;  %676 = vst.msk [vmem:[#allocation2 + $0xb8] sm:$0xff] %vm7459_vm0, %v6062_v4  ;;  %v701_v31 = vld [vmem:[%s6176_s7 + $0x58] sm:$0xff]  ;;  %v702_v32 = vld [vmem:[%s6176_s7 + $0x60] sm:$0xff]  ;;  %5760 = vmatprep.subr.bf16.mxu1 %v6198_v24  ;;  %v6237_v45 = vpack.c.bf16 %v4871_v29, %v4870_v28 }
  0x1a   : > { %677 = vst.msk [vmem:[#allocation2 + $0xc0] sm:$0xff] %vm7459_vm0, %v6062_v4  ;;  %678 = vst.msk [vmem:[#allocation2 + $0xc8] sm:$0xff] %vm7459_vm0, %v6062_v4  ;;  %v703_v33 = vld [vmem:[%s6176_s7 + $0x68] sm:$0xff]  ;;  %v704_v34 = vld [vmem:[%s6176_s7 + $0x70] sm:$0xff] }
  0x1b   : > { %679 = vst.msk [vmem:[#allocation2 + $0xd0] sm:$0xff] %vm7459_vm0, %v6062_v4  ;;  %680 = vst.msk [vmem:[#allocation2 + $0xd8] sm:$0xff] %vm7459_vm0, %v6062_v4  ;;  %v705_v35 = vld [vmem:[%s6176_s7 + $0x78] sm:$0xff]  ;;  %v706_v36 = vld [vmem:[%s6176_s7 + $0x80] sm:$0xff] }
  0x1c   : > { %681 = vst.msk [vmem:[#allocation2 + $0xe0] sm:$0xff] %vm7459_vm0, %v6062_v4  ;;  %682 = vst.msk [vmem:[#allocation2 + $0xe8] sm:$0xff] %vm7459_vm0, %v6062_v4  ;;  %v707_v37 = vld [vmem:[%s6176_s7 + $0x88] sm:$0xff]  ;;  %v708_v38 = vld [vmem:[%s6176_s7 + $0x90] sm:$0xff] }
  0x1d   : > { %683 = vst.msk [vmem:[#allocation2 + $0xf0] sm:$0xff] %vm7459_vm0, %v6062_v4  ;;  %684 = vst.msk [vmem:[#allocation2 + $0xf8] sm:$0xff] %vm7459_vm0, %v6062_v4  ;;  %v709_v39 = vld [vmem:[%s6176_s7 + $0x98] sm:$0xff]  ;;  %v710_v40 = vld [vmem:[%s6176_s7 + $0xa0] sm:$0xff] }
  0x1e   : > { %685 = vst.msk [vmem:[#allocation2 + $0x100] sm:$0xff] %vm7459_vm0, %v6062_v4  ;;  %686 = vst.msk [vmem:[#allocation2 + $0x108] sm:$0xff] %vm7459_vm0, %v6062_v4  ;;  %v711_v41 = vld [vmem:[%s6176_s7 + $0xa8] sm:$0xff]  ;;  %v712_v50 = vld [vmem:[%s6176_s7 + $0xb0] sm:$0xff] }
  0x1f   : > { %687 = vst.msk [vmem:[#allocation2 + $0x110] sm:$0xff] %vm7459_vm0, %v6062_v4  ;;  %688 = vst.msk [vmem:[#allocation2 + $0x118] sm:$0xff] %vm7459_vm0, %v6062_v4  ;;  %v713_v51 = vld [vmem:[%s6176_s7 + $0xb8] sm:$0xff]  ;;  %v714_v52 = vld [vmem:[%s6176_s7 + $0xc0] sm:$0xff] }
  0x20   : > { %689 = vst.msk [vmem:[#allocation2 + $0x120] sm:$0xff] %vm7459_vm0, %v6062_v4  ;;  %722 = vst.msk [vmem:[#allocation2 + $0x11] sm:$0xff] %vm7459_vm0, %v690_v15  ;;  %v715_v54 = vld [vmem:[%s6176_s7 + $0xc8] sm:$0xff]  ;;  %v716_v57 = vld [vmem:[%s6176_s7 + $0xd0] sm:$0xff]  ;;  %v177_v15 = vadd.s32 40, %v6278_v63 }
  0x21   : > { %723 = vst.msk [vmem:[#allocation2 + $0x19] sm:$0xff] %vm7459_vm0, %v691_v16  ;;  %724 = vst.msk [vmem:[#allocation2 + $0x21] sm:$0xff] %vm7459_vm0, %v692_v17  ;;  %v717_v58 = vld [vmem:[%s6176_s7 + $0xd8] sm:$0xff]  ;;  %v718_v59 = vld [vmem:[%s6176_s7 + $0xe0] sm:$0xff] }
  0x22   : > { %725 = vst.msk [vmem:[#allocation2 + $0x29] sm:$0xff] %vm7459_vm0, %v693_v18  ;;  %726 = vst.msk [vmem:[#allocation2 + $0x31] sm:$0xff] %vm7459_vm0, %v694_v19  ;;  %v719_v60 = vld [vmem:[%s6176_s7 + $0xe8] sm:$0xff]  ;;  %v720_v10 = vld [vmem:[%s6176_s7 + $0xf0] sm:$0xff] }
  0x23   : > { %727 = vst.msk [vmem:[#allocation2 + $0x39] sm:$0xff] %vm7459_vm0, %v695_v20  ;;  %728 = vst.msk [vmem:[#allocation2 + $0x41] sm:$0xff] %vm7459_vm0, %v696_v23  ;;  %v721_v16 = vld [vmem:[%s6176_s7 + $0xf8] sm:$0xff]  ;;  %v4904_v17 = vld [vmem:[%s7456_s1 + $0x70] sm:$0xff] }
  0x24   : > { %729 = vst.msk [vmem:[#allocation2 + $0x49] sm:$0xff] %vm7459_vm0, %v697_v25  ;;  %730 = vst.msk [vmem:[#allocation2 + $0x51] sm:$0xff] %vm7459_vm0, %v698_v26  ;;  %v4905_v18 = vld [vmem:[%s7456_s1 + $0x78] sm:$0xff]  ;;  %v243_v25 = vand.u32 15, %v177_v15  ;;  %v179_v26 = vadd.s32 56, %v6278_v63  ;;  %v176_v15 = vadd.s32 32, %v6278_v63 }
  0x25   : > { %731 = vst.msk [vmem:[#allocation2 + $0x59] sm:$0xff] %vm7459_vm0, %v699_v27  ;;  %732 = vst.msk [vmem:[#allocation2 + $0x61] sm:$0xff] %vm7459_vm0, %v700_v30  ;;  %v6328_v27 = vpack.c.bf16 %v4905_v18, %v4904_v17 }
  0x26   : > { %733 = vst.msk [vmem:[#allocation2 + $0x69] sm:$0xff] %vm7459_vm0, %v701_v31  ;;  %734 = vst.msk [vmem:[#allocation2 + $0x71] sm:$0xff] %vm7459_vm0, %v702_v32  ;;  %vm6345_vm3 = vcmp.le.s32.totalorder %v243_v25, 14 }
  0x27   : > { %735 = vst.msk [vmem:[#allocation2 + $0x79] sm:$0xff] %vm7459_vm0, %v703_v33  ;;  %736 = vst.msk [vmem:[#allocation2 + $0x81] sm:$0xff] %vm7459_vm0, %v704_v34  ;;  %v886_v42 = vld [vmem:[#allocation2 + $0x11] sm:$0xff]  ;;  %v7568_v33 = vmov 0 }
  0x28   : > { %737 = vst.msk [vmem:[#allocation2 + $0x89] sm:$0xff] %vm7459_vm0, %v705_v35  ;;  %738 = vst.msk [vmem:[#allocation2 + $0x91] sm:$0xff] %vm7459_vm0, %v706_v36  ;;  %v887_v43 = vld [vmem:[#allocation2 + $0x19] sm:$0xff]  ;;  %v888_v44 = vld [vmem:[#allocation2 + $0x21] sm:$0xff]  ;;  %5290 = vmatprep.mubr.msk.f32.mxu1 %vm7459_vm0, %v886_v42  ;;  %5495 = vmatprep.mubr.msk.f32.mxu0 %vm7459_vm0, %v886_v42  ;;  %v7569_v33 = vsel %vm6345_vm3, 4294967295, %v7568_v33  ;;  %v257_v35 = vand.u32 15, %v179_v26 }
  0x29   : > { %739 = vst.msk [vmem:[#allocation2 + $0x99] sm:$0xff] %vm7459_vm0, %v707_v37  ;;  %740 = vst.msk [vmem:[#allocation2 + $0xa1] sm:$0xff] %vm7459_vm0, %v708_v38  ;;  %5291 = vmatmul.mubr.msk.f32.gmra.mrb[2].mxu1 %vm7459_vm0, %v887_v43  ;;  %5496 = vmatmul.mubr.msk.f32.vlgmr.msra.gmra.mrb[0].mxu0 %vm7459_vm0, %v887_v43  ;;  %v889_v46 = vld [vmem:[#allocation2 + $0x29] sm:$0xff]  ;;  %v890_v47 = vld [vmem:[#allocation2 + $0x31] sm:$0xff]  ;;  %v181_v36 = vadd.s32 72, %v6278_v63  ;;  %v191_v26 = vadd.s32 152, %v6278_v63 }
  0x2a   : > { %741 = vst.msk [vmem:[#allocation2 + $0xa9] sm:$0xff] %vm7459_vm0, %v709_v39  ;;  %742 = vst.msk [vmem:[#allocation2 + $0xb1] sm:$0xff] %vm7459_vm0, %v710_v40  ;;  %5774 = vmatpush3.bf16.msra.mxu0 %v6166_v12  ;;  %5293 = vmatprep.mubr.msk.f32.mxu1 %vm7459_vm0, %v888_v44  ;;  %v891_v48 = vld [vmem:[#allocation2 + $0x39] sm:$0xff]  ;;  %v892_v49 = vld [vmem:[#allocation2 + $0x41] sm:$0xff]  ;;  %v7563_v12 = vmov 0  ;;  %vm6368_vm4 = vcmp.le.s32.totalorder %v257_v35, 14 }
  0x2b   : > { %743 = vst.msk [vmem:[#allocation2 + $0xb9] sm:$0xff] %vm7459_vm0, %v711_v41  ;;  %5498 = vmatprep.mubr.msk.f32.mxu0 %vm7459_vm0, %v888_v44  ;;  %5776 = vmatprep.subr.bf16.mxu0 %v6237_v45  ;;  %744 = vst.msk [vmem:[#allocation2 + $0xc1] sm:$0xff] %vm7459_vm0, %v712_v50  ;;  %v893_v53 = vld [vmem:[#allocation2 + $0x49] sm:$0xff]  ;;  %v894_v55 = vld [vmem:[#allocation2 + $0x51] sm:$0xff]  ;;  %v7564_v12 = vsel %vm6297_vm1, 4294967295, %v7563_v12  ;;  %v7572_v41 = vmov 0 }
  0x2c   : > { %745 = vst.msk [vmem:[#allocation2 + $0xc9] sm:$0xff] %vm7459_vm0, %v713_v51  ;;  %746 = vst.msk [vmem:[#allocation2 + $0xd1] sm:$0xff] %vm7459_vm0, %v714_v52  ;;  %v895_v61 = vld [vmem:[#allocation2 + $0x59] sm:$0xff]  ;;  %v896_v62 = vld [vmem:[#allocation2 + $0x61] sm:$0xff]  ;;  %v7573_v41 = vsel %vm6368_vm4, 4294967295, %v7572_v41  ;;  %v271_v43 = vand.u32 15, %v181_v36 }
  0x2d   : > { %5294 = vmatmul.mubr.msk.f32.gmra.mrb[4].mxu1 %vm7459_vm0, %v889_v46  ;;  %5499 = vmatmul.mubr.msk.f32.gmra.mrb[2].mxu0 %vm7459_vm0, %v889_v46  ;;  %747 = vst.msk [vmem:[#allocation2 + $0xd9] sm:$0xff] %vm7459_vm0, %v715_v54  ;;  %748 = vst.msk [vmem:[#allocation2 + $0xe1] sm:$0xff] %vm7459_vm0, %v716_v57  ;;  %v897_v0 = vld [vmem:[#allocation2 + $0x69] sm:$0xff]  ;;  %v898_v1 = vld [vmem:[#allocation2 + $0x71] sm:$0xff]  ;;  %v183_v44 = vadd.s32 88, %v6278_v63  ;;  %v185_v52 = vadd.s32 104, %v6278_v63 }
  0x2e   : > { %5296 = vmatprep.mubr.msk.f32.mxu1 %vm7459_vm0, %v890_v47  ;;  %5501 = vmatprep.mubr.msk.f32.mxu0 %vm7459_vm0, %v890_v47  ;;  %749 = vst.msk [vmem:[#allocation2 + $0xe9] sm:$0xff] %vm7459_vm0, %v717_v58  ;;  %750 = vst.msk [vmem:[#allocation2 + $0xf1] sm:$0xff] %vm7459_vm0, %v718_v59  ;;  %v899_v3 = vld [vmem:[#allocation2 + $0x79] sm:$0xff]  ;;  %v900_v4 = vld [vmem:[#allocation2 + $0x81] sm:$0xff]  ;;  %vm6391_vm5 = vcmp.le.s32.totalorder %v271_v43, 14  ;;  %v7580_v57 = vmov 0 }
  0x2f   : > { %751 = vst.msk [vmem:[#allocation2 + $0xf9] sm:$0xff] %vm7459_vm0, %v719_v60  ;;  %v901_v7 = vld [vmem:[#allocation2 + $0x89] sm:$0xff]  ;;  %v6294_v9 = vld [vmem:[#allocation2 + $0x12] sm:$0xff]  ;;  %v6301_v13 = vld [vmem:[#allocation2 + $0x1a] sm:$0xff]  ;;  %v285_v51 = vand.u32 15, %v183_v44  ;;  %v299_v59 = vand.u32 15, %v185_v52 }
  0x30   : > { %v902_v11 = vld [vmem:[#allocation2 + $0x91] sm:$0xff]  ;;  %752 = vst.msk [vmem:[#allocation2 + $0x101] sm:$0xff] %vm7459_vm0, %v720_v10  ;;  %753 = vst.msk [vmem:[#allocation2 + $0x109] sm:$0xff] %vm7459_vm0, %v721_v16  ;;  %v903_v19 = vld [vmem:[#allocation2 + $0x99] sm:$0xff]  ;;  %v2886_v20 = vsel %vm6297_vm1, %v6301_v13, 0.0  ;;  %v187_v60 = vadd.s32 120, %v6278_v63 }
  0x31   : > { %5297 = vmatmul.mubr.msk.f32.gmra.mrb[6].mxu1 %vm7459_vm0, %v891_v48  ;;  %5502 = vmatmul.mubr.msk.f32.gmra.mrb[4].mxu0 %vm7459_vm0, %v891_v48  ;;  %v904_v21 = vld [vmem:[#allocation2 + $0xa1] sm:$0xff]  ;;  %v6325_v23 = vld [vmem:[#allocation2 + $0x2a] sm:$0xff]  ;;  %v6343_v32 = vld [vmem:[#allocation2 + $0x32] sm:$0xff]  ;;  %vm6414_vm6 = vcmp.le.s32.totalorder %v285_v51, 14  ;;  %vm6439_vm7 = vcmp.le.s32.totalorder %v299_v59, 14  ;;  %v7586_v10 = vmov 0 }
  0x32   : > { %5299 = vmatprep.mubr.msk.f32.mxu1 %vm7459_vm0, %v892_v49  ;;  %5504 = vmatprep.mubr.msk.f32.mxu0 %vm7459_vm0, %v892_v49  ;;  %v6330_v28 = vld [vmem:[#allocation2 + $0x22] sm:$0xff]  ;;  %v2888_v30 = vsel %vm6321_vm2, %v6325_v23, 0.0  ;;  %v6341_v31 = vld [vmem:[#allocation2 + $0xb1] sm:$0xff]  ;;  %v6349_v34 = vld [vmem:[#allocation2 + $0x3a] sm:$0xff]  ;;  %v7576_v49 = vmov 0  ;;  %v7581_v57 = vsel %vm6414_vm6, 4294967295, %v7580_v57 }
  0x33   : > { %v905_v29 = vld [vmem:[#allocation2 + $0xa9] sm:$0xff]  ;;  %7567 = vst [vmem:[#allocation3_spill] sm:$0xff] %v6341_v31  ;;  %v6359_v37 = vld [vmem:[#allocation2 + $0xb9] sm:$0xff]  ;;  %v2890_v38 = vsel %vm6345_vm3, %v6349_v34, 0.0  ;;  %v6364_v39 = vld [vmem:[#allocation2 + $0xc1] sm:$0xff]  ;;  %v7577_v49 = vsel %vm6391_vm5, 4294967295, %v7576_v49 }
  0x34   : > { %7570 = vst [vmem:[#allocation4_spill] sm:$0xff] %v6359_v37  ;;  %7571 = vst [vmem:[#allocation5_spill] sm:$0xff] %v6364_v39  ;;  %v6366_v40 = vld [vmem:[#allocation2 + $0x42] sm:$0xff]  ;;  %v6372_v42 = vld [vmem:[#allocation2 + $0x4a] sm:$0xff]  ;;  %v313_v6 = vand.u32 15, %v187_v60  ;;  %v236_v35 = vand.u32 15, %v176_v15 }
  0x35   : > { %5300 = vmatmul.mubr.msk.f32.gmra.mrb[8].mxu1 %vm7459_vm0, %v893_v53  ;;  %5505 = vmatmul.mubr.msk.f32.gmra.mrb[6].mxu0 %vm7459_vm0, %v893_v53  ;;  %v2892_v46 = vsel %vm6368_vm4, %v6372_v42, 0.0  ;;  %v6387_v47 = vld [vmem:[#allocation2 + $0xd1] sm:$0xff]  ;;  %v6395_v50 = vld [vmem:[#allocation2 + $0x5a] sm:$0xff]  ;;  %v6412_v56 = vld [vmem:[#allocation2 + $0x62] sm:$0xff]  ;;  %v178_v36 = vadd.s32 48, %v6278_v63  ;;  %v7597_v59 = vmov 0 }
  0x36   : > { %5302 = vmatprep.mubr.msk.f32.mxu1 %vm7459_vm0, %v894_v55  ;;  %5507 = vmatprep.mubr.msk.f32.mxu0 %vm7459_vm0, %v894_v55  ;;  %7575 = vst [vmem:[#allocation7_spill] sm:$0xff] %v6387_v47  ;;  %v6389_v48 = vld [vmem:[#allocation2 + $0x52] sm:$0xff]  ;;  %v2894_v54 = vsel %vm6391_vm5, %v6395_v50, 0.0  ;;  %v6410_v55 = vld [vmem:[#allocation2 + $0xe1] sm:$0xff]  ;;  %v6418_v58 = vld [vmem:[#allocation2 + $0x6a] sm:$0xff]  ;;  %vm6467_vm9 = vcmp.le.s32.totalorder %v313_v6, 14 }
  0x37   : > { %v6405_v53 = vld [vmem:[#allocation2 + $0xd9] sm:$0xff]  ;;  %7579 = vst [vmem:[#allocation9_spill] sm:$0xff] %v6410_v55  ;;  %v6435_v2 = vld [vmem:[#allocation2 + $0xf1] sm:$0xff]  ;;  %vm6511_vm12 = vcmp.ge.s32.totalorder %v236_v35, 1  ;;  %v7607_v35 = vmov 0  ;;  %v7615_v15 = vmov 0 }
  0x38   : > { %7578 = vst [vmem:[#allocation8_spill] sm:$0xff] %v6405_v53  ;;  %7583 = vst [vmem:[#allocation11_spill] sm:$0xff] %v6435_v2  ;;  %v6443_v5 = vld [vmem:[#allocation2 + $0x7a] sm:$0xff]  ;;  %v197_v44 = vadd.s32 200, %v6278_v63 }
  0x39   : > { %5303 = vmatmul.mubr.msk.f32.gmra.mrb[10].mxu1 %vm7459_vm0, %v895_v61  ;;  %5508 = vmatmul.mubr.msk.f32.gmra.mrb[8].mxu0 %vm7459_vm0, %v895_v61  ;;  %v208_v61 = vand.u32 15, %v6278_v63  ;;  %v6458_v16 = vld [vmem:[#allocation2 + $0xf9] sm:$0xff]  ;;  %v2898_v17 = vsel %vm6439_vm7, %v6443_v5, 0.0 }
  0x3a   : > { %5305 = vmatprep.mubr.msk.f32.mxu1 %vm7459_vm0, %v896_v62  ;;  %5510 = vmatprep.mubr.msk.f32.mxu0 %vm7459_vm0, %v896_v62  ;;  %v174_v62 = vadd.s32 16, %v6278_v63  ;;  %7589 = vst [vmem:[#allocation13_spill] sm:$0xff] %v6458_v16  ;;  %v4769_v43 = vld [vmem:[%s7456_s1 + $0x38] sm:$0xff]  ;;  %v6515_v6 = vld [vmem:[#allocation2 + $0x20] sm:$0xff] }
  0x3b   : > { %vm6446_vm8 = vcmp.ge.s32.totalorder %v208_v61, 1  ;;  %v6508_v60 = vld [vmem:[#allocation2 + $0x9a] sm:$0xff]  ;;  %v341_v61 = vand.u32 15, %v191_v26  ;;  %7604 = vst [vmem:[#allocation20_spill] sm:$0xff] %v6515_v6  ;;  %v6537_v26 = vld [vmem:[#allocation2 + $0xa2] sm:$0xff] }
  0x3c   : > { %v7587_v10 = vsel %vm6446_vm8, 4294967295, %v7586_v10  ;;  %v222_v14 = vand.u32 15, %v174_v62  ;;  %7600 = vst [vmem:[#allocation18_spill] sm:$0xff] %v6508_v60  ;;  %v193_v62 = vadd.s32 168, %v6278_v63  ;;  %7606 = vst [vmem:[#allocation22_spill] sm:$0xff] %v6537_v26 }
  0x3d   : > { %5306 = vmatmul.mubr.msk.f32.gmra.mrb[12].mxu1 %vm7459_vm0, %v897_v0  ;;  %5511 = vmatmul.mubr.msk.f32.gmra.mrb[10].mxu0 %vm7459_vm0, %v897_v0  ;;  %v6430_v0 = vld [vmem:[#allocation2 + $0xe9] sm:$0xff]  ;;  %7588 = vst [vmem:[#allocation12_spill] sm:$0xff] %v7587_v10  ;;  %vm6539_vm13 = vcmp.le.s32.totalorder %v341_v61, 14 }
  0x3e   : > { %5308 = vmatprep.mubr.msk.f32.mxu1 %vm7459_vm0, %v898_v1  ;;  %5513 = vmatprep.mubr.msk.f32.mxu0 %vm7459_vm0, %v898_v1  ;;  %7582 = vst [vmem:[#allocation10_spill] sm:$0xff] %v6430_v0  ;;  %v2896_v1 = vsel %vm6414_vm6, %v6418_v58, 0.0  ;;  %vm6474_vm10 = vcmp.ge.s32.totalorder %v222_v14, 1  ;;  %v7608_v35 = vsel %vm6539_vm13, 4294967295, %v7607_v35 }
  0x3f   : > { %7609 = vst [vmem:[#allocation23_spill] sm:$0xff] %v7608_v35  ;;  %v6715_v35 = vld [vmem:[#allocation2 + $0x80] sm:$0xff] }
  0x41   : > { %5309 = vmatmul.mubr.msk.f32.gmra.mrb[14].mxu1 %vm7459_vm0, %v899_v3  ;;  %5514 = vmatmul.mubr.msk.f32.gmra.mrb[12].mxu0 %vm7459_vm0, %v899_v3  ;;  %v6437_v3 = vld [vmem:[#allocation2 + $0x72] sm:$0xff] }
  0x42   : > { %5311 = vmatprep.mubr.msk.f32.mxu1 %vm7459_vm0, %v900_v4  ;;  %5516 = vmatprep.mubr.msk.f32.mxu0 %vm7459_vm0, %v900_v4  ;;  %v7584_v4 = vmov 0 }
  0x43   : > { %v7585_v4 = vsel %vm6439_vm7, 4294967295, %v7584_v4 }
  0x45   : > { %5312 = vmatmul.mubr.msk.f32.gmra.mrb[16].mxu1 %vm7459_vm0, %v901_v7  ;;  %5517 = vmatmul.mubr.msk.f32.gmra.mrb[14].mxu0 %vm7459_vm0, %v901_v7  ;;  %v189_v7 = vadd.s32 136, %v6278_v63 }
  0x46   : > { %5314 = vmatprep.mubr.msk.f32.mxu1 %vm7459_vm0, %v902_v11  ;;  %5547 = vmatprep.mubr.msk.f32.mxu0 %vm7459_vm0, %v6294_v9  ;;  %v754_v11 = vld [vmem:[#allocation2] sm:$0xff] }
  0x47   : > { %v850_v18 = vsel %vm6446_vm8, %v754_v11, 0.0  ;;  %v327_v25 = vand.u32 15, %v189_v7  ;;  %v250_v7 = vand.u32 15, %v178_v36  ;;  %v180_v11 = vadd.s32 64, %v6278_v63  ;;  %v6543_v36 = vld [vmem:[#allocation2 + $0xaa] sm:$0xff] }
  0x48   : > { %7610 = vst [vmem:[#allocation24_spill] sm:$0xff] %v6543_v36 }
  0x49   : > { %5315 = vmatmul.mubr.msk.f32.gmra.mrb[18].mxu1 %vm7459_vm0, %v903_v19  ;;  %5548 = vmatmul.mubr.msk.f32.vlgmr.msra.gmra.mrb[0].mxu0 %vm7459_vm0, %v2886_v20  ;;  %v6465_v19 = vld [vmem:[#allocation2 + $0x82] sm:$0xff]  ;;  %v7590_v20 = vmov 0  ;;  %vm6504_vm11 = vcmp.le.s32.totalorder %v327_v25, 14  ;;  %v854_v25 = vsel %vm6511_vm12, %v6515_v6, 0.0  ;;  %vm6546_vm14 = vcmp.ge.s32.totalorder %v250_v7, 1 }
  0x4a   : > { %5778 = vmatpush3.bf16.msra.mxu0 %v6237_v45  ;;  %5317 = vmatprep.mubr.msk.f32.mxu1 %vm7459_vm0, %v904_v21  ;;  %v6382_v45 = vld [vmem:[#allocation2 + $0xc9] sm:$0xff]  ;;  %v7591_v20 = vsel %vm6467_vm9, 4294967295, %v7590_v20  ;;  %v7598_v59 = vsel %vm6504_vm11, 4294967295, %v7597_v59  ;;  %v2904_v7 = vsel %vm6539_vm13, %v6543_v36, 0.0  ;;  %vm7622_vm13 = vcmask 130048  }
  0x4b   : > { %5550 = vmatprep.mubr.msk.f32.mxu0 %vm7459_vm0, %v6330_v28  ;;  %5780 = vmatprep.subr.bf16.mxu0 %v6328_v27  ;;  %7574 = vst [vmem:[#allocation6_spill] sm:$0xff] %v6382_v45  ;;  %v6471_v21 = vld [vmem:[#allocation2 + $0x8a] sm:$0xff]  ;;  %7599 = vst [vmem:[#allocation17_spill] sm:$0xff] %v7598_v59  ;;  %v190_v36 = vadd.s32 144, %v6278_v63  ;;  %v196_v59 = vadd.s32 192, %v6278_v63 }
  0x4c   : > { %7592 = vst [vmem:[#allocation14_spill] sm:$0xff] %v6471_v21  ;;  %v2900_v51 = vsel %vm6467_vm9, %v6471_v21, 0.0  ;;  %v4087_v21 = vld [vmem:[#allocation2 + $0x52] sm:$0xff] }
  0x4d   : > { %5318 = vmatmul.mubr.msk.f32.gmra.mrb[20].mxu1 %vm7459_vm0, %v905_v29  ;;  %5551 = vmatmul.mubr.msk.f32.gmra.mrb[2].mxu0 %vm7459_vm0, %v2888_v30  ;;  %v7593_v29 = vmov 0  ;;  %v6478_v30 = vld [vmem:[#allocation2 + $0x10] sm:$0xff] }
  0x4e   : > { %5320 = vmatprep.mubr.msk.f32.mxu1 %vm7459_vm0, %v6341_v31  ;;  %5553 = vmatprep.mubr.msk.f32.mxu0 %vm7459_vm0, %v6343_v32  ;;  %v7594_v29 = vsel %vm6474_vm10, 4294967295, %v7593_v29  ;;  %7595 = vst [vmem:[#allocation15_spill] sm:$0xff] %v6478_v30  ;;  %v852_v52 = vsel %vm6474_vm10, %v6478_v30, 0.0  ;;  %v186_v31 = vadd.s32 112, %v6278_v63  ;;  %v201_v30 = vadd.s32 232, %v6278_v63 }
  0x51   : > { %5321 = vmatmul.mubr.msk.f32.gmra.mrb[22].mxu1 %vm7459_vm0, %v6359_v37  ;;  %5554 = vmatmul.mubr.msk.f32.gmra.mrb[4].mxu0 %vm7459_vm0, %v2890_v38  ;;  %v4768_v38 = vld [vmem:[%s7456_s1 + $0x30] sm:$0xff] }
  0x52   : > { %5323 = vmatprep.mubr.msk.f32.mxu1 %vm7459_vm0, %v6364_v39  ;;  %5556 = vmatprep.mubr.msk.f32.mxu0 %vm7459_vm0, %v6366_v40  ;;  %v6518_v14 = vpack.c.bf16 %v4769_v43, %v4768_v38  ;;  %v355_v38 = vand.u32 15, %v193_v62  ;;  %v195_v43 = vadd.s32 184, %v6278_v63  ;;  %v6563_v62 = vld [vmem:[#allocation2 + $0x28] sm:$0xff]  ;;  %v6617_v39 = vld [vmem:[#allocation2 + $0x50] sm:$0xff] }
  0x53   : > { %7634 = vst [vmem:[#allocation34_spill] sm:$0xff] %v6617_v39 }
  0x54   : > { %vm6573_vm15 = vcmp.le.s32.totalorder %v355_v38, 14  ;;  %v369_v61 = vand.u32 15, %v195_v43  ;;  %v6596_v43 = vld [vmem:[#allocation2 + $0x38] sm:$0xff]  ;;  %v383_v38 = vand.u32 15, %v197_v44 }
  0x55   : > { %5324 = vmatmul.mubr.msk.f32.gmra.mrb[24].mxu1 %vm7459_vm0, %v6382_v45  ;;  %5557 = vmatmul.mubr.msk.f32.gmra.mrb[6].mxu0 %vm7459_vm0, %v2892_v46  ;;  %v755_v46 = vld [vmem:[#allocation2 + $0x8] sm:$0xff]  ;;  %v7616_v15 = vsel %vm6573_vm15, 4294967295, %v7615_v15  ;;  %7626 = vst [vmem:[#allocation30_spill] sm:$0xff] %v6596_v43  ;;  %v7632_v45 = vmov 0 }
  0x56   : > { %5326 = vmatprep.mubr.msk.f32.mxu1 %vm7459_vm0, %v6387_v47  ;;  %5559 = vmatprep.mubr.msk.f32.mxu0 %vm7459_vm0, %v6389_v48  ;;  %7617 = vst [vmem:[#allocation27_spill] sm:$0xff] %v7616_v15  ;;  %v199_v47 = vadd.s32 216, %v6278_v63 }
  0x58   : > { %v397_v44 = vand.u32 15, %v199_v47  ;;  %v411_v47 = vand.u32 15, %v201_v30 }
  0x59   : > { %5327 = vmatmul.mubr.msk.f32.gmra.mrb[26].mxu1 %vm7459_vm0, %v6405_v53  ;;  %5560 = vmatmul.mubr.msk.f32.gmra.mrb[8].mxu0 %vm7459_vm0, %v2894_v54  ;;  %v6502_v54 = vld [vmem:[#allocation2 + $0x92] sm:$0xff]  ;;  %v7628_v53 = vmov 0 }
  0x5a   : > { %5329 = vmatprep.mubr.msk.f32.mxu1 %vm7459_vm0, %v6410_v55  ;;  %5562 = vmatprep.mubr.msk.f32.mxu0 %vm7459_vm0, %v6412_v56  ;;  %7596 = vst [vmem:[#allocation16_spill] sm:$0xff] %v6502_v54  ;;  %v184_v55 = vadd.s32 96, %v6278_v63 }
  0x5c   : > { %v292_v37 = vand.u32 15, %v184_v55 }
  0x5d   : > { %5330 = vmatmul.mubr.msk.f32.gmra.mrb[28].mxu1 %vm7459_vm0, %v6430_v0  ;;  %5563 = vmatmul.mubr.msk.f32.gmra.mrb[10].mxu0 %vm7459_vm0, %v2896_v1  ;;  %v7601_v1 = vmov 0 }
  0x5e   : > { %5332 = vmatprep.mubr.msk.f32.mxu1 %vm7459_vm0, %v6435_v2  ;;  %5565 = vmatprep.mubr.msk.f32.mxu0 %vm7459_vm0, %v6437_v3  ;;  %v7602_v1 = vsel %vm6511_vm12, 4294967295, %v7601_v1  ;;  %v6584_v2 = vld [vmem:[#allocation2 + $0x40] sm:$0xff] }
  0x5f   : > { %7603 = vst [vmem:[#allocation19_spill] sm:$0xff] %v7602_v1  ;;  %7621 = vst [vmem:[#allocation29_spill] sm:$0xff] %v6584_v2  ;;  %v6849_v1 = vld [vmem:[#allocation2 + $0xd0] sm:$0xff] }
  0x61   : > { %5333 = vmatmul.mubr.msk.f32.gmra.mrb[30].mxu1 %vm7459_vm0, %v6458_v16  ;;  %5566 = vmatmul.mubr.msk.f32.gmra.mrb[12].mxu0 %vm7459_vm0, %v2898_v17  ;;  %v6528_v17 = vld [vmem:[#allocation2 + $0x18] sm:$0xff]  ;;  %v7619_v16 = vmov 0 }
  0x62   : > { %5339 = vmatprep.mubr.msk.f32.mxu1 %vm7459_vm0, %v850_v18  ;;  %5568 = vmatprep.mubr.msk.f32.mxu0 %vm7459_vm0, %v6465_v19  ;;  %7605 = vst [vmem:[#allocation21_spill] sm:$0xff] %v6528_v17  ;;  %v2902_v18 = vsel %vm6504_vm11, %v6508_v60, 0.0  ;;  %vm7623_vm11 = vmmov %vm7622_vm13  ;;  %v7673_v60 = vmov 0 }
  0x63   : > { %vm7624_vm9 = vmmov %vm7623_vm11 }
  0x64   : > { %vm7625_vm7 = vmmov %vm7624_vm9 }
  0x65   : > { %5340 = vmatmul.mubr.msk.f32.vlgmr.msra.gmra.mrb[0].mxu1 %vm7459_vm0, %v755_v46  ;;  %5569 = vmatmul.mubr.msk.f32.gmra.mrb[14].mxu0 %vm7459_vm0, %v2900_v51  ;;  %v7611_v46 = vmov 0  ;;  %v264_v51 = vand.u32 15, %v180_v11  ;;  %vm7637_vm6 = vmmov %vm7624_vm9 }
  0x66   : > { %5342 = vmatprep.mubr.msk.f32.mxu1 %vm7459_vm0, %v852_v52  ;;  %5571 = vmatprep.mubr.msk.f32.mxu0 %vm7459_vm0, %v6502_v54  ;;  %v7612_v46 = vsel %vm6546_vm14, 4294967295, %v7611_v46  ;;  %v182_v52 = vadd.s32 80, %v6278_v63 }
  0x67   : > { %5762 = vmatpush3.bf16.msra.mxu1 %v6198_v24  ;;  %v6550_v24 = vld [vmem:[#allocation2 + $0x30] sm:$0xff] }
  0x68   : > { %7613 = vst [vmem:[#allocation25_spill] sm:$0xff] %v6550_v24  ;;  %5764 = vmatprep.subr.bf16.mxu1 %v6518_v14  ;;  %v856_v11 = vsel %vm6546_vm14, %v6550_v24, 0.0  ;;  %v278_v0 = vand.u32 15, %v182_v52 }
  0x69   : > { %5343 = vmatmul.mubr.msk.f32.gmra.mrb[2].mxu1 %vm7459_vm0, %v6528_v17  ;;  %5572 = vmatmul.mubr.msk.f32.gmra.mrb[16].mxu0 %vm7459_vm0, %v2902_v18  ;;  %v6571_v18 = vld [vmem:[#allocation2 + $0xb2] sm:$0xff]  ;;  %v7640_v17 = vmov 0 }
  0x6a   : > { %5345 = vmatprep.mubr.msk.f32.mxu1 %vm7459_vm0, %v854_v25  ;;  %5574 = vmatprep.mubr.msk.f32.mxu0 %vm7459_vm0, %v6537_v26  ;;  %7614 = vst [vmem:[#allocation26_spill] sm:$0xff] %v6571_v18  ;;  %v6577_v25 = vld [vmem:[#allocation2 + $0xba] sm:$0xff]  ;;  %vm6580_vm0 = vcmp.ge.s32.totalorder %v264_v51, 1  ;;  %v7663_v26 = vmov 0 }
  0x6b   : > { %7618 = vst [vmem:[#allocation28_spill] sm:$0xff] %v6577_v25  ;;  %v7620_v16 = vsel %vm6580_vm0, 4294967295, %v7619_v16  ;;  %v2906_v51 = vsel %vm6573_vm15, %v6577_v25, 0.0  ;;  %v858_v52 = vsel %vm6580_vm0, %v6584_v2, 0.0  ;;  %vm7636_vm15 = vmmov %vm7624_vm9  ;;  %v188_v25 = vadd.s32 128, %v6278_v63 }
  0x6d   : > { %5346 = vmatmul.mubr.msk.f32.gmra.mrb[4].mxu1 %vm7622_vm13, %v6563_v62  ;;  %5575 = vmatmul.mubr.msk.f32.gmra.mrb[18].mxu0 %vm7623_vm11, %v2904_v7  ;;  %v6604_v7 = vld [vmem:[#allocation2 + $0xc2] sm:$0xff]  ;;  %vm6606_vm11 = vcmp.le.s32.totalorder %v369_v61, 14  ;;  %vm7635_vm13 = vmmov %vm7624_vm9 }
  0x6e   : > { %5348 = vmatprep.mubr.msk.f32.mxu1 %vm7624_vm9, %v856_v11  ;;  %5577 = vmatprep.mubr.msk.f32.mxu0 %vm7625_vm7, %v6571_v18  ;;  %7627 = vst [vmem:[#allocation31_spill] sm:$0xff] %v6604_v7  ;;  %v7629_v53 = vsel %vm6606_vm11, 4294967295, %v7628_v53  ;;  %v6610_v11 = vld [vmem:[#allocation2 + $0xca] sm:$0xff]  ;;  %vm6613_vm7 = vcmp.ge.s32.totalorder %v278_v0, 1  ;;  %v7651_v18 = vmov 0 }
  0x6f   : > { %7630 = vst [vmem:[#allocation32_spill] sm:$0xff] %v7629_v53  ;;  %7631 = vst [vmem:[#allocation33_spill] sm:$0xff] %v6610_v11  ;;  %v7633_v45 = vsel %vm6613_vm7, 4294967295, %v7632_v45  ;;  %v6629_v0 = vld [vmem:[#allocation2 + $0x48] sm:$0xff]  ;;  %v2908_v55 = vsel %vm6606_vm11, %v6610_v11, 0.0  ;;  %v860_v61 = vsel %vm6613_vm7, %v6617_v39, 0.0 }
  0x70   : > { %7638 = vst [vmem:[#allocation35_spill] sm:$0xff] %v6629_v0  ;;  %v6650_v11 = vld [vmem:[#allocation2 + $0x60] sm:$0xff]  ;;  %v306_v53 = vand.u32 15, %v186_v31  ;;  %vm7648_vm11 = vmmov %vm7635_vm13 }
  0x71   : > { %5349 = vmatmul.mubr.msk.f32.gmra.mrb[6].mxu1 %vm7624_vm9, %v6596_v43  ;;  %5578 = vmatmul.mubr.msk.f32.gmra.mrb[20].mxu0 %vm7635_vm13, %v2906_v51  ;;  %v6637_v51 = vld [vmem:[#allocation2 + $0xd2] sm:$0xff]  ;;  %vm6639_vm9 = vcmp.le.s32.totalorder %v383_v38, 14  ;;  %7646 = vst [vmem:[#allocation39_spill] sm:$0xff] %v6650_v11  ;;  %vm7649_vm5 = vmmov %vm7648_vm11 }
  0x72   : > { %5351 = vmatprep.mubr.msk.f32.mxu1 %vm7636_vm15, %v858_v52  ;;  %5580 = vmatprep.mubr.msk.f32.mxu0 %vm7637_vm6, %v6604_v7  ;;  %7639 = vst [vmem:[#allocation36_spill] sm:$0xff] %v6637_v51  ;;  %v7641_v17 = vsel %vm6639_vm9, 4294967295, %v7640_v17  ;;  %v6643_v52 = vld [vmem:[#allocation2 + $0xda] sm:$0xff]  ;;  %vm6646_vm6 = vcmp.ge.s32.totalorder %v292_v37, 1  ;;  %v7644_v7 = vmov 0  ;;  %vm7647_vm15 = vmmov %vm7635_vm13 }
  0x73   : > { %7642 = vst [vmem:[#allocation37_spill] sm:$0xff] %v7641_v17  ;;  %7643 = vst [vmem:[#allocation38_spill] sm:$0xff] %v6643_v52  ;;  %v7645_v7 = vsel %vm6646_vm6, 4294967295, %v7644_v7  ;;  %v6662_v37 = vld [vmem:[#allocation2 + $0x58] sm:$0xff]  ;;  %v2910_v31 = vsel %vm6639_vm9, %v6643_v52, 0.0  ;;  %v862_v38 = vsel %vm6646_vm6, %v6650_v11, 0.0 }
  0x74   : > { %v6683_v52 = vld [vmem:[#allocation2 + $0x70] sm:$0xff]  ;;  %v320_v17 = vand.u32 15, %v188_v25  ;;  %vm7659_vm9 = vmmov %vm7648_vm11 }
  0x75   : > { %5352 = vmatmul.mubr.msk.f32.gmra.mrb[8].mxu1 %vm7647_vm15, %v6629_v0  ;;  %5581 = vmatmul.mubr.msk.f32.gmra.mrb[22].mxu0 %vm7635_vm13, %v2908_v55  ;;  %v6670_v55 = vld [vmem:[#allocation2 + $0xe2] sm:$0xff]  ;;  %vm6672_vm15 = vcmp.le.s32.totalorder %v397_v44, 14  ;;  %7657 = vst [vmem:[#allocation43_spill] sm:$0xff] %v6683_v52  ;;  %vm7658_vm13 = vmmov %vm7648_vm11 }
  0x76   : > { %5354 = vmatprep.mubr.msk.f32.mxu1 %vm7648_vm11, %v860_v61  ;;  %5583 = vmatprep.mubr.msk.f32.mxu0 %vm7649_vm5, %v6637_v51  ;;  %7650 = vst [vmem:[#allocation40_spill] sm:$0xff] %v6670_v55  ;;  %v7652_v18 = vsel %vm6672_vm15, 4294967295, %v7651_v18  ;;  %v6676_v61 = vld [vmem:[#allocation2 + $0xea] sm:$0xff]  ;;  %v203_v51 = vadd.s32 248, %v6278_v63  ;;  %vm6679_vm5 = vcmp.ge.s32.totalorder %v306_v53, 1  ;;  %vm7660_vm4 = vmmov %vm7659_vm9 }
  0x77   : > { %7653 = vst [vmem:[#allocation41_spill] sm:$0xff] %v7652_v18  ;;  %7654 = vst [vmem:[#allocation42_spill] sm:$0xff] %v6676_v61  ;;  %v6695_v53 = vld [vmem:[#allocation2 + $0x68] sm:$0xff]  ;;  %v2912_v25 = vsel %vm6672_vm15, %v6676_v61, 0.0  ;;  %v864_v44 = vsel %vm6679_vm5, %v6683_v52, 0.0  ;;  %v334_v61 = vand.u32 15, %v190_v36 }
  0x78   : > { %7661 = vst [vmem:[#allocation44_spill] sm:$0xff] %v6695_v53  ;;  %v425_v30 = vand.u32 15, %v203_v51  ;;  %v192_v18 = vadd.s32 160, %v6278_v63  ;;  %vm7670_vm15 = vmmov %vm7659_vm9 }
  0x79   : > { %5355 = vmatmul.mubr.msk.f32.gmra.mrb[10].mxu1 %vm7648_vm11, %v6662_v37  ;;  %5584 = vmatmul.mubr.msk.f32.gmra.mrb[24].mxu0 %vm7658_vm13, %v2910_v31  ;;  %v6703_v31 = vld [vmem:[#allocation2 + $0xf2] sm:$0xff]  ;;  %vm6705_vm11 = vcmp.le.s32.totalorder %v411_v47, 14  ;;  %vm7669_vm13 = vmmov %vm7659_vm9 }
  0x7a   : > { %5357 = vmatprep.mubr.msk.f32.mxu1 %vm7659_vm9, %v862_v38  ;;  %5586 = vmatprep.mubr.msk.f32.mxu0 %vm7660_vm4, %v6670_v55  ;;  %7662 = vst [vmem:[#allocation45_spill] sm:$0xff] %v6703_v31  ;;  %v7664_v26 = vsel %vm6705_vm11, 4294967295, %v7663_v26  ;;  %v6709_v38 = vld [vmem:[#allocation2 + $0xfa] sm:$0xff]  ;;  %vm6711_vm4 = vcmp.ge.s32.totalorder %v320_v17, 1  ;;  %vm7671_vm3 = vmmov %vm7659_vm9 }
  0x7b   : > { %7665 = vst [vmem:[#allocation46_spill] sm:$0xff] %v7664_v26  ;;  %7666 = vst [vmem:[#allocation47_spill] sm:$0xff] %v6709_v38  ;;  %v6727_v17 = vld [vmem:[#allocation2 + $0x78] sm:$0xff]  ;;  %v2914_v36 = vsel %vm6705_vm11, %v6709_v38, 0.0  ;;  %v866_v51 = vsel %vm6711_vm4, %v6715_v35, 0.0  ;;  %v348_v26 = vand.u32 15, %v192_v18 }
  0x7c   : > { %v194_v38 = vadd.s32 176, %v6278_v63  ;;  %vm7680_vm11 = vmmov %vm7671_vm3 }
  0x7d   : > { %5358 = vmatmul.mubr.msk.f32.gmra.mrb[12].mxu1 %vm7659_vm9, %v6695_v53  ;;  %5587 = vmatmul.mubr.msk.f32.gmra.mrb[26].mxu0 %vm7669_vm13, %v2912_v25  ;;  %v6735_v25 = vld [vmem:[#allocation2 + $0x102] sm:$0xff]  ;;  %vm6737_vm9 = vcmp.le.s32.totalorder %v425_v30, 14  ;;  %vm7679_vm13 = vmmov %vm7671_vm3 }
  0x7e   : > { %5360 = vmatprep.mubr.msk.f32.mxu1 %vm7670_vm15, %v864_v44  ;;  %5589 = vmatprep.mubr.msk.f32.mxu0 %vm7671_vm3, %v6703_v31  ;;  %7672 = vst [vmem:[#allocation48_spill] sm:$0xff] %v6735_v25  ;;  %v7674_v60 = vsel %vm6737_vm9, 4294967295, %v7673_v60  ;;  %v6741_v44 = vld [vmem:[#allocation2 + $0x10a] sm:$0xff]  ;;  %vm6743_vm15 = vcmp.ge.s32.totalorder %v334_v61, 1  ;;  %vm7681_vm2 = vmmov %vm7671_vm3  ;;  %v4085_v30 = vld [vmem:[#allocation2 + $0x42] sm:$0xff] }
  0x7f   : > { %7675 = vst [vmem:[#allocation49_spill] sm:$0xff] %v7674_v60  ;;  %7676 = vst [vmem:[#allocation50_spill] sm:$0xff] %v6741_v44  ;;  %v6747_v31 = vld [vmem:[#allocation2 + $0x90] sm:$0xff]  ;;  %v6759_v61 = vld [vmem:[#allocation2 + $0x88] sm:$0xff]  ;;  %v2916_v18 = vsel %vm6737_vm9, %v6741_v44, 0.0 }
  0x80   : > { %v868_v54 = vsel %vm6743_vm15, %v6747_v31, 0.0  ;;  %v4938_v44 = vld [vmem:[%s7456_s1 + $0x80] sm:$0xff]  ;;  %v4939_v60 = vld [vmem:[%s7456_s1 + $0x88] sm:$0xff]  ;;  %v7878_v15 = vsel %vm6711_vm4, %v6747_v31, 0.0 }
  0x81   : > { %5361 = vmatmul.mubr.msk.f32.gmra.mrb[14].mxu1 %vm7671_vm3, %v6727_v17  ;;  %5590 = vmatmul.mubr.msk.f32.gmra.mrb[28].mxu0 %vm7679_vm13, %v2914_v36  ;;  %v3305_v36 = vsel %vm6446_vm8, %v6515_v6, 0.0  ;;  %vm6770_vm3 = vcmp.ge.s32.totalorder %v348_v26, 1  ;;  %vm7685_vm13 = vmmov %vm7681_vm2  ;;  %v6796_v10 = vpack.c.bf16 %v4939_v60, %v4938_v44  ;;  %v6805_v26 = vld [vmem:[#allocation2 + $0xb0] sm:$0xff]  ;;  %v6814_v60 = vld [vmem:[#allocation2 + $0xa8] sm:$0xff] }
  0x82   : > { %5363 = vmatprep.mubr.msk.f32.mxu1 %vm7680_vm11, %v866_v51  ;;  %5592 = vmatprep.mubr.msk.f32.mxu0 %vm7681_vm2, %v6735_v25  ;;  %v6774_v51 = vld [vmem:[#allocation2 + $0xa0] sm:$0xff]  ;;  %v362_v25 = vand.u32 15, %v194_v38  ;;  %vm7684_vm11 = vmmov %vm7681_vm2  ;;  %v6791_v38 = vld [vmem:[#allocation2 + $0x98] sm:$0xff] }
  0x83   : > { %vm7686_vm8 = vmmov %vm7681_vm2  ;;  %v870_v6 = vsel %vm6770_vm3, %v6774_v51, 0.0  ;;  %v4089_v44 = vld [vmem:[#allocation2 + $0x62] sm:$0xff] }
  0x85   : > { %5364 = vmatmul.mubr.msk.f32.gmra.mrb[16].mxu1 %vm7681_vm2, %v6759_v61  ;;  %5593 = vmatmul.mubr.msk.f32.gmra.mrb[30].mxu0 %vm7684_vm11, %v2916_v18  ;;  %v3307_v18 = vsel %vm6474_vm10, %v6550_v24, 0.0  ;;  %vm6801_vm2 = vcmp.ge.s32.totalorder %v362_v25, 1  ;;  %vm7689_vm11 = vmmov %vm7686_vm8  ;;  %v3309_v25 = vsel %vm6511_vm12, %v6584_v2, 0.0  ;;  %v200_v24 = vadd.s32 224, %v6278_v63  ;;  %v4091_v2 = vld [vmem:[#allocation2 + $0x72] sm:$0xff] }
  0x86   : > { %5366 = vmatprep.mubr.msk.f32.mxu1 %vm7685_vm13, %v868_v54  ;;  %5599 = vmatprep.mubr.msk.f32.mxu0 %vm7686_vm8, %v3305_v36  ;;  %v376_v54 = vand.u32 15, %v196_v59  ;;  %v198_v36 = vadd.s32 208, %v6278_v63  ;;  %vm7690_vm13 = vmmov %vm7686_vm8  ;;  %v872_v59 = vsel %vm6801_vm2, %v6805_v26, 0.0 }
  0x87   : > { %vm7691_vm10 = vmmov %vm7686_vm8 }
  0x88   : > { %vm7696_vm12 = vmmov %vm7691_vm10 }
  0x89   : > { %5367 = vmatmul.mubr.msk.f32.gmra.mrb[18].mxu1 %vm7686_vm8, %v6791_v38  ;;  %5600 = vmatmul.mubr.msk.f32.vlgmr.msra.gmra.mrb[0].mxu0 %vm7689_vm11, %v6563_v62  ;;  %vm6824_vm8 = vcmp.ge.s32.totalorder %v376_v54, 1  ;;  %vm7694_vm11 = vmmov %vm7691_vm10 }
  0x8a   : > { %5782 = vmatpush3.bf16.msra.mxu0 %v6328_v27  ;;  %5369 = vmatprep.mubr.msk.f32.mxu1 %vm7690_vm13, %v870_v6  ;;  %v6828_v27 = vld [vmem:[#allocation2 + $0xc0] sm:$0xff]  ;;  %v390_v6 = vand.u32 15, %v198_v36  ;;  %vm7695_vm13 = vmmov %vm7691_vm10  ;;  %v3311_v36 = vsel %vm6546_vm14, %v6617_v39, 0.0 }
  0x8b   : > { %5602 = vmatprep.mubr.msk.f32.mxu0 %vm7691_vm10, %v3307_v18  ;;  %5784 = vmatprep.subr.bf16.mxu0 %v6796_v10  ;;  %v6837_v18 = vld [vmem:[#allocation2 + $0xb8] sm:$0xff]  ;;  %v874_v54 = vsel %vm6824_vm8, %v6828_v27, 0.0  ;;  %v6870_v39 = vld [vmem:[#allocation2 + $0xe0] sm:$0xff] }
  0x8c   : > { %vm6845_vm9 = vcmp.ge.s32.totalorder %v390_v6, 1 }
  0x8d   : > { %5370 = vmatmul.mubr.msk.f32.gmra.mrb[20].mxu1 %vm7691_vm10, %v6814_v60  ;;  %5603 = vmatmul.mubr.msk.f32.gmra.mrb[2].mxu0 %vm7694_vm11, %v6596_v43  ;;  %v404_v43 = vand.u32 15, %v200_v24  ;;  %vm7700_vm11 = vmmov %vm7691_vm10  ;;  %v876_v6 = vsel %vm6845_vm9, %v6849_v1, 0.0  ;;  %v7702_v24 = vmov 0 }
  0x8e   : > { %5372 = vmatprep.mubr.msk.f32.mxu1 %vm7695_vm13, %v872_v59  ;;  %5605 = vmatprep.mubr.msk.f32.mxu0 %vm7696_vm12, %v3309_v25  ;;  %v202_v59 = vadd.s32 240, %v6278_v63  ;;  %vm7699_vm12 = vmmov %vm7691_vm10  ;;  %v6858_v25 = vld [vmem:[#allocation2 + $0xc8] sm:$0xff]  ;;  %v3313_v63 = vsel %vm6580_vm0, %v6650_v11, 0.0  ;;  %v6890_v11 = vld [vmem:[#allocation2 + $0xf0] sm:$0xff] }
  0x8f   : > { %vm7701_vm13 = vmmov %vm7691_vm10  ;;  %vm6866_vm14 = vcmp.ge.s32.totalorder %v404_v43, 1 }
  0x90   : > { %v7703_v24 = vsel %vm6866_vm14, 4294967295, %v7702_v24  ;;  %v878_v43 = vsel %vm6866_vm14, %v6870_v39, 0.0 }
  0x91   : > { %5373 = vmatmul.mubr.msk.f32.gmra.mrb[22].mxu1 %vm7699_vm12, %v6837_v18  ;;  %5606 = vmatmul.mubr.msk.f32.gmra.mrb[4].mxu0 %vm7691_vm10, %v6629_v0  ;;  %v418_v0 = vand.u32 15, %v202_v59  ;;  %vm7704_vm12 = vmmov %vm7691_vm10  ;;  %v7707_v59 = vmov 0 }
  0x92   : > { %5375 = vmatprep.mubr.msk.f32.mxu1 %vm7700_vm11, %v874_v54  ;;  %5608 = vmatprep.mubr.msk.f32.mxu0 %vm7701_vm13, %v3311_v36  ;;  %vm7705_vm11 = vmmov %vm7691_vm10  ;;  %v6878_v54 = vld [vmem:[#allocation2 + $0xd8] sm:$0xff]  ;;  %v3315_v36 = vsel %vm6613_vm7, %v6683_v52, 0.0  ;;  %v3319_v52 = vsel %vm6679_vm5, %v6747_v31, 0.0  ;;  %v2097_v31 = vsel %vm6770_vm3, %v6805_v26, 0.0 }
  0x93   : > { %vm7706_vm13 = vmmov %vm7691_vm10  ;;  %vm6886_vm0 = vcmp.ge.s32.totalorder %v418_v0, 1 }
  0x94   : > { %v7708_v59 = vsel %vm6886_vm0, 4294967295, %v7707_v59  ;;  %v880_v0 = vsel %vm6886_vm0, %v6890_v11, 0.0  ;;  %vm7712_vm7 = vmmov %vm7691_vm10 }
  0x95   : > { %5376 = vmatmul.mubr.msk.f32.gmra.mrb[24].mxu1 %vm7704_vm12, %v6858_v25  ;;  %5609 = vmatmul.mubr.msk.f32.gmra.mrb[6].mxu0 %vm7691_vm10, %v6662_v37  ;;  %vm7709_vm12 = vmmov %vm7691_vm10 }
  0x96   : > { %5378 = vmatprep.mubr.msk.f32.mxu1 %vm7705_vm11, %v876_v6  ;;  %5611 = vmatprep.mubr.msk.f32.mxu0 %vm7706_vm13, %v3313_v63  ;;  %vm7710_vm11 = vmmov %vm7691_vm10  ;;  %v6898_v6 = vld [vmem:[#allocation2 + $0xe8] sm:$0xff]  ;;  %v3317_v63 = vsel %vm6646_vm6, %v6715_v35, 0.0 }
  0x97   : > { %vm7711_vm13 = vmmov %vm7691_vm10 }
  0x98   : > { %vm7717_vm6 = vmmov %vm7712_vm7 }
  0x99   : > { %5379 = vmatmul.mubr.msk.f32.gmra.mrb[26].mxu1 %vm7709_vm12, %v6878_v54  ;;  %5612 = vmatmul.mubr.msk.f32.gmra.mrb[8].mxu0 %vm7691_vm10, %v6695_v53  ;;  %vm7713_vm12 = vmmov %vm7712_vm7  ;;  %v1562_v53 = vld [vmem:[#allocation2 + $0xa] sm:$0xff] }
  0x9a   : > { %5381 = vmatprep.mubr.msk.f32.mxu1 %vm7710_vm11, %v878_v43  ;;  %5614 = vmatprep.mubr.msk.f32.mxu0 %vm7711_vm13, %v3315_v36  ;;  %vm7714_vm10 = vmmov %vm7712_vm7  ;;  %v6912_v43 = vld [vmem:[#allocation2 + $0xf8] sm:$0xff]  ;;  %v1561_v36 = vld [vmem:[#allocation2 + $0x2] sm:$0xff] }
  0x9b   : > { %vm7715_vm11 = vmmov %vm7712_vm7 }
  0x9c   : > { %vm7716_vm13 = vmmov %vm7712_vm7 }
  0x9d   : > { %5382 = vmatmul.mubr.msk.f32.gmra.mrb[28].mxu1 %vm7712_vm7, %v6898_v6  ;;  %5615 = vmatmul.mubr.msk.f32.gmra.mrb[10].mxu0 %vm7713_vm12, %v6727_v17  ;;  %vm7718_vm12 = vmmov %vm7717_vm6 }
  0x9e   : > { %5384 = vmatprep.mubr.msk.f32.mxu1 %vm7714_vm10, %v880_v0  ;;  %5617 = vmatprep.mubr.msk.f32.mxu0 %vm7715_vm11, %v3317_v63  ;;  %v1658_v0 = vsel %vm6297_vm1, %v1562_v53, 0.0  ;;  %v3321_v63 = vsel %vm6711_vm4, %v6774_v51, 0.0  ;;  %vm7719_vm10 = vmmov %vm7717_vm6  ;;  %v3323_v53 = vsel %vm6743_vm15, %v6805_v26, 0.0  ;;  %vm7885_vm4 = vnez %v7564_v12 }
  0x9f   : > { %vm7720_vm11 = vmmov %vm7717_vm6  ;;  %v2099_v12 = vsel %vm6801_vm2, %v6828_v27, 0.0 }
  0xa1   : > { %5385 = vmatmul.mubr.msk.f32.gmra.mrb[30].mxu1 %vm7716_vm13, %v6912_v43  ;;  %5618 = vmatmul.mubr.msk.f32.gmra.mrb[12].mxu0 %vm7712_vm7, %v6759_v61  ;;  %vm7721_vm13 = vmmov %vm7717_vm6 }
  0xa2   : > { %5391 = vmatprep.mubr.msk.f32.mxu1 %vm7717_vm6, %v1561_v36  ;;  %5620 = vmatprep.mubr.msk.f32.mxu0 %vm7718_vm12, %v3319_v52  ;;  %vm7722_vm7 = vmmov %vm7717_vm6  ;;  %vm7723_vm6 = vnez %v7566_v22  ;;  %v3303_v36 = vld [vmem:[#allocation2 + $0x110] sm:$0xff] }
  0xa3   : > { %v1660_v52 = vsel %vm7723_vm6, %v6301_v13, 0.0  ;;  %vm7724_vm12 = vmmov %vm7722_vm7  ;;  %v3325_v13 = vsel %vm6770_vm3, %v6828_v27, 0.0 }
  0xa5   : > { %5392 = vmatmul.mubr.msk.f32.vlgmr.msra.gmra.mrb[0].mxu1 %vm7719_vm10, %v1658_v0  ;;  %5621 = vmatmul.mubr.msk.f32.gmra.mrb[14].mxu0 %vm7720_vm11, %v6791_v38  ;;  %vm7725_vm10 = vmmov %vm7722_vm7  ;;  %v3335_v0 = vsel %vm6886_vm0, %v3303_v36, 0.0  ;;  %v3697_v36 = vld [vmem:[#allocation2 + $0x41] sm:$0xff] }
  0xa6   : > { %5394 = vmatprep.mubr.msk.f32.mxu1 %vm7721_vm13, %v6294_v9  ;;  %5623 = vmatprep.mubr.msk.f32.mxu0 %vm7722_vm7, %v3321_v63  ;;  %vm7726_vm11 = vmmov %vm7722_vm7  ;;  %v7756_v63 = vld [vmem:[#allocation17_spill] sm:$0xff] }
  0xa7   : > { %5766 = vmatpush3.bf16.msra.mxu1 %v6518_v14  ;;  %vm7727_vm13 = vmmov %vm7722_vm7  ;;  %vm7728_vm7 = vnez %v7569_v33  ;;  %v6990_v14 = vld [vmem:[#allocation2 + $0x100] sm:$0xff] }
  0xa8   : > { %5787 = vmatprep.subr.bf16.mxu1 %v6152_v8  ;;  %v1662_v9 = vsel %vm7728_vm7, %v6325_v23, 0.0  ;;  %vm7729_vm6 = vmmov %vm7725_vm10  ;;  %v3327_v23 = vsel %vm6801_vm2, %v6849_v1, 0.0 }
  0xa9   : > { %5395 = vmatmul.mubr.msk.f32.gmra.mrb[2].mxu1 %vm7724_vm12, %v1660_v52  ;;  %5624 = vmatmul.mubr.msk.f32.gmra.mrb[16].mxu0 %vm7725_vm10, %v6814_v60  ;;  %vm7730_vm12 = vmmov %vm7729_vm6 }
  0xaa   : > { %5397 = vmatprep.mubr.msk.f32.mxu1 %vm7726_vm11, %v6330_v28  ;;  %5626 = vmatprep.mubr.msk.f32.mxu0 %vm7727_vm13, %v3323_v53  ;;  %vm7731_vm10 = vmmov %vm7729_vm6  ;;  %vm7733_vm11 = vnez %v7573_v41  ;;  %v3693_v53 = vld [vmem:[#allocation2 + $0x21] sm:$0xff] }
  0xab   : > { %vm7732_vm1 = vmmov %vm7729_vm6  ;;  %v1664_v28 = vsel %vm7733_vm11, %v6349_v34, 0.0  ;;  %v3329_v34 = vsel %vm6824_vm8, %v6870_v39, 0.0 }
  0xac   : > { %vm7734_vm13 = vmmov %vm7732_vm1 }
  0xad   : > { %5398 = vmatmul.mubr.msk.f32.gmra.mrb[4].mxu1 %vm7729_vm6, %v1662_v9  ;;  %5627 = vmatmul.mubr.msk.f32.gmra.mrb[18].mxu0 %vm7730_vm12, %v6837_v18  ;;  %vm7735_vm6 = vmmov %vm7732_vm1  ;;  %v7760_v9 = vld [vmem:[#allocation16_spill] sm:$0xff] }
  0xae   : > { %5400 = vmatprep.mubr.msk.f32.mxu1 %vm7731_vm10, %v6343_v32  ;;  %5629 = vmatprep.mubr.msk.f32.mxu0 %vm7732_vm1, %v3325_v13  ;;  %vm7736_vm12 = vmmov %vm7732_vm1  ;;  %v7763_v13 = vld [vmem:[#allocation18_spill] sm:$0xff] }
  0xaf   : > { %vm7737_vm7 = vmmov %vm7732_vm1  ;;  %vm7738_vm1 = vnez %v7577_v49 }
  0xb0   : > { %v1666_v32 = vsel %vm7738_vm1, %v6372_v42, 0.0  ;;  %vm7739_vm10 = vmmov %vm7735_vm6  ;;  %v3331_v42 = vsel %vm6845_vm9, %v6890_v11, 0.0 }
  0xb1   : > { %5401 = vmatmul.mubr.msk.f32.gmra.mrb[6].mxu1 %vm7734_vm13, %v1664_v28  ;;  %5630 = vmatmul.mubr.msk.f32.gmra.mrb[20].mxu0 %vm7735_vm6, %v6858_v25  ;;  %vm7740_vm13 = vmmov %vm7735_vm6  ;;  %v7764_v28 = vld [vmem:[#allocation23_spill] sm:$0xff] }
  0xb2   : > { %5403 = vmatprep.mubr.msk.f32.mxu1 %vm7736_vm12, %v6366_v40  ;;  %5632 = vmatprep.mubr.msk.f32.mxu0 %vm7737_vm7, %v3327_v23  ;;  %vm7741_vm11 = vmmov %vm7735_vm6  ;;  %vm7742_vm7 = vnez %v7581_v57  ;;  %v3694_v23 = vld [vmem:[#allocation2 + $0x29] sm:$0xff] }
  0xb3   : > { %v1668_v40 = vsel %vm7742_vm7, %v6395_v50, 0.0  ;;  %vm7743_vm12 = vmmov %vm7735_vm6  ;;  %v3333_v50 = vsel %vm6866_vm14, %v6990_v14, 0.0 }
  0xb4   : > { %vm7747_vm7 = vmmov %vm7735_vm6 }
  0xb5   : > { %5404 = vmatmul.mubr.msk.f32.gmra.mrb[8].mxu1 %vm7739_vm10, %v1666_v32  ;;  %5633 = vmatmul.mubr.msk.f32.gmra.mrb[22].mxu0 %vm7740_vm13, %v6878_v54  ;;  %vm7744_vm10 = vmmov %vm7735_vm6  ;;  %v3695_v32 = vld [vmem:[#allocation2 + $0x31] sm:$0xff] }
  0xb6   : > { %5406 = vmatprep.mubr.msk.f32.mxu1 %vm7735_vm6, %v6389_v48  ;;  %5635 = vmatprep.mubr.msk.f32.mxu0 %vm7741_vm11, %v3329_v34  ;;  %vm7745_vm13 = vmmov %vm7735_vm6  ;;  %vm7746_vm11 = vnez %v7585_v4  ;;  %v7768_v34 = vld [vmem:[#allocation22_spill] sm:$0xff] }
  0xb7   : > { %v1670_v48 = vsel %vm7746_vm11, %v6418_v58, 0.0  ;;  %v7013_v58 = vld [vmem:[#allocation2 + $0x108] sm:$0xff]  ;;  %vm7752_vm11 = vmmov %vm7747_vm7 }
  0xb9   : > { %5407 = vmatmul.mubr.msk.f32.gmra.mrb[10].mxu1 %vm7743_vm12, %v1668_v40  ;;  %5636 = vmatmul.mubr.msk.f32.gmra.mrb[24].mxu0 %vm7744_vm10, %v6898_v6  ;;  %vm7748_vm12 = vmmov %vm7735_vm6  ;;  %v7770_v40 = vld [vmem:[#allocation24_spill] sm:$0xff] }
  0xba   : > { %5409 = vmatprep.mubr.msk.f32.mxu1 %vm7745_vm13, %v6412_v56  ;;  %5638 = vmatprep.mubr.msk.f32.mxu0 %vm7735_vm6, %v3331_v42  ;;  %vm7749_vm10 = vmmov %vm7735_vm6  ;;  %v7771_v42 = vld [vmem:[#allocation27_spill] sm:$0xff] }
  0xbb   : > { %vm7750_vm13 = vmmov %vm7735_vm6  ;;  %vm7751_vm6 = vnez %v7591_v20 }
  0xbc   : > { %v1672_v56 = vsel %vm7751_vm6, %v6443_v5, 0.0  ;;  %v3304_v5 = vld [vmem:[#allocation2 + $0x118] sm:$0xff]  ;;  %vm7758_vm6 = vmmov %vm7747_vm7 }
  0xbd   : > { %5410 = vmatmul.mubr.msk.f32.gmra.mrb[12].mxu1 %vm7747_vm7, %v1670_v48  ;;  %5639 = vmatmul.mubr.msk.f32.gmra.mrb[26].mxu0 %vm7748_vm12, %v6912_v43  ;;  %vm7753_vm12 = vmmov %vm7747_vm7 }
  0xbe   : > { %5412 = vmatprep.mubr.msk.f32.mxu1 %vm7749_vm10, %v6437_v3  ;;  %5641 = vmatprep.mubr.msk.f32.mxu0 %vm7750_vm13, %v3333_v50  ;;  %vm7754_vm10 = vmmov %vm7747_vm7  ;;  %v7755_v3 = vld [vmem:[#allocation14_spill] sm:$0xff]  ;;  %vm7757_vm13 = vnez %v7756_v63 }
  0xbf   : > { %v1674_v52 = vsel %vm7757_vm13, %v7755_v3, 0.0  ;;  %vm7759_vm14 = vmmov %vm7758_vm6  ;;  %v3696_v50 = vld [vmem:[#allocation2 + $0x39] sm:$0xff] }
  0xc0   : > { %vm7762_vm0 = vmmov %vm7758_vm6 }
  0xc1   : > { %5413 = vmatmul.mubr.msk.f32.gmra.mrb[14].mxu1 %vm7752_vm11, %v1672_v56  ;;  %5642 = vmatmul.mubr.msk.f32.gmra.mrb[28].mxu0 %vm7747_vm7, %v7013_v58  ;;  %vm7761_vm11 = vmmov %vm7758_vm6  ;;  %vm7765_vm7 = vnez %v7764_v28  ;;  %v7775_v56 = vld [vmem:[#allocation26_spill] sm:$0xff] }
  0xc2   : > { %5415 = vmatprep.mubr.msk.f32.mxu1 %vm7753_vm12, %v6465_v19  ;;  %5644 = vmatprep.mubr.msk.f32.mxu0 %vm7754_vm10, %v3335_v0  ;;  %v1676_v19 = vsel %vm7765_vm7, %v7763_v13, 0.0  ;;  %vm7766_vm12 = vmmov %vm7762_vm0  ;;  %v7779_v0 = vld [vmem:[#allocation32_spill] sm:$0xff]  ;;  %v7786_v13 = vld [vmem:[#allocation37_spill] sm:$0xff] }
  0xc3   : > { %vm7767_vm10 = vmmov %vm7762_vm0 }
  0xc4   : > { %vm7774_vm7 = vmmov %vm7762_vm0 }
  0xc5   : > { %5416 = vmatmul.mubr.msk.f32.gmra.mrb[16].mxu1 %vm7758_vm6, %v1674_v52  ;;  %5645 = vmatmul.mubr.msk.f32.gmra.mrb[30].mxu0 %vm7759_vm14, %v3304_v5  ;;  %vm7769_vm6 = vmmov %vm7762_vm0  ;;  %vm7772_vm14 = vnez %v7771_v42  ;;  %v3698_v52 = vld [vmem:[#allocation2 + $0x49] sm:$0xff]  ;;  %v3699_v5 = vld [vmem:[#allocation2 + $0x51] sm:$0xff] }
  0xc6   : > { %5418 = vmatprep.mubr.msk.f32.mxu1 %vm7761_vm11, %v7760_v9  ;;  %5651 = vmatprep.mubr.msk.f32.mxu0 %vm7762_vm0, %v3693_v53  ;;  %v1678_v48 = vsel %vm7772_vm14, %v7770_v40, 0.0  ;;  %vm7773_vm11 = vmmov %vm7762_vm0  ;;  %v7783_v53 = vld [vmem:[#allocation31_spill] sm:$0xff]  ;;  %v7785_v9 = vld [vmem:[#allocation33_spill] sm:$0xff] }
  0xc7   : > { %vm7781_vm14 = vmmov %vm7762_vm0  ;;  %v7793_v40 = vld [vmem:[#allocation38_spill] sm:$0xff] }
  0xc8   : > { %vm7782_vm13 = vmmov %vm7762_vm0 }
  0xc9   : > { %5419 = vmatmul.mubr.msk.f32.gmra.mrb[18].mxu1 %vm7766_vm12, %v1676_v19  ;;  %5652 = vmatmul.mubr.msk.f32.vlgmr.msra.gmra.mrb[0].mxu0 %vm7767_vm10, %v3694_v23  ;;  %vm7776_vm12 = vmmov %vm7762_vm0  ;;  %v3700_v23 = vld [vmem:[#allocation2 + $0x59] sm:$0xff] }
  0xca   : > { %5786 = vmatpush3.bf16.msra.mxu0 %v6796_v10  ;;  %5421 = vmatprep.mubr.msk.f32.mxu1 %vm7769_vm6, %v7768_v34  ;;  %vm7777_vm10 = vmmov %vm7762_vm0  ;;  %v7778_v10 = vld [vmem:[#allocation28_spill] sm:$0xff]  ;;  %vm7780_vm6 = vnez %v7779_v0 }
  0xcb   : > { %5654 = vmatprep.mubr.msk.f32.mxu0 %vm7762_vm0, %v3695_v32  ;;  %v1680_v3 = vsel %vm7780_vm6, %v7778_v10, 0.0  ;;  %v3701_v32 = vld [vmem:[#allocation2 + $0x61] sm:$0xff]  ;;  %v7790_v34 = vld [vmem:[#allocation36_spill] sm:$0xff]  ;;  %vm7791_vm6 = vmmov %vm7762_vm0 }
  0xcc   : > { %v7797_v10 = vld [vmem:[#allocation40_spill] sm:$0xff] }
  0xcd   : > { %5422 = vmatmul.mubr.msk.f32.gmra.mrb[20].mxu1 %vm7773_vm11, %v1678_v48  ;;  %5655 = vmatmul.mubr.msk.f32.gmra.mrb[2].mxu0 %vm7774_vm7, %v3696_v50  ;;  %vm7784_vm11 = vmmov %vm7762_vm0  ;;  %vm7787_vm7 = vnez %v7786_v13  ;;  %v7794_v48 = vld [vmem:[#allocation41_spill] sm:$0xff] }
  0xce   : > { %5424 = vmatprep.mubr.msk.f32.mxu1 %vm7776_vm12, %v7775_v56  ;;  %5657 = vmatprep.mubr.msk.f32.mxu0 %vm7777_vm10, %v3697_v36  ;;  %v1682_v19 = vsel %vm7787_vm7, %v7785_v9, 0.0  ;;  %vm7788_vm12 = vmmov %vm7762_vm0  ;;  %v3702_v36 = vld [vmem:[#allocation2 + $0x69] sm:$0xff]  ;;  %v3703_v56 = vld [vmem:[#allocation2 + $0x71] sm:$0xff] }
  0xcf   : > { %vm7789_vm10 = vmmov %vm7762_vm0  ;;  %v3705_v9 = vld [vmem:[#allocation2 + $0x81] sm:$0xff] }
  0xd0   : > { %vm7798_vm7 = vmmov %vm7762_vm0 }
  0xd1   : > { %5425 = vmatmul.mubr.msk.f32.gmra.mrb[22].mxu1 %vm7781_vm14, %v1680_v3  ;;  %5658 = vmatmul.mubr.msk.f32.gmra.mrb[4].mxu0 %vm7782_vm13, %v3698_v52  ;;  %vm7792_vm14 = vmmov %vm7762_vm0  ;;  %vm7795_vm13 = vnez %v7794_v48  ;;  %v7800_v3 = vld [vmem:[#allocation42_spill] sm:$0xff]  ;;  %v7818_v48 = vld [vmem:[#allocation21_spill] sm:$0xff] }
  0xd2   : > { %5427 = vmatprep.mubr.msk.f32.mxu1 %vm7762_vm0, %v7783_v53  ;;  %5660 = vmatprep.mubr.msk.f32.mxu0 %vm7784_vm11, %v3699_v5  ;;  %v1684_v50 = vsel %vm7795_vm13, %v7793_v40, 0.0  ;;  %vm7796_vm11 = vmmov %vm7762_vm0  ;;  %v7801_v52 = vld [vmem:[#allocation46_spill] sm:$0xff] }
  0xd3   : > { %v3704_v53 = vld [vmem:[#allocation2 + $0x79] sm:$0xff]  ;;  %vm7806_vm13 = vmmov %vm7762_vm0 }
  0xd5   : > { %5428 = vmatmul.mubr.msk.f32.gmra.mrb[24].mxu1 %vm7788_vm12, %v1682_v19  ;;  %5661 = vmatmul.mubr.msk.f32.gmra.mrb[6].mxu0 %vm7789_vm10, %v3700_v23  ;;  %vm7799_vm12 = vmmov %vm7762_vm0  ;;  %v7805_v19 = vld [vmem:[#allocation45_spill] sm:$0xff]  ;;  %v7807_v23 = vld [vmem:[#allocation47_spill] sm:$0xff] }
  0xd6   : > { %5430 = vmatprep.mubr.msk.f32.mxu1 %vm7791_vm6, %v7790_v34  ;;  %5663 = vmatprep.mubr.msk.f32.mxu0 %vm7792_vm14, %v3701_v32  ;;  %vm7802_vm6 = vnez %v7801_v52  ;;  %vm7803_vm10 = vmmov %vm7762_vm0  ;;  %v7808_v32 = vld [vmem:[#allocation49_spill] sm:$0xff]  ;;  %v7812_v52 = vld [vmem:[#allocation12_spill] sm:$0xff] }
  0xd7   : > { %v1686_v5 = vsel %vm7802_vm6, %v7800_v3, 0.0  ;;  %vm7804_vm14 = vmmov %vm7762_vm0 }
  0xd8   : > { %vm7841_vm6 = vmmov %vm7762_vm0 }
  0xd9   : > { %5431 = vmatmul.mubr.msk.f32.gmra.mrb[26].mxu1 %vm7762_vm0, %v1684_v50  ;;  %5664 = vmatmul.mubr.msk.f32.gmra.mrb[8].mxu0 %vm7796_vm11, %v3702_v36  ;;  %v3706_v36 = vld [vmem:[#allocation2 + $0x89] sm:$0xff]  ;;  %vm7810_vm11 = vmmov %vm7762_vm0 }
  0xda   : > { %5433 = vmatprep.mubr.msk.f32.mxu1 %vm7798_vm7, %v7797_v10  ;;  %5666 = vmatprep.mubr.msk.f32.mxu0 %vm7799_vm12, %v3703_v56  ;;  %vm7809_vm7 = vnez %v7808_v32  ;;  %v7083_v56 = vld [vmem:[#allocation2 + $0x91] sm:$0xff]  ;;  %vm7811_vm12 = vmmov %vm7762_vm0  ;;  %v7096_v32 = vld [vmem:[#allocation2 + $0xa1] sm:$0xff] }
  0xdb   : > { %v1688_v50 = vsel %vm7809_vm7, %v7807_v23, 0.0  ;;  %vm7836_vm7 = vmmov %vm7762_vm0 }
  0xdd   : > { %5434 = vmatmul.mubr.msk.f32.gmra.mrb[28].mxu1 %vm7803_vm10, %v1686_v5  ;;  %5667 = vmatmul.mubr.msk.f32.gmra.mrb[10].mxu0 %vm7804_vm14, %v3704_v53  ;;  %vm7813_vm10 = vnez %v7812_v52  ;;  %v7814_v5 = vld [vmem:[#allocation15_spill] sm:$0xff]  ;;  %vm7816_vm14 = vmmov %vm7762_vm0  ;;  %v7821_v52 = vld [vmem:[#allocation20_spill] sm:$0xff] }
  0xde   : > { %5436 = vmatprep.mubr.msk.f32.mxu1 %vm7806_vm13, %v7805_v19  ;;  %5669 = vmatprep.mubr.msk.f32.mxu0 %vm7762_vm0, %v3705_v9  ;;  %v7815_v53 = vsel %vm7813_vm10, %v7814_v5, 0.0  ;;  %vm7817_vm13 = vmmov %vm7762_vm0  ;;  %v7094_v9 = vld [vmem:[#allocation2 + $0x99] sm:$0xff] }
  0xdf   : > { %vm7823_vm10 = vmmov %vm7762_vm0 }
  0xe1   : > { %5437 = vmatmul.mubr.msk.f32.gmra.mrb[30].mxu1 %vm7810_vm11, %v1688_v50  ;;  %5670 = vmatmul.mubr.msk.f32.gmra.mrb[12].mxu0 %vm7811_vm12, %v3706_v36  ;;  %vm7819_vm11 = vmmov %vm7762_vm0  ;;  %vm7820_vm12 = vnez %v7594_v29  ;;  %v7109_v36 = vld [vmem:[#allocation2 + $0xa9] sm:$0xff]  ;;  %v7828_v29 = vld [vmem:[#allocation25_spill] sm:$0xff] }
  0xe2   : > { %5443 = vmatprep.mubr.msk.f32.mxu1 %vm7816_vm14, %v7815_v53  ;;  %5672 = vmatprep.mubr.msk.f32.mxu0 %vm7817_vm13, %v7083_v56  ;;  %v7822_v50 = vsel %vm7820_vm12, %v7821_v52, 0.0  ;;  %vm7824_vm14 = vmmov %vm7762_vm0  ;;  %v7831_v53 = vld [vmem:[#allocation3_spill] sm:$0xff]  ;;  %v7833_v52 = vld [vmem:[#allocation30_spill] sm:$0xff] }
  0xe3   : > { %vm7825_vm13 = vmmov %vm7762_vm0 }
  0xe4   : > { %vm7830_vm12 = vmmov %vm7762_vm0 }
  0xe5   : > { %5444 = vmatmul.mubr.msk.f32.vlgmr.msra.gmra.mrb[0].mxu1 %vm7762_vm0, %v7818_v48  ;;  %5673 = vmatmul.mubr.msk.f32.gmra.mrb[14].mxu0 %vm7819_vm11, %v7094_v9  ;;  %v7826_v48 = vld [vmem:[#allocation19_spill] sm:$0xff] }
  0xe6   : > { %5446 = vmatprep.mubr.msk.f32.mxu1 %vm7823_vm10, %v7822_v50  ;;  %5675 = vmatprep.mubr.msk.f32.mxu0 %vm7824_vm14, %v7096_v32  ;;  %vm7827_vm11 = vnez %v7826_v48  ;;  %vm7832_vm10 = vmmov %vm7762_vm0  ;;  %v7835_v50 = vld [vmem:[#allocation4_spill] sm:$0xff]  ;;  %v7840_v48 = vld [vmem:[#allocation5_spill] sm:$0xff] }
  0xe7   : > { %5788 = vmatpush3.bf16.msra.mxu1 %v6152_v8  ;;  %v7829_v5 = vsel %vm7827_vm11, %v7828_v29, 0.0  ;;  %vm7834_vm14 = vmmov %vm7762_vm0  ;;  %v7838_v8 = vld [vmem:[#allocation29_spill] sm:$0xff]  ;;  %v7842_v29 = vld [vmem:[#allocation35_spill] sm:$0xff] }
  0xe8   : > { %vm7843_vm11 = vmmov %vm7762_vm0 }
  0xe9   : > { %5447 = vmatmul.mubr.msk.f32.gmra.mrb[2].mxu1 %vm7825_vm13, %v6563_v62  ;;  %5676 = vmatmul.mubr.msk.f32.gmra.mrb[16].mxu0 %vm7762_vm0, %v7109_v36  ;;  %vm7837_vm13 = vnez %v7612_v46  ;;  %v7850_v46 = vld [vmem:[#allocation7_spill] sm:$0xff] }
  0xea   : > { %5449 = vmatprep.mubr.msk.f32.mxu1 %vm7830_vm12, %v7829_v5  ;;  %5678 = vmatprep.mubr.msk.f32.mxu0 %vm7832_vm10, %v7831_v53  ;;  %v7839_v62 = vsel %vm7837_vm13, %v7838_v8, 0.0  ;;  %v7844_v5 = vld [vmem:[#allocation6_spill] sm:$0xff]  ;;  %vm7845_vm12 = vmmov %vm7762_vm0  ;;  %vm7846_vm10 = vnez %v7620_v16  ;;  %v7856_v8 = vld [vmem:[#allocation39_spill] sm:$0xff] }
  0xeb   : > { %v7847_v53 = vld [vmem:[#allocation34_spill] sm:$0xff]  ;;  %vm7852_vm13 = vmmov %vm7762_vm0  ;;  %v7859_v16 = vld [vmem:[#allocation9_spill] sm:$0xff] }
  0xed   : > { %5450 = vmatmul.mubr.msk.f32.gmra.mrb[4].mxu1 %vm7834_vm14, %v7833_v52  ;;  %5679 = vmatmul.mubr.msk.f32.gmra.mrb[18].mxu0 %vm7836_vm7, %v7835_v50  ;;  %v7848_v52 = vsel %vm7846_vm10, %v7847_v53, 0.0  ;;  %vm7849_vm7 = vmmov %vm7762_vm0  ;;  %v7853_v50 = vld [vmem:[#allocation8_spill] sm:$0xff]  ;;  %v7167_v53 = vld [vmem:[#allocation2 + $0x101] sm:$0xff] }
  0xee   : > { %5452 = vmatprep.mubr.msk.f32.mxu1 %vm7762_vm0, %v7839_v62  ;;  %5681 = vmatprep.mubr.msk.f32.mxu0 %vm7841_vm6, %v7840_v48  ;;  %vm7851_vm14 = vmmov %vm7762_vm0  ;;  %v7861_v48 = vld [vmem:[#allocation44_spill] sm:$0xff] }
  0xef   : > { %vm7854_vm6 = vmmov %vm7762_vm0  ;;  %vm7855_vm0 = vnez %v7633_v45  ;;  %v7869_v45 = vld [vmem:[#allocation11_spill] sm:$0xff] }
  0xf0   : > { %v7857_v62 = vsel %vm7855_vm0, %v7856_v8, 0.0  ;;  %vm7862_vm10 = vmmov %vm7854_vm6  ;;  %v4082_v8 = vld [vmem:[#allocation2 + $0x2a] sm:$0xff] }
  0xf1   : > { %5453 = vmatmul.mubr.msk.f32.gmra.mrb[6].mxu1 %vm7843_vm11, %v7842_v29  ;;  %5682 = vmatmul.mubr.msk.f32.gmra.mrb[20].mxu0 %vm7845_vm12, %v7844_v5  ;;  %vm7858_vm11 = vmmov %vm7854_vm6  ;;  %v7863_v29 = vld [vmem:[#allocation10_spill] sm:$0xff]  ;;  %v4114_v55 = vsel %vm7885_vm4, %v4082_v8, 0.0 }
  0xf2   : > { %5455 = vmatprep.mubr.msk.f32.mxu1 %vm7849_vm7, %v7848_v52  ;;  %5684 = vmatprep.mubr.msk.f32.mxu0 %vm7851_vm14, %v7850_v46  ;;  %vm7860_vm12 = vmmov %vm7854_vm6  ;;  %vm7865_vm14 = vnez %v7645_v7  ;;  %v7871_v52 = vld [vmem:[#allocation13_spill] sm:$0xff]  ;;  %v7873_v46 = vsel %vm6679_vm5, %v6715_v35, 0.0  ;;  %v7180_v7 = vld [vmem:[#allocation2 + $0x109] sm:$0xff] }
  0xf3   : > { %vm7864_vm7 = vmmov %vm7854_vm6  ;;  %v3724_v35 = vld [vmem:[#allocation2 + $0x119] sm:$0xff] }
  0xf4   : > { %vm7870_vm0 = vmmov %vm7854_vm6 }
  0xf5   : > { %5456 = vmatmul.mubr.msk.f32.gmra.mrb[8].mxu1 %vm7852_vm13, %v6662_v37  ;;  %5685 = vmatmul.mubr.msk.f32.gmra.mrb[22].mxu0 %vm7854_vm6, %v7853_v50  ;;  %v7866_v37 = vld [vmem:[#allocation43_spill] sm:$0xff]  ;;  %vm7868_vm13 = vmmov %vm7854_vm6  ;;  %v3723_v50 = vld [vmem:[#allocation2 + $0x111] sm:$0xff] }
  0xf6   : > { %5458 = vmatprep.mubr.msk.f32.mxu1 %vm7858_vm11, %v7857_v62  ;;  %5687 = vmatprep.mubr.msk.f32.mxu0 %vm7860_vm12, %v7859_v16  ;;  %v7867_v5 = vsel %vm7865_vm14, %v7866_v37, 0.0  ;;  %vm7872_vm11 = vmmov %vm7870_vm0  ;;  %v4083_v62 = vld [vmem:[#allocation2 + $0x32] sm:$0xff]  ;;  %v4084_v16 = vld [vmem:[#allocation2 + $0x3a] sm:$0xff] }
  0xf7   : > { %vm7874_vm12 = vmmov %vm7870_vm0  ;;  %v2489_v37 = vld [vmem:[#allocation2 + $0xd1] sm:$0xff] }
  0xf8   : > { %vm7877_vm14 = vmmov %vm7870_vm0 }
  0xf9   : > { %5459 = vmatmul.mubr.msk.f32.gmra.mrb[10].mxu1 %vm7862_vm10, %v7861_v48  ;;  %5688 = vmatmul.mubr.msk.f32.gmra.mrb[24].mxu0 %vm7864_vm7, %v7863_v29  ;;  %vm7875_vm10 = vmmov %vm7870_vm0  ;;  %v4101_v48 = vld [vmem:[#allocation2 + $0xc2] sm:$0xff] }
  0xfa   : > { %5461 = vmatprep.mubr.msk.f32.mxu1 %vm7868_vm13, %v7867_v5  ;;  %5690 = vmatprep.mubr.msk.f32.mxu0 %vm7854_vm6, %v7869_v45  ;;  %vm7876_vm7 = vmmov %vm7870_vm0  ;;  %v2491_v45 = vld [vmem:[#allocation2 + $0xe1] sm:$0xff] }
  0xfb   : > { %vm7879_vm13 = vmmov %vm7870_vm0 }
  0xfc   : > { %vm7880_vm5 = vmmov %vm7870_vm0 }
  0xfd   : > { %5462 = vmatmul.mubr.msk.f32.gmra.mrb[12].mxu1 %vm7870_vm0, %v6727_v17  ;;  %5691 = vmatmul.mubr.msk.f32.gmra.mrb[26].mxu0 %vm7872_vm11, %v7871_v52  ;;  %v4081_v17 = vld [vmem:[#allocation2 + $0x22] sm:$0xff]  ;;  %vm7881_vm6 = vmmov %vm7870_vm0  ;;  %v2493_v52 = vld [vmem:[#allocation2 + $0xf1] sm:$0xff] }
  0xfe   : > { %5464 = vmatprep.mubr.msk.f32.mxu1 %vm7874_vm12, %v7873_v46  ;;  %5693 = vmatprep.mubr.msk.f32.mxu0 %vm7875_vm10, %v7167_v53  ;;  %vm7883_vm11 = vmmov %vm7870_vm0  ;;  %v7955_v46 = vld [vmem:[#allocation46_spill] sm:$0xff] }
  0xff   : > { %vm7884_vm12 = vmmov %vm7870_vm0 }
 0x100   : > { %vm7886_vm10 = vmmov %vm7870_vm0 }
 0x101   : > { %5465 = vmatmul.mubr.msk.f32.gmra.mrb[14].mxu1 %vm7876_vm7, %v6759_v61  ;;  %5694 = vmatmul.mubr.msk.f32.gmra.mrb[28].mxu0 %vm7877_vm14, %v7180_v7  ;;  %v7882_v61 = vsel %vm6743_vm15, %v6774_v51, 0.0  ;;  %vm7887_vm7 = vmmov %vm7870_vm0  ;;  %v4086_v51 = vld [vmem:[#allocation2 + $0x4a] sm:$0xff] }
 0x102   : > { %5467 = vmatprep.mubr.msk.f32.mxu1 %vm7879_vm13, %v7878_v15  ;;  %5696 = vmatprep.mubr.msk.f32.mxu0 %vm7880_vm5, %v3723_v50  ;;  %vm7888_vm14 = vmmov %vm7870_vm0  ;;  %vm7890_vm13 = vnez %v7566_v22  ;;  %v2101_v22 = vsel %vm6824_vm8, %v6849_v1, 0.0  ;;  %v4090_v1 = vld [vmem:[#allocation2 + $0x6a] sm:$0xff]  ;;  %v4112_v15 = vld [vmem:[#allocation2 + $0x11a] sm:$0xff] }
 0x103   : > { %vm7889_vm15 = vmmov %vm7870_vm0  ;;  %v4116_v47 = vsel %vm7890_vm13, %v4084_v16, 0.0  ;;  %v4122_v27 = vsel %vm7738_vm1, %v4090_v1, 0.0  ;;  %vm7909_vm1 = vnez %v7708_v59 }
 0x104   : > { %vm7891_vm3 = vmmov %vm7870_vm0  ;;  %v2107_v49 = vsel %vm7909_vm1, %v6990_v14, 0.0  ;;  %v2485_v14 = vld [vmem:[#allocation2 + $0xb1] sm:$0xff] }
 0x105   : > { %5468 = vmatmul.mubr.msk.f32.gmra.mrb[16].mxu1 %vm7881_vm6, %v6791_v38  ;;  %5697 = vmatmul.mubr.msk.f32.gmra.mrb[30].mxu0 %vm7870_vm0, %v3724_v35  ;;  %vm7892_vm5 = vmmov %vm7870_vm0  ;;  %v4088_v38 = vld [vmem:[#allocation2 + $0x5a] sm:$0xff] }
 0x106   : > { %5470 = vmatprep.mubr.msk.f32.mxu1 %vm7883_vm11, %v7882_v61  ;;  %5703 = vmatprep.mubr.msk.f32.mxu0 %vm7884_vm12, %v4081_v17  ;;  %vm7893_vm6 = vmmov %vm7870_vm0  ;;  %vm7894_vm11 = vnez %v7569_v33  ;;  %v2103_v33 = vsel %vm6845_vm9, %v6870_v39, 0.0  ;;  %v4092_v39 = vld [vmem:[#allocation2 + $0x7a] sm:$0xff] }
 0x107   : > { %v4118_v26 = vsel %vm7894_vm11, %v4086_v51, 0.0  ;;  %vm7895_vm2 = vmmov %vm7870_vm0  ;;  %vm7908_vm11 = vnez %v7581_v57  ;;  %v4095_v57 = vld [vmem:[#allocation2 + $0x92] sm:$0xff] }
 0x108   : > { %vm7896_vm12 = vmmov %vm7870_vm0 }
 0x109   : > { %5471 = vmatmul.mubr.msk.f32.gmra.mrb[18].mxu1 %vm7886_vm10, %v6814_v60  ;;  %5704 = vmatmul.mubr.msk.f32.vlgmr.msra.gmra.mrb[0].mxu0 %vm7887_vm7, %v4114_v55  ;;  %vm7897_vm4 = vmmov %vm7870_vm0  ;;  %vm7899_vm7 = vnez %v7573_v41 }
 0x10a   : > { %5473 = vmatprep.mubr.msk.f32.mxu1 %vm7888_vm14, %v2097_v31  ;;  %5706 = vmatprep.mubr.msk.f32.mxu0 %vm7889_vm15, %v4083_v62  ;;  %vm7898_vm10 = vmmov %vm7870_vm0  ;;  %v4120_v60 = vsel %vm7899_vm7, %v4088_v38, 0.0  ;;  %vm7914_vm7 = vnez %v7585_v4 }
 0x10b   : > { %vm7900_vm8 = vmmov %vm7870_vm0 }
 0x10c   : > { %vm7901_vm14 = vmmov %vm7870_vm0 }
 0x10d   : > { %5474 = vmatmul.mubr.msk.f32.gmra.mrb[20].mxu1 %vm7891_vm3, %v6837_v18  ;;  %5707 = vmatmul.mubr.msk.f32.gmra.mrb[2].mxu0 %vm7892_vm5, %v4116_v47  ;;  %vm7902_vm15 = vmmov %vm7870_vm0  ;;  %vm7904_vm3 = vnez %v7703_v24  ;;  %v4124_v18 = vsel %vm7908_vm11, %v4092_v39, 0.0  ;;  %vm7923_vm11 = vnez %v7756_v63  ;;  %v4102_v63 = vld [vmem:[#allocation2 + $0xca] sm:$0xff] }
 0x10e   : > { %5476 = vmatprep.mubr.msk.f32.mxu1 %vm7893_vm6, %v2099_v12  ;;  %5709 = vmatprep.mubr.msk.f32.mxu0 %vm7870_vm0, %v4085_v30  ;;  %vm7903_vm13 = vmmov %vm7870_vm0  ;;  %v2105_v41 = vsel %vm7904_vm3, %v6890_v11, 0.0  ;;  %v4094_v11 = vld [vmem:[#allocation2 + $0x8a] sm:$0xff]  ;;  %vm7919_vm3 = vnez %v7591_v20  ;;  %v2486_v20 = vld [vmem:[#allocation2 + $0xb9] sm:$0xff] }
 0x10f   : > { %vm7905_vm9 = vmmov %vm7870_vm0  ;;  %v4126_v24 = vsel %vm7914_vm7, %v4094_v11, 0.0 }
 0x110   : > { %vm7906_vm5 = vmmov %vm7870_vm0 }
 0x111   : > { %5477 = vmatmul.mubr.msk.f32.gmra.mrb[22].mxu1 %vm7895_vm2, %v6858_v25  ;;  %5710 = vmatmul.mubr.msk.f32.gmra.mrb[4].mxu0 %vm7896_vm12, %v4118_v26  ;;  %vm7907_vm6 = vmmov %vm7870_vm0  ;;  %v4093_v25 = vld [vmem:[#allocation2 + $0x82] sm:$0xff] }
 0x112   : > { %5479 = vmatprep.mubr.msk.f32.mxu1 %vm7897_vm4, %v2101_v22  ;;  %5712 = vmatprep.mubr.msk.f32.mxu0 %vm7898_vm10, %v4087_v21  ;;  %vm7910_vm2 = vmmov %vm7870_vm0 }
 0x113   : > { %vm7911_vm12 = vmmov %vm7870_vm0 }
 0x114   : > { %vm7912_vm4 = vmmov %vm7870_vm0 }
 0x115   : > { %5480 = vmatmul.mubr.msk.f32.gmra.mrb[24].mxu1 %vm7900_vm8, %v6878_v54  ;;  %5713 = vmatmul.mubr.msk.f32.gmra.mrb[6].mxu0 %vm7901_vm14, %v4120_v60  ;;  %vm7913_vm10 = vmmov %vm7870_vm0  ;;  %v4096_v54 = vld [vmem:[#allocation2 + $0x9a] sm:$0xff] }
 0x116   : > { %5482 = vmatprep.mubr.msk.f32.mxu1 %vm7902_vm15, %v2103_v33  ;;  %5715 = vmatprep.mubr.msk.f32.mxu0 %vm7903_vm13, %v4089_v44  ;;  %vm7915_vm8 = vmmov %vm7870_vm0  ;;  %v4128_v59 = vsel %vm7919_vm3, %v4096_v54, 0.0  ;;  %v7343_v60 = vld [vmem:[%s7457_s2] ss:$0 sm:$0xff] }
 0x117   : > { %vm7916_vm14 = vmmov %vm7870_vm0 }
 0x118   : > { %vm7917_vm15 = vmmov %vm7870_vm0 }
 0x119   : > { %5483 = vmatmul.mubr.msk.f32.gmra.mrb[26].mxu1 %vm7905_vm9, %v6898_v6  ;;  %5716 = vmatmul.mubr.msk.f32.gmra.mrb[8].mxu0 %vm7906_vm5, %v4122_v27  ;;  %vm7918_vm13 = vmmov %vm7870_vm0  ;;  %v4097_v6 = vld [vmem:[#allocation2 + $0xa2] sm:$0xff] }
 0x11a   : > { %5485 = vmatprep.mubr.msk.f32.mxu1 %vm7907_vm6, %v2105_v41  ;;  %5718 = vmatprep.mubr.msk.f32.mxu0 %vm7870_vm0, %v4091_v2  ;;  %vm7920_vm9 = vmmov %vm7870_vm0 }
 0x11b   : > { %vm7921_vm5 = vmmov %vm7870_vm0 }
 0x11c   : > { %vm7922_vm6 = vmmov %vm7870_vm0 }
 0x11d   : > { %5486 = vmatmul.mubr.msk.f32.gmra.mrb[28].mxu1 %vm7910_vm2, %v6912_v43  ;;  %5719 = vmatmul.mubr.msk.f32.gmra.mrb[10].mxu0 %vm7911_vm12, %v4124_v18  ;;  %v4098_v43 = vld [vmem:[#allocation2 + $0xaa] sm:$0xff]  ;;  %vm7924_vm1 = vmmov %vm7870_vm0 }
 0x11e   : > { %5488 = vmatprep.mubr.msk.f32.mxu1 %vm7912_vm4, %v2107_v49  ;;  %5721 = vmatprep.mubr.msk.f32.mxu0 %vm7913_vm10, %v4093_v25  ;;  %v4130_v4 = vsel %vm7923_vm11, %v4098_v43, 0.0  ;;  %vm7925_vm2 = vmmov %vm7870_vm0  ;;  %vm7928_vm10 = vnez %v7764_v28  ;;  %v2490_v28 = vld [vmem:[#allocation2 + $0xd9] sm:$0xff] }
 0x11f   : > { %vm7926_vm12 = vmmov %vm7870_vm0 }
 0x120   : > { %vm7927_vm4 = vmmov %vm7870_vm0 }
 0x121   : > { %5489 = vmatmul.mubr.msk.f32.gmra.mrb[30].mxu1 %vm7915_vm8, %v7013_v58  ;;  %5722 = vmatmul.mubr.msk.f32.gmra.mrb[12].mxu0 %vm7916_vm14, %v4126_v24  ;;  %v4099_v58 = vld [vmem:[#allocation2 + $0xb2] sm:$0xff]  ;;  %vm7929_vm7 = vmmov %vm7870_vm0 }
 0x122   : > { %5519 = vmatprep.mubr.msk.f32.mxu1 %vm7917_vm15, %v7083_v56  ;;  %5724 = vmatprep.mubr.msk.f32.mxu0 %vm7918_vm13, %v4095_v57  ;;  %v4100_v56 = vld [vmem:[#allocation2 + $0xba] sm:$0xff]  ;;  %vm7930_vm8 = vmmov %vm7870_vm0  ;;  %vm7933_vm13 = vnez %v7771_v42  ;;  %v2492_v42 = vld [vmem:[#allocation2 + $0xe9] sm:$0xff] }
 0x123   : > { %vm7931_vm14 = vmmov %vm7870_vm0  ;;  %v4134_v29 = vsel %vm7933_vm13, %v4102_v63, 0.0 }
 0x124   : > { %vm7932_vm15 = vmmov %vm7870_vm0 }
 0x125   : > { %5520 = vmatmul.mubr.msk.f32.vlgmr.msra.gmra.mrb[16].mxu1 %vm7920_vm9, %v7094_v9  ;;  %5725 = vmatmul.mubr.msk.f32.gmra.mrb[14].mxu0 %vm7921_vm5, %v4128_v59  ;;  %v2487_v9 = vld [vmem:[#allocation2 + $0xc1] sm:$0xff]  ;;  %vm7934_vm3 = vmmov %vm7870_vm0 }
 0x126   : > { %5522 = vmatprep.mubr.msk.f32.mxu1 %vm7922_vm6, %v7096_v32  ;;  %5727 = vmatprep.mubr.msk.f32.mxu0 %vm7870_vm0, %v4097_v6  ;;  %v4132_v32 = vsel %vm7928_vm10, %v4100_v56, 0.0  ;;  %vm7935_vm9 = vmmov %vm7870_vm0 }
 0x127   : > { %vm7936_vm5 = vmmov %vm7870_vm0 }
 0x128   : > { %vm7937_vm6 = vmmov %vm7870_vm0  ;;  %vm7938_vm0 = vnez %v7779_v0  ;;  %v2494_v0 = vld [vmem:[#allocation2 + $0xf9] sm:$0xff] }
 0x129   : > { %5523 = vmatmul.mubr.msk.f32.gmra.mrb[18].mxu1 %vm7924_vm1, %v7109_v36  ;;  %5728 = vmatmul.mubr.msk.f32.gmra.mrb[16].mxu0 %vm7925_vm2, %v4130_v4  ;;  %v2488_v36 = vld [vmem:[#allocation2 + $0xc9] sm:$0xff]  ;;  %v4136_v5 = vsel %vm7938_vm0, %v7793_v40, 0.0  ;;  %vm7939_vm11 = vmmov %vm7924_vm1  ;;  %v7947_v40 = vld [vmem:[#allocation41_spill] sm:$0xff] }
 0x12a   : > { %5525 = vmatprep.mubr.msk.f32.mxu1 %vm7926_vm12, %v2485_v14  ;;  %5730 = vmatprep.mubr.msk.f32.mxu0 %vm7927_vm4, %v4099_v58  ;;  %vm7940_vm2 = vmmov %vm7924_vm1  ;;  %vm7942_vm4 = vnez %v7786_v13  ;;  %v7952_v13 = vld [vmem:[#allocation48_spill] sm:$0xff] }
 0x12b   : > { %vm7941_vm12 = vmmov %vm7924_vm1 }
 0x12c   : > { %vm7943_vm10 = vmmov %vm7924_vm1 }
 0x12d   : > { %5526 = vmatmul.mubr.msk.f32.gmra.mrb[20].mxu1 %vm7929_vm7, %v2486_v20  ;;  %5731 = vmatmul.mubr.msk.f32.gmra.mrb[18].mxu0 %vm7930_vm8, %v4132_v32  ;;  %vm7944_vm7 = vmmov %vm7924_vm1 }
 0x12e   : > { %5528 = vmatprep.mubr.msk.f32.mxu1 %vm7931_vm14, %v2487_v9  ;;  %5733 = vmatprep.mubr.msk.f32.mxu0 %vm7932_vm15, %v4101_v48  ;;  %vm7945_vm8 = vmmov %vm7924_vm1  ;;  %vm7948_vm15 = vnez %v7947_v40 }
 0x12f   : > { %vm7946_vm14 = vmmov %vm7924_vm1 }
 0x130   : > { %vm7949_vm13 = vmmov %vm7924_vm1 }
 0x131   : > { %5529 = vmatmul.mubr.msk.f32.gmra.mrb[22].mxu1 %vm7934_vm3, %v2488_v36  ;;  %5734 = vmatmul.mubr.msk.f32.gmra.mrb[20].mxu0 %vm7935_vm9, %v4134_v29  ;;  %vm7950_vm3 = vmmov %vm7924_vm1 }
 0x132   : > { %5531 = vmatprep.mubr.msk.f32.mxu1 %vm7936_vm5, %v2489_v37  ;;  %5736 = vmatprep.mubr.msk.f32.mxu0 %vm7937_vm6, %v7790_v34  ;;  %v4138_v34 = vsel %vm7942_vm4, %v7800_v3, 0.0  ;;  %vm7951_vm9 = vmmov %vm7924_vm1  ;;  %v7954_v3 = vld [vmem:[#allocation50_spill] sm:$0xff]  ;;  %vm7956_vm6 = vnez %v7955_v46 }
 0x133   : > { %vm7953_vm5 = vmmov %vm7924_vm1  ;;  %v4142_v50 = vsel %vm7956_vm6, %v7954_v3, 0.0 }
 0x134   : > { %vm7957_vm0 = vmmov %vm7924_vm1 }
 0x135   : > { %5532 = vmatmul.mubr.msk.f32.gmra.mrb[24].mxu1 %vm7939_vm11, %v2490_v28  ;;  %5737 = vmatmul.mubr.msk.f32.gmra.mrb[22].mxu0 %vm7924_vm1, %v4136_v5  ;;  %vm7958_vm11 = vmmov %vm7957_vm0 }
 0x136   : > { %5534 = vmatprep.mubr.msk.f32.mxu1 %vm7940_vm2, %v2491_v45  ;;  %5739 = vmatprep.mubr.msk.f32.mxu0 %vm7941_vm12, %v7797_v10  ;;  %v4140_v10 = vsel %vm7948_vm15, %v7807_v23, 0.0  ;;  %vm7959_vm1 = vmmov %vm7957_vm0  ;;  %v7960_v23 = vld [vmem:[#allocation49_spill] sm:$0xff] }
 0x137   : > { %vm7961_vm2 = vnez %v7960_v23  ;;  %vm7962_vm12 = vmmov %vm7957_vm0 }
 0x138   : > { %v4144_v35 = vsel %vm7961_vm2, %v4112_v15, 0.0  ;;  %vm7963_vm4 = vmmov %vm7957_vm0 }
 0x139   : > { %5535 = vmatmul.mubr.msk.f32.gmra.mrb[26].mxu1 %vm7943_vm10, %v2492_v42  ;;  %5740 = vmatmul.mubr.msk.f32.gmra.mrb[24].mxu0 %vm7944_vm7, %v4138_v34  ;;  %vm7964_vm10 = vmmov %vm7957_vm0 }
 0x13a   : > { %5537 = vmatprep.mubr.msk.f32.mxu1 %vm7945_vm8, %v2493_v52  ;;  %5742 = vmatprep.mubr.msk.f32.mxu0 %vm7946_vm14, %v7805_v19  ;;  %v4111_v19 = vld [vmem:[#allocation2 + $0x112] sm:$0xff]  ;;  %vm7965_vm7 = vmmov %vm7957_vm0 }
 0x13b   : > { %vm7966_vm8 = vmmov %vm7957_vm0 }
 0x13c   : > { %vm7967_vm14 = vmmov %vm7957_vm0 }
 0x13d   : > { %5538 = vmatmul.mubr.msk.f32.gmra.mrb[28].mxu1 %vm7949_vm13, %v2494_v0  ;;  %5743 = vmatmul.mubr.msk.f32.gmra.mrb[26].mxu0 %vm7950_vm3, %v4140_v10  ;;  %vm7968_vm15 = vmmov %vm7957_vm0 }
 0x13e   : > { %5540 = vmatprep.mubr.msk.f32.mxu1 %vm7951_vm9, %v7167_v53  ;;  %5745 = vmatprep.mubr.msk.f32.mxu0 %vm7953_vm5, %v7952_v13  ;;  %vm7969_vm13 = vmmov %vm7957_vm0 }
 0x13f   : > { %vm7970_vm3 = vmmov %vm7957_vm0 }
 0x140   : > { %vm7971_vm9 = vmmov %vm7957_vm0 }
 0x141   : > { %5541 = vmatmul.mubr.msk.f32.gmra.mrb[30].mxu1 %vm7957_vm0, %v7180_v7  ;;  %5746 = vmatmul.mubr.msk.f32.gmra.mrb[28].mxu0 %vm7958_vm11, %v4142_v50  ;;  %vm7972_vm5 = vmmov %vm7957_vm0 }
 0x142   : > { %5748 = vmatprep.mubr.msk.f32.mxu0 %vm7959_vm1, %v4111_v19  ;;  %vm7973_vm6 = vmmov %vm7957_vm0 }
 0x143   : > { %vm7974_vm11 = vmmov %vm7957_vm0 }
 0x144   : > { %vm7975_vm1 = vmmov %vm7957_vm0 }
 0x145   : > { %5749 = vmatmul.mubr.msk.f32.gmra.mrb[30].mxu0 %vm7962_vm12, %v4144_v35  ;;  %vm7976_vm2 = vmmov %vm7957_vm0 }
 0x146   : > { %vm7977_vm12 = vmmov %vm7957_vm0 }
 0x1b8   : > { %v5445_v53 = vpop.f32.mrb[0].mxu1 }
 0x1b9   : > { %v2274_v17 = vpop.f32.mrb[1].mxu1 }
 0x1bc   : > { %v5448_v8 = vpop.f32.mrb[2].mxu1 }
 0x1bd   : > { %v2284_v61 = vpop.f32.mrb[3].mxu1 }
 0x1c0   : > { %v5451_v55 = vpop.f32.mrb[4].mxu1 }
 0x1c1   : > { %v2294_v31 = vpop.f32.mrb[5].mxu1 }
 0x1c4   : > { %v5454_v62 = vpop.f32.mrb[6].mxu1 }
 0x1c5   : > { %v2304_v16 = vpop.f32.mrb[7].mxu1 }
 0x1c8   : > { %v5457_v47 = vpop.f32.mrb[8].mxu1 }
 0x1c9   : > { %v2314_v7 = vpop.f32.mrb[9].mxu1 }
 0x1cc   : > { %v5460_v12 = vpop.f32.mrb[10].mxu1 }
 0x1cd   : > { %v2324_v30 = vpop.f32.mrb[11].mxu1 }
 0x1d0   : > { %v7332_v51 = vpop.f32.mrb[12].mxu1 }
 0x1d1   : > { %v7334_v26 = vpop.f32.mrb[13].mxu1 }
 0x1d4   : > { %v7336_v22 = vpop.f32.mrb[14].mxu1 }
 0x1d5   : > { %v7338_v21 = vpop.f32.mrb[15].mxu1 }
 0x1dc   : > { %v5705_v38 = vpop.f32.mrb[0].mxu0 }
 0x1dd   : > { %v5789_v33 = vadd.f32 %v5705_v38, %v5445_v53  ;;  %v4310_v44 = vpop.f32.mrb[1].mxu0 }
 0x1de   : > { %v5790_v1 = vadd.f32 %v4310_v44, %v2274_v17 }
 0x1df   : > { %v4509_v27 = vadd.f32 %v5789_v33, %v7343_v60 }
 0x1e0   : > { %v4508_v41 = vadd.f32 %v5790_v1, %v7343_v60  ;;  %v5708_v2 = vpop.f32.mrb[2].mxu0 }
 0x1e1   : > { %v4541_v39 = vmax.f32 %v4509_v27, 0.0  ;;  %v5791_v18 = vadd.f32 %v5708_v2, %v5448_v8  ;;  %v4320_v49 = vpop.f32.mrb[3].mxu0 }
 0x1e2   : > { %v4540_v25 = vmax.f32 %v4508_v41, 0.0  ;;  %v5792_v11 = vadd.f32 %v4320_v49, %v2284_v61 }
 0x1e3   : > { %4573 = vst.msk [vmem:[%s7351_s8 + $0x8] sm:$0xff] %vm7963_vm4, %v4541_v39  ;;  %v4511_v24 = vadd.f32 %v5791_v18, %v7343_v60  ;;  %vm7978_vm4 = vmmov %vm7957_vm0 }
 0x1e4   : > { %4572 = vst.msk [vmem:[%s7351_s8] sm:$0xff] %vm7964_vm10, %v4540_v25  ;;  %v4510_v57 = vadd.f32 %v5792_v11, %v7343_v60  ;;  %v5711_v54 = vpop.f32.mrb[4].mxu0  ;;  %vm7979_vm10 = vmmov %vm7957_vm0 }
 0x1e5   : > { %v4543_v59 = vmax.f32 %v4511_v24, 0.0  ;;  %v5793_v6 = vadd.f32 %v5711_v54, %v5451_v55  ;;  %v4330_v43 = vpop.f32.mrb[5].mxu0 }
 0x1e6   : > { %v4542_v4 = vmax.f32 %v4510_v57, 0.0  ;;  %v5794_v14 = vadd.f32 %v4330_v43, %v2294_v31 }
 0x1e7   : > { %4575 = vst.msk [vmem:[%s7351_s8 + $0x18] sm:$0xff] %vm7965_vm7, %v4543_v59  ;;  %v4513_v58 = vadd.f32 %v5793_v6, %v7343_v60  ;;  %vm7980_vm7 = vmmov %vm7957_vm0 }
 0x1e8   : > { %4574 = vst.msk [vmem:[%s7351_s8 + $0x10] sm:$0xff] %vm7966_vm8, %v4542_v4  ;;  %v4512_v56 = vadd.f32 %v5794_v14, %v7343_v60  ;;  %v5714_v20 = vpop.f32.mrb[6].mxu0  ;;  %vm7981_vm8 = vmmov %vm7957_vm0 }
 0x1e9   : > { %v4545_v32 = vmax.f32 %v4513_v58, 0.0  ;;  %v5795_v9 = vadd.f32 %v5714_v20, %v5454_v62  ;;  %v4340_v48 = vpop.f32.mrb[7].mxu0 }
 0x1ea   : > { %v4544_v63 = vmax.f32 %v4512_v56, 0.0  ;;  %v5796_v36 = vadd.f32 %v4340_v48, %v2304_v16 }
 0x1eb   : > { %4577 = vst.msk [vmem:[%s7351_s8 + $0x28] sm:$0xff] %vm7967_vm14, %v4545_v32  ;;  %v4515_v29 = vadd.f32 %v5795_v9, %v7343_v60  ;;  %vm7982_vm14 = vmmov %vm7957_vm0 }
 0x1ec   : > { %4576 = vst.msk [vmem:[%s7351_s8 + $0x20] sm:$0xff] %vm7968_vm15, %v4544_v63  ;;  %v4514_v37 = vadd.f32 %v5796_v36, %v7343_v60  ;;  %v5717_v28 = vpop.f32.mrb[8].mxu0  ;;  %vm7983_vm15 = vmmov %vm7957_vm0 }
 0x1ed   : > { %v4547_v5 = vmax.f32 %v4515_v29, 0.0  ;;  %v5797_v45 = vadd.f32 %v5717_v28, %v5457_v47  ;;  %v4350_v42 = vpop.f32.mrb[9].mxu0 }
 0x1ee   : > { %v4546_v34 = vmax.f32 %v4514_v37, 0.0  ;;  %v5798_v52 = vadd.f32 %v4350_v42, %v2314_v7 }
 0x1ef   : > { %4579 = vst.msk [vmem:[%s7351_s8 + $0x38] sm:$0xff] %vm7969_vm13, %v4547_v5  ;;  %v4517_v0 = vadd.f32 %v5797_v45, %v7343_v60  ;;  %vm7984_vm13 = vmmov %vm7957_vm0 }
 0x1f0   : > { %4578 = vst.msk [vmem:[%s7351_s8 + $0x30] sm:$0xff] %vm7970_vm3, %v4546_v34  ;;  %v4516_v40 = vadd.f32 %v5798_v52, %v7343_v60  ;;  %v5720_v10 = vpop.f32.mrb[10].mxu0  ;;  %vm7985_vm3 = vmmov %vm7957_vm0 }
 0x1f1   : > { %v4549_v13 = vmax.f32 %v4517_v0, 0.0  ;;  %v5799_v3 = vadd.f32 %v5720_v10, %v5460_v12  ;;  %v4360_v46 = vpop.f32.mrb[11].mxu0 }
 0x1f2   : > { %v4548_v50 = vmax.f32 %v4516_v40, 0.0  ;;  %v5800_v19 = vadd.f32 %v4360_v46, %v2324_v30 }
 0x1f3   : > { %4581 = vst.msk [vmem:[%s7351_s8 + $0x48] sm:$0xff] %vm7971_vm9, %v4549_v13  ;;  %v4519_v15 = vadd.f32 %v5799_v3, %v7343_v60  ;;  %vm7986_vm9 = vmmov %vm7957_vm0 }
 0x1f4   : > { %4580 = vst.msk [vmem:[%s7351_s8 + $0x40] sm:$0xff] %vm7972_vm5, %v4548_v50  ;;  %v4518_v23 = vadd.f32 %v5800_v19, %v7343_v60  ;;  %v5723_v35 = vpop.f32.mrb[12].mxu0  ;;  %vm7987_vm5 = vmmov %vm7957_vm0 }
 0x1f5   : > { %v4551_v53 = vmax.f32 %v4519_v15, 0.0  ;;  %v5801_v17 = vadd.f32 %v5723_v35, %v7332_v51  ;;  %v4370_v8 = vpop.f32.mrb[13].mxu0 }
 0x1f6   : > { %v4550_v61 = vmax.f32 %v4518_v23, 0.0  ;;  %v5802_v55 = vadd.f32 %v4370_v8, %v7334_v26 }
 0x1f7   : > { %4583 = vst.msk [vmem:[%s7351_s8 + $0x58] sm:$0xff] %vm7973_vm6, %v4551_v53  ;;  %v4521_v31 = vadd.f32 %v5801_v17, %v7343_v60  ;;  %vm7988_vm6 = vmmov %vm7957_vm0 }
 0x1f8   : > { %4582 = vst.msk [vmem:[%s7351_s8 + $0x50] sm:$0xff] %vm7957_vm0, %v4550_v61  ;;  %v4520_v62 = vadd.f32 %v5802_v55, %v7343_v60  ;;  %v5521_v16 = vpop.f32.mrb[16].mxu1  ;;  %v5726_v47 = vpop.f32.mrb[14].mxu0 }
 0x1f9   : > { %v4553_v7 = vmax.f32 %v4521_v31, 0.0  ;;  %v5803_v12 = vadd.f32 %v5726_v47, %v7336_v22  ;;  %v2742_v30 = vpop.f32.mrb[17].mxu1  ;;  %v4380_v51 = vpop.f32.mrb[15].mxu0 }
 0x1fa   : > { %v4552_v38 = vmax.f32 %v4520_v62, 0.0  ;;  %v5804_v26 = vadd.f32 %v4380_v51, %v7338_v21 }
 0x1fb   : > { %4585 = vst.msk [vmem:[%s7351_s8 + $0x68] sm:$0xff] %vm7974_vm11, %v4553_v7  ;;  %v4523_v33 = vadd.f32 %v5803_v12, %v7343_v60  ;;  %vm7989_vm11 = vmmov %vm7957_vm0 }
 0x1fc   : > { %4584 = vst.msk [vmem:[%s7351_s8 + $0x60] sm:$0xff] %vm7975_vm1, %v4552_v38  ;;  %v4522_v44 = vadd.f32 %v5804_v26, %v7343_v60  ;;  %v5524_v1 = vpop.f32.mrb[18].mxu1  ;;  %v5729_v27 = vpop.f32.mrb[16].mxu0  ;;  %vm7990_vm1 = vmmov %vm7957_vm0 }
 0x1fd   : > { %v4555_v41 = vmax.f32 %v4523_v33, 0.0  ;;  %v5805_v2 = vadd.f32 %v5729_v27, %v5521_v16  ;;  %v2752_v22 = vpop.f32.mrb[19].mxu1  ;;  %v4390_v39 = vpop.f32.mrb[17].mxu0 }
 0x1fe   : > { %v4554_v18 = vmax.f32 %v4522_v44, 0.0  ;;  %v5806_v49 = vadd.f32 %v4390_v39, %v2742_v30 }
 0x1ff   : > { %4587 = vst.msk [vmem:[%s7351_s8 + $0x78] sm:$0xff] %vm7976_vm2, %v4555_v41  ;;  %v4525_v21 = vadd.f32 %v5805_v2, %v7343_v60  ;;  %vm7991_vm2 = vmmov %vm7957_vm0 }
 0x200   : > { %4586 = vst.msk [vmem:[%s7351_s8 + $0x70] sm:$0xff] %vm7977_vm12, %v4554_v18  ;;  %v4524_v25 = vadd.f32 %v5806_v49, %v7343_v60  ;;  %v5527_v11 = vpop.f32.mrb[20].mxu1  ;;  %v5732_v24 = vpop.f32.mrb[18].mxu0  ;;  %vm7992_vm12 = vmmov %vm7957_vm0 }
 0x201   : > { %v4557_v57 = vmax.f32 %v4525_v21, 0.0  ;;  %v5807_v54 = vadd.f32 %v5732_v24, %v5524_v1  ;;  %v2762_v59 = vpop.f32.mrb[21].mxu1  ;;  %v4400_v6 = vpop.f32.mrb[19].mxu0 }
 0x202   : > { %v4556_v43 = vmax.f32 %v4524_v25, 0.0  ;;  %v5808_v4 = vadd.f32 %v4400_v6, %v2752_v22 }
 0x203   : > { %4589 = vst.msk [vmem:[%s7351_s8 + $0x88] sm:$0xff] %vm7978_vm4, %v4557_v57  ;;  %v4527_v14 = vadd.f32 %v5807_v54, %v7343_v60 }
 0x204   : > { %4588 = vst.msk [vmem:[%s7351_s8 + $0x80] sm:$0xff] %vm7979_vm10, %v4556_v43  ;;  %v4526_v58 = vadd.f32 %v5808_v4, %v7343_v60  ;;  %v5530_v56 = vpop.f32.mrb[22].mxu1  ;;  %v5735_v20 = vpop.f32.mrb[20].mxu0 }
 0x205   : > { %v4559_v32 = vmax.f32 %v4527_v14, 0.0  ;;  %v5809_v9 = vadd.f32 %v5735_v20, %v5527_v11  ;;  %v2772_v48 = vpop.f32.mrb[23].mxu1  ;;  %v4410_v63 = vpop.f32.mrb[21].mxu0 }
 0x206   : > { %v4558_v36 = vmax.f32 %v4526_v58, 0.0  ;;  %v5810_v29 = vadd.f32 %v4410_v63, %v2762_v59 }
 0x207   : > { %4591 = vst.msk [vmem:[%s7351_s8 + $0x98] sm:$0xff] %vm7980_vm7, %v4559_v32  ;;  %v4529_v37 = vadd.f32 %v5809_v9, %v7343_v60 }
 0x208   : > { %4590 = vst.msk [vmem:[%s7351_s8 + $0x90] sm:$0xff] %vm7981_vm8, %v4558_v36  ;;  %v4528_v28 = vadd.f32 %v5810_v29, %v7343_v60  ;;  %v5533_v5 = vpop.f32.mrb[24].mxu1  ;;  %v5738_v45 = vpop.f32.mrb[22].mxu0 }
 0x209   : > { %v4561_v42 = vmax.f32 %v4529_v37, 0.0  ;;  %v5811_v34 = vadd.f32 %v5738_v45, %v5530_v56  ;;  %v2782_v52 = vpop.f32.mrb[25].mxu1  ;;  %v4420_v0 = vpop.f32.mrb[23].mxu0 }
 0x20a   : > { %v4560_v40 = vmax.f32 %v4528_v28, 0.0  ;;  %v5812_v10 = vadd.f32 %v4420_v0, %v2772_v48 }
 0x20b   : > { %4593 = vst.msk [vmem:[%s7351_s8 + $0xa8] sm:$0xff] %vm7982_vm14, %v4561_v42  ;;  %v4531_v13 = vadd.f32 %v5811_v34, %v7343_v60 }
 0x20c   : > { %4592 = vst.msk [vmem:[%s7351_s8 + $0xa0] sm:$0xff] %vm7983_vm15, %v4560_v40  ;;  %v4530_v3 = vadd.f32 %v5812_v10, %v7343_v60  ;;  %v5536_v46 = vpop.f32.mrb[26].mxu1  ;;  %v5741_v50 = vpop.f32.mrb[24].mxu0 }
 0x20d   : > { %v4563_v19 = vmax.f32 %v4531_v13, 0.0  ;;  %v5813_v15 = vadd.f32 %v5741_v50, %v5533_v5  ;;  %v2792_v23 = vpop.f32.mrb[27].mxu1  ;;  %v4430_v35 = vpop.f32.mrb[25].mxu0 }
 0x20e   : > { %v4562_v53 = vmax.f32 %v4530_v3, 0.0  ;;  %v5814_v17 = vadd.f32 %v4430_v35, %v2782_v52 }
 0x20f   : > { %4595 = vst.msk [vmem:[%s7351_s8 + $0xb8] sm:$0xff] %vm7984_vm13, %v4563_v19  ;;  %v4533_v8 = vadd.f32 %v5813_v15, %v7343_v60 }
 0x210   : > { %4594 = vst.msk [vmem:[%s7351_s8 + $0xb0] sm:$0xff] %vm7985_vm3, %v4562_v53  ;;  %v4532_v61 = vadd.f32 %v5814_v17, %v7343_v60  ;;  %v5539_v55 = vpop.f32.mrb[28].mxu1  ;;  %v5744_v31 = vpop.f32.mrb[26].mxu0 }
 0x211   : > { %v4565_v62 = vmax.f32 %v4533_v8, 0.0  ;;  %v5815_v16 = vadd.f32 %v5744_v31, %v5536_v46  ;;  %v2802_v47 = vpop.f32.mrb[29].mxu1  ;;  %v4440_v7 = vpop.f32.mrb[27].mxu0 }
 0x212   : > { %v4564_v12 = vmax.f32 %v4532_v61, 0.0  ;;  %v5816_v30 = vadd.f32 %v4440_v7, %v2792_v23 }
 0x213   : > { %4597 = vst.msk [vmem:[%s7351_s8 + $0xc8] sm:$0xff] %vm7986_vm9, %v4565_v62  ;;  %v4535_v51 = vadd.f32 %v5815_v16, %v7343_v60 }
 0x214   : > { %4596 = vst.msk [vmem:[%s7351_s8 + $0xc0] sm:$0xff] %vm7987_vm5, %v4564_v12  ;;  %v4534_v38 = vadd.f32 %v5816_v30, %v7343_v60  ;;  %v5542_v26 = vpop.f32.mrb[30].mxu1  ;;  %v5747_v33 = vpop.f32.mrb[28].mxu0 }
 0x215   : > { %v4567_v44 = vmax.f32 %v4535_v51, 0.0  ;;  %v5817_v1 = vadd.f32 %v5747_v33, %v5539_v55  ;;  %v2812_v27 = vpop.f32.mrb[31].mxu1  ;;  %v4450_v41 = vpop.f32.mrb[29].mxu0 }
 0x216   : > { %v4566_v2 = vmax.f32 %v4534_v38, 0.0  ;;  %v5818_v22 = vadd.f32 %v4450_v41, %v2802_v47 }
 0x217   : > { %4599 = vst.msk [vmem:[%s7351_s8 + $0xd8] sm:$0xff] %vm7988_vm6, %v4567_v44  ;;  %v4537_v39 = vadd.f32 %v5817_v1, %v7343_v60 }
 0x218   : > { %4598 = vst.msk [vmem:[%s7351_s8 + $0xd0] sm:$0xff] %vm7957_vm0, %v4566_v2  ;;  %v4536_v18 = vadd.f32 %v5818_v22, %v7343_v60  ;;  %v5750_v49 = vpop.f32.mrb[30].mxu0 }
 0x219   : > { %v4569_v21 = vmax.f32 %v4537_v39, 0.0  ;;  %v5819_v25 = vadd.f32 %v5750_v49, %v5542_v26  ;;  %v4460_v11 = vpop.f32.mrb[31].mxu0 }
 0x21a   : > { %v4568_v24 = vmax.f32 %v4536_v18, 0.0  ;;  %v5820_v57 = vadd.f32 %v4460_v11, %v2812_v27 }
 0x21b   : > { %4601 = vst.msk [vmem:[%s7351_s8 + $0xe8] sm:$0xff] %vm7989_vm11, %v4569_v21  ;;  %v4539_v54 = vadd.f32 %v5819_v25, %v7343_v60 }
 0x21c   : > { %4600 = vst.msk [vmem:[%s7351_s8 + $0xe0] sm:$0xff] %vm7990_vm1, %v4568_v24  ;;  %v4538_v59 = vadd.f32 %v5820_v57, %v7343_v60 }
 0x21d   : > { %v4571_v6 = vmax.f32 %v4539_v54, 0.0 }
 0x21e   : > { %v4570_v43 = vmax.f32 %v4538_v59, 0.0 }
 0x21f   : > { %4603 = vst.msk [vmem:[%s7351_s8 + $0xf8] sm:$0xff] %vm7991_vm2, %v4571_v6 }
 0x220   : > { %4602 = vst.msk [vmem:[%s7351_s8 + $0xf0] sm:$0xff] %vm7992_vm12, %v4570_v43 }
 0x221 PF: > { %s13_s12 = sadd.s32 1, %s6060_s12  }
 0x222   : > { %p10_p4 = scmp.ge.s32.totalorder %s13_s12, 4  }
 0x224   :  { %12 = sbr.rel (!%p10_p4) target bundleno = 1 (0x1), region = 70 }

// kernel: unet_up_origin_forward.4
= control target key start
LH: loop header
LB: loop body
LE: loop exit
PB: predicated region body
PF: predicated region fallthrough
CT: control target
= control target key end

     0   :  { %s11366_s18 = smov 0   ;;  %s13821_s0 = inlined_call_operand.vmem [shape: f32[2,256,16], index: 0, kind: input, shape index: {}]   ;;  %s13822_s1 = inlined_call_operand.vmem [shape: f32[2,256,16], index: 1, kind: input, shape index: {}]   ;;  %s13823_s2 = inlined_call_operand.vmem [shape: f32[9,16,16], index: 2, kind: input, shape index: {}]   ;;  %s13824_s3 = inlined_call_operand.vmem [shape: f32[9,16,16], index: 3, kind: input, shape index: {}]   ;;  %s13825_s4 = inlined_call_operand.vmem [shape: f32[1,16], index: 4, kind: input, shape index: {}]   ;;  %s13826_s5 = inlined_call_operand.vmem [shape: f32[2,256,16], index: 5, kind: output, shape index: {}]  }
   0x1 LB: > { %s8529_s19 = sadd.s32 4294967295, %s11333_s18   ;;  %p8533_p0 = scmp.ge.s32.totalorder %s11333_s18, 1  ;;  %s11333_s18 = sphi %s11366_s18, %s15_s18  }
   0x2   : > { %p197_p1 = scmp.lt.s32.totalorder %s11333_s18, 3 }
   0x4   : > { %p198_p2 = pnand %p8533_p0, %p197_p1 }
   0x6   : > { %201 = sbr.rel (%p198_p2) target bundleno = 851 (0x353), region = 40 }
   0xd   : > { %v8540_v0 = vld [vmem:[%s13823_s2 + $0x10] sm:$0xff]  ;;  %v8541_v1 = vld [vmem:[%s13823_s2 + $0x18] sm:$0xff]  ;;  %v11383_v2 = vld [vmem:[%s13824_s3] sm:$0xff]  ;;  %vm726_vm0 = vcmask 130048   ;;  %v245_v3 = vlaneseq  ;;  %p11387_p3 = scmp.lt.s32.totalorder %s8529_s19, 1  ;;  %v11335_v6 = vmov 0.0  }
   0xe   : > { %v11391_v4 = vpack.c.bf16 %v8541_v1, %v8540_v0  ;;  %v11396_v5 = vld [vmem:[%s13824_s3 + $0x8] sm:$0xff]  ;;  %727 = vst.msk [vmem:[#allocation2] sm:$0xff] %vm726_vm0, %v11335_v6  ;;  %728 = vst.msk [vmem:[#allocation2 + $0x8] sm:$0xff] %vm726_vm0, %v11335_v6  ;;  %v1057_v7 = vld [vmem:[%s13823_s2] sm:$0xff]  ;;  %v14048_v21 = vmov 0 }
   0xf   : > { %729 = vst.msk [vmem:[#allocation2 + $0x10] sm:$0xff] %vm726_vm0, %v11335_v6  ;;  %730 = vst.msk [vmem:[#allocation2 + $0x18] sm:$0xff] %vm726_vm0, %v11335_v6  ;;  %v1058_v8 = vld [vmem:[%s13823_s2 + $0x8] sm:$0xff]  ;;  %v10738_v9 = vpack.c.bf16 %v11396_v5, %v11383_v2  ;;  %v11555_v11 = vshrl.u32 %v245_v3, 7  ;;  %v8876_v12 = vld [vmem:[%s13824_s3 + $0x10] sm:$0xff]  ;;  %s14428_s19 = smov (!%p11387_p3, %s8529_s19), 1 }
  0x10   : > { %731 = vst.msk [vmem:[#allocation2 + $0x20] sm:$0xff] %vm726_vm0, %v11335_v6  ;;  %732 = vst.msk [vmem:[#allocation2 + $0x28] sm:$0xff] %vm726_vm0, %v11335_v6  ;;  %v10706_v10 = vpack.c.bf16 %v1058_v8, %v1057_v7  ;;  %v8877_v13 = vld [vmem:[%s13824_s3 + $0x18] sm:$0xff]  ;;  %10703 = vmatprep.subr.bf16.mxu1 %v11391_v4  ;;  %s11570_s12 = sshll.u32 %s14428_s19, 8  ;;  %v8606_v17 = vld [vmem:[%s13823_s2 + $0x20] sm:$0xff] }
  0x11   : > { %733 = vst.msk [vmem:[#allocation2 + $0x30] sm:$0xff] %vm726_vm0, %v11335_v6  ;;  %734 = vst.msk [vmem:[#allocation2 + $0x38] sm:$0xff] %vm726_vm0, %v11335_v6  ;;  %v10742_v14 = vpack.c.bf16 %v8877_v13, %v8876_v12  ;;  %10739 = vmatprep.subr.bf16.mxu0 %v10738_v9  ;;  %10705 = vmatpush3.bf16.msra.mxu1 %v11391_v4  ;;  %v282_v15 = vand.u32 15, %v11555_v11  ;;  %v248_v16 = vadd.s32 16, %v11555_v11  ;;  %s11580_s17 = scalar_lea.vmem %s13821_s0, %s11570_s12  ;;  %s11586_s19 = scalar_lea.vmem %s13822_s1, %s11570_s12  ;;  %v8607_v18 = vld [vmem:[%s13823_s2 + $0x28] sm:$0xff]  ;;  %v8910_v19 = vld [vmem:[%s13824_s3 + $0x20] sm:$0xff] }
  0x12   : > { %735 = vst.msk [vmem:[#allocation2 + $0x40] sm:$0xff] %vm726_vm0, %v11335_v6  ;;  %736 = vst.msk [vmem:[#allocation2 + $0x48] sm:$0xff] %vm726_vm0, %v11335_v6  ;;  %10741 = vmatpush3.bf16.msra.mxu0 %v10738_v9  ;;  %10707 = vmatprep.subr.bf16.mxu1 %v10706_v10  ;;  %v8911_v20 = vld [vmem:[%s13824_s3 + $0x28] sm:$0xff]  ;;  %v764_v22 = vld [vmem:[%s11580_s17] sm:$0xff]  ;;  %v250_v28 = vadd.s32 32, %v11555_v11  ;;  %v252_v33 = vadd.s32 48, %v11555_v11  ;;  %v11615_v34 = vpack.c.bf16 %v8607_v18, %v8606_v17  ;;  %s13721_s9 = scalar_lea.vmem %s13826_s5, %s11570_s12 }
  0x13   : > { %737 = vst.msk [vmem:[#allocation2 + $0x50] sm:$0xff] %vm726_vm0, %v11335_v6  ;;  %738 = vst.msk [vmem:[#allocation2 + $0x58] sm:$0xff] %vm726_vm0, %v11335_v6  ;;  %vm11597_vm1 = vcmp.ge.s32.totalorder %v282_v15, 1  ;;  %10743 = vmatprep.subr.bf16.mxu0 %v10742_v14  ;;  %v765_v23 = vld [vmem:[%s11580_s17 + $0x8] sm:$0xff]  ;;  %v865_v24 = vld [vmem:[%s11586_s19] sm:$0xff]  ;;  %v296_v32 = vand.u32 15, %v248_v16  ;;  %v11622_v39 = vpack.c.bf16 %v8911_v20, %v8910_v19 }
  0x14   : > { %739 = vst.msk [vmem:[#allocation2 + $0x60] sm:$0xff] %vm726_vm0, %v11335_v6  ;;  %740 = vst.msk [vmem:[#allocation2 + $0x68] sm:$0xff] %vm726_vm0, %v11335_v6  ;;  %v14049_v21 = vsel %vm11597_vm1, 4294967295, %v14048_v21  ;;  %v866_v25 = vld [vmem:[%s11586_s19 + $0x8] sm:$0xff]  ;;  %v766_v26 = vld [vmem:[%s11580_s17 + $0x10] sm:$0xff]  ;;  %v310_v43 = vand.u32 15, %v250_v28 }
  0x15   : > { %741 = vst.msk [vmem:[#allocation2 + $0x70] sm:$0xff] %vm726_vm0, %v11335_v6  ;;  %742 = vst.msk [vmem:[#allocation2 + $0x78] sm:$0xff] %vm726_vm0, %v11335_v6  ;;  %v767_v27 = vld [vmem:[%s11580_s17 + $0x18] sm:$0xff]  ;;  %v1059_v29 = vld [vmem:[#allocation2 + $0x1] sm:$0xff]  ;;  %vm11638_vm2 = vcmp.ge.s32.totalorder %v296_v32, 1  ;;  %v324_v48 = vand.u32 15, %v252_v33 }
  0x16   : > { %743 = vst.msk [vmem:[#allocation2 + $0x80] sm:$0xff] %vm726_vm0, %v11335_v6  ;;  %744 = vst.msk [vmem:[#allocation2 + $0x88] sm:$0xff] %vm726_vm0, %v11335_v6  ;;  %v1060_v30 = vld [vmem:[#allocation2 + $0x9] sm:$0xff]  ;;  %9770 = vmatprep.mubr.msk.f32.mxu1 %vm726_vm0, %v1059_v29  ;;  %v868_v38 = vld [vmem:[%s11586_s19 + $0x18] sm:$0xff]  ;;  %v254_v49 = vadd.s32 64, %v11555_v11  ;;  %vm11663_vm3 = vcmp.ge.s32.totalorder %v310_v43, 1 }
  0x17   : > { %745 = vst.msk [vmem:[#allocation2 + $0x90] sm:$0xff] %vm726_vm0, %v11335_v6  ;;  %746 = vst.msk [vmem:[#allocation2 + $0x98] sm:$0xff] %vm726_vm0, %v11335_v6  ;;  %v867_v37 = vld [vmem:[%s11586_s19 + $0x10] sm:$0xff]  ;;  %9771 = vmatmul.mubr.msk.f32.vlgmr.msra.gmra.mrb[0].mxu1 %vm726_vm0, %v1060_v30  ;;  %v768_v40 = vld [vmem:[%s11580_s17 + $0x20] sm:$0xff]  ;;  %vm11669_vm4 = vcmp.ge.s32.totalorder %v324_v48, 1  ;;  %v256_v1 = vadd.s32 80, %v11555_v11 }
  0x18   : > { %747 = vst.msk [vmem:[#allocation2 + $0xa0] sm:$0xff] %vm726_vm0, %v11335_v6  ;;  %748 = vst.msk [vmem:[#allocation2 + $0xa8] sm:$0xff] %vm726_vm0, %v11335_v6  ;;  %v769_v41 = vld [vmem:[%s11580_s17 + $0x28] sm:$0xff]  ;;  %v869_v42 = vld [vmem:[%s11586_s19 + $0x20] sm:$0xff]  ;;  %10709 = vmatpush3.bf16.msra.mxu1 %v10706_v10  ;;  %v338_v0 = vand.u32 15, %v254_v49  ;;  %v258_v17 = vadd.s32 96, %v11555_v11 }
  0x19   : > { %749 = vst.msk [vmem:[#allocation2 + $0xb0] sm:$0xff] %vm726_vm0, %v11335_v6  ;;  %750 = vst.msk [vmem:[#allocation2 + $0xb8] sm:$0xff] %vm726_vm0, %v11335_v6  ;;  %v870_v44 = vld [vmem:[%s11586_s19 + $0x28] sm:$0xff]  ;;  %v770_v45 = vld [vmem:[%s11580_s17 + $0x30] sm:$0xff]  ;;  %10711 = vmatprep.subr.bf16.mxu1 %v11615_v34  ;;  %v352_v16 = vand.u32 15, %v256_v1 }
  0x1a   : > { %751 = vst.msk [vmem:[#allocation2 + $0xc0] sm:$0xff] %vm726_vm0, %v11335_v6  ;;  %752 = vst.msk [vmem:[#allocation2 + $0xc8] sm:$0xff] %vm726_vm0, %v11335_v6  ;;  %v771_v46 = vld [vmem:[%s11580_s17 + $0x38] sm:$0xff]  ;;  %v871_v50 = vld [vmem:[%s11586_s19 + $0x30] sm:$0xff]  ;;  %vm11690_vm5 = vcmp.ge.s32.totalorder %v338_v0, 1  ;;  %v366_v33 = vand.u32 15, %v258_v17 }
  0x1b   : > { %753 = vst.msk [vmem:[#allocation2 + $0xd0] sm:$0xff] %vm726_vm0, %v11335_v6  ;;  %754 = vst.msk [vmem:[#allocation2 + $0xd8] sm:$0xff] %vm726_vm0, %v11335_v6  ;;  %v872_v51 = vld [vmem:[%s11586_s19 + $0x38] sm:$0xff]  ;;  %v772_v52 = vld [vmem:[%s11580_s17 + $0x40] sm:$0xff]  ;;  %vm11710_vm6 = vcmp.ge.s32.totalorder %v352_v16, 1  ;;  %v266_v17 = vadd.s32 160, %v11555_v11 }
  0x1c   : > { %755 = vst.msk [vmem:[#allocation2 + $0xe0] sm:$0xff] %vm726_vm0, %v11335_v6  ;;  %756 = vst.msk [vmem:[#allocation2 + $0xe8] sm:$0xff] %vm726_vm0, %v11335_v6  ;;  %v773_v53 = vld [vmem:[%s11580_s17 + $0x48] sm:$0xff]  ;;  %v873_v54 = vld [vmem:[%s11586_s19 + $0x40] sm:$0xff]  ;;  %vm11737_vm7 = vcmp.ge.s32.totalorder %v366_v33, 1 }
  0x1d   : > { %757 = vst.msk [vmem:[#allocation2 + $0xf0] sm:$0xff] %vm726_vm0, %v11335_v6  ;;  %758 = vst.msk [vmem:[#allocation2 + $0xf8] sm:$0xff] %vm726_vm0, %v11335_v6  ;;  %v874_v55 = vld [vmem:[%s11586_s19 + $0x48] sm:$0xff]  ;;  %v774_v2 = vld [vmem:[%s11580_s17 + $0x50] sm:$0xff] }
  0x1e   : > { %759 = vst.msk [vmem:[#allocation2 + $0x100] sm:$0xff] %vm726_vm0, %v11335_v6  ;;  %760 = vst.msk [vmem:[#allocation2 + $0x108] sm:$0xff] %vm726_vm0, %v11335_v6  ;;  %v775_v3 = vld [vmem:[%s11580_s17 + $0x58] sm:$0xff]  ;;  %v875_v4 = vld [vmem:[%s11586_s19 + $0x50] sm:$0xff] }
  0x1f   : > { %761 = vst.msk [vmem:[#allocation2 + $0x110] sm:$0xff] %vm726_vm0, %v11335_v6  ;;  %762 = vst.msk [vmem:[#allocation2 + $0x118] sm:$0xff] %vm726_vm0, %v11335_v6  ;;  %v876_v7 = vld [vmem:[%s11586_s19 + $0x58] sm:$0xff]  ;;  %v881_v43 = vld [vmem:[%s11586_s19 + $0x80] sm:$0xff] }
  0x20   : > { %763 = vst.msk [vmem:[#allocation2 + $0x120] sm:$0xff] %vm726_vm0, %v11335_v6  ;;  %828 = vst.msk [vmem:[#allocation3] sm:$0xff] %vm726_vm0, %v11335_v6  ;;  %v779_v28 = vld [vmem:[%s11580_s17 + $0x78] sm:$0xff]  ;;  %v782_v48 = vld [vmem:[%s11580_s17 + $0x90] sm:$0xff] }
  0x21   : > { %829 = vst.msk [vmem:[#allocation3 + $0x8] sm:$0xff] %vm726_vm0, %v11335_v6  ;;  %830 = vst.msk [vmem:[#allocation3 + $0x10] sm:$0xff] %vm726_vm0, %v11335_v6  ;;  %v783_v49 = vld [vmem:[%s11580_s17 + $0x98] sm:$0xff] }
  0x22   : > { %831 = vst.msk [vmem:[#allocation3 + $0x18] sm:$0xff] %vm726_vm0, %v11335_v6  ;;  %832 = vst.msk [vmem:[#allocation3 + $0x20] sm:$0xff] %vm726_vm0, %v11335_v6 }
  0x23   : > { %833 = vst.msk [vmem:[#allocation3 + $0x28] sm:$0xff] %vm726_vm0, %v11335_v6  ;;  %834 = vst.msk [vmem:[#allocation3 + $0x30] sm:$0xff] %vm726_vm0, %v11335_v6 }
  0x24   : > { %835 = vst.msk [vmem:[#allocation3 + $0x38] sm:$0xff] %vm726_vm0, %v11335_v6  ;;  %836 = vst.msk [vmem:[#allocation3 + $0x40] sm:$0xff] %vm726_vm0, %v11335_v6 }
  0x25   : > { %837 = vst.msk [vmem:[#allocation3 + $0x48] sm:$0xff] %vm726_vm0, %v11335_v6  ;;  %838 = vst.msk [vmem:[#allocation3 + $0x50] sm:$0xff] %vm726_vm0, %v11335_v6 }
  0x26   : > { %839 = vst.msk [vmem:[#allocation3 + $0x58] sm:$0xff] %vm726_vm0, %v11335_v6  ;;  %840 = vst.msk [vmem:[#allocation3 + $0x60] sm:$0xff] %vm726_vm0, %v11335_v6 }
  0x27   : > { %841 = vst.msk [vmem:[#allocation3 + $0x68] sm:$0xff] %vm726_vm0, %v11335_v6  ;;  %842 = vst.msk [vmem:[#allocation3 + $0x70] sm:$0xff] %vm726_vm0, %v11335_v6  ;;  %v4676_v31 = vld [vmem:[#allocation3] sm:$0xff] }
  0x28   : > { %843 = vst.msk [vmem:[#allocation3 + $0x78] sm:$0xff] %vm726_vm0, %v11335_v6  ;;  %844 = vst.msk [vmem:[#allocation3 + $0x80] sm:$0xff] %vm726_vm0, %v11335_v6  ;;  %v4708_v35 = vsel %vm11597_vm1, %v4676_v31, 0.0  ;;  %v4677_v36 = vld [vmem:[#allocation3 + $0x8] sm:$0xff] }
  0x29   : > { %845 = vst.msk [vmem:[#allocation3 + $0x88] sm:$0xff] %vm726_vm0, %v11335_v6  ;;  %846 = vst.msk [vmem:[#allocation3 + $0x90] sm:$0xff] %vm726_vm0, %v11335_v6  ;;  %10238 = vmatprep.mubr.msk.f32.mxu0 %vm726_vm0, %v4708_v35  ;;  %v260_v35 = vadd.s32 112, %v11555_v11 }
  0x2a   : > { %847 = vst.msk [vmem:[#allocation3 + $0x98] sm:$0xff] %vm726_vm0, %v11335_v6  ;;  %848 = vst.msk [vmem:[#allocation3 + $0xa0] sm:$0xff] %vm726_vm0, %v11335_v6  ;;  %10239 = vmatmul.mubr.msk.f32.vlgmr.msra.gmra.mrb[0].mxu0 %vm726_vm0, %v4677_v36 }
  0x2b   : > { %849 = vst.msk [vmem:[#allocation3 + $0xa8] sm:$0xff] %vm726_vm0, %v11335_v6  ;;  %850 = vst.msk [vmem:[#allocation3 + $0xb0] sm:$0xff] %vm726_vm0, %v11335_v6  ;;  %10745 = vmatpush3.bf16.msra.mxu0 %v10742_v14 }
  0x2c   : > { %851 = vst.msk [vmem:[#allocation3 + $0xb8] sm:$0xff] %vm726_vm0, %v11335_v6  ;;  %852 = vst.msk [vmem:[#allocation3 + $0xc0] sm:$0xff] %vm726_vm0, %v11335_v6  ;;  %10747 = vmatprep.subr.bf16.mxu0 %v11622_v39 }
  0x2d   : > { %853 = vst.msk [vmem:[#allocation3 + $0xc8] sm:$0xff] %vm726_vm0, %v11335_v6  ;;  %854 = vst.msk [vmem:[#allocation3 + $0xd0] sm:$0xff] %vm726_vm0, %v11335_v6 }
  0x2e   : > { %855 = vst.msk [vmem:[#allocation3 + $0xd8] sm:$0xff] %vm726_vm0, %v11335_v6  ;;  %856 = vst.msk [vmem:[#allocation3 + $0xe0] sm:$0xff] %vm726_vm0, %v11335_v6 }
  0x2f   : > { %857 = vst.msk [vmem:[#allocation3 + $0xe8] sm:$0xff] %vm726_vm0, %v11335_v6  ;;  %858 = vst.msk [vmem:[#allocation3 + $0xf0] sm:$0xff] %vm726_vm0, %v11335_v6 }
  0x30   : > { %859 = vst.msk [vmem:[#allocation3 + $0xf8] sm:$0xff] %vm726_vm0, %v11335_v6  ;;  %860 = vst.msk [vmem:[#allocation3 + $0x100] sm:$0xff] %vm726_vm0, %v11335_v6 }
  0x31   : > { %861 = vst.msk [vmem:[#allocation3 + $0x108] sm:$0xff] %vm726_vm0, %v11335_v6  ;;  %862 = vst.msk [vmem:[#allocation3 + $0x110] sm:$0xff] %vm726_vm0, %v11335_v6 }
  0x32   : > { %863 = vst.msk [vmem:[#allocation3 + $0x118] sm:$0xff] %vm726_vm0, %v11335_v6  ;;  %864 = vst.msk [vmem:[#allocation3 + $0x120] sm:$0xff] %vm726_vm0, %v11335_v6 }
  0x33   : > { %14050 = vst [vmem:[#allocation4_spill] sm:$0xff] %v14049_v21  ;;  %796 = vst.msk [vmem:[#allocation2 + $0x11] sm:$0xff] %vm726_vm0, %v764_v22  ;;  %v776_v22 = vld [vmem:[%s11580_s17 + $0x60] sm:$0xff] }
  0x34   : > { %797 = vst.msk [vmem:[#allocation2 + $0x19] sm:$0xff] %vm726_vm0, %v765_v23  ;;  %897 = vst.msk [vmem:[#allocation3 + $0x11] sm:$0xff] %vm726_vm0, %v865_v24  ;;  %v777_v23 = vld [vmem:[%s11580_s17 + $0x68] sm:$0xff]  ;;  %v877_v24 = vld [vmem:[%s11586_s19 + $0x60] sm:$0xff] }
  0x35   : > { %898 = vst.msk [vmem:[#allocation3 + $0x19] sm:$0xff] %vm726_vm0, %v866_v25  ;;  %798 = vst.msk [vmem:[#allocation2 + $0x21] sm:$0xff] %vm726_vm0, %v766_v26  ;;  %v878_v26 = vld [vmem:[%s11586_s19 + $0x68] sm:$0xff] }
  0x36   : > { %799 = vst.msk [vmem:[#allocation2 + $0x29] sm:$0xff] %vm726_vm0, %v767_v27  ;;  %899 = vst.msk [vmem:[#allocation3 + $0x21] sm:$0xff] %vm726_vm0, %v867_v37  ;;  %v778_v27 = vld [vmem:[%s11580_s17 + $0x70] sm:$0xff] }
  0x37   : > { %900 = vst.msk [vmem:[#allocation3 + $0x29] sm:$0xff] %vm726_vm0, %v868_v38  ;;  %800 = vst.msk [vmem:[#allocation2 + $0x31] sm:$0xff] %vm726_vm0, %v768_v40  ;;  %v879_v37 = vld [vmem:[%s11586_s19 + $0x70] sm:$0xff]  ;;  %v880_v38 = vld [vmem:[%s11586_s19 + $0x78] sm:$0xff] }
  0x38   : > { %801 = vst.msk [vmem:[#allocation2 + $0x39] sm:$0xff] %vm726_vm0, %v769_v41  ;;  %901 = vst.msk [vmem:[#allocation3 + $0x31] sm:$0xff] %vm726_vm0, %v869_v42  ;;  %v780_v41 = vld [vmem:[%s11580_s17 + $0x80] sm:$0xff]  ;;  %v781_v42 = vld [vmem:[%s11580_s17 + $0x88] sm:$0xff] }
  0x39   : > { %902 = vst.msk [vmem:[#allocation3 + $0x39] sm:$0xff] %vm726_vm0, %v870_v44  ;;  %802 = vst.msk [vmem:[#allocation2 + $0x41] sm:$0xff] %vm726_vm0, %v770_v45 }
  0x3a   : > { %803 = vst.msk [vmem:[#allocation2 + $0x49] sm:$0xff] %vm726_vm0, %v771_v46  ;;  %903 = vst.msk [vmem:[#allocation3 + $0x41] sm:$0xff] %vm726_vm0, %v871_v50  ;;  %v1061_v56 = vld [vmem:[#allocation2 + $0x11] sm:$0xff]  ;;  %v882_v46 = vld [vmem:[%s11586_s19 + $0x88] sm:$0xff] }
  0x3b   : > { %904 = vst.msk [vmem:[#allocation3 + $0x49] sm:$0xff] %vm726_vm0, %v872_v51  ;;  %804 = vst.msk [vmem:[#allocation2 + $0x51] sm:$0xff] %vm726_vm0, %v772_v52  ;;  %v1062_v57 = vld [vmem:[#allocation2 + $0x19] sm:$0xff]  ;;  %9773 = vmatprep.mubr.msk.f32.mxu1 %vm726_vm0, %v1061_v56  ;;  %v380_v51 = vand.u32 15, %v260_v35  ;;  %v262_v52 = vadd.s32 128, %v11555_v11  ;;  %v785_v56 = vld [vmem:[%s11580_s17 + $0xa8] sm:$0xff] }
  0x3c   : > { %v4678_v58 = vld [vmem:[#allocation3 + $0x10] sm:$0xff]  ;;  %805 = vst.msk [vmem:[#allocation2 + $0x59] sm:$0xff] %vm726_vm0, %v773_v53  ;;  %905 = vst.msk [vmem:[#allocation3 + $0x51] sm:$0xff] %vm726_vm0, %v873_v54  ;;  %v4679_v60 = vld [vmem:[#allocation3 + $0x18] sm:$0xff]  ;;  %9774 = vmatmul.mubr.msk.f32.gmra.mrb[2].mxu1 %vm726_vm0, %v1062_v57  ;;  %v422_v35 = vand.u32 15, %v266_v17  ;;  %v276_v17 = vadd.s32 240, %v11555_v11 }
  0x3d   : > { %906 = vst.msk [vmem:[#allocation3 + $0x59] sm:$0xff] %vm726_vm0, %v874_v55  ;;  %v4710_v59 = vsel %vm11638_vm2, %v4678_v58, 0.0  ;;  %v1063_v61 = vld [vmem:[#allocation2 + $0x21] sm:$0xff]  ;;  %v1064_v5 = vld [vmem:[#allocation2 + $0x29] sm:$0xff]  ;;  %806 = vst.msk [vmem:[#allocation2 + $0x61] sm:$0xff] %vm726_vm0, %v774_v2  ;;  %vm11763_vm8 = vcmp.ge.s32.totalorder %v380_v51, 1 }
  0x3e   : > { %10241 = vmatprep.mubr.msk.f32.mxu0 %vm726_vm0, %v4710_v59  ;;  %9776 = vmatprep.mubr.msk.f32.mxu1 %vm726_vm0, %v1063_v61  ;;  %v4680_v6 = vld [vmem:[#allocation3 + $0x20] sm:$0xff]  ;;  %807 = vst.msk [vmem:[#allocation2 + $0x69] sm:$0xff] %vm726_vm0, %v775_v3  ;;  %907 = vst.msk [vmem:[#allocation3 + $0x61] sm:$0xff] %vm726_vm0, %v875_v4  ;;  %v4681_v9 = vld [vmem:[#allocation3 + $0x28] sm:$0xff]  ;;  %v394_v2 = vand.u32 15, %v262_v52  ;;  %v264_v3 = vadd.s32 144, %v11555_v11 }
  0x3f   : > { %10242 = vmatmul.mubr.msk.f32.gmra.mrb[2].mxu0 %vm726_vm0, %v4679_v60  ;;  %v4712_v8 = vsel %vm11663_vm3, %v4680_v6, 0.0  ;;  %v1065_v10 = vld [vmem:[#allocation2 + $0x31] sm:$0xff]  ;;  %908 = vst.msk [vmem:[#allocation3 + $0x69] sm:$0xff] %vm726_vm0, %v876_v7  ;;  %v1066_v18 = vld [vmem:[#allocation2 + $0x39] sm:$0xff]  ;;  %808 = vst.msk [vmem:[#allocation2 + $0x71] sm:$0xff] %vm726_vm0, %v776_v22  ;;  %vm11827_vm11 = vcmp.ge.s32.totalorder %v422_v35, 1 }
  0x40   : > { %v4682_v12 = vld [vmem:[#allocation3 + $0x30] sm:$0xff]  ;;  %10244 = vmatprep.mubr.msk.f32.mxu0 %vm726_vm0, %v4712_v8  ;;  %9777 = vmatmul.mubr.msk.f32.gmra.mrb[4].mxu1 %vm726_vm0, %v1064_v5  ;;  %v4683_v19 = vld [vmem:[#allocation3 + $0x38] sm:$0xff]  ;;  %809 = vst.msk [vmem:[#allocation2 + $0x79] sm:$0xff] %vm726_vm0, %v777_v23  ;;  %909 = vst.msk [vmem:[#allocation3 + $0x71] sm:$0xff] %vm726_vm0, %v877_v24  ;;  %vm11782_vm9 = vcmp.ge.s32.totalorder %v394_v2, 1  ;;  %v408_v16 = vand.u32 15, %v264_v3 }
  0x41   : > { %v4714_v13 = vsel %vm11669_vm4, %v4682_v12, 0.0  ;;  %v4684_v15 = vld [vmem:[#allocation3 + $0x40] sm:$0xff]  ;;  %9779 = vmatprep.mubr.msk.f32.mxu1 %vm726_vm0, %v1065_v10  ;;  %910 = vst.msk [vmem:[#allocation3 + $0x79] sm:$0xff] %vm726_vm0, %v878_v26  ;;  %810 = vst.msk [vmem:[#allocation2 + $0x81] sm:$0xff] %vm726_vm0, %v778_v27  ;;  %v883_v53 = vld [vmem:[%s11586_s19 + $0x90] sm:$0xff]  ;;  %v270_v51 = vadd.s32 192, %v11555_v11 }
  0x42   : > { %v1067_v20 = vld [vmem:[#allocation2 + $0x41] sm:$0xff]  ;;  %v4716_v25 = vsel %vm11690_vm5, %v4684_v15, 0.0  ;;  %v1068_v29 = vld [vmem:[#allocation2 + $0x49] sm:$0xff]  ;;  %811 = vst.msk [vmem:[#allocation2 + $0x89] sm:$0xff] %vm726_vm0, %v779_v28  ;;  %v1069_v36 = vld [vmem:[#allocation2 + $0x51] sm:$0xff]  ;;  %vm11802_vm10 = vcmp.ge.s32.totalorder %v408_v16, 1 }
  0x43   : > { %10245 = vmatmul.mubr.msk.f32.gmra.mrb[4].mxu0 %vm726_vm0, %v4681_v9  ;;  %v4685_v30 = vld [vmem:[#allocation3 + $0x48] sm:$0xff]  ;;  %v4686_v32 = vld [vmem:[#allocation3 + $0x50] sm:$0xff]  ;;  %911 = vst.msk [vmem:[#allocation3 + $0x81] sm:$0xff] %vm726_vm0, %v879_v37  ;;  %912 = vst.msk [vmem:[#allocation3 + $0x89] sm:$0xff] %vm726_vm0, %v880_v38  ;;  %v14073_v3 = vmov 0 }
  0x44   : > { %10247 = vmatprep.mubr.msk.f32.mxu0 %vm726_vm0, %v4714_v13  ;;  %9780 = vmatmul.mubr.msk.f32.gmra.mrb[6].mxu1 %vm726_vm0, %v1066_v18  ;;  %v1070_v44 = vld [vmem:[#allocation2 + $0x59] sm:$0xff]  ;;  %v4718_v45 = vsel %vm11710_vm6, %v4686_v32, 0.0  ;;  %812 = vst.msk [vmem:[#allocation2 + $0x91] sm:$0xff] %vm726_vm0, %v780_v41  ;;  %813 = vst.msk [vmem:[#allocation2 + $0x99] sm:$0xff] %vm726_vm0, %v781_v42  ;;  %v886_v58 = vld [vmem:[%s11586_s19 + $0xa8] sm:$0xff]  ;;  %v14067_v32 = vmov 0 }
  0x45   : > { %9782 = vmatprep.mubr.msk.f32.mxu1 %vm726_vm0, %v1067_v20  ;;  %v4688_v40 = vld [vmem:[#allocation3 + $0x60] sm:$0xff]  ;;  %913 = vst.msk [vmem:[#allocation3 + $0x91] sm:$0xff] %vm726_vm0, %v881_v43  ;;  %914 = vst.msk [vmem:[#allocation3 + $0x99] sm:$0xff] %vm726_vm0, %v882_v46  ;;  %v884_v54 = vld [vmem:[%s11586_s19 + $0x98] sm:$0xff]  ;;  %v14068_v32 = vsel %vm11802_vm10, 4294967295, %v14067_v32 }
  0x46   : > { %814 = vst.msk [vmem:[#allocation2 + $0xa1] sm:$0xff] %vm726_vm0, %v782_v48  ;;  %815 = vst.msk [vmem:[#allocation2 + $0xa9] sm:$0xff] %vm726_vm0, %v783_v49  ;;  %v784_v55 = vld [vmem:[%s11580_s17 + $0xa0] sm:$0xff]  ;;  %v4720_v61 = vsel %vm11737_vm7, %v4688_v40, 0.0  ;;  %v786_v4 = vld [vmem:[%s11580_s17 + $0xb0] sm:$0xff] }
  0x47   : > { %10248 = vmatmul.mubr.msk.f32.gmra.mrb[6].mxu0 %vm726_vm0, %v4683_v19  ;;  %915 = vst.msk [vmem:[#allocation3 + $0xa1] sm:$0xff] %vm726_vm0, %v883_v53  ;;  %916 = vst.msk [vmem:[#allocation3 + $0xa9] sm:$0xff] %vm726_vm0, %v884_v54  ;;  %v885_v57 = vld [vmem:[%s11586_s19 + $0xa0] sm:$0xff]  ;;  %v4690_v0 = vld [vmem:[#allocation3 + $0x70] sm:$0xff] }
  0x48   : > { %10250 = vmatprep.mubr.msk.f32.mxu0 %vm726_vm0, %v4716_v25  ;;  %9783 = vmatmul.mubr.msk.f32.gmra.mrb[8].mxu1 %vm726_vm0, %v1068_v29  ;;  %816 = vst.msk [vmem:[#allocation2 + $0xb1] sm:$0xff] %vm726_vm0, %v784_v55  ;;  %v4687_v59 = vld [vmem:[#allocation3 + $0x58] sm:$0xff]  ;;  %817 = vst.msk [vmem:[#allocation2 + $0xb9] sm:$0xff] %vm726_vm0, %v785_v56  ;;  %v787_v5 = vld [vmem:[%s11580_s17 + $0xb8] sm:$0xff]  ;;  %v4722_v12 = vsel %vm11763_vm8, %v4690_v0, 0.0  ;;  %v14071_v56 = vmov 0 }
  0x49   : > { %9785 = vmatprep.mubr.msk.f32.mxu1 %vm726_vm0, %v1069_v36  ;;  %v1071_v60 = vld [vmem:[#allocation2 + $0x61] sm:$0xff]  ;;  %917 = vst.msk [vmem:[#allocation3 + $0xb1] sm:$0xff] %vm726_vm0, %v885_v57  ;;  %918 = vst.msk [vmem:[#allocation3 + $0xb9] sm:$0xff] %vm726_vm0, %v886_v58  ;;  %v887_v6 = vld [vmem:[%s11586_s19 + $0xb0] sm:$0xff]  ;;  %v268_v36 = vadd.s32 176, %v11555_v11  ;;  %v450_v58 = vand.u32 15, %v270_v51 }
  0x4a   : > { %v1072_v7 = vld [vmem:[#allocation2 + $0x69] sm:$0xff]  ;;  %818 = vst.msk [vmem:[#allocation2 + $0xc1] sm:$0xff] %vm726_vm0, %v786_v4  ;;  %819 = vst.msk [vmem:[#allocation2 + $0xc9] sm:$0xff] %vm726_vm0, %v787_v5  ;;  %v888_v8 = vld [vmem:[%s11586_s19 + $0xb8] sm:$0xff] }
  0x4b   : > { %10251 = vmatmul.mubr.msk.f32.gmra.mrb[8].mxu0 %vm726_vm0, %v4685_v30  ;;  %919 = vst.msk [vmem:[#allocation3 + $0xc1] sm:$0xff] %vm726_vm0, %v887_v6  ;;  %v4689_v9 = vld [vmem:[#allocation3 + $0x68] sm:$0xff]  ;;  %920 = vst.msk [vmem:[#allocation3 + $0xc9] sm:$0xff] %vm726_vm0, %v888_v8  ;;  %v4692_v15 = vld [vmem:[#allocation3 + $0x80] sm:$0xff]  ;;  %v436_v49 = vand.u32 15, %v268_v36  ;;  %vm11850_vm13 = vcmp.ge.s32.totalorder %v450_v58, 1 }
  0x4c   : > { %10253 = vmatprep.mubr.msk.f32.mxu0 %vm726_vm0, %v4718_v45  ;;  %9786 = vmatmul.mubr.msk.f32.gmra.mrb[10].mxu1 %vm726_vm0, %v1070_v44  ;;  %v1073_v10 = vld [vmem:[#allocation2 + $0x71] sm:$0xff]  ;;  %v1074_v18 = vld [vmem:[#allocation2 + $0x79] sm:$0xff]  ;;  %v1075_v20 = vld [vmem:[#allocation2 + $0x81] sm:$0xff]  ;;  %v4724_v25 = vsel %vm11782_vm9, %v4692_v15, 0.0  ;;  %v14074_v3 = vsel %vm11850_vm13, 4294967295, %v14073_v3  ;;  %v274_v6 = vadd.s32 224, %v11555_v11 }
  0x4d   : > { %9788 = vmatprep.mubr.msk.f32.mxu1 %vm726_vm0, %v1071_v60  ;;  %v4691_v19 = vld [vmem:[#allocation3 + $0x78] sm:$0xff]  ;;  %v789_v23 = vld [vmem:[%s11580_s17 + $0xc8] sm:$0xff]  ;;  %v790_v27 = vld [vmem:[%s11580_s17 + $0xd0] sm:$0xff]  ;;  %vm11839_vm12 = vcmp.ge.s32.totalorder %v436_v49, 1 }
  0x4e   : > { %v788_v22 = vld [vmem:[%s11580_s17 + $0xc0] sm:$0xff]  ;;  %821 = vst.msk [vmem:[#allocation2 + $0xd9] sm:$0xff] %vm726_vm0, %v789_v23  ;;  %v890_v26 = vld [vmem:[%s11586_s19 + $0xc8] sm:$0xff]  ;;  %v791_v28 = vld [vmem:[%s11580_s17 + $0xd8] sm:$0xff]  ;;  %v14072_v56 = vsel %vm11839_vm12, 4294967295, %v14071_v56  ;;  %v478_v16 = vand.u32 15, %v274_v6 }
  0x4f   : > { %10254 = vmatmul.mubr.msk.f32.gmra.mrb[10].mxu0 %vm726_vm0, %v4687_v59  ;;  %v889_v24 = vld [vmem:[%s11586_s19 + $0xc0] sm:$0xff]  ;;  %820 = vst.msk [vmem:[#allocation2 + $0xd1] sm:$0xff] %vm726_vm0, %v788_v22  ;;  %v1076_v29 = vld [vmem:[#allocation2 + $0x89] sm:$0xff]  ;;  %v4694_v33 = vld [vmem:[#allocation3 + $0x90] sm:$0xff]  ;;  %v272_v59 = vadd.s32 208, %v11555_v11  ;;  %v14077_v23 = vmov 0 }
  0x50   : > { %10256 = vmatprep.mubr.msk.f32.mxu0 %vm726_vm0, %v4720_v61  ;;  %9789 = vmatmul.mubr.msk.f32.gmra.mrb[12].mxu1 %vm726_vm0, %v1072_v7  ;;  %921 = vst.msk [vmem:[#allocation3 + $0xd1] sm:$0xff] %vm726_vm0, %v889_v24  ;;  %v4693_v30 = vld [vmem:[#allocation3 + $0x88] sm:$0xff]  ;;  %922 = vst.msk [vmem:[#allocation3 + $0xd9] sm:$0xff] %vm726_vm0, %v890_v26  ;;  %v892_v40 = vld [vmem:[%s11586_s19 + $0xd8] sm:$0xff]  ;;  %v4726_v44 = vsel %vm11802_vm10, %v4694_v33, 0.0  ;;  %vm11872_vm15 = vcmp.ge.s32.totalorder %v478_v16, 1 }
  0x51   : > { %9791 = vmatprep.mubr.msk.f32.mxu1 %vm726_vm0, %v1073_v10  ;;  %822 = vst.msk [vmem:[#allocation2 + $0xe1] sm:$0xff] %vm726_vm0, %v790_v27  ;;  %823 = vst.msk [vmem:[#allocation2 + $0xe9] sm:$0xff] %vm726_vm0, %v791_v28  ;;  %v1077_v37 = vld [vmem:[#allocation2 + $0x91] sm:$0xff]  ;;  %v792_v41 = vld [vmem:[%s11580_s17 + $0xe0] sm:$0xff]  ;;  %v464_v5 = vand.u32 15, %v272_v59  ;;  %v14078_v23 = vsel %vm11872_vm15, 4294967295, %v14077_v23 }
  0x52   : > { %v891_v38 = vld [vmem:[%s11586_s19 + $0xd0] sm:$0xff]  ;;  %924 = vst.msk [vmem:[#allocation3 + $0xe9] sm:$0xff] %vm726_vm0, %v892_v40  ;;  %v793_v42 = vld [vmem:[%s11580_s17 + $0xe8] sm:$0xff]  ;;  %v893_v43 = vld [vmem:[%s11586_s19 + $0xe0] sm:$0xff] }
  0x53   : > { %10257 = vmatmul.mubr.msk.f32.gmra.mrb[12].mxu0 %vm726_vm0, %v4689_v9  ;;  %923 = vst.msk [vmem:[#allocation3 + $0xe1] sm:$0xff] %vm726_vm0, %v891_v38  ;;  %824 = vst.msk [vmem:[#allocation2 + $0xf1] sm:$0xff] %vm726_vm0, %v792_v41  ;;  %v894_v45 = vld [vmem:[%s11586_s19 + $0xe8] sm:$0xff]  ;;  %v1078_v52 = vld [vmem:[#allocation2 + $0x99] sm:$0xff]  ;;  %vm11861_vm14 = vcmp.ge.s32.totalorder %v464_v5, 1 }
  0x54   : > { %10259 = vmatprep.mubr.msk.f32.mxu0 %vm726_vm0, %v4722_v12  ;;  %9792 = vmatmul.mubr.msk.f32.gmra.mrb[14].mxu1 %vm726_vm0, %v1074_v18  ;;  %825 = vst.msk [vmem:[#allocation2 + $0xf9] sm:$0xff] %vm726_vm0, %v793_v42  ;;  %925 = vst.msk [vmem:[#allocation3 + $0xf1] sm:$0xff] %vm726_vm0, %v893_v43  ;;  %v4696_v48 = vld [vmem:[#allocation3 + $0xa0] sm:$0xff]  ;;  %v4695_v53 = vld [vmem:[#allocation3 + $0x98] sm:$0xff]  ;;  %v14075_v12 = vmov 0 }
  0x55   : > { %9794 = vmatprep.mubr.msk.f32.mxu1 %vm726_vm0, %v1075_v20  ;;  %926 = vst.msk [vmem:[#allocation3 + $0xf9] sm:$0xff] %vm726_vm0, %v894_v45  ;;  %v1079_v54 = vld [vmem:[#allocation2 + $0xa1] sm:$0xff]  ;;  %v4728_v55 = vsel %vm11827_vm11, %v4696_v48, 0.0  ;;  %v4698_v57 = vld [vmem:[#allocation3 + $0xb0] sm:$0xff]  ;;  %v1080_v60 = vld [vmem:[#allocation2 + $0xa9] sm:$0xff]  ;;  %v14076_v12 = vsel %vm11861_vm14, 4294967295, %v14075_v12 }
  0x56   : > { %v4697_v61 = vld [vmem:[#allocation3 + $0xa8] sm:$0xff]  ;;  %v4730_v2 = vsel %vm11839_vm12, %v4698_v57, 0.0  ;;  %v4700_v4 = vld [vmem:[#allocation3 + $0xc0] sm:$0xff]  ;;  %v1082_v7 = vld [vmem:[#allocation2 + $0xb9] sm:$0xff]  ;;  %14079 = vst [vmem:[#allocation5_spill] sm:$0xff] %v14078_v23 }
  0x57   : > { %10260 = vmatmul.mubr.msk.f32.gmra.mrb[14].mxu0 %vm726_vm0, %v4691_v19  ;;  %v1081_v0 = vld [vmem:[#allocation2 + $0xb1] sm:$0xff]  ;;  %v4699_v8 = vld [vmem:[#allocation3 + $0xb8] sm:$0xff]  ;;  %v4732_v10 = vsel %vm11850_vm13, %v4700_v4, 0.0  ;;  %v1084_v18 = vld [vmem:[#allocation2 + $0xc9] sm:$0xff] }
  0x58   : > { %10262 = vmatprep.mubr.msk.f32.mxu0 %vm726_vm0, %v4724_v25  ;;  %9795 = vmatmul.mubr.msk.f32.gmra.mrb[16].mxu1 %vm726_vm0, %v1076_v29  ;;  %v1083_v9 = vld [vmem:[#allocation2 + $0xc1] sm:$0xff]  ;;  %v4702_v15 = vld [vmem:[#allocation3 + $0xd0] sm:$0xff]  ;;  %v4701_v19 = vld [vmem:[#allocation3 + $0xc8] sm:$0xff]  ;;  %v492_v25 = vand.u32 15, %v276_v17 }
  0x59   : > { %9797 = vmatprep.mubr.msk.f32.mxu1 %vm726_vm0, %v1077_v37  ;;  %v1085_v20 = vld [vmem:[#allocation2 + $0xd1] sm:$0xff]  ;;  %v4734_v22 = vsel %vm11861_vm14, %v4702_v15, 0.0  ;;  %v1086_v26 = vld [vmem:[#allocation2 + $0xd9] sm:$0xff]  ;;  %v1087_v28 = vld [vmem:[#allocation2 + $0xe1] sm:$0xff] }
  0x5a   : > { %v4704_v24 = vld [vmem:[#allocation3 + $0xe0] sm:$0xff]  ;;  %v4703_v27 = vld [vmem:[#allocation3 + $0xd8] sm:$0xff]  ;;  %vm11882_vm14 = vcmp.ge.s32.totalorder %v492_v25, 1  ;;  %v4705_v36 = vld [vmem:[#allocation3 + $0xe8] sm:$0xff] }
  0x5b   : > { %10263 = vmatmul.mubr.msk.f32.gmra.mrb[16].mxu0 %vm726_vm0, %v4693_v30  ;;  %v4736_v29 = vsel %vm11872_vm15, %v4704_v24, 0.0  ;;  %v14080_v30 = vmov 0  ;;  %v4706_v33 = vld [vmem:[#allocation3 + $0xf0] sm:$0xff]  ;;  %v1088_v35 = vld [vmem:[#allocation2 + $0xe9] sm:$0xff]  ;;  %v929_v40 = vld [vmem:[#allocation2] sm:$0xff] }
  0x5c   : > { %10265 = vmatprep.mubr.msk.f32.mxu0 %vm726_vm0, %v4726_v44  ;;  %9798 = vmatmul.mubr.msk.f32.gmra.mrb[18].mxu1 %vm726_vm0, %v1078_v52  ;;  %v14081_v30 = vsel %vm11882_vm14, 4294967295, %v14080_v30  ;;  %v1089_v37 = vld [vmem:[#allocation2 + $0xf1] sm:$0xff]  ;;  %v4738_v38 = vsel %vm11882_vm14, %v4706_v33, 0.0  ;;  %v1090_v41 = vld [vmem:[#allocation2 + $0xf9] sm:$0xff]  ;;  %v1025_v43 = vsel %vm11597_vm1, %v929_v40, 0.0  ;;  %v5095_v44 = vld [vmem:[#allocation3 + $0x1] sm:$0xff] }
  0x5d   : > { %9800 = vmatprep.mubr.msk.f32.mxu1 %vm726_vm0, %v1079_v54  ;;  %14082 = vst [vmem:[#allocation6_spill] sm:$0xff] %v14081_v30  ;;  %v4707_v42 = vld [vmem:[#allocation3 + $0xf8] sm:$0xff]  ;;  %v11898_v45 = vld [vmem:[#allocation2 + $0x10] sm:$0xff]  ;;  %v8641_v49 = vld [vmem:[%s13823_s2 + $0x38] sm:$0xff] }
  0x5e   : > { %v8640_v48 = vld [vmem:[%s13823_s2 + $0x30] sm:$0xff]  ;;  %v930_v51 = vld [vmem:[#allocation2 + $0x8] sm:$0xff]  ;;  %v11918_v57 = vld [vmem:[#allocation2 + $0x20] sm:$0xff] }
  0x5f   : > { %10266 = vmatmul.mubr.msk.f32.gmra.mrb[18].mxu0 %vm726_vm0, %v4695_v53  ;;  %v8944_v52 = vld [vmem:[%s13824_s3 + $0x30] sm:$0xff]  ;;  %v8945_v53 = vld [vmem:[%s13824_s3 + $0x38] sm:$0xff]  ;;  %v11920_v58 = vpack.c.bf16 %v8641_v49, %v8640_v48  ;;  %v11974_v25 = vld [vmem:[#allocation2 + $0x60] sm:$0xff]  ;;  %v2254_v21 = vsel %vm11638_vm2, %v11918_v57, 0.0 }
  0x60   : > { %10268 = vmatprep.mubr.msk.f32.mxu0 %vm726_vm0, %v4728_v55  ;;  %9801 = vmatmul.mubr.msk.f32.gmra.mrb[20].mxu1 %vm726_vm0, %v1080_v60  ;;  %v5096_v54 = vld [vmem:[#allocation3 + $0x9] sm:$0xff]  ;;  %v1027_v55 = vsel %vm11638_vm2, %v11898_v45, 0.0  ;;  %v5097_v59 = vld [vmem:[#allocation3 + $0x11] sm:$0xff]  ;;  %v11923_v60 = vpack.c.bf16 %v8945_v53, %v8944_v52  ;;  %v5099_v4 = vld [vmem:[#allocation3 + $0x21] sm:$0xff] }
  0x61   : > { %9803 = vmatprep.mubr.msk.f32.mxu1 %vm726_vm0, %v1081_v0  ;;  %v5098_v0 = vld [vmem:[#allocation3 + $0x19] sm:$0xff]  ;;  %v11935_v5 = vld [vmem:[#allocation2 + $0x30] sm:$0xff]  ;;  %v5105_v24 = vld [vmem:[#allocation3 + $0x51] sm:$0xff] }
  0x62   : > { %v1031_v6 = vsel %vm11669_vm4, %v11935_v5, 0.0  ;;  %v5103_v16 = vld [vmem:[#allocation3 + $0x41] sm:$0xff]  ;;  %v5109_v40 = vld [vmem:[#allocation3 + $0x71] sm:$0xff]  ;;  %v5112_v52 = vld [vmem:[#allocation3 + $0x89] sm:$0xff] }
  0x63   : > { %10269 = vmatmul.mubr.msk.f32.gmra.mrb[20].mxu0 %vm726_vm0, %v4697_v61  ;;  %v11927_v61 = vld [vmem:[#allocation2 + $0x18] sm:$0xff]  ;;  %v11961_v17 = vld [vmem:[#allocation2 + $0x50] sm:$0xff]  ;;  %v5486_v30 = vld [vmem:[#allocation3 + $0x1a] sm:$0xff] }
  0x64   : > { %10271 = vmatprep.mubr.msk.f32.mxu0 %vm726_vm0, %v4730_v2  ;;  %9804 = vmatmul.mubr.msk.f32.gmra.mrb[22].mxu1 %vm726_vm0, %v1082_v7  ;;  %v1029_v2 = vsel %vm11663_vm3, %v11918_v57, 0.0  ;;  %v5101_v7 = vld [vmem:[#allocation3 + $0x31] sm:$0xff]  ;;  %v5107_v33 = vld [vmem:[#allocation3 + $0x61] sm:$0xff] }
  0x65   : > { %9806 = vmatprep.mubr.msk.f32.mxu1 %vm726_vm0, %v1083_v9  ;;  %v11955_v9 = vld [vmem:[#allocation2 + $0x38] sm:$0xff]  ;;  %v5111_v48 = vld [vmem:[#allocation3 + $0x81] sm:$0xff]  ;;  %v3460_v14 = vld [vmem:[#allocation2 + $0x80] sm:$0xff] }
  0x66   : > { %v12013_v49 = vld [vmem:[#allocation2 + $0x90] sm:$0xff]  ;;  %v3464_v50 = vld [vmem:[#allocation2 + $0xa0] sm:$0xff] }
  0x67   : > { %10272 = vmatmul.mubr.msk.f32.gmra.mrb[22].mxu0 %vm726_vm0, %v4699_v8  ;;  %v11949_v8 = vld [vmem:[#allocation2 + $0x40] sm:$0xff]  ;;  %v1043_v53 = vsel %vm11802_vm10, %v12013_v49, 0.0  ;;  %v12540_v57 = vld [vmem:[#allocation3 + $0x28] sm:$0xff] }
  0x68   : > { %10274 = vmatprep.mubr.msk.f32.mxu0 %vm726_vm0, %v4732_v10  ;;  %9807 = vmatmul.mubr.msk.f32.gmra.mrb[24].mxu1 %vm726_vm0, %v1084_v18  ;;  %v5102_v10 = vld [vmem:[#allocation3 + $0x39] sm:$0xff]  ;;  %v1033_v15 = vsel %vm11690_vm5, %v11949_v8, 0.0  ;;  %v3458_v63 = vld [vmem:[#allocation2 + $0x70] sm:$0xff] }
  0x69   : > { %9809 = vmatprep.mubr.msk.f32.mxu1 %vm726_vm0, %v1085_v20  ;;  %v11967_v18 = vld [vmem:[#allocation2 + $0x48] sm:$0xff]  ;;  %v1035_v20 = vsel %vm11710_vm6, %v11961_v17, 0.0  ;;  %v3462_v31 = vld [vmem:[#allocation2 + $0x90] sm:$0xff]  ;;  %v3468_v13 = vld [vmem:[#allocation2 + $0xc0] sm:$0xff] }
  0x6a   : > { %v3466_v1 = vld [vmem:[#allocation2 + $0xb0] sm:$0xff]  ;;  %v3472_v46 = vld [vmem:[#allocation2 + $0xe0] sm:$0xff] }
  0x6b   : > { %10275 = vmatmul.mubr.msk.f32.gmra.mrb[24].mxu0 %vm726_vm0, %v4701_v19  ;;  %v5104_v19 = vld [vmem:[#allocation3 + $0x49] sm:$0xff] }
  0x6c   : > { %10277 = vmatprep.mubr.msk.f32.mxu0 %vm726_vm0, %v4734_v22  ;;  %9810 = vmatmul.mubr.msk.f32.gmra.mrb[26].mxu1 %vm726_vm0, %v1086_v26  ;;  %v794_v22 = vld [vmem:[%s11580_s17 + $0xf0] sm:$0xff] }
  0x6d   : > { %9812 = vmatprep.mubr.msk.f32.mxu1 %vm726_vm0, %v1087_v28  ;;  %826 = vst.msk [vmem:[#allocation2 + $0x101] sm:$0xff] %vm726_vm0, %v794_v22  ;;  %v895_v26 = vld [vmem:[%s11586_s19 + $0xf0] sm:$0xff]  ;;  %v5106_v28 = vld [vmem:[#allocation3 + $0x59] sm:$0xff] }
  0x6e   : > { %927 = vst.msk [vmem:[#allocation3 + $0x101] sm:$0xff] %vm726_vm0, %v895_v26  ;;  %v12061_v26 = vld [vmem:[#allocation2 + $0xd0] sm:$0xff] }
  0x6f   : > { %10278 = vmatmul.mubr.msk.f32.gmra.mrb[26].mxu0 %vm726_vm0, %v4703_v27  ;;  %v11983_v27 = vld [vmem:[#allocation2 + $0x58] sm:$0xff] }
  0x70   : > { %10280 = vmatprep.mubr.msk.f32.mxu0 %vm726_vm0, %v4736_v29  ;;  %9813 = vmatmul.mubr.msk.f32.gmra.mrb[28].mxu1 %vm726_vm0, %v1088_v35  ;;  %v1037_v29 = vsel %vm11737_vm7, %v11974_v25, 0.0  ;;  %v11989_v35 = vld [vmem:[#allocation2 + $0x70] sm:$0xff] }
  0x71   : > { %9815 = vmatprep.mubr.msk.f32.mxu1 %vm726_vm0, %v1089_v37  ;;  %v5108_v37 = vld [vmem:[#allocation3 + $0x69] sm:$0xff] }
  0x73   : > { %10281 = vmatmul.mubr.msk.f32.gmra.mrb[28].mxu0 %vm726_vm0, %v4705_v36  ;;  %v11995_v36 = vld [vmem:[#allocation2 + $0x68] sm:$0xff] }
  0x74   : > { %10283 = vmatprep.mubr.msk.f32.mxu0 %vm726_vm0, %v4738_v38  ;;  %9816 = vmatmul.mubr.msk.f32.gmra.mrb[30].mxu1 %vm726_vm0, %v1090_v41  ;;  %v1039_v38 = vsel %vm11763_vm8, %v11989_v35, 0.0  ;;  %v12001_v41 = vld [vmem:[#allocation2 + $0x80] sm:$0xff] }
  0x75   : > { %9822 = vmatprep.mubr.msk.f32.mxu1 %vm726_vm0, %v1025_v43  ;;  %v5110_v43 = vld [vmem:[#allocation3 + $0x79] sm:$0xff] }
  0x77   : > { %10284 = vmatmul.mubr.msk.f32.gmra.mrb[30].mxu0 %vm726_vm0, %v4707_v42  ;;  %v12007_v42 = vld [vmem:[#allocation2 + $0x78] sm:$0xff] }
  0x78   : > { %10290 = vmatprep.mubr.msk.f32.mxu0 %vm726_vm0, %v5095_v44  ;;  %9823 = vmatmul.mubr.msk.f32.vlgmr.msra.gmra.mrb[0].mxu1 %vm726_vm0, %v930_v51  ;;  %v1041_v44 = vsel %vm11782_vm9, %v12001_v41, 0.0  ;;  %v12019_v51 = vld [vmem:[#allocation2 + $0x88] sm:$0xff] }
  0x79   : > { %10713 = vmatpush3.bf16.msra.mxu1 %v11615_v34  ;;  %9825 = vmatprep.mubr.msk.f32.mxu1 %vm726_vm0, %v1027_v55  ;;  %v11943_v34 = vld [vmem:[#allocation2 + $0x28] sm:$0xff]  ;;  %v12025_v55 = vld [vmem:[#allocation2 + $0xa0] sm:$0xff] }
  0x7a   : > { %10715 = vmatprep.subr.bf16.mxu1 %v11920_v58 }
  0x7b   : > { %10291 = vmatmul.mubr.msk.f32.vlgmr.msra.gmra.mrb[0].mxu0 %vm726_vm0, %v5096_v54  ;;  %v5113_v54 = vld [vmem:[#allocation3 + $0x91] sm:$0xff] }
  0x7c   : > { %10749 = vmatpush3.bf16.msra.mxu0 %v11622_v39  ;;  %10293 = vmatprep.mubr.msk.f32.mxu0 %vm726_vm0, %v5097_v59  ;;  %v5100_v39 = vld [vmem:[#allocation3 + $0x29] sm:$0xff] }
  0x7d   : > { %9826 = vmatmul.mubr.msk.f32.gmra.mrb[2].mxu1 %vm726_vm0, %v11927_v61  ;;  %10751 = vmatprep.subr.bf16.mxu0 %v11923_v60  ;;  %v12031_v59 = vld [vmem:[#allocation2 + $0x98] sm:$0xff] }
  0x7e   : > { %9828 = vmatprep.mubr.msk.f32.mxu1 %vm726_vm0, %v1029_v2  ;;  %v1045_v2 = vsel %vm11827_vm11, %v12025_v55, 0.0 }
  0x7f   : > { %10294 = vmatmul.mubr.msk.f32.gmra.mrb[2].mxu0 %vm726_vm0, %v5098_v0  ;;  %v5114_v0 = vld [vmem:[#allocation3 + $0x99] sm:$0xff] }
  0x80   : > { %10296 = vmatprep.mubr.msk.f32.mxu0 %vm726_vm0, %v5099_v4  ;;  %v5115_v4 = vld [vmem:[#allocation3 + $0xa1] sm:$0xff] }
  0x81   : > { %9829 = vmatmul.mubr.msk.f32.gmra.mrb[4].mxu1 %vm726_vm0, %v11943_v34 }
  0x82   : > { %9831 = vmatprep.mubr.msk.f32.mxu1 %vm726_vm0, %v1031_v6  ;;  %v12043_v6 = vld [vmem:[#allocation2 + $0xa8] sm:$0xff] }
  0x83   : > { %10297 = vmatmul.mubr.msk.f32.gmra.mrb[4].mxu0 %vm726_vm0, %v5100_v39  ;;  %v12037_v39 = vld [vmem:[#allocation2 + $0xb0] sm:$0xff] }
  0x84   : > { %10299 = vmatprep.mubr.msk.f32.mxu0 %vm726_vm0, %v5101_v7  ;;  %v5116_v7 = vld [vmem:[#allocation3 + $0xa9] sm:$0xff] }
  0x85   : > { %9832 = vmatmul.mubr.msk.f32.gmra.mrb[6].mxu1 %vm726_vm0, %v11955_v9 }
  0x86   : > { %9834 = vmatprep.mubr.msk.f32.mxu1 %vm726_vm0, %v1033_v15  ;;  %v5117_v15 = vld [vmem:[#allocation3 + $0xb1] sm:$0xff] }
  0x87   : > { %10300 = vmatmul.mubr.msk.f32.gmra.mrb[6].mxu0 %vm726_vm0, %v5102_v10  ;;  %v1047_v10 = vsel %vm11839_vm12, %v12037_v39, 0.0  ;;  %vm14083_vm12 = vnez %v14076_v12 }
  0x88   : > { %10302 = vmatprep.mubr.msk.f32.mxu0 %vm726_vm0, %v5103_v16  ;;  %v12049_v16 = vld [vmem:[#allocation2 + $0xc0] sm:$0xff] }
  0x89   : > { %9835 = vmatmul.mubr.msk.f32.gmra.mrb[8].mxu1 %vm726_vm0, %v11967_v18  ;;  %v1049_v22 = vsel %vm11850_vm13, %v12049_v16, 0.0 }
  0x8a   : > { %9837 = vmatprep.mubr.msk.f32.mxu1 %vm726_vm0, %v1035_v20  ;;  %v5118_v20 = vld [vmem:[#allocation3 + $0xb9] sm:$0xff] }
  0x8b   : > { %10303 = vmatmul.mubr.msk.f32.gmra.mrb[8].mxu0 %vm726_vm0, %v5104_v19  ;;  %v12055_v19 = vld [vmem:[#allocation2 + $0xb8] sm:$0xff] }
  0x8c   : > { %10305 = vmatprep.mubr.msk.f32.mxu0 %vm726_vm0, %v5105_v24  ;;  %v5119_v24 = vld [vmem:[#allocation3 + $0xc1] sm:$0xff] }
  0x8d   : > { %9838 = vmatmul.mubr.msk.f32.gmra.mrb[10].mxu1 %vm726_vm0, %v11983_v27 }
  0x8e   : > { %9840 = vmatprep.mubr.msk.f32.mxu1 %vm726_vm0, %v1037_v29  ;;  %v5120_v29 = vld [vmem:[#allocation3 + $0xc9] sm:$0xff] }
  0x8f   : > { %10306 = vmatmul.mubr.msk.f32.gmra.mrb[10].mxu0 %vm726_vm0, %v5106_v28  ;;  %v12067_v28 = vld [vmem:[#allocation2 + $0xc8] sm:$0xff] }
  0x90   : > { %10308 = vmatprep.mubr.msk.f32.mxu0 %vm726_vm0, %v5107_v33  ;;  %v1051_v33 = vsel %vm14083_vm12, %v12061_v26, 0.0 }
  0x91   : > { %9841 = vmatmul.mubr.msk.f32.gmra.mrb[12].mxu1 %vm726_vm0, %v11995_v36 }
  0x92   : > { %9843 = vmatprep.mubr.msk.f32.mxu1 %vm726_vm0, %v1039_v38  ;;  %v12073_v38 = vld [vmem:[#allocation2 + $0xe0] sm:$0xff] }
  0x93   : > { %10309 = vmatmul.mubr.msk.f32.gmra.mrb[12].mxu0 %vm726_vm0, %v5108_v37  ;;  %v5121_v37 = vld [vmem:[#allocation3 + $0xd1] sm:$0xff] }
  0x94   : > { %10311 = vmatprep.mubr.msk.f32.mxu0 %vm726_vm0, %v5109_v40  ;;  %v12079_v40 = vld [vmem:[#allocation2 + $0xd8] sm:$0xff] }
  0x95   : > { %9844 = vmatmul.mubr.msk.f32.gmra.mrb[14].mxu1 %vm726_vm0, %v12007_v42 }
  0x96   : > { %9846 = vmatprep.mubr.msk.f32.mxu1 %vm726_vm0, %v1041_v44  ;;  %v1053_v44 = vsel %vm11872_vm15, %v12073_v38, 0.0 }
  0x97   : > { %10312 = vmatmul.mubr.msk.f32.gmra.mrb[14].mxu0 %vm726_vm0, %v5110_v43  ;;  %v5122_v43 = vld [vmem:[#allocation3 + $0xd9] sm:$0xff] }
  0x98   : > { %10314 = vmatprep.mubr.msk.f32.mxu0 %vm726_vm0, %v5111_v48  ;;  %v247_v48 = vadd.s32 8, %v11555_v11 }
  0x99   : > { %9847 = vmatmul.mubr.msk.f32.gmra.mrb[16].mxu1 %vm726_vm0, %v12019_v51 }
  0x9a   : > { %9849 = vmatprep.mubr.msk.f32.mxu1 %vm726_vm0, %v1043_v53  ;;  %v12086_v53 = vld [vmem:[#allocation2 + $0xf0] sm:$0xff] }
  0x9b   : > { %10315 = vmatmul.mubr.msk.f32.gmra.mrb[16].mxu0 %vm726_vm0, %v5112_v52  ;;  %v5123_v52 = vld [vmem:[#allocation3 + $0xe1] sm:$0xff] }
  0x9c   : > { %10317 = vmatprep.mubr.msk.f32.mxu0 %vm726_vm0, %v5113_v54  ;;  %v795_v54 = vld [vmem:[%s11580_s17 + $0xf8] sm:$0xff] }
  0x9d   : > { %9850 = vmatmul.mubr.msk.f32.gmra.mrb[18].mxu1 %vm726_vm0, %v12031_v59  ;;  %827 = vst.msk [vmem:[#allocation2 + $0x109] sm:$0xff] %vm726_vm0, %v795_v54  ;;  %v8674_v54 = vld [vmem:[%s13823_s2 + $0x40] sm:$0xff] }
  0x9e   : > { %9852 = vmatprep.mubr.msk.f32.mxu1 %vm726_vm0, %v1045_v2  ;;  %v12095_v2 = vld [vmem:[#allocation2 + $0xe8] sm:$0xff] }
  0x9f   : > { %10318 = vmatmul.mubr.msk.f32.gmra.mrb[18].mxu0 %vm726_vm0, %v5114_v0  ;;  %v896_v0 = vld [vmem:[%s11586_s19 + $0xf8] sm:$0xff]  ;;  %14084 = vst [vmem:[#allocation7_spill] sm:$0xff] %v12095_v2 }
  0xa0   : > { %10320 = vmatprep.mubr.msk.f32.mxu0 %vm726_vm0, %v5115_v4  ;;  %928 = vst.msk [vmem:[#allocation3 + $0x109] sm:$0xff] %vm726_vm0, %v896_v0  ;;  %v5124_v4 = vld [vmem:[#allocation3 + $0xe9] sm:$0xff]  ;;  %v8675_v0 = vld [vmem:[%s13823_s2 + $0x48] sm:$0xff] }
  0xa1   : > { %9853 = vmatmul.mubr.msk.f32.gmra.mrb[20].mxu1 %vm726_vm0, %v12043_v6 }
  0xa2   : > { %9855 = vmatprep.mubr.msk.f32.mxu1 %vm726_vm0, %v1047_v10  ;;  %v289_v10 = vand.u32 15, %v247_v48  ;;  %v5483_v48 = vld [vmem:[#allocation3 + $0x2] sm:$0xff] }
  0xa3   : > { %10321 = vmatmul.mubr.msk.f32.gmra.mrb[20].mxu0 %vm726_vm0, %v5116_v7  ;;  %v1055_v7 = vsel %vm11882_vm14, %v12086_v53, 0.0 }
  0xa4   : > { %10323 = vmatprep.mubr.msk.f32.mxu0 %vm726_vm0, %v5117_v15  ;;  %v249_v15 = vadd.s32 24, %v11555_v11  ;;  %vm12110_vm15 = vcmp.le.s32.totalorder %v289_v10, 14  ;;  %v8979_v10 = vld [vmem:[%s13824_s3 + $0x48] sm:$0xff] }
  0xa5   : > { %9856 = vmatmul.mubr.msk.f32.gmra.mrb[22].mxu1 %vm726_vm0, %v12055_v19 }
  0xa6   : > { %9858 = vmatprep.mubr.msk.f32.mxu1 %vm726_vm0, %v1049_v22  ;;  %v12107_v22 = vld [vmem:[#allocation2 + $0xf8] sm:$0xff] }
  0xa7   : > { %10324 = vmatmul.mubr.msk.f32.gmra.mrb[22].mxu0 %vm726_vm0, %v5118_v20  ;;  %v5125_v20 = vld [vmem:[#allocation3 + $0xf1] sm:$0xff]  ;;  %14085 = vst [vmem:[#allocation8_spill] sm:$0xff] %v12107_v22 }
  0xa8   : > { %10326 = vmatprep.mubr.msk.f32.mxu0 %vm726_vm0, %v5119_v24  ;;  %v5126_v24 = vld [vmem:[#allocation3 + $0xf9] sm:$0xff] }
  0xa9   : > { %9859 = vmatmul.mubr.msk.f32.gmra.mrb[24].mxu1 %vm726_vm0, %v12067_v28 }
  0xaa   : > { %9861 = vmatprep.mubr.msk.f32.mxu1 %vm726_vm0, %v1051_v33  ;;  %v14086_v33 = vmov 0 }
  0xab   : > { %10327 = vmatmul.mubr.msk.f32.gmra.mrb[24].mxu0 %vm726_vm0, %v5120_v29  ;;  %v1736_v29 = vld [vmem:[#allocation2 + $0x2] sm:$0xff]  ;;  %v14087_v33 = vsel %vm12110_vm15, 4294967295, %v14086_v33 }
  0xac   : > { %10329 = vmatprep.mubr.msk.f32.mxu0 %vm726_vm0, %v5121_v37  ;;  %14088 = vst [vmem:[#allocation9_spill] sm:$0xff] %v14087_v33  ;;  %v1737_v37 = vld [vmem:[#allocation2 + $0xa] sm:$0xff] }
  0xad   : > { %9862 = vmatmul.mubr.msk.f32.gmra.mrb[26].mxu1 %vm726_vm0, %v12079_v40 }
  0xae   : > { %9864 = vmatprep.mubr.msk.f32.mxu1 %vm726_vm0, %v1053_v44  ;;  %v251_v44 = vadd.s32 40, %v11555_v11 }
  0xaf   : > { %10330 = vmatmul.mubr.msk.f32.gmra.mrb[26].mxu0 %vm726_vm0, %v5122_v43  ;;  %v303_v43 = vand.u32 15, %v249_v15 }
  0xb0   : > { %10332 = vmatprep.mubr.msk.f32.mxu0 %vm726_vm0, %v5123_v52  ;;  %v5484_v52 = vld [vmem:[#allocation3 + $0xa] sm:$0xff] }
  0xb1   : > { %9865 = vmatmul.mubr.msk.f32.gmra.mrb[28].mxu1 %vm726_vm0, %v12095_v2  ;;  %v5516_v15 = vsel %vm12110_vm15, %v5484_v52, 0.0  ;;  %vm12136_vm14 = vcmp.le.s32.totalorder %v303_v43, 14  ;;  %v12145_v2 = vpack.c.bf16 %v8675_v0, %v8674_v54  ;;  %v1740_v52 = vld [vmem:[#allocation2 + $0x22] sm:$0xff]  ;;  %v14092_v54 = vmov 0 }
  0xb2   : > { %9867 = vmatprep.mubr.msk.f32.mxu1 %vm726_vm0, %v1055_v7  ;;  %v8978_v7 = vld [vmem:[%s13824_s3 + $0x40] sm:$0xff] }
  0xb3   : > { %10333 = vmatmul.mubr.msk.f32.gmra.mrb[28].mxu0 %vm726_vm0, %v5124_v4  ;;  %v1833_v4 = vsel %vm12110_vm15, %v1737_v37, 0.0  ;;  %v253_v37 = vadd.s32 56, %v11555_v11  ;;  %v12150_v33 = vpack.c.bf16 %v8979_v10, %v8978_v7  ;;  %v5487_v7 = vld [vmem:[#allocation3 + $0x22] sm:$0xff] }
  0xb4   : > { %10335 = vmatprep.mubr.msk.f32.mxu0 %vm726_vm0, %v5125_v20  ;;  %v14089_v20 = vmov 0 }
  0xb5   : > { %9868 = vmatmul.mubr.msk.f32.gmra.mrb[30].mxu1 %vm726_vm0, %v12107_v22  ;;  %v14090_v20 = vsel %vm12136_vm14, 4294967295, %v14089_v20  ;;  %v12143_v22 = vld [vmem:[#allocation2 + $0x12] sm:$0xff]  ;;  %v331_v0 = vand.u32 15, %v253_v37  ;;  %v12183_v37 = vld [vmem:[#allocation2 + $0x3a] sm:$0xff] }
  0xb6   : > { %9874 = vmatprep.mubr.msk.f32.mxu1 %vm726_vm0, %v1736_v29  ;;  %14091 = vst [vmem:[#allocation10_spill] sm:$0xff] %v14090_v20  ;;  %v317_v29 = vand.u32 15, %v251_v44  ;;  %v5518_v44 = vsel %vm12136_vm14, %v5486_v30, 0.0  ;;  %v12186_v20 = vld [vmem:[#allocation3 + $0x32] sm:$0xff] }
  0xb7   : > { %10336 = vmatmul.mubr.msk.f32.gmra.mrb[30].mxu0 %vm726_vm0, %v5126_v24  ;;  %v12140_v24 = vld [vmem:[#allocation2 + $0x1a] sm:$0xff]  ;;  %14098 = vst [vmem:[#allocation13_spill] sm:$0xff] %v12186_v20 }
  0xb8   : > { %10342 = vmatprep.mubr.msk.f32.mxu0 %vm726_vm0, %v5483_v48  ;;  %v12148_v48 = vld [vmem:[#allocation3 + $0x12] sm:$0xff]  ;;  %v1835_v43 = vsel %vm12136_vm14, %v12140_v24, 0.0  ;;  %vm12162_vm15 = vcmp.le.s32.totalorder %v317_v29, 14  ;;  %vm12179_vm14 = vcmp.le.s32.totalorder %v331_v0, 14  ;;  %v14095_v29 = vmov 0 }
  0xb9   : > { %9875 = vmatmul.mubr.msk.f32.vlgmr.msra.gmra.mrb[0].mxu1 %vm726_vm0, %v1833_v4  ;;  %v14093_v54 = vsel %vm12162_vm15, 4294967295, %v14092_v54  ;;  %v255_v4 = vadd.s32 72, %v11555_v11  ;;  %v14096_v29 = vsel %vm12179_vm14, 4294967295, %v14095_v29 }
  0xba   : > { %10717 = vmatpush3.bf16.msra.mxu1 %v11920_v58  ;;  %9877 = vmatprep.mubr.msk.f32.mxu1 %vm726_vm0, %v12143_v22  ;;  %14094 = vst [vmem:[#allocation11_spill] sm:$0xff] %v14093_v54  ;;  %v1741_v58 = vld [vmem:[#allocation2 + $0x2a] sm:$0xff]  ;;  %14097 = vst [vmem:[#allocation12_spill] sm:$0xff] %v14096_v29  ;;  %v12212_v54 = vld [vmem:[#allocation3 + $0x4a] sm:$0xff] }
  0xbb   : > { %10343 = vmatmul.mubr.msk.f32.vlgmr.msra.gmra.mrb[0].mxu0 %vm726_vm0, %v5516_v15  ;;  %10719 = vmatprep.subr.bf16.mxu1 %v12145_v2  ;;  %v1837_v30 = vsel %vm12162_vm15, %v1741_v58, 0.0  ;;  %v1742_v15 = vld [vmem:[#allocation2 + $0x32] sm:$0xff]  ;;  %v1839_v58 = vsel %vm12179_vm14, %v12183_v37, 0.0  ;;  %14106 = vst [vmem:[#allocation19_spill] sm:$0xff] %v12212_v54 }
  0xbc   : > { %10753 = vmatpush3.bf16.msra.mxu0 %v11923_v60  ;;  %10345 = vmatprep.mubr.msk.f32.mxu0 %vm726_vm0, %v12148_v48  ;;  %v5488_v60 = vld [vmem:[#allocation3 + $0x2a] sm:$0xff] }
  0xbd   : > { %9878 = vmatmul.mubr.msk.f32.gmra.mrb[2].mxu1 %vm726_vm0, %v1835_v43  ;;  %10755 = vmatprep.subr.bf16.mxu0 %v12150_v33  ;;  %v5520_v10 = vsel %vm12162_vm15, %v5488_v60, 0.0  ;;  %v345_v43 = vand.u32 15, %v255_v4  ;;  %v12201_v4 = vld [vmem:[#allocation2 + $0x42] sm:$0xff]  ;;  %v12207_v60 = vld [vmem:[#allocation2 + $0x4a] sm:$0xff]  ;;  %v12226_v29 = vld [vmem:[#allocation2 + $0x52] sm:$0xff] }
  0xbe   : > { %9880 = vmatprep.mubr.msk.f32.mxu1 %vm726_vm0, %v1740_v52  ;;  %v12188_v52 = vld [vmem:[#allocation3 + $0x3a] sm:$0xff]  ;;  %14100 = vst [vmem:[#allocation15_spill] sm:$0xff] %v12201_v4  ;;  %14104 = vst [vmem:[#allocation17_spill] sm:$0xff] %v12207_v60 }
  0xbf   : > { %10346 = vmatmul.mubr.msk.f32.gmra.mrb[2].mxu0 %vm726_vm0, %v5518_v44  ;;  %v257_v44 = vadd.s32 88, %v11555_v11  ;;  %14099 = vst [vmem:[#allocation14_spill] sm:$0xff] %v12188_v52  ;;  %v5522_v0 = vsel %vm12179_vm14, %v12188_v52, 0.0  ;;  %vm12203_vm15 = vcmp.le.s32.totalorder %v345_v43, 14  ;;  %14107 = vst [vmem:[#allocation20_spill] sm:$0xff] %v12226_v29  ;;  %v261_v52 = vadd.s32 120, %v11555_v11 }
  0xc0   : > { %10348 = vmatprep.mubr.msk.f32.mxu0 %vm726_vm0, %v5487_v7  ;;  %v14101_v7 = vmov 0  ;;  %v1841_v43 = vsel %vm12203_vm15, %v12207_v60, 0.0  ;;  %v12237_v60 = vld [vmem:[#allocation3 + $0x5a] sm:$0xff] }
  0xc1   : > { %9881 = vmatmul.mubr.msk.f32.gmra.mrb[4].mxu1 %vm726_vm0, %v1837_v30  ;;  %v14102_v7 = vsel %vm12203_vm15, 4294967295, %v14101_v7  ;;  %v359_v30 = vand.u32 15, %v257_v44  ;;  %v5524_v44 = vsel %vm12203_vm15, %v12212_v54, 0.0  ;;  %14113 = vst [vmem:[#allocation24_spill] sm:$0xff] %v12237_v60  ;;  %v263_v54 = vadd.s32 136, %v11555_v11 }
  0xc2   : > { %9883 = vmatprep.mubr.msk.f32.mxu1 %vm726_vm0, %v1742_v15  ;;  %14103 = vst [vmem:[#allocation16_spill] sm:$0xff] %v14102_v7  ;;  %v12210_v15 = vld [vmem:[#allocation3 + $0x42] sm:$0xff]  ;;  %v12251_v7 = vld [vmem:[#allocation2 + $0x62] sm:$0xff] }
  0xc3   : > { %10349 = vmatmul.mubr.msk.f32.gmra.mrb[4].mxu0 %vm726_vm0, %v5520_v10  ;;  %v259_v10 = vadd.s32 104, %v11555_v11  ;;  %14105 = vst [vmem:[#allocation18_spill] sm:$0xff] %v12210_v15  ;;  %vm12228_vm14 = vcmp.le.s32.totalorder %v359_v30, 14  ;;  %14114 = vst [vmem:[#allocation25_spill] sm:$0xff] %v12251_v7 }
  0xc4   : > { %10351 = vmatprep.mubr.msk.f32.mxu0 %vm726_vm0, %v12186_v20  ;;  %v12235_v20 = vld [vmem:[#allocation3 + $0x52] sm:$0xff] }
  0xc5   : > { %9884 = vmatmul.mubr.msk.f32.gmra.mrb[6].mxu1 %vm726_vm0, %v1839_v58  ;;  %v14108_v58 = vmov 0  ;;  %14112 = vst [vmem:[#allocation23_spill] sm:$0xff] %v12235_v20 }
  0xc6   : > { %9886 = vmatprep.mubr.msk.f32.mxu1 %vm726_vm0, %v12201_v4  ;;  %v14109_v58 = vsel %vm12228_vm14, 4294967295, %v14108_v58  ;;  %v373_v4 = vand.u32 15, %v259_v10  ;;  %v5526_v10 = vsel %vm12228_vm14, %v12237_v60, 0.0  ;;  %v265_v60 = vadd.s32 152, %v11555_v11 }
  0xc7   : > { %10352 = vmatmul.mubr.msk.f32.gmra.mrb[6].mxu0 %vm726_vm0, %v5522_v0  ;;  %14110 = vst [vmem:[#allocation21_spill] sm:$0xff] %v14109_v58  ;;  %v12232_v0 = vld [vmem:[#allocation2 + $0x5a] sm:$0xff]  ;;  %v12276_v58 = vld [vmem:[#allocation2 + $0x72] sm:$0xff] }
  0xc8   : > { %10354 = vmatprep.mubr.msk.f32.mxu0 %vm726_vm0, %v12210_v15  ;;  %14111 = vst [vmem:[#allocation22_spill] sm:$0xff] %v12232_v0  ;;  %v1843_v30 = vsel %vm12228_vm14, %v12232_v0, 0.0  ;;  %vm12253_vm15 = vcmp.le.s32.totalorder %v373_v4, 14  ;;  %v12260_v15 = vld [vmem:[#allocation3 + $0x62] sm:$0xff]  ;;  %v12262_v0 = vld [vmem:[#allocation3 + $0x6a] sm:$0xff]  ;;  %14121 = vst [vmem:[#allocation30_spill] sm:$0xff] %v12276_v58 }
  0xc9   : > { %9887 = vmatmul.mubr.msk.f32.gmra.mrb[8].mxu1 %vm726_vm0, %v1841_v43  ;;  %v14115_v43 = vmov 0  ;;  %14119 = vst [vmem:[#allocation28_spill] sm:$0xff] %v12260_v15  ;;  %14120 = vst [vmem:[#allocation29_spill] sm:$0xff] %v12262_v0 }
  0xca   : > { %9889 = vmatprep.mubr.msk.f32.mxu1 %vm726_vm0, %v12226_v29  ;;  %v14116_v43 = vsel %vm12253_vm15, 4294967295, %v14115_v43  ;;  %v387_v29 = vand.u32 15, %v261_v52  ;;  %v5528_v52 = vsel %vm12253_vm15, %v12262_v0, 0.0  ;;  %v267_v0 = vadd.s32 168, %v11555_v11 }
  0xcb   : > { %10355 = vmatmul.mubr.msk.f32.gmra.mrb[8].mxu0 %vm726_vm0, %v5524_v44  ;;  %14117 = vst [vmem:[#allocation26_spill] sm:$0xff] %v14116_v43  ;;  %v12257_v44 = vld [vmem:[#allocation2 + $0x6a] sm:$0xff]  ;;  %v12301_v43 = vld [vmem:[#allocation2 + $0x82] sm:$0xff] }
  0xcc   : > { %10357 = vmatprep.mubr.msk.f32.mxu0 %vm726_vm0, %v12235_v20  ;;  %14118 = vst [vmem:[#allocation27_spill] sm:$0xff] %v12257_v44  ;;  %v1845_v4 = vsel %vm12253_vm15, %v12257_v44, 0.0  ;;  %vm12278_vm14 = vcmp.le.s32.totalorder %v387_v29, 14  ;;  %v12285_v20 = vld [vmem:[#allocation3 + $0x72] sm:$0xff]  ;;  %v12287_v44 = vld [vmem:[#allocation3 + $0x7a] sm:$0xff]  ;;  %14128 = vst [vmem:[#allocation35_spill] sm:$0xff] %v12301_v43 }
  0xcd   : > { %9890 = vmatmul.mubr.msk.f32.gmra.mrb[10].mxu1 %vm726_vm0, %v1843_v30  ;;  %v14122_v30 = vmov 0  ;;  %14126 = vst [vmem:[#allocation33_spill] sm:$0xff] %v12285_v20  ;;  %14127 = vst [vmem:[#allocation34_spill] sm:$0xff] %v12287_v44 }
  0xce   : > { %9892 = vmatprep.mubr.msk.f32.mxu1 %vm726_vm0, %v12251_v7  ;;  %v14123_v30 = vsel %vm12278_vm14, 4294967295, %v14122_v30  ;;  %v401_v7 = vand.u32 15, %v263_v54  ;;  %v5530_v54 = vsel %vm12278_vm14, %v12287_v44, 0.0  ;;  %v269_v44 = vadd.s32 184, %v11555_v11 }
  0xcf   : > { %10358 = vmatmul.mubr.msk.f32.gmra.mrb[10].mxu0 %vm726_vm0, %v5526_v10  ;;  %14124 = vst [vmem:[#allocation31_spill] sm:$0xff] %v14123_v30  ;;  %v12282_v10 = vld [vmem:[#allocation2 + $0x7a] sm:$0xff]  ;;  %v12326_v30 = vld [vmem:[#allocation2 + $0x92] sm:$0xff] }
  0xd0   : > { %10360 = vmatprep.mubr.msk.f32.mxu0 %vm726_vm0, %v12260_v15  ;;  %14125 = vst [vmem:[#allocation32_spill] sm:$0xff] %v12282_v10  ;;  %v1847_v29 = vsel %vm12278_vm14, %v12282_v10, 0.0  ;;  %vm12303_vm15 = vcmp.le.s32.totalorder %v401_v7, 14  ;;  %v12310_v15 = vld [vmem:[#allocation3 + $0x82] sm:$0xff]  ;;  %v12312_v10 = vld [vmem:[#allocation3 + $0x8a] sm:$0xff]  ;;  %14135 = vst [vmem:[#allocation40_spill] sm:$0xff] %v12326_v30 }
  0xd1   : > { %9893 = vmatmul.mubr.msk.f32.gmra.mrb[12].mxu1 %vm726_vm0, %v1845_v4  ;;  %v14129_v4 = vmov 0  ;;  %14133 = vst [vmem:[#allocation38_spill] sm:$0xff] %v12310_v15  ;;  %14134 = vst [vmem:[#allocation39_spill] sm:$0xff] %v12312_v10 }
  0xd2   : > { %9895 = vmatprep.mubr.msk.f32.mxu1 %vm726_vm0, %v12276_v58  ;;  %v14130_v4 = vsel %vm12303_vm15, 4294967295, %v14129_v4  ;;  %v415_v58 = vand.u32 15, %v265_v60  ;;  %v5532_v60 = vsel %vm12303_vm15, %v12312_v10, 0.0  ;;  %v271_v10 = vadd.s32 200, %v11555_v11 }
  0xd3   : > { %10361 = vmatmul.mubr.msk.f32.gmra.mrb[12].mxu0 %vm726_vm0, %v5528_v52  ;;  %14131 = vst [vmem:[#allocation36_spill] sm:$0xff] %v14130_v4  ;;  %v12307_v52 = vld [vmem:[#allocation2 + $0x8a] sm:$0xff]  ;;  %v12351_v4 = vld [vmem:[#allocation2 + $0xa2] sm:$0xff] }
  0xd4   : > { %10363 = vmatprep.mubr.msk.f32.mxu0 %vm726_vm0, %v12285_v20  ;;  %14132 = vst [vmem:[#allocation37_spill] sm:$0xff] %v12307_v52  ;;  %v1849_v7 = vsel %vm12303_vm15, %v12307_v52, 0.0  ;;  %vm12328_vm14 = vcmp.le.s32.totalorder %v415_v58, 14  ;;  %v12335_v20 = vld [vmem:[#allocation3 + $0x92] sm:$0xff]  ;;  %v12337_v52 = vld [vmem:[#allocation3 + $0x9a] sm:$0xff]  ;;  %14142 = vst [vmem:[#allocation45_spill] sm:$0xff] %v12351_v4 }
  0xd5   : > { %9896 = vmatmul.mubr.msk.f32.gmra.mrb[14].mxu1 %vm726_vm0, %v1847_v29  ;;  %v14136_v29 = vmov 0  ;;  %14140 = vst [vmem:[#allocation43_spill] sm:$0xff] %v12335_v20  ;;  %14141 = vst [vmem:[#allocation44_spill] sm:$0xff] %v12337_v52 }
  0xd6   : > { %9898 = vmatprep.mubr.msk.f32.mxu1 %vm726_vm0, %v12301_v43  ;;  %v14137_v29 = vsel %vm12328_vm14, 4294967295, %v14136_v29  ;;  %v429_v43 = vand.u32 15, %v267_v0  ;;  %v5534_v0 = vsel %vm12328_vm14, %v12337_v52, 0.0  ;;  %v273_v52 = vadd.s32 216, %v11555_v11 }
  0xd7   : > { %10364 = vmatmul.mubr.msk.f32.gmra.mrb[14].mxu0 %vm726_vm0, %v5530_v54  ;;  %14138 = vst [vmem:[#allocation41_spill] sm:$0xff] %v14137_v29  ;;  %v12332_v54 = vld [vmem:[#allocation2 + $0x9a] sm:$0xff]  ;;  %v12376_v29 = vld [vmem:[#allocation2 + $0xb2] sm:$0xff] }
  0xd8   : > { %10366 = vmatprep.mubr.msk.f32.mxu0 %vm726_vm0, %v12310_v15  ;;  %14139 = vst [vmem:[#allocation42_spill] sm:$0xff] %v12332_v54  ;;  %v1851_v58 = vsel %vm12328_vm14, %v12332_v54, 0.0  ;;  %vm12353_vm15 = vcmp.le.s32.totalorder %v429_v43, 14  ;;  %v12360_v15 = vld [vmem:[#allocation3 + $0xa2] sm:$0xff]  ;;  %v12362_v54 = vld [vmem:[#allocation3 + $0xaa] sm:$0xff]  ;;  %14149 = vst [vmem:[#allocation50_spill] sm:$0xff] %v12376_v29 }
  0xd9   : > { %9899 = vmatmul.mubr.msk.f32.gmra.mrb[16].mxu1 %vm726_vm0, %v1849_v7  ;;  %v14143_v7 = vmov 0  ;;  %14147 = vst [vmem:[#allocation48_spill] sm:$0xff] %v12360_v15  ;;  %14148 = vst [vmem:[#allocation49_spill] sm:$0xff] %v12362_v54 }
  0xda   : > { %9901 = vmatprep.mubr.msk.f32.mxu1 %vm726_vm0, %v12326_v30  ;;  %v14144_v7 = vsel %vm12353_vm15, 4294967295, %v14143_v7  ;;  %v443_v30 = vand.u32 15, %v269_v44  ;;  %v5536_v44 = vsel %vm12353_vm15, %v12362_v54, 0.0  ;;  %v275_v54 = vadd.s32 232, %v11555_v11 }
  0xdb   : > { %10367 = vmatmul.mubr.msk.f32.gmra.mrb[16].mxu0 %vm726_vm0, %v5532_v60  ;;  %14145 = vst [vmem:[#allocation46_spill] sm:$0xff] %v14144_v7  ;;  %v12357_v60 = vld [vmem:[#allocation2 + $0xaa] sm:$0xff]  ;;  %v12401_v7 = vld [vmem:[#allocation2 + $0xc2] sm:$0xff] }
  0xdc   : > { %10369 = vmatprep.mubr.msk.f32.mxu0 %vm726_vm0, %v12335_v20  ;;  %14146 = vst [vmem:[#allocation47_spill] sm:$0xff] %v12357_v60  ;;  %v1853_v43 = vsel %vm12353_vm15, %v12357_v60, 0.0  ;;  %vm12378_vm14 = vcmp.le.s32.totalorder %v443_v30, 14  ;;  %v12385_v20 = vld [vmem:[#allocation3 + $0xb2] sm:$0xff]  ;;  %v12387_v60 = vld [vmem:[#allocation3 + $0xba] sm:$0xff]  ;;  %14156 = vst [vmem:[#allocation55_spill] sm:$0xff] %v12401_v7 }
  0xdd   : > { %9902 = vmatmul.mubr.msk.f32.gmra.mrb[18].mxu1 %vm726_vm0, %v1851_v58  ;;  %v14150_v58 = vmov 0  ;;  %14154 = vst [vmem:[#allocation53_spill] sm:$0xff] %v12385_v20  ;;  %14155 = vst [vmem:[#allocation54_spill] sm:$0xff] %v12387_v60 }
  0xde   : > { %9904 = vmatprep.mubr.msk.f32.mxu1 %vm726_vm0, %v12351_v4  ;;  %v14151_v58 = vsel %vm12378_vm14, 4294967295, %v14150_v58  ;;  %v457_v4 = vand.u32 15, %v271_v10  ;;  %v5538_v10 = vsel %vm12378_vm14, %v12387_v60, 0.0  ;;  %v277_v60 = vadd.s32 248, %v11555_v11 }
  0xdf   : > { %10370 = vmatmul.mubr.msk.f32.gmra.mrb[18].mxu0 %vm726_vm0, %v5534_v0  ;;  %14152 = vst [vmem:[#allocation51_spill] sm:$0xff] %v14151_v58  ;;  %v12382_v0 = vld [vmem:[#allocation2 + $0xba] sm:$0xff]  ;;  %v12426_v58 = vld [vmem:[#allocation2 + $0xd2] sm:$0xff] }
  0xe0   : > { %10372 = vmatprep.mubr.msk.f32.mxu0 %vm726_vm0, %v12360_v15  ;;  %14153 = vst [vmem:[#allocation52_spill] sm:$0xff] %v12382_v0  ;;  %v1855_v30 = vsel %vm12378_vm14, %v12382_v0, 0.0  ;;  %vm12403_vm15 = vcmp.le.s32.totalorder %v457_v4, 14  ;;  %v12410_v15 = vld [vmem:[#allocation3 + $0xc2] sm:$0xff]  ;;  %v12412_v0 = vld [vmem:[#allocation3 + $0xca] sm:$0xff]  ;;  %14162 = vst [vmem:[#allocation59_spill] sm:$0xff] %v12426_v58 }
  0xe1   : > { %9905 = vmatmul.mubr.msk.f32.gmra.mrb[20].mxu1 %vm726_vm0, %v1853_v43  ;;  %v14157_v43 = vmov 0  ;;  %14161 = vst [vmem:[#allocation58_spill] sm:$0xff] %v12412_v0 }
  0xe2   : > { %9907 = vmatprep.mubr.msk.f32.mxu1 %vm726_vm0, %v12376_v29  ;;  %v14158_v43 = vsel %vm12403_vm15, 4294967295, %v14157_v43  ;;  %v471_v29 = vand.u32 15, %v273_v52  ;;  %v5540_v52 = vsel %vm12403_vm15, %v12412_v0, 0.0  ;;  %v12461_v0 = vld [vmem:[#allocation3 + $0xea] sm:$0xff] }
  0xe3   : > { %10373 = vmatmul.mubr.msk.f32.gmra.mrb[20].mxu0 %vm726_vm0, %v5536_v44  ;;  %14159 = vst [vmem:[#allocation56_spill] sm:$0xff] %v14158_v43  ;;  %v12407_v44 = vld [vmem:[#allocation2 + $0xca] sm:$0xff]  ;;  %v499_v43 = vand.u32 15, %v277_v60 }
  0xe4   : > { %10375 = vmatprep.mubr.msk.f32.mxu0 %vm726_vm0, %v12385_v20  ;;  %14160 = vst [vmem:[#allocation57_spill] sm:$0xff] %v12407_v44  ;;  %v1857_v4 = vsel %vm12403_vm15, %v12407_v44, 0.0  ;;  %vm12428_vm14 = vcmp.le.s32.totalorder %v471_v29, 14  ;;  %v12435_v20 = vld [vmem:[#allocation3 + $0xd2] sm:$0xff]  ;;  %v12437_v44 = vld [vmem:[#allocation3 + $0xda] sm:$0xff] }
  0xe5   : > { %9908 = vmatmul.mubr.msk.f32.gmra.mrb[22].mxu1 %vm726_vm0, %v1855_v30  ;;  %v14163_v30 = vmov 0  ;;  %14166 = vst [vmem:[#allocation61_spill] sm:$0xff] %v12437_v44  ;;  %v5542_v11 = vsel %vm12428_vm14, %v12437_v44, 0.0  ;;  %v12485_v44 = vld [vmem:[#allocation3 + $0xfa] sm:$0xff] }
  0xe6   : > { %9910 = vmatprep.mubr.msk.f32.mxu1 %vm726_vm0, %v12401_v7  ;;  %v14164_v30 = vsel %vm12428_vm14, 4294967295, %v14163_v30  ;;  %v485_v7 = vand.u32 15, %v275_v54  ;;  %v12451_v54 = vld [vmem:[#allocation2 + $0xe2] sm:$0xff]  ;;  %14178 = vst [vmem:[#allocation69_spill] sm:$0xff] %v12485_v44 }
  0xe7   : > { %10376 = vmatmul.mubr.msk.f32.gmra.mrb[22].mxu0 %vm726_vm0, %v5538_v10  ;;  %14165 = vst [vmem:[#allocation60_spill] sm:$0xff] %v14164_v30  ;;  %v12432_v10 = vld [vmem:[#allocation2 + $0xda] sm:$0xff]  ;;  %14167 = vst [vmem:[#allocation62_spill] sm:$0xff] %v12451_v54  ;;  %v12475_v30 = vld [vmem:[#allocation2 + $0xf2] sm:$0xff] }
  0xe8   : > { %10378 = vmatprep.mubr.msk.f32.mxu0 %vm726_vm0, %v12410_v15  ;;  %v1859_v29 = vsel %vm12428_vm14, %v12432_v10, 0.0  ;;  %vm12453_vm15 = vcmp.le.s32.totalorder %v485_v7, 14  ;;  %14172 = vst [vmem:[#allocation65_spill] sm:$0xff] %v12475_v30  ;;  %vm12477_vm14 = vcmp.le.s32.totalorder %v499_v43, 14 }
  0xe9   : > { %9911 = vmatmul.mubr.msk.f32.gmra.mrb[24].mxu1 %vm726_vm0, %v1857_v4  ;;  %v14168_v4 = vmov 0  ;;  %v5544_v60 = vsel %vm12453_vm15, %v12461_v0, 0.0 }
  0xea   : > { %9913 = vmatprep.mubr.msk.f32.mxu1 %vm726_vm0, %v12426_v58  ;;  %v14169_v4 = vsel %vm12453_vm15, 4294967295, %v14168_v4  ;;  %v12459_v58 = vld [vmem:[#allocation3 + $0xe2] sm:$0xff] }
  0xeb   : > { %10379 = vmatmul.mubr.msk.f32.gmra.mrb[24].mxu0 %vm726_vm0, %v5540_v52  ;;  %14170 = vst [vmem:[#allocation63_spill] sm:$0xff] %v14169_v4  ;;  %v12457_v52 = vld [vmem:[#allocation2 + $0xea] sm:$0xff]  ;;  %v5546_v4 = vsel %vm12477_vm14, %v12485_v44, 0.0  ;;  %v12532_v44 = vld [vmem:[#allocation3 + $0x30] sm:$0xff] }
  0xec   : > { %10381 = vmatprep.mubr.msk.f32.mxu0 %vm726_vm0, %v12435_v20  ;;  %14171 = vst [vmem:[#allocation64_spill] sm:$0xff] %v12457_v52  ;;  %v1861_v7 = vsel %vm12453_vm15, %v12457_v52, 0.0  ;;  %v5903_v52 = vld [vmem:[#allocation3 + $0x10] sm:$0xff] }
  0xed   : > { %9914 = vmatmul.mubr.msk.f32.gmra.mrb[26].mxu1 %vm726_vm0, %v1859_v29  ;;  %v14173_v29 = vmov 0 }
  0xee   : > { %9916 = vmatprep.mubr.msk.f32.mxu1 %vm726_vm0, %v12451_v54  ;;  %v14174_v29 = vsel %vm12477_vm14, 4294967295, %v14173_v29  ;;  %v12483_v54 = vld [vmem:[#allocation3 + $0xf2] sm:$0xff] }
  0xef   : > { %10382 = vmatmul.mubr.msk.f32.gmra.mrb[26].mxu0 %vm726_vm0, %v5542_v11  ;;  %14175 = vst [vmem:[#allocation66_spill] sm:$0xff] %v14174_v29  ;;  %v12481_v11 = vld [vmem:[#allocation2 + $0xfa] sm:$0xff]  ;;  %14177 = vst [vmem:[#allocation68_spill] sm:$0xff] %v12483_v54  ;;  %v12513_v29 = vld [vmem:[#allocation3 + $0x20] sm:$0xff] }
  0xf0   : > { %10384 = vmatprep.mubr.msk.f32.mxu0 %vm726_vm0, %v12459_v58  ;;  %14176 = vst [vmem:[#allocation67_spill] sm:$0xff] %v12481_v11  ;;  %v1863_v43 = vsel %vm12477_vm14, %v12481_v11, 0.0  ;;  %v8708_v11 = vld [vmem:[%s13823_s2 + $0x50] sm:$0xff] }
  0xf1   : > { %9917 = vmatmul.mubr.msk.f32.gmra.mrb[28].mxu1 %vm726_vm0, %v1861_v7  ;;  %v2252_v7 = vsel %vm11597_vm1, %v11898_v45, 0.0  ;;  %v9012_v45 = vld [vmem:[%s13824_s3 + $0x50] sm:$0xff] }
  0xf2   : > { %9919 = vmatprep.mubr.msk.f32.mxu1 %vm726_vm0, %v12475_v30 }
  0xf3   : > { %10385 = vmatmul.mubr.msk.f32.gmra.mrb[28].mxu0 %vm726_vm0, %v5544_v60  ;;  %v5935_v60 = vsel %vm11597_vm1, %v5903_v52, 0.0  ;;  %v9013_v52 = vld [vmem:[%s13824_s3 + $0x58] sm:$0xff] }
  0xf4   : > { %10387 = vmatprep.mubr.msk.f32.mxu0 %vm726_vm0, %v12483_v54  ;;  %v8709_v54 = vld [vmem:[%s13823_s2 + $0x58] sm:$0xff]  ;;  %v12534_v30 = vpack.c.bf16 %v9013_v52, %v9012_v45  ;;  %v12591_v45 = vld [vmem:[#allocation3 + $0x58] sm:$0xff] }
  0xf5   : > { %9920 = vmatmul.mubr.msk.f32.gmra.mrb[30].mxu1 %vm726_vm0, %v1863_v43  ;;  %v5904_v43 = vld [vmem:[#allocation3 + $0x18] sm:$0xff] }
  0xf6   : > { %9926 = vmatprep.mubr.msk.f32.mxu1 %vm726_vm0, %v2252_v7  ;;  %v5937_v7 = vsel %vm11638_vm2, %v12513_v29, 0.0 }
  0xf7   : > { %10388 = vmatmul.mubr.msk.f32.gmra.mrb[30].mxu0 %vm726_vm0, %v5546_v4  ;;  %v12525_v4 = vpack.c.bf16 %v8709_v54, %v8708_v11  ;;  %v5939_v54 = vsel %vm11663_vm3, %v12532_v44, 0.0  ;;  %v12575_v11 = vld [vmem:[#allocation3 + $0x48] sm:$0xff] }
  0xf8   : > { %10394 = vmatprep.mubr.msk.f32.mxu0 %vm726_vm0, %v5935_v60 }
  0xf9   : > { %9927 = vmatmul.mubr.msk.f32.vlgmr.msra.gmra.mrb[0].mxu1 %vm726_vm0, %v11927_v61  ;;  %v2256_v61 = vsel %vm11663_vm3, %v11935_v5, 0.0  ;;  %v2258_v5 = vsel %vm11669_vm4, %v11949_v8, 0.0  ;;  %v2260_v8 = vsel %vm11690_vm5, %v11961_v17, 0.0  ;;  %v2262_v17 = vsel %vm11710_vm6, %v11974_v25, 0.0 }
  0xfa   : > { %10721 = vmatpush3.bf16.msra.mxu1 %v12145_v2  ;;  %9929 = vmatprep.mubr.msk.f32.mxu1 %vm726_vm0, %v2254_v21  ;;  %v12552_v2 = vld [vmem:[#allocation3 + $0x40] sm:$0xff]  ;;  %v12559_v21 = vld [vmem:[#allocation3 + $0x38] sm:$0xff]  ;;  %v2264_v25 = vsel %vm11737_vm7, %v11989_v35, 0.0  ;;  %v2266_v35 = vsel %vm11763_vm8, %v12001_v41, 0.0  ;;  %v2268_v41 = vsel %vm11782_vm9, %v12013_v49, 0.0  ;;  %v2270_v49 = vsel %vm11802_vm10, %v12025_v55, 0.0 }
  0xfb   : > { %10395 = vmatmul.mubr.msk.f32.vlgmr.msra.gmra.mrb[0].mxu0 %vm726_vm0, %v5904_v43  ;;  %10723 = vmatprep.subr.bf16.mxu1 %v12525_v4  ;;  %v12607_v43 = vld [vmem:[#allocation3 + $0x68] sm:$0xff]  ;;  %v2272_v55 = vsel %vm11827_vm11, %v12037_v39, 0.0  ;;  %v7167_v47 = vsel %vm11663_vm3, %v12552_v2, 0.0 }
  0xfc   : > { %10757 = vmatpush3.bf16.msra.mxu0 %v12150_v33  ;;  %10397 = vmatprep.mubr.msk.f32.mxu0 %vm726_vm0, %v5937_v7  ;;  %v12569_v33 = vld [vmem:[#allocation3 + $0x50] sm:$0xff] }
  0xfd   : > { %9930 = vmatmul.mubr.msk.f32.gmra.mrb[2].mxu1 %vm726_vm0, %v11943_v34  ;;  %10759 = vmatprep.subr.bf16.mxu0 %v12534_v30  ;;  %v5941_v34 = vsel %vm11669_vm4, %v12552_v2, 0.0  ;;  %v5943_v60 = vsel %vm11690_vm5, %v12569_v33, 0.0  ;;  %v7169_v62 = vsel %vm11669_vm4, %v12569_v33, 0.0  ;;  %v3456_v2 = vld [vmem:[#allocation2 + $0x60] sm:$0xff]  ;;  %v3457_v33 = vld [vmem:[#allocation2 + $0x68] sm:$0xff] }
  0xfe   : > { %9932 = vmatprep.mubr.msk.f32.mxu1 %vm726_vm0, %v2256_v61  ;;  %v12623_v61 = vld [vmem:[#allocation3 + $0x78] sm:$0xff] }
  0xff   : > { %10398 = vmatmul.mubr.msk.f32.gmra.mrb[2].mxu0 %vm726_vm0, %v12540_v57 }
 0x100   : > { %10400 = vmatprep.mubr.msk.f32.mxu0 %vm726_vm0, %v5939_v54 }
 0x101   : > { %9933 = vmatmul.mubr.msk.f32.gmra.mrb[4].mxu1 %vm726_vm0, %v11955_v9  ;;  %v12585_v9 = vld [vmem:[#allocation3 + $0x60] sm:$0xff] }
 0x102   : > { %9935 = vmatprep.mubr.msk.f32.mxu1 %vm726_vm0, %v2258_v5  ;;  %v5945_v52 = vsel %vm11710_vm6, %v12585_v9, 0.0  ;;  %v12639_v5 = vld [vmem:[#allocation3 + $0x88] sm:$0xff] }
 0x103   : > { %10401 = vmatmul.mubr.msk.f32.gmra.mrb[4].mxu0 %vm726_vm0, %v12559_v21 }
 0x104   : > { %10403 = vmatprep.mubr.msk.f32.mxu0 %vm726_vm0, %v5941_v34 }
 0x105   : > { %9936 = vmatmul.mubr.msk.f32.gmra.mrb[6].mxu1 %vm726_vm0, %v11967_v18  ;;  %v12601_v18 = vld [vmem:[#allocation3 + $0x70] sm:$0xff] }
 0x106   : > { %9938 = vmatprep.mubr.msk.f32.mxu1 %vm726_vm0, %v2260_v8  ;;  %v5947_v7 = vsel %vm11737_vm7, %v12601_v18, 0.0  ;;  %v12655_v8 = vld [vmem:[#allocation3 + $0x98] sm:$0xff] }
 0x107   : > { %10404 = vmatmul.mubr.msk.f32.gmra.mrb[6].mxu0 %vm726_vm0, %v12575_v11 }
 0x108   : > { %10406 = vmatprep.mubr.msk.f32.mxu0 %vm726_vm0, %v5943_v60 }
 0x109   : > { %9939 = vmatmul.mubr.msk.f32.gmra.mrb[8].mxu1 %vm726_vm0, %v11983_v27  ;;  %v12617_v27 = vld [vmem:[#allocation3 + $0x80] sm:$0xff] }
 0x10a   : > { %9941 = vmatprep.mubr.msk.f32.mxu1 %vm726_vm0, %v2262_v17  ;;  %v5949_v54 = vsel %vm11763_vm8, %v12617_v27, 0.0  ;;  %v12671_v17 = vld [vmem:[#allocation3 + $0xa8] sm:$0xff] }
 0x10b   : > { %10407 = vmatmul.mubr.msk.f32.gmra.mrb[8].mxu0 %vm726_vm0, %v12591_v45 }
 0x10c   : > { %10409 = vmatprep.mubr.msk.f32.mxu0 %vm726_vm0, %v5945_v52 }
 0x10d   : > { %9942 = vmatmul.mubr.msk.f32.gmra.mrb[10].mxu1 %vm726_vm0, %v11995_v36  ;;  %v12633_v36 = vld [vmem:[#allocation3 + $0x90] sm:$0xff] }
 0x10e   : > { %9944 = vmatprep.mubr.msk.f32.mxu1 %vm726_vm0, %v2264_v25  ;;  %v5951_v34 = vsel %vm11782_vm9, %v12633_v36, 0.0  ;;  %v12687_v25 = vld [vmem:[#allocation3 + $0xb8] sm:$0xff] }
 0x10f   : > { %10410 = vmatmul.mubr.msk.f32.gmra.mrb[10].mxu0 %vm726_vm0, %v12607_v43 }
 0x110   : > { %10412 = vmatprep.mubr.msk.f32.mxu0 %vm726_vm0, %v5947_v7 }
 0x111   : > { %9945 = vmatmul.mubr.msk.f32.gmra.mrb[12].mxu1 %vm726_vm0, %v12007_v42  ;;  %v12649_v42 = vld [vmem:[#allocation3 + $0xa0] sm:$0xff] }
 0x112   : > { %9947 = vmatprep.mubr.msk.f32.mxu1 %vm726_vm0, %v2266_v35  ;;  %v5953_v60 = vsel %vm11802_vm10, %v12649_v42, 0.0  ;;  %vm14179_vm10 = vnez %v14072_v56  ;;  %v12703_v35 = vld [vmem:[#allocation3 + $0xc8] sm:$0xff] }
 0x113   : > { %10413 = vmatmul.mubr.msk.f32.gmra.mrb[12].mxu0 %vm726_vm0, %v12623_v61  ;;  %v2274_v39 = vsel %vm14179_vm10, %v12049_v16, 0.0  ;;  %v2276_v16 = vsel %vm11850_vm13, %v12061_v26, 0.0  ;;  %v2278_v26 = vsel %vm14083_vm12, %v12073_v38, 0.0  ;;  %v3474_v56 = vld [vmem:[#allocation2 + $0xf0] sm:$0xff] }
 0x114   : > { %10415 = vmatprep.mubr.msk.f32.mxu0 %vm726_vm0, %v5949_v54 }
 0x115   : > { %9948 = vmatmul.mubr.msk.f32.gmra.mrb[14].mxu1 %vm726_vm0, %v12019_v51  ;;  %v12665_v51 = vld [vmem:[#allocation3 + $0xb0] sm:$0xff] }
 0x116   : > { %9950 = vmatprep.mubr.msk.f32.mxu1 %vm726_vm0, %v2268_v41  ;;  %v5955_v52 = vsel %vm11827_vm11, %v12665_v51, 0.0  ;;  %v12719_v41 = vld [vmem:[#allocation3 + $0xd8] sm:$0xff] }
 0x117   : > { %10416 = vmatmul.mubr.msk.f32.gmra.mrb[14].mxu0 %vm726_vm0, %v12639_v5 }
 0x118   : > { %10418 = vmatprep.mubr.msk.f32.mxu0 %vm726_vm0, %v5951_v34 }
 0x119   : > { %9951 = vmatmul.mubr.msk.f32.gmra.mrb[16].mxu1 %vm726_vm0, %v12031_v59  ;;  %v12681_v59 = vld [vmem:[#allocation3 + $0xc0] sm:$0xff] }
 0x11a   : > { %9953 = vmatprep.mubr.msk.f32.mxu1 %vm726_vm0, %v2270_v49  ;;  %v5957_v7 = vsel %vm14179_vm10, %v12681_v59, 0.0  ;;  %v12735_v49 = vld [vmem:[#allocation3 + $0xe8] sm:$0xff] }
 0x11b   : > { %10419 = vmatmul.mubr.msk.f32.gmra.mrb[16].mxu0 %vm726_vm0, %v12655_v8 }
 0x11c   : > { %10421 = vmatprep.mubr.msk.f32.mxu0 %vm726_vm0, %v5953_v60 }
 0x11d   : > { %9954 = vmatmul.mubr.msk.f32.gmra.mrb[18].mxu1 %vm726_vm0, %v12043_v6  ;;  %v12697_v6 = vld [vmem:[#allocation3 + $0xd0] sm:$0xff] }
 0x11e   : > { %9956 = vmatprep.mubr.msk.f32.mxu1 %vm726_vm0, %v2272_v55  ;;  %v5959_v54 = vsel %vm11850_vm13, %v12697_v6, 0.0  ;;  %vm14180_vm13 = vnez %v14078_v23  ;;  %v14181_v55 = vld [vmem:[#allocation7_spill] sm:$0xff] }
 0x11f   : > { %10422 = vmatmul.mubr.msk.f32.gmra.mrb[18].mxu0 %vm726_vm0, %v12671_v17  ;;  %v2280_v38 = vsel %vm14180_vm13, %v12086_v53, 0.0  ;;  %v14184_v53 = vld [vmem:[#allocation6_spill] sm:$0xff]  ;;  %v12800_v23 = vld [vmem:[#allocation2 + $0x29] sm:$0xff] }
 0x120   : > { %10424 = vmatprep.mubr.msk.f32.mxu0 %vm726_vm0, %v5955_v52  ;;  %v12747_v52 = vld [vmem:[#allocation3 + $0x100] sm:$0xff]  ;;  %14191 = vst [vmem:[#allocation74_spill] sm:$0xff] %v12800_v23 }
 0x121   : > { %9957 = vmatmul.mubr.msk.f32.gmra.mrb[20].mxu1 %vm726_vm0, %v12055_v19  ;;  %v12713_v19 = vld [vmem:[#allocation3 + $0xe0] sm:$0xff]  ;;  %14182 = vst [vmem:[#allocation7_spill] sm:$0xff] %v12747_v52 }
 0x122   : > { %9959 = vmatprep.mubr.msk.f32.mxu1 %vm726_vm0, %v2274_v39  ;;  %v5961_v34 = vsel %vm14083_vm12, %v12713_v19, 0.0  ;;  %v12753_v39 = vld [vmem:[#allocation3 + $0xf8] sm:$0xff]  ;;  %vm14185_vm12 = vnez %v14184_v53 }
 0x123   : > { %10425 = vmatmul.mubr.msk.f32.gmra.mrb[20].mxu0 %vm726_vm0, %v12687_v25  ;;  %14183 = vst [vmem:[#allocation70_spill] sm:$0xff] %v12753_v39  ;;  %v6324_v53 = vld [vmem:[#allocation3 + $0x19] sm:$0xff] }
 0x124   : > { %10427 = vmatprep.mubr.msk.f32.mxu0 %vm726_vm0, %v5957_v7 }
 0x125   : > { %9960 = vmatmul.mubr.msk.f32.gmra.mrb[22].mxu1 %vm726_vm0, %v12067_v28  ;;  %v12729_v28 = vld [vmem:[#allocation3 + $0xf0] sm:$0xff] }
 0x126   : > { %9962 = vmatprep.mubr.msk.f32.mxu1 %vm726_vm0, %v2276_v16  ;;  %v5963_v60 = vsel %vm14180_vm13, %v12729_v28, 0.0  ;;  %v5965_v16 = vsel %vm14185_vm12, %v12747_v52, 0.0 }
 0x127   : > { %10428 = vmatmul.mubr.msk.f32.gmra.mrb[22].mxu0 %vm726_vm0, %v12703_v35 }
 0x128   : > { %10430 = vmatprep.mubr.msk.f32.mxu0 %vm726_vm0, %v5959_v54  ;;  %v14186_v54 = vld [vmem:[#allocation8_spill] sm:$0xff] }
 0x129   : > { %9963 = vmatmul.mubr.msk.f32.gmra.mrb[24].mxu1 %vm726_vm0, %v12079_v40  ;;  %v12743_v40 = vld [vmem:[#allocation2 + $0x100] sm:$0xff] }
 0x12a   : > { %9965 = vmatprep.mubr.msk.f32.mxu1 %vm726_vm0, %v2278_v26  ;;  %v2282_v7 = vsel %vm14185_vm12, %v12743_v40, 0.0  ;;  %v12766_v26 = vld [vmem:[#allocation2 + $0x108] sm:$0xff] }
 0x12b   : > { %10431 = vmatmul.mubr.msk.f32.gmra.mrb[24].mxu0 %vm726_vm0, %v12719_v41  ;;  %14187 = vst [vmem:[#allocation8_spill] sm:$0xff] %v12766_v26 }
 0x12c   : > { %10433 = vmatprep.mubr.msk.f32.mxu0 %vm726_vm0, %v5961_v34  ;;  %v12769_v34 = vld [vmem:[#allocation3 + $0x108] sm:$0xff] }
 0x12d   : > { %9966 = vmatmul.mubr.msk.f32.gmra.mrb[26].mxu1 %vm726_vm0, %v14181_v55  ;;  %14188 = vst [vmem:[#allocation71_spill] sm:$0xff] %v12769_v34  ;;  %v8742_v55 = vld [vmem:[%s13823_s2 + $0x60] sm:$0xff] }
 0x12e   : > { %9968 = vmatprep.mubr.msk.f32.mxu1 %vm726_vm0, %v2280_v38  ;;  %v2640_v38 = vld [vmem:[#allocation2 + $0x11] sm:$0xff] }
 0x12f   : > { %10434 = vmatmul.mubr.msk.f32.gmra.mrb[26].mxu0 %vm726_vm0, %v12735_v49 }
 0x130   : > { %10436 = vmatprep.mubr.msk.f32.mxu0 %vm726_vm0, %v5963_v60  ;;  %v6323_v60 = vld [vmem:[#allocation3 + $0x11] sm:$0xff] }
 0x131   : > { %9969 = vmatmul.mubr.msk.f32.gmra.mrb[28].mxu1 %vm726_vm0, %v14186_v54  ;;  %v8743_v54 = vld [vmem:[%s13823_s2 + $0x68] sm:$0xff] }
 0x132   : > { %9971 = vmatprep.mubr.msk.f32.mxu1 %vm726_vm0, %v2282_v7  ;;  %v2641_v7 = vld [vmem:[#allocation2 + $0x19] sm:$0xff]  ;;  %v12791_v52 = vpack.c.bf16 %v8743_v54, %v8742_v55  ;;  %v12807_v55 = vld [vmem:[#allocation2 + $0x31] sm:$0xff]  ;;  %v12829_v54 = vld [vmem:[#allocation3 + $0x41] sm:$0xff] }
 0x133   : > { %10437 = vmatmul.mubr.msk.f32.gmra.mrb[28].mxu0 %vm726_vm0, %v12753_v39  ;;  %v12789_v39 = vld [vmem:[#allocation2 + $0x21] sm:$0xff]  ;;  %14193 = vst [vmem:[#allocation76_spill] sm:$0xff] %v12807_v55  ;;  %14198 = vst [vmem:[#allocation81_spill] sm:$0xff] %v12829_v54 }
 0x134   : > { %10439 = vmatprep.mubr.msk.f32.mxu0 %vm726_vm0, %v5965_v16  ;;  %v9046_v16 = vld [vmem:[%s13824_s3 + $0x60] sm:$0xff]  ;;  %14189 = vst [vmem:[#allocation72_spill] sm:$0xff] %v12789_v39 }
 0x135   : > { %9972 = vmatmul.mubr.msk.f32.gmra.mrb[30].mxu1 %vm726_vm0, %v12766_v26  ;;  %v9047_v26 = vld [vmem:[%s13824_s3 + $0x68] sm:$0xff] }
 0x136   : > { %9978 = vmatprep.mubr.msk.f32.mxu1 %vm726_vm0, %v2640_v38  ;;  %v12796_v38 = vpack.c.bf16 %v9047_v26, %v9046_v16  ;;  %v12811_v26 = vld [vmem:[#allocation3 + $0x31] sm:$0xff]  ;;  %v12841_v16 = vld [vmem:[#allocation3 + $0x49] sm:$0xff] }
 0x137   : > { %10440 = vmatmul.mubr.msk.f32.gmra.mrb[30].mxu0 %vm726_vm0, %v12769_v34  ;;  %v12794_v34 = vld [vmem:[#allocation3 + $0x21] sm:$0xff]  ;;  %14194 = vst [vmem:[#allocation77_spill] sm:$0xff] %v12811_v26  ;;  %14200 = vst [vmem:[#allocation83_spill] sm:$0xff] %v12841_v16 }
 0x138   : > { %10446 = vmatprep.mubr.msk.f32.mxu0 %vm726_vm0, %v6323_v60  ;;  %14190 = vst [vmem:[#allocation73_spill] sm:$0xff] %v12794_v34  ;;  %v12805_v60 = vld [vmem:[#allocation3 + $0x29] sm:$0xff] }
 0x139   : > { %9979 = vmatmul.mubr.msk.f32.vlgmr.msra.gmra.mrb[0].mxu1 %vm726_vm0, %v2641_v7  ;;  %14192 = vst [vmem:[#allocation75_spill] sm:$0xff] %v12805_v60  ;;  %v12837_v7 = vld [vmem:[#allocation2 + $0x49] sm:$0xff] }
 0x13a   : > { %10725 = vmatpush3.bf16.msra.mxu1 %v12525_v4  ;;  %9981 = vmatprep.mubr.msk.f32.mxu1 %vm726_vm0, %v12789_v39  ;;  %v12825_v4 = vld [vmem:[#allocation3 + $0x39] sm:$0xff]  ;;  %14199 = vst [vmem:[#allocation82_spill] sm:$0xff] %v12837_v7 }
 0x13b   : > { %10447 = vmatmul.mubr.msk.f32.vlgmr.msra.gmra.mrb[0].mxu0 %vm726_vm0, %v6324_v53  ;;  %10727 = vmatprep.subr.bf16.mxu1 %v12791_v52  ;;  %14196 = vst [vmem:[#allocation79_spill] sm:$0xff] %v12825_v4  ;;  %v12827_v53 = vld [vmem:[#allocation2 + $0x41] sm:$0xff] }
 0x13c   : > { %10761 = vmatpush3.bf16.msra.mxu0 %v12534_v30  ;;  %10449 = vmatprep.mubr.msk.f32.mxu0 %vm726_vm0, %v12794_v34  ;;  %v12821_v30 = vld [vmem:[#allocation2 + $0x39] sm:$0xff]  ;;  %14197 = vst [vmem:[#allocation80_spill] sm:$0xff] %v12827_v53  ;;  %v13069_v34 = vld [vmem:[#allocation3 + $0x22] sm:$0xff] }
 0x13d   : > { %9982 = vmatmul.mubr.msk.f32.gmra.mrb[2].mxu1 %vm726_vm0, %v12800_v23  ;;  %10763 = vmatprep.subr.bf16.mxu0 %v12796_v38  ;;  %14195 = vst [vmem:[#allocation78_spill] sm:$0xff] %v12821_v30  ;;  %v13064_v23 = vld [vmem:[#allocation3 + $0x2a] sm:$0xff] }
 0x13e   : > { %9984 = vmatprep.mubr.msk.f32.mxu1 %vm726_vm0, %v12807_v55  ;;  %v12845_v55 = vld [vmem:[#allocation3 + $0x51] sm:$0xff] }
 0x13f   : > { %10450 = vmatmul.mubr.msk.f32.gmra.mrb[2].mxu0 %vm726_vm0, %v12805_v60  ;;  %14202 = vst [vmem:[#allocation85_spill] sm:$0xff] %v12845_v55  ;;  %v13060_v60 = vld [vmem:[#allocation2 + $0x2a] sm:$0xff] }
 0x140   : > { %10452 = vmatprep.mubr.msk.f32.mxu0 %vm726_vm0, %v12811_v26  ;;  %v12843_v26 = vld [vmem:[#allocation2 + $0x51] sm:$0xff] }
 0x141   : > { %9985 = vmatmul.mubr.msk.f32.gmra.mrb[4].mxu1 %vm726_vm0, %v12821_v30  ;;  %14201 = vst [vmem:[#allocation84_spill] sm:$0xff] %v12843_v26  ;;  %v12861_v30 = vld [vmem:[#allocation3 + $0x61] sm:$0xff] }
 0x142   : > { %9987 = vmatprep.mubr.msk.f32.mxu1 %vm726_vm0, %v12827_v53  ;;  %v12853_v53 = vld [vmem:[#allocation2 + $0x59] sm:$0xff]  ;;  %14206 = vst [vmem:[#allocation89_spill] sm:$0xff] %v12861_v30 }
 0x143   : > { %10453 = vmatmul.mubr.msk.f32.gmra.mrb[4].mxu0 %vm726_vm0, %v12825_v4  ;;  %14203 = vst [vmem:[#allocation86_spill] sm:$0xff] %v12853_v53  ;;  %v12859_v4 = vld [vmem:[#allocation2 + $0x61] sm:$0xff] }
 0x144   : > { %10455 = vmatprep.mubr.msk.f32.mxu0 %vm726_vm0, %v12829_v54  ;;  %v12857_v54 = vld [vmem:[#allocation3 + $0x59] sm:$0xff]  ;;  %14205 = vst [vmem:[#allocation88_spill] sm:$0xff] %v12859_v4 }
 0x145   : > { %9988 = vmatmul.mubr.msk.f32.gmra.mrb[6].mxu1 %vm726_vm0, %v12837_v7  ;;  %14204 = vst [vmem:[#allocation87_spill] sm:$0xff] %v12857_v54  ;;  %v12877_v7 = vld [vmem:[#allocation3 + $0x71] sm:$0xff] }
 0x146   : > { %9990 = vmatprep.mubr.msk.f32.mxu1 %vm726_vm0, %v12843_v26  ;;  %v12869_v26 = vld [vmem:[#allocation2 + $0x69] sm:$0xff]  ;;  %14210 = vst [vmem:[#allocation93_spill] sm:$0xff] %v12877_v7 }
 0x147   : > { %10456 = vmatmul.mubr.msk.f32.gmra.mrb[6].mxu0 %vm726_vm0, %v12841_v16  ;;  %14207 = vst [vmem:[#allocation90_spill] sm:$0xff] %v12869_v26  ;;  %v12875_v16 = vld [vmem:[#allocation2 + $0x71] sm:$0xff] }
 0x148   : > { %10458 = vmatprep.mubr.msk.f32.mxu0 %vm726_vm0, %v12845_v55  ;;  %v12873_v55 = vld [vmem:[#allocation3 + $0x69] sm:$0xff]  ;;  %14209 = vst [vmem:[#allocation92_spill] sm:$0xff] %v12875_v16 }
 0x149   : > { %9991 = vmatmul.mubr.msk.f32.gmra.mrb[8].mxu1 %vm726_vm0, %v12853_v53  ;;  %14208 = vst [vmem:[#allocation91_spill] sm:$0xff] %v12873_v55  ;;  %v12893_v53 = vld [vmem:[#allocation3 + $0x81] sm:$0xff] }
 0x14a   : > { %9993 = vmatprep.mubr.msk.f32.mxu1 %vm726_vm0, %v12859_v4  ;;  %v12885_v4 = vld [vmem:[#allocation2 + $0x79] sm:$0xff]  ;;  %14214 = vst [vmem:[#allocation97_spill] sm:$0xff] %v12893_v53 }
 0x14b   : > { %10459 = vmatmul.mubr.msk.f32.gmra.mrb[8].mxu0 %vm726_vm0, %v12857_v54  ;;  %14211 = vst [vmem:[#allocation94_spill] sm:$0xff] %v12885_v4  ;;  %v12891_v54 = vld [vmem:[#allocation2 + $0x81] sm:$0xff] }
 0x14c   : > { %10461 = vmatprep.mubr.msk.f32.mxu0 %vm726_vm0, %v12861_v30  ;;  %v12889_v30 = vld [vmem:[#allocation3 + $0x79] sm:$0xff]  ;;  %14213 = vst [vmem:[#allocation96_spill] sm:$0xff] %v12891_v54 }
 0x14d   : > { %9994 = vmatmul.mubr.msk.f32.gmra.mrb[10].mxu1 %vm726_vm0, %v12869_v26  ;;  %14212 = vst [vmem:[#allocation95_spill] sm:$0xff] %v12889_v30  ;;  %v12909_v26 = vld [vmem:[#allocation3 + $0x91] sm:$0xff] }
 0x14e   : > { %9996 = vmatprep.mubr.msk.f32.mxu1 %vm726_vm0, %v12875_v16  ;;  %v12901_v16 = vld [vmem:[#allocation2 + $0x89] sm:$0xff]  ;;  %14218 = vst [vmem:[#allocation101_spill] sm:$0xff] %v12909_v26 }
 0x14f   : > { %10462 = vmatmul.mubr.msk.f32.gmra.mrb[10].mxu0 %vm726_vm0, %v12873_v55  ;;  %14215 = vst [vmem:[#allocation98_spill] sm:$0xff] %v12901_v16  ;;  %v12907_v55 = vld [vmem:[#allocation2 + $0x91] sm:$0xff] }
 0x150   : > { %10464 = vmatprep.mubr.msk.f32.mxu0 %vm726_vm0, %v12877_v7  ;;  %v12905_v7 = vld [vmem:[#allocation3 + $0x89] sm:$0xff]  ;;  %14217 = vst [vmem:[#allocation100_spill] sm:$0xff] %v12907_v55 }
 0x151   : > { %9997 = vmatmul.mubr.msk.f32.gmra.mrb[12].mxu1 %vm726_vm0, %v12885_v4  ;;  %14216 = vst [vmem:[#allocation99_spill] sm:$0xff] %v12905_v7  ;;  %v12925_v4 = vld [vmem:[#allocation3 + $0xa1] sm:$0xff] }
 0x152   : > { %9999 = vmatprep.mubr.msk.f32.mxu1 %vm726_vm0, %v12891_v54  ;;  %v12917_v54 = vld [vmem:[#allocation2 + $0x99] sm:$0xff]  ;;  %14222 = vst [vmem:[#allocation105_spill] sm:$0xff] %v12925_v4 }
 0x153   : > { %10465 = vmatmul.mubr.msk.f32.gmra.mrb[12].mxu0 %vm726_vm0, %v12889_v30  ;;  %14219 = vst [vmem:[#allocation102_spill] sm:$0xff] %v12917_v54  ;;  %v12923_v30 = vld [vmem:[#allocation2 + $0xa1] sm:$0xff] }
 0x154   : > { %10467 = vmatprep.mubr.msk.f32.mxu0 %vm726_vm0, %v12893_v53  ;;  %v12921_v53 = vld [vmem:[#allocation3 + $0x99] sm:$0xff]  ;;  %14221 = vst [vmem:[#allocation104_spill] sm:$0xff] %v12923_v30 }
 0x155   : > { %10000 = vmatmul.mubr.msk.f32.gmra.mrb[14].mxu1 %vm726_vm0, %v12901_v16  ;;  %14220 = vst [vmem:[#allocation103_spill] sm:$0xff] %v12921_v53  ;;  %v12941_v16 = vld [vmem:[#allocation3 + $0xb1] sm:$0xff] }
 0x156   : > { %10002 = vmatprep.mubr.msk.f32.mxu1 %vm726_vm0, %v12907_v55  ;;  %v12933_v55 = vld [vmem:[#allocation2 + $0xa9] sm:$0xff]  ;;  %14226 = vst [vmem:[#allocation109_spill] sm:$0xff] %v12941_v16 }
 0x157   : > { %10468 = vmatmul.mubr.msk.f32.gmra.mrb[14].mxu0 %vm726_vm0, %v12905_v7  ;;  %14223 = vst [vmem:[#allocation106_spill] sm:$0xff] %v12933_v55  ;;  %v12939_v7 = vld [vmem:[#allocation2 + $0xb1] sm:$0xff] }
 0x158   : > { %10470 = vmatprep.mubr.msk.f32.mxu0 %vm726_vm0, %v12909_v26  ;;  %v12937_v26 = vld [vmem:[#allocation3 + $0xa9] sm:$0xff]  ;;  %14225 = vst [vmem:[#allocation108_spill] sm:$0xff] %v12939_v7 }
 0x159   : > { %10003 = vmatmul.mubr.msk.f32.gmra.mrb[16].mxu1 %vm726_vm0, %v12917_v54  ;;  %14224 = vst [vmem:[#allocation107_spill] sm:$0xff] %v12937_v26  ;;  %v12957_v54 = vld [vmem:[#allocation3 + $0xc1] sm:$0xff] }
 0x15a   : > { %10005 = vmatprep.mubr.msk.f32.mxu1 %vm726_vm0, %v12923_v30  ;;  %v12949_v30 = vld [vmem:[#allocation2 + $0xb9] sm:$0xff]  ;;  %14230 = vst [vmem:[#allocation113_spill] sm:$0xff] %v12957_v54 }
 0x15b   : > { %10471 = vmatmul.mubr.msk.f32.gmra.mrb[16].mxu0 %vm726_vm0, %v12921_v53  ;;  %14227 = vst [vmem:[#allocation110_spill] sm:$0xff] %v12949_v30  ;;  %v12955_v53 = vld [vmem:[#allocation2 + $0xc1] sm:$0xff] }
 0x15c   : > { %10473 = vmatprep.mubr.msk.f32.mxu0 %vm726_vm0, %v12925_v4  ;;  %v12953_v4 = vld [vmem:[#allocation3 + $0xb9] sm:$0xff]  ;;  %14229 = vst [vmem:[#allocation112_spill] sm:$0xff] %v12955_v53 }
 0x15d   : > { %10006 = vmatmul.mubr.msk.f32.gmra.mrb[18].mxu1 %vm726_vm0, %v12933_v55  ;;  %14228 = vst [vmem:[#allocation111_spill] sm:$0xff] %v12953_v4  ;;  %v12973_v55 = vld [vmem:[#allocation3 + $0xd1] sm:$0xff] }
 0x15e   : > { %10008 = vmatprep.mubr.msk.f32.mxu1 %vm726_vm0, %v12939_v7  ;;  %v12965_v7 = vld [vmem:[#allocation2 + $0xc9] sm:$0xff]  ;;  %14234 = vst [vmem:[#allocation117_spill] sm:$0xff] %v12973_v55 }
 0x15f   : > { %10474 = vmatmul.mubr.msk.f32.gmra.mrb[18].mxu0 %vm726_vm0, %v12937_v26  ;;  %14231 = vst [vmem:[#allocation114_spill] sm:$0xff] %v12965_v7  ;;  %v12971_v26 = vld [vmem:[#allocation2 + $0xd1] sm:$0xff] }
 0x160   : > { %10476 = vmatprep.mubr.msk.f32.mxu0 %vm726_vm0, %v12941_v16  ;;  %v12969_v16 = vld [vmem:[#allocation3 + $0xc9] sm:$0xff]  ;;  %14233 = vst [vmem:[#allocation116_spill] sm:$0xff] %v12971_v26 }
 0x161   : > { %10009 = vmatmul.mubr.msk.f32.gmra.mrb[20].mxu1 %vm726_vm0, %v12949_v30  ;;  %14232 = vst [vmem:[#allocation115_spill] sm:$0xff] %v12969_v16  ;;  %v12989_v30 = vld [vmem:[#allocation3 + $0xe1] sm:$0xff] }
 0x162   : > { %10011 = vmatprep.mubr.msk.f32.mxu1 %vm726_vm0, %v12955_v53  ;;  %v12981_v53 = vld [vmem:[#allocation2 + $0xd9] sm:$0xff]  ;;  %14238 = vst [vmem:[#allocation121_spill] sm:$0xff] %v12989_v30 }
 0x163   : > { %10477 = vmatmul.mubr.msk.f32.gmra.mrb[20].mxu0 %vm726_vm0, %v12953_v4  ;;  %14235 = vst [vmem:[#allocation118_spill] sm:$0xff] %v12981_v53  ;;  %v12987_v4 = vld [vmem:[#allocation2 + $0xe1] sm:$0xff] }
 0x164   : > { %10479 = vmatprep.mubr.msk.f32.mxu0 %vm726_vm0, %v12957_v54  ;;  %v12985_v54 = vld [vmem:[#allocation3 + $0xd9] sm:$0xff]  ;;  %14237 = vst [vmem:[#allocation120_spill] sm:$0xff] %v12987_v4 }
 0x165   : > { %10012 = vmatmul.mubr.msk.f32.gmra.mrb[22].mxu1 %vm726_vm0, %v12965_v7  ;;  %14236 = vst [vmem:[#allocation119_spill] sm:$0xff] %v12985_v54  ;;  %v13005_v7 = vld [vmem:[#allocation3 + $0xf1] sm:$0xff] }
 0x166   : > { %10014 = vmatprep.mubr.msk.f32.mxu1 %vm726_vm0, %v12971_v26  ;;  %v12997_v26 = vld [vmem:[#allocation2 + $0xe9] sm:$0xff]  ;;  %14242 = vst [vmem:[#allocation125_spill] sm:$0xff] %v13005_v7 }
 0x167   : > { %10480 = vmatmul.mubr.msk.f32.gmra.mrb[22].mxu0 %vm726_vm0, %v12969_v16  ;;  %14239 = vst [vmem:[#allocation122_spill] sm:$0xff] %v12997_v26  ;;  %v13003_v16 = vld [vmem:[#allocation2 + $0xf1] sm:$0xff] }
 0x168   : > { %10482 = vmatprep.mubr.msk.f32.mxu0 %vm726_vm0, %v12973_v55  ;;  %v13001_v55 = vld [vmem:[#allocation3 + $0xe9] sm:$0xff]  ;;  %14241 = vst [vmem:[#allocation124_spill] sm:$0xff] %v13003_v16 }
 0x169   : > { %10015 = vmatmul.mubr.msk.f32.gmra.mrb[24].mxu1 %vm726_vm0, %v12981_v53  ;;  %14240 = vst [vmem:[#allocation123_spill] sm:$0xff] %v13001_v55  ;;  %v13021_v53 = vld [vmem:[#allocation3 + $0x101] sm:$0xff] }
 0x16a   : > { %10017 = vmatprep.mubr.msk.f32.mxu1 %vm726_vm0, %v12987_v4  ;;  %v13013_v4 = vld [vmem:[#allocation2 + $0xf9] sm:$0xff]  ;;  %14246 = vst [vmem:[#allocation129_spill] sm:$0xff] %v13021_v53 }
 0x16b   : > { %10483 = vmatmul.mubr.msk.f32.gmra.mrb[24].mxu0 %vm726_vm0, %v12985_v54  ;;  %14243 = vst [vmem:[#allocation126_spill] sm:$0xff] %v13013_v4  ;;  %v13019_v54 = vld [vmem:[#allocation2 + $0x101] sm:$0xff] }
 0x16c   : > { %10485 = vmatprep.mubr.msk.f32.mxu0 %vm726_vm0, %v12989_v30  ;;  %v13017_v30 = vld [vmem:[#allocation3 + $0xf9] sm:$0xff]  ;;  %14245 = vst [vmem:[#allocation128_spill] sm:$0xff] %v13019_v54 }
 0x16d   : > { %10018 = vmatmul.mubr.msk.f32.gmra.mrb[26].mxu1 %vm726_vm0, %v12997_v26  ;;  %14244 = vst [vmem:[#allocation127_spill] sm:$0xff] %v13017_v30  ;;  %v9081_v26 = vld [vmem:[%s13824_s3 + $0x78] sm:$0xff] }
 0x16e   : > { %10020 = vmatprep.mubr.msk.f32.mxu1 %vm726_vm0, %v13003_v16  ;;  %v13029_v16 = vld [vmem:[#allocation2 + $0x109] sm:$0xff] }
 0x16f   : > { %10486 = vmatmul.mubr.msk.f32.gmra.mrb[26].mxu0 %vm726_vm0, %v13001_v55  ;;  %14247 = vst [vmem:[#allocation130_spill] sm:$0xff] %v13029_v16  ;;  %v6712_v55 = vld [vmem:[#allocation3 + $0x1a] sm:$0xff] }
 0x170   : > { %10488 = vmatprep.mubr.msk.f32.mxu0 %vm726_vm0, %v13005_v7  ;;  %v13033_v7 = vld [vmem:[#allocation3 + $0x109] sm:$0xff] }
 0x171   : > { %10021 = vmatmul.mubr.msk.f32.gmra.mrb[28].mxu1 %vm726_vm0, %v13013_v4  ;;  %14248 = vst [vmem:[#allocation131_spill] sm:$0xff] %v13033_v7  ;;  %v8776_v4 = vld [vmem:[%s13823_s2 + $0x70] sm:$0xff] }
 0x172   : > { %10023 = vmatprep.mubr.msk.f32.mxu1 %vm726_vm0, %v13019_v54 }
 0x173   : > { %10489 = vmatmul.mubr.msk.f32.gmra.mrb[28].mxu0 %vm726_vm0, %v13017_v30  ;;  %v8777_v30 = vld [vmem:[%s13823_s2 + $0x78] sm:$0xff] }
 0x174   : > { %10491 = vmatprep.mubr.msk.f32.mxu0 %vm726_vm0, %v13021_v53  ;;  %v14249_v53 = vld [vmem:[#allocation9_spill] sm:$0xff] }
 0x175   : > { %10024 = vmatmul.mubr.msk.f32.gmra.mrb[30].mxu1 %vm726_vm0, %v13029_v16  ;;  %vm14250_vm12 = vnez %v14249_v53  ;;  %v9080_v16 = vld [vmem:[%s13824_s3 + $0x70] sm:$0xff] }
 0x176   : > { %10030 = vmatprep.mubr.msk.f32.mxu1 %vm726_vm0, %v12143_v22  ;;  %v3061_v54 = vsel %vm14250_vm12, %v12140_v24, 0.0  ;;  %v13062_v22 = vld [vmem:[#allocation2 + $0x22] sm:$0xff]  ;;  %v13066_v24 = vpack.c.bf16 %v8777_v30, %v8776_v4  ;;  %v13071_v39 = vpack.c.bf16 %v9081_v26, %v9080_v16  ;;  %v13084_v4 = vld [vmem:[#allocation2 + $0x32] sm:$0xff] }
 0x177   : > { %10492 = vmatmul.mubr.msk.f32.gmra.mrb[30].mxu0 %vm726_vm0, %v13033_v7  ;;  %v6744_v7 = vsel %vm14250_vm12, %v6712_v55, 0.0  ;;  %14253 = vst [vmem:[#allocation9_spill] sm:$0xff] %v13084_v4  ;;  %v14256_v26 = vld [vmem:[#allocation13_spill] sm:$0xff]  ;;  %v14258_v16 = vld [vmem:[#allocation15_spill] sm:$0xff] }
 0x178   : > { %10498 = vmatprep.mubr.msk.f32.mxu0 %vm726_vm0, %v12148_v48  ;;  %v14251_v48 = vld [vmem:[#allocation10_spill] sm:$0xff] }
 0x179   : > { %10031 = vmatmul.mubr.msk.f32.vlgmr.msra.gmra.mrb[0].mxu1 %vm726_vm0, %v3061_v54  ;;  %vm14252_vm12 = vnez %v14251_v48  ;;  %v14257_v54 = vld [vmem:[#allocation14_spill] sm:$0xff] }
 0x17a   : > { %10729 = vmatpush3.bf16.msra.mxu1 %v12791_v52  ;;  %v3063_v55 = vsel %vm14252_vm12, %v13060_v60, 0.0  ;;  %10033 = vmatprep.mubr.msk.f32.mxu1 %vm726_vm0, %v13062_v22  ;;  %v6746_v30 = vsel %vm14252_vm12, %v13064_v23, 0.0  ;;  %v14254_v52 = vld [vmem:[#allocation11_spill] sm:$0xff] }
 0x17b   : > { %10499 = vmatmul.mubr.msk.f32.vlgmr.msra.gmra.mrb[0].mxu0 %vm726_vm0, %v6744_v7  ;;  %10731 = vmatprep.subr.bf16.mxu1 %v13066_v24  ;;  %vm14255_vm13 = vnez %v14254_v52  ;;  %v14268_v52 = vld [vmem:[#allocation23_spill] sm:$0xff] }
 0x17c   : > { %10765 = vmatpush3.bf16.msra.mxu0 %v12796_v38  ;;  %10501 = vmatprep.mubr.msk.f32.mxu0 %vm726_vm0, %v13069_v34  ;;  %v3065_v38 = vsel %vm14255_vm13, %v12183_v37, 0.0  ;;  %v6748_v7 = vsel %vm14255_vm13, %v14257_v54, 0.0  ;;  %v14263_v37 = vld [vmem:[#allocation19_spill] sm:$0xff]  ;;  %v14265_v54 = vld [vmem:[#allocation22_spill] sm:$0xff] }
 0x17d   : > { %10034 = vmatmul.mubr.msk.f32.gmra.mrb[2].mxu1 %vm726_vm0, %v3063_v55  ;;  %10767 = vmatprep.subr.bf16.mxu0 %v13071_v39  ;;  %v14259_v55 = vld [vmem:[#allocation17_spill] sm:$0xff] }
 0x17e   : > { %10036 = vmatprep.mubr.msk.f32.mxu1 %vm726_vm0, %v13084_v4  ;;  %v14262_v4 = vld [vmem:[#allocation18_spill] sm:$0xff] }
 0x17f   : > { %10502 = vmatmul.mubr.msk.f32.gmra.mrb[2].mxu0 %vm726_vm0, %v6746_v30  ;;  %v14260_v30 = vld [vmem:[#allocation12_spill] sm:$0xff] }
 0x180   : > { %10504 = vmatprep.mubr.msk.f32.mxu0 %vm726_vm0, %v14256_v26  ;;  %vm14261_vm12 = vnez %v14260_v30  ;;  %v14274_v30 = vld [vmem:[#allocation28_spill] sm:$0xff] }
 0x181   : > { %10037 = vmatmul.mubr.msk.f32.gmra.mrb[4].mxu1 %vm726_vm0, %v3065_v38  ;;  %v3067_v48 = vsel %vm14261_vm12, %v14259_v55, 0.0  ;;  %v6750_v26 = vsel %vm14261_vm12, %v14263_v37, 0.0  ;;  %v14264_v38 = vld [vmem:[#allocation20_spill] sm:$0xff]  ;;  %v14271_v37 = vld [vmem:[#allocation27_spill] sm:$0xff] }
 0x182   : > { %10039 = vmatprep.mubr.msk.f32.mxu1 %vm726_vm0, %v14258_v16  ;;  %v14269_v55 = vld [vmem:[#allocation24_spill] sm:$0xff] }
 0x183   : > { %10505 = vmatmul.mubr.msk.f32.gmra.mrb[4].mxu0 %vm726_vm0, %v6748_v7  ;;  %v14266_v7 = vld [vmem:[#allocation16_spill] sm:$0xff] }
 0x184   : > { %10507 = vmatprep.mubr.msk.f32.mxu0 %vm726_vm0, %v14262_v4  ;;  %vm14267_vm13 = vnez %v14266_v7  ;;  %v14280_v7 = vld [vmem:[#allocation33_spill] sm:$0xff] }
 0x185   : > { %10040 = vmatmul.mubr.msk.f32.gmra.mrb[6].mxu1 %vm726_vm0, %v3067_v48  ;;  %v3069_v16 = vsel %vm14267_vm13, %v14265_v54, 0.0  ;;  %v6752_v4 = vsel %vm14267_vm13, %v14269_v55, 0.0  ;;  %v14270_v48 = vld [vmem:[#allocation25_spill] sm:$0xff]  ;;  %v14277_v55 = vld [vmem:[#allocation32_spill] sm:$0xff] }
 0x186   : > { %10042 = vmatprep.mubr.msk.f32.mxu1 %vm726_vm0, %v14264_v38  ;;  %v14275_v54 = vld [vmem:[#allocation29_spill] sm:$0xff] }
 0x187   : > { %10508 = vmatmul.mubr.msk.f32.gmra.mrb[6].mxu0 %vm726_vm0, %v6750_v26  ;;  %v14272_v26 = vld [vmem:[#allocation21_spill] sm:$0xff] }
 0x188   : > { %10510 = vmatprep.mubr.msk.f32.mxu0 %vm726_vm0, %v14268_v52  ;;  %vm14273_vm12 = vnez %v14272_v26  ;;  %v14286_v26 = vld [vmem:[#allocation38_spill] sm:$0xff] }
 0x189   : > { %10043 = vmatmul.mubr.msk.f32.gmra.mrb[8].mxu1 %vm726_vm0, %v3069_v16  ;;  %v3071_v38 = vsel %vm14273_vm12, %v14271_v37, 0.0  ;;  %v6754_v52 = vsel %vm14273_vm12, %v14275_v54, 0.0  ;;  %v14276_v16 = vld [vmem:[#allocation30_spill] sm:$0xff]  ;;  %v14283_v54 = vld [vmem:[#allocation37_spill] sm:$0xff] }
 0x18a   : > { %10045 = vmatprep.mubr.msk.f32.mxu1 %vm726_vm0, %v14270_v48  ;;  %v14281_v37 = vld [vmem:[#allocation34_spill] sm:$0xff] }
 0x18b   : > { %10511 = vmatmul.mubr.msk.f32.gmra.mrb[8].mxu0 %vm726_vm0, %v6752_v4  ;;  %v14278_v4 = vld [vmem:[#allocation26_spill] sm:$0xff] }
 0x18c   : > { %10513 = vmatprep.mubr.msk.f32.mxu0 %vm726_vm0, %v14274_v30  ;;  %vm14279_vm13 = vnez %v14278_v4  ;;  %v14292_v4 = vld [vmem:[#allocation43_spill] sm:$0xff] }
 0x18d   : > { %10046 = vmatmul.mubr.msk.f32.gmra.mrb[10].mxu1 %vm726_vm0, %v3071_v38  ;;  %v3073_v48 = vsel %vm14279_vm13, %v14277_v55, 0.0  ;;  %v6756_v30 = vsel %vm14279_vm13, %v14281_v37, 0.0  ;;  %v14282_v38 = vld [vmem:[#allocation35_spill] sm:$0xff]  ;;  %v14289_v37 = vld [vmem:[#allocation42_spill] sm:$0xff] }
 0x18e   : > { %10048 = vmatprep.mubr.msk.f32.mxu1 %vm726_vm0, %v14276_v16  ;;  %v14287_v55 = vld [vmem:[#allocation39_spill] sm:$0xff] }
 0x18f   : > { %10514 = vmatmul.mubr.msk.f32.gmra.mrb[10].mxu0 %vm726_vm0, %v6754_v52  ;;  %v14284_v52 = vld [vmem:[#allocation31_spill] sm:$0xff] }
 0x190   : > { %10516 = vmatprep.mubr.msk.f32.mxu0 %vm726_vm0, %v14280_v7  ;;  %vm14285_vm12 = vnez %v14284_v52  ;;  %v14298_v52 = vld [vmem:[#allocation48_spill] sm:$0xff] }
 0x191   : > { %10049 = vmatmul.mubr.msk.f32.gmra.mrb[12].mxu1 %vm726_vm0, %v3073_v48  ;;  %v3075_v16 = vsel %vm14285_vm12, %v14283_v54, 0.0  ;;  %v6758_v7 = vsel %vm14285_vm12, %v14287_v55, 0.0  ;;  %v14288_v48 = vld [vmem:[#allocation40_spill] sm:$0xff]  ;;  %v14295_v55 = vld [vmem:[#allocation47_spill] sm:$0xff] }
 0x192   : > { %10051 = vmatprep.mubr.msk.f32.mxu1 %vm726_vm0, %v14282_v38  ;;  %v14293_v54 = vld [vmem:[#allocation44_spill] sm:$0xff] }
 0x193   : > { %10517 = vmatmul.mubr.msk.f32.gmra.mrb[12].mxu0 %vm726_vm0, %v6756_v30  ;;  %v14290_v30 = vld [vmem:[#allocation36_spill] sm:$0xff] }
 0x194   : > { %10519 = vmatprep.mubr.msk.f32.mxu0 %vm726_vm0, %v14286_v26  ;;  %vm14291_vm13 = vnez %v14290_v30  ;;  %v14304_v30 = vld [vmem:[#allocation53_spill] sm:$0xff] }
 0x195   : > { %10052 = vmatmul.mubr.msk.f32.gmra.mrb[14].mxu1 %vm726_vm0, %v3075_v16  ;;  %v3077_v38 = vsel %vm14291_vm13, %v14289_v37, 0.0  ;;  %v6760_v26 = vsel %vm14291_vm13, %v14293_v54, 0.0  ;;  %v14294_v16 = vld [vmem:[#allocation45_spill] sm:$0xff]  ;;  %v14301_v54 = vld [vmem:[#allocation52_spill] sm:$0xff] }
 0x196   : > { %10054 = vmatprep.mubr.msk.f32.mxu1 %vm726_vm0, %v14288_v48  ;;  %v14299_v37 = vld [vmem:[#allocation49_spill] sm:$0xff] }
 0x197   : > { %10520 = vmatmul.mubr.msk.f32.gmra.mrb[14].mxu0 %vm726_vm0, %v6758_v7  ;;  %v14296_v7 = vld [vmem:[#allocation41_spill] sm:$0xff] }
 0x198   : > { %10522 = vmatprep.mubr.msk.f32.mxu0 %vm726_vm0, %v14292_v4  ;;  %vm14297_vm12 = vnez %v14296_v7 }
 0x199   : > { %10055 = vmatmul.mubr.msk.f32.gmra.mrb[16].mxu1 %vm726_vm0, %v3077_v38  ;;  %v3079_v48 = vsel %vm14297_vm12, %v14295_v55, 0.0  ;;  %v6762_v4 = vsel %vm14297_vm12, %v14299_v37, 0.0  ;;  %v14300_v38 = vld [vmem:[#allocation50_spill] sm:$0xff]  ;;  %v14307_v37 = vld [vmem:[#allocation57_spill] sm:$0xff] }
 0x19a   : > { %10057 = vmatprep.mubr.msk.f32.mxu1 %vm726_vm0, %v14294_v16  ;;  %v14305_v55 = vld [vmem:[#allocation54_spill] sm:$0xff] }
 0x19b   : > { %10523 = vmatmul.mubr.msk.f32.gmra.mrb[16].mxu0 %vm726_vm0, %v6760_v26  ;;  %v14302_v26 = vld [vmem:[#allocation46_spill] sm:$0xff] }
 0x19c   : > { %10525 = vmatprep.mubr.msk.f32.mxu0 %vm726_vm0, %v14298_v52  ;;  %vm14303_vm13 = vnez %v14302_v26 }
 0x19d   : > { %10058 = vmatmul.mubr.msk.f32.gmra.mrb[18].mxu1 %vm726_vm0, %v3079_v48  ;;  %v3081_v16 = vsel %vm14303_vm13, %v14301_v54, 0.0  ;;  %v6764_v52 = vsel %vm14303_vm13, %v14305_v55, 0.0  ;;  %v14306_v48 = vld [vmem:[#allocation55_spill] sm:$0xff]  ;;  %v14310_v54 = vld [vmem:[#allocation58_spill] sm:$0xff]  ;;  %v14312_v55 = vld [vmem:[#allocation56_spill] sm:$0xff] }
 0x19e   : > { %10060 = vmatprep.mubr.msk.f32.mxu1 %vm726_vm0, %v14300_v38  ;;  %vm14313_vm13 = vnez %v14312_v55 }
 0x19f   : > { %10526 = vmatmul.mubr.msk.f32.gmra.mrb[18].mxu0 %vm726_vm0, %v6762_v4  ;;  %v14308_v4 = vld [vmem:[#allocation51_spill] sm:$0xff] }
 0x1a0   : > { %10528 = vmatprep.mubr.msk.f32.mxu0 %vm726_vm0, %v14304_v30  ;;  %vm14309_vm12 = vnez %v14308_v4 }
 0x1a1   : > { %10061 = vmatmul.mubr.msk.f32.gmra.mrb[20].mxu1 %vm726_vm0, %v3081_v16  ;;  %v3083_v38 = vsel %vm14309_vm12, %v14307_v37, 0.0  ;;  %v6766_v30 = vsel %vm14309_vm12, %v14310_v54, 0.0  ;;  %v14311_v16 = vld [vmem:[#allocation59_spill] sm:$0xff]  ;;  %v14315_v37 = vld [vmem:[#allocation62_spill] sm:$0xff]  ;;  %v14317_v54 = vld [vmem:[#allocation60_spill] sm:$0xff] }
 0x1a2   : > { %10063 = vmatprep.mubr.msk.f32.mxu1 %vm726_vm0, %v14306_v48  ;;  %v14314_v48 = vld [vmem:[#allocation61_spill] sm:$0xff]  ;;  %vm14318_vm12 = vnez %v14317_v54 }
 0x1a3   : > { %10529 = vmatmul.mubr.msk.f32.gmra.mrb[20].mxu0 %vm726_vm0, %v6764_v52  ;;  %v3085_v52 = vsel %vm14313_vm13, %v12432_v10, 0.0  ;;  %v14319_v10 = vld [vmem:[#allocation65_spill] sm:$0xff] }
 0x1a4   : > { %10531 = vmatprep.mubr.msk.f32.mxu0 %vm726_vm0, %v12410_v15  ;;  %v6768_v15 = vsel %vm14313_vm13, %v14314_v48, 0.0 }
 0x1a5   : > { %10064 = vmatmul.mubr.msk.f32.gmra.mrb[22].mxu1 %vm726_vm0, %v3083_v38  ;;  %v14316_v38 = vld [vmem:[#allocation64_spill] sm:$0xff] }
 0x1a6   : > { %10066 = vmatprep.mubr.msk.f32.mxu1 %vm726_vm0, %v14311_v16  ;;  %v14320_v16 = vld [vmem:[#allocation67_spill] sm:$0xff] }
 0x1a7   : > { %10532 = vmatmul.mubr.msk.f32.gmra.mrb[22].mxu0 %vm726_vm0, %v6766_v30  ;;  %v3087_v30 = vsel %vm14318_vm12, %v14316_v38, 0.0  ;;  %v3089_v48 = vsel %vm12453_vm15, %v14320_v16, 0.0  ;;  %v13246_v38 = vld [vmem:[#allocation2 + $0x102] sm:$0xff] }
 0x1a8   : > { %10534 = vmatprep.mubr.msk.f32.mxu0 %vm726_vm0, %v12435_v20  ;;  %v6770_v20 = vsel %vm14318_vm12, %v12461_v0, 0.0  ;;  %v13248_v0 = vld [vmem:[#allocation2 + $0x10a] sm:$0xff]  ;;  %v3452_v16 = vld [vmem:[#allocation2 + $0x40] sm:$0xff] }
 0x1a9   : > { %10067 = vmatmul.mubr.msk.f32.gmra.mrb[24].mxu1 %vm726_vm0, %v3085_v52  ;;  %14324 = vst [vmem:[#allocation13_spill] sm:$0xff] %v13248_v0  ;;  %v9115_v52 = vld [vmem:[%s13824_s3 + $0x88] sm:$0xff] }
 0x1aa   : > { %10069 = vmatprep.mubr.msk.f32.mxu1 %vm726_vm0, %v14315_v37  ;;  %v14323_v37 = vld [vmem:[#allocation69_spill] sm:$0xff] }
 0x1ab   : > { %10535 = vmatmul.mubr.msk.f32.gmra.mrb[24].mxu0 %vm726_vm0, %v6768_v15  ;;  %v14322_v15 = vld [vmem:[#allocation68_spill] sm:$0xff] }
 0x1ac   : > { %10537 = vmatprep.mubr.msk.f32.mxu0 %vm726_vm0, %v12459_v58  ;;  %v6772_v58 = vsel %vm12453_vm15, %v14323_v37, 0.0 }
 0x1ad   : > { %10070 = vmatmul.mubr.msk.f32.gmra.mrb[26].mxu1 %vm726_vm0, %v3087_v30  ;;  %v13250_v30 = vld [vmem:[#allocation3 + $0x102] sm:$0xff] }
 0x1ae   : > { %10072 = vmatprep.mubr.msk.f32.mxu1 %vm726_vm0, %v14319_v10  ;;  %14325 = vst [vmem:[#allocation14_spill] sm:$0xff] %v13250_v30  ;;  %v3448_v10 = vld [vmem:[#allocation2 + $0x20] sm:$0xff] }
 0x1af   : > { %10538 = vmatmul.mubr.msk.f32.gmra.mrb[26].mxu0 %vm726_vm0, %v6770_v20  ;;  %v13252_v20 = vld [vmem:[#allocation3 + $0x10a] sm:$0xff]  ;;  %v3480_v54 = vsel %vm11597_vm1, %v3448_v10, 0.0  ;;  %v3449_v10 = vld [vmem:[#allocation2 + $0x28] sm:$0xff] }
 0x1b0   : > { %10540 = vmatprep.mubr.msk.f32.mxu0 %vm726_vm0, %v14322_v15  ;;  %14326 = vst [vmem:[#allocation15_spill] sm:$0xff] %v13252_v20  ;;  %v3091_v15 = vsel %vm12477_vm14, %v13248_v0, 0.0  ;;  %v6774_v37 = vsel %vm12477_vm14, %v13252_v20, 0.0  ;;  %v8810_v0 = vld [vmem:[%s13823_s2 + $0x80] sm:$0xff]  ;;  %v14422_v55 = vld [vmem:[#allocation13_spill] sm:$0xff] }
 0x1b1   : > { %10073 = vmatmul.mubr.msk.f32.gmra.mrb[28].mxu1 %vm726_vm0, %v3089_v48  ;;  %v7163_v48 = vsel %vm11597_vm1, %v12513_v29, 0.0  ;;  %v9114_v29 = vld [vmem:[%s13824_s3 + $0x80] sm:$0xff]  ;;  %vm14329_vm1 = vnez %v14068_v32  ;;  %v3470_v32 = vld [vmem:[#allocation2 + $0xd0] sm:$0xff] }
 0x1b2   : > { %10075 = vmatprep.mubr.msk.f32.mxu1 %vm726_vm0, %v13246_v38 }
 0x1b3   : > { %10541 = vmatmul.mubr.msk.f32.gmra.mrb[28].mxu0 %vm726_vm0, %v6772_v58  ;;  %v3450_v58 = vld [vmem:[#allocation2 + $0x30] sm:$0xff] }
 0x1b4   : > { %10543 = vmatprep.mubr.msk.f32.mxu0 %vm726_vm0, %v13250_v30  ;;  %v8811_v30 = vld [vmem:[%s13823_s2 + $0x88] sm:$0xff] }
 0x1b5   : > { %10076 = vmatmul.mubr.msk.f32.gmra.mrb[30].mxu1 %vm726_vm0, %v3091_v15  ;;  %v3482_v15 = vsel %vm11638_vm2, %v3450_v58, 0.0  ;;  %v13289_v20 = vpack.c.bf16 %v8811_v30, %v8810_v0  ;;  %v3484_v0 = vsel %vm11663_vm3, %v3452_v16, 0.0  ;;  %v7171_v30 = vsel %vm11690_vm5, %v12585_v9, 0.0  ;;  %v3459_v9 = vld [vmem:[#allocation2 + $0x78] sm:$0xff] }
 0x1b6   : > { %10082 = vmatprep.mubr.msk.f32.mxu1 %vm726_vm0, %v3480_v54  ;;  %v7165_v54 = vsel %vm11638_vm2, %v12532_v44, 0.0  ;;  %v3454_v44 = vld [vmem:[#allocation2 + $0x50] sm:$0xff]  ;;  %v7173_v16 = vsel %vm11710_vm6, %v12601_v18, 0.0  ;;  %v7175_v58 = vsel %vm11737_vm7, %v12617_v27, 0.0  ;;  %v3461_v18 = vld [vmem:[#allocation2 + $0x88] sm:$0xff]  ;;  %v3463_v27 = vld [vmem:[#allocation2 + $0x98] sm:$0xff]  ;;  %vm14330_vm2 = vnez %v14074_v3 }
 0x1b7   : > { %10544 = vmatmul.mubr.msk.f32.gmra.mrb[30].mxu0 %vm726_vm0, %v6774_v37  ;;  %v13295_v37 = vpack.c.bf16 %v9115_v52, %v9114_v29  ;;  %v7179_v29 = vsel %vm11782_vm9, %v12649_v42, 0.0  ;;  %v7181_v52 = vsel %vm14329_vm1, %v12665_v51, 0.0  ;;  %v3467_v42 = vld [vmem:[#allocation2 + $0xb8] sm:$0xff]  ;;  %v3469_v51 = vld [vmem:[#allocation2 + $0xc8] sm:$0xff]  ;;  %vm14331_vm3 = vnez %v14076_v12  ;;  %v3478_v12 = vld [vmem:[#allocation2 + $0x110] sm:$0xff] }
 0x1b8   : > { %10550 = vmatprep.mubr.msk.f32.mxu0 %vm726_vm0, %v7163_v48  ;;  %v3451_v48 = vld [vmem:[#allocation2 + $0x38] sm:$0xff] }
 0x1b9   : > { %10083 = vmatmul.mubr.msk.f32.vlgmr.msra.gmra.mrb[0].mxu1 %vm726_vm0, %v3449_v10  ;;  %v7177_v10 = vsel %vm11763_vm8, %v12633_v36, 0.0  ;;  %v3465_v36 = vld [vmem:[#allocation2 + $0xa8] sm:$0xff]  ;;  %v3475_v3 = vld [vmem:[#allocation2 + $0xf8] sm:$0xff] }
 0x1ba   : > { %10733 = vmatpush3.bf16.msra.mxu1 %v13066_v24  ;;  %10085 = vmatprep.mubr.msk.f32.mxu1 %vm726_vm0, %v3482_v15  ;;  %v3488_v24 = vsel %vm11690_vm5, %v3456_v2, 0.0  ;;  %v7183_v15 = vsel %vm11827_vm11, %v12681_v59, 0.0  ;;  %v3471_v59 = vld [vmem:[#allocation2 + $0xd8] sm:$0xff]  ;;  %v14339_v2 = vld [vmem:[#allocation71_spill] sm:$0xff] }
 0x1bb   : > { %10551 = vmatmul.mubr.msk.f32.vlgmr.msra.gmra.mrb[0].mxu0 %vm726_vm0, %v12540_v57  ;;  %10735 = vmatprep.subr.bf16.mxu1 %v13289_v20  ;;  %v3453_v57 = vld [vmem:[#allocation2 + $0x48] sm:$0xff] }
 0x1bc   : > { %10769 = vmatpush3.bf16.msra.mxu0 %v13071_v39  ;;  %10553 = vmatprep.mubr.msk.f32.mxu0 %vm726_vm0, %v7165_v54  ;;  %v3486_v39 = vsel %vm11669_vm4, %v3454_v44, 0.0  ;;  %v7185_v54 = vsel %vm14179_vm10, %v12697_v6, 0.0  ;;  %v3473_v6 = vld [vmem:[#allocation2 + $0xe8] sm:$0xff] }
 0x1bd   : > { %10086 = vmatmul.mubr.msk.f32.gmra.mrb[2].mxu1 %vm726_vm0, %v3451_v48  ;;  %10771 = vmatprep.subr.bf16.mxu0 %v13295_v37  ;;  %v7187_v48 = vsel %vm14330_vm2, %v12713_v19, 0.0  ;;  %v14332_v19 = vld [vmem:[#allocation5_spill] sm:$0xff] }
 0x1be   : > { %10088 = vmatprep.mubr.msk.f32.mxu1 %vm726_vm0, %v3484_v0  ;;  %v7189_v0 = vsel %vm14331_vm3, %v12729_v28, 0.0  ;;  %vm14333_vm4 = vnez %v14332_v19  ;;  %v7161_v28 = vld [vmem:[#allocation3 + $0x110] sm:$0xff]  ;;  %v14380_v19 = vld [vmem:[#allocation112_spill] sm:$0xff] }
 0x1bf   : > { %10554 = vmatmul.mubr.msk.f32.gmra.mrb[2].mxu0 %vm726_vm0, %v12559_v21  ;;  %v3455_v21 = vld [vmem:[#allocation2 + $0x58] sm:$0xff] }
 0x1c0   : > { %10556 = vmatprep.mubr.msk.f32.mxu0 %vm726_vm0, %v7167_v47  ;;  %v14334_v47 = vld [vmem:[#allocation7_spill] sm:$0xff] }
 0x1c1   : > { %10089 = vmatmul.mubr.msk.f32.gmra.mrb[4].mxu1 %vm726_vm0, %v3453_v57  ;;  %v7191_v44 = vsel %vm14333_vm4, %v14334_v47, 0.0  ;;  %v14335_v57 = vld [vmem:[#allocation70_spill] sm:$0xff] }
 0x1c2   : > { %10091 = vmatprep.mubr.msk.f32.mxu1 %vm726_vm0, %v3486_v39  ;;  %v14382_v47 = vld [vmem:[#allocation114_spill] sm:$0xff] }
 0x1c3   : > { %10557 = vmatmul.mubr.msk.f32.gmra.mrb[4].mxu0 %vm726_vm0, %v12575_v11  ;;  %v3490_v11 = vsel %vm11710_vm6, %v3458_v63, 0.0  ;;  %v14341_v63 = vld [vmem:[#allocation73_spill] sm:$0xff]  ;;  %vm14400_vm6 = vnez %v14249_v53  ;;  %v4260_v53 = vld [vmem:[#allocation2 + $0x42] sm:$0xff] }
 0x1c4   : > { %10559 = vmatprep.mubr.msk.f32.mxu0 %vm726_vm0, %v7169_v62  ;;  %v14338_v62 = vld [vmem:[#allocation8_spill] sm:$0xff] }
 0x1c5   : > { %10092 = vmatmul.mubr.msk.f32.gmra.mrb[6].mxu1 %vm726_vm0, %v3455_v21  ;;  %v3479_v21 = vld [vmem:[#allocation2 + $0x118] sm:$0xff] }
 0x1c6   : > { %10094 = vmatprep.mubr.msk.f32.mxu1 %vm726_vm0, %v3488_v24  ;;  %v7162_v24 = vld [vmem:[#allocation3 + $0x118] sm:$0xff] }
 0x1c7   : > { %10560 = vmatmul.mubr.msk.f32.gmra.mrb[6].mxu0 %vm726_vm0, %v12591_v45  ;;  %v3492_v45 = vsel %vm11737_vm7, %v3460_v14, 0.0  ;;  %v14345_v14 = vld [vmem:[#allocation77_spill] sm:$0xff] }
 0x1c8   : > { %10562 = vmatprep.mubr.msk.f32.mxu0 %vm726_vm0, %v7171_v30  ;;  %v14340_v30 = vld [vmem:[#allocation72_spill] sm:$0xff] }
 0x1c9   : > { %10095 = vmatmul.mubr.msk.f32.gmra.mrb[8].mxu1 %vm726_vm0, %v3457_v33  ;;  %v14342_v33 = vld [vmem:[#allocation74_spill] sm:$0xff] }
 0x1ca   : > { %10097 = vmatprep.mubr.msk.f32.mxu1 %vm726_vm0, %v3490_v11  ;;  %v14343_v11 = vld [vmem:[#allocation75_spill] sm:$0xff] }
 0x1cb   : > { %10563 = vmatmul.mubr.msk.f32.gmra.mrb[8].mxu0 %vm726_vm0, %v12607_v43  ;;  %v3494_v43 = vsel %vm11763_vm8, %v3462_v31, 0.0  ;;  %v14350_v31 = vld [vmem:[#allocation82_spill] sm:$0xff] }
 0x1cc   : > { %10565 = vmatprep.mubr.msk.f32.mxu0 %vm726_vm0, %v7173_v16  ;;  %v14344_v16 = vld [vmem:[#allocation76_spill] sm:$0xff] }
 0x1cd   : > { %10098 = vmatmul.mubr.msk.f32.gmra.mrb[10].mxu1 %vm726_vm0, %v3459_v9  ;;  %v14346_v9 = vld [vmem:[#allocation78_spill] sm:$0xff] }
 0x1ce   : > { %10100 = vmatprep.mubr.msk.f32.mxu1 %vm726_vm0, %v3492_v45  ;;  %v14347_v45 = vld [vmem:[#allocation79_spill] sm:$0xff] }
 0x1cf   : > { %10566 = vmatmul.mubr.msk.f32.gmra.mrb[10].mxu0 %vm726_vm0, %v12623_v61  ;;  %v3496_v61 = vsel %vm11782_vm9, %v3464_v50, 0.0  ;;  %v14355_v50 = vld [vmem:[#allocation87_spill] sm:$0xff] }
 0x1d0   : > { %10568 = vmatprep.mubr.msk.f32.mxu0 %vm726_vm0, %v7175_v58  ;;  %v14348_v58 = vld [vmem:[#allocation80_spill] sm:$0xff] }
 0x1d1   : > { %10101 = vmatmul.mubr.msk.f32.gmra.mrb[12].mxu1 %vm726_vm0, %v3461_v18  ;;  %v14352_v18 = vld [vmem:[#allocation84_spill] sm:$0xff] }
 0x1d2   : > { %10103 = vmatprep.mubr.msk.f32.mxu1 %vm726_vm0, %v3494_v43  ;;  %v14353_v43 = vld [vmem:[#allocation85_spill] sm:$0xff] }
 0x1d3   : > { %10569 = vmatmul.mubr.msk.f32.gmra.mrb[12].mxu0 %vm726_vm0, %v12639_v5  ;;  %v3498_v5 = vsel %vm14329_vm1, %v3466_v1, 0.0  ;;  %v14359_v1 = vld [vmem:[#allocation91_spill] sm:$0xff] }
 0x1d4   : > { %10571 = vmatprep.mubr.msk.f32.mxu0 %vm726_vm0, %v7177_v10  ;;  %v14354_v10 = vld [vmem:[#allocation86_spill] sm:$0xff] }
 0x1d5   : > { %10104 = vmatmul.mubr.msk.f32.gmra.mrb[14].mxu1 %vm726_vm0, %v3463_v27  ;;  %v14356_v27 = vld [vmem:[#allocation88_spill] sm:$0xff] }
 0x1d6   : > { %10106 = vmatprep.mubr.msk.f32.mxu1 %vm726_vm0, %v3496_v61  ;;  %v14357_v61 = vld [vmem:[#allocation89_spill] sm:$0xff] }
 0x1d7   : > { %10572 = vmatmul.mubr.msk.f32.gmra.mrb[14].mxu0 %vm726_vm0, %v12655_v8  ;;  %v3500_v8 = vsel %vm11827_vm11, %v3468_v13, 0.0  ;;  %v14363_v13 = vld [vmem:[#allocation95_spill] sm:$0xff] }
 0x1d8   : > { %10574 = vmatprep.mubr.msk.f32.mxu0 %vm726_vm0, %v7179_v29  ;;  %v14358_v29 = vld [vmem:[#allocation90_spill] sm:$0xff] }
 0x1d9   : > { %10107 = vmatmul.mubr.msk.f32.gmra.mrb[16].mxu1 %vm726_vm0, %v3465_v36  ;;  %v14360_v36 = vld [vmem:[#allocation92_spill] sm:$0xff] }
 0x1da   : > { %10109 = vmatprep.mubr.msk.f32.mxu1 %vm726_vm0, %v3498_v5  ;;  %v14361_v5 = vld [vmem:[#allocation93_spill] sm:$0xff] }
 0x1db   : > { %10575 = vmatmul.mubr.msk.f32.gmra.mrb[16].mxu0 %vm726_vm0, %v12671_v17  ;;  %v3502_v17 = vsel %vm14179_vm10, %v3470_v32, 0.0  ;;  %v14367_v32 = vld [vmem:[#allocation99_spill] sm:$0xff] }
 0x1dc   : > { %10577 = vmatprep.mubr.msk.f32.mxu0 %vm726_vm0, %v7181_v52  ;;  %v14362_v52 = vld [vmem:[#allocation94_spill] sm:$0xff] }
 0x1dd   : > { %10110 = vmatmul.mubr.msk.f32.gmra.mrb[18].mxu1 %vm726_vm0, %v3467_v42  ;;  %v14364_v42 = vld [vmem:[#allocation96_spill] sm:$0xff] }
 0x1de   : > { %10112 = vmatprep.mubr.msk.f32.mxu1 %vm726_vm0, %v3500_v8  ;;  %v14365_v8 = vld [vmem:[#allocation97_spill] sm:$0xff] }
 0x1df   : > { %10578 = vmatmul.mubr.msk.f32.gmra.mrb[18].mxu0 %vm726_vm0, %v12687_v25  ;;  %v3504_v25 = vsel %vm14330_vm2, %v3472_v46, 0.0  ;;  %v14371_v46 = vld [vmem:[#allocation103_spill] sm:$0xff] }
 0x1e0   : > { %10580 = vmatprep.mubr.msk.f32.mxu0 %vm726_vm0, %v7183_v15  ;;  %v14366_v15 = vld [vmem:[#allocation98_spill] sm:$0xff] }
 0x1e1   : > { %10113 = vmatmul.mubr.msk.f32.gmra.mrb[20].mxu1 %vm726_vm0, %v3469_v51  ;;  %v14368_v51 = vld [vmem:[#allocation100_spill] sm:$0xff] }
 0x1e2   : > { %10115 = vmatprep.mubr.msk.f32.mxu1 %vm726_vm0, %v3502_v17  ;;  %v14369_v17 = vld [vmem:[#allocation101_spill] sm:$0xff] }
 0x1e3   : > { %10581 = vmatmul.mubr.msk.f32.gmra.mrb[20].mxu0 %vm726_vm0, %v12703_v35  ;;  %v3506_v35 = vsel %vm14331_vm3, %v3474_v56, 0.0  ;;  %v14375_v56 = vld [vmem:[#allocation107_spill] sm:$0xff] }
 0x1e4   : > { %10583 = vmatprep.mubr.msk.f32.mxu0 %vm726_vm0, %v7185_v54  ;;  %v14370_v54 = vld [vmem:[#allocation102_spill] sm:$0xff] }
 0x1e5   : > { %10116 = vmatmul.mubr.msk.f32.gmra.mrb[22].mxu1 %vm726_vm0, %v3471_v59  ;;  %v14372_v59 = vld [vmem:[#allocation104_spill] sm:$0xff] }
 0x1e6   : > { %10118 = vmatprep.mubr.msk.f32.mxu1 %vm726_vm0, %v3504_v25  ;;  %v14373_v25 = vld [vmem:[#allocation105_spill] sm:$0xff] }
 0x1e7   : > { %10584 = vmatmul.mubr.msk.f32.gmra.mrb[22].mxu0 %vm726_vm0, %v12719_v41  ;;  %v3508_v41 = vsel %vm14333_vm4, %v12743_v40, 0.0  ;;  %vm14418_vm4 = vnez %v14296_v7  ;;  %v4278_v7 = vld [vmem:[#allocation2 + $0xd2] sm:$0xff] }
 0x1e8   : > { %10586 = vmatprep.mubr.msk.f32.mxu0 %vm726_vm0, %v7187_v48  ;;  %v14374_v48 = vld [vmem:[#allocation106_spill] sm:$0xff] }
 0x1e9   : > { %10119 = vmatmul.mubr.msk.f32.gmra.mrb[24].mxu1 %vm726_vm0, %v3473_v6  ;;  %v14376_v6 = vld [vmem:[#allocation108_spill] sm:$0xff] }
 0x1ea   : > { %10121 = vmatprep.mubr.msk.f32.mxu1 %vm726_vm0, %v3506_v35  ;;  %v14377_v35 = vld [vmem:[#allocation109_spill] sm:$0xff] }
 0x1eb   : > { %10587 = vmatmul.mubr.msk.f32.gmra.mrb[24].mxu0 %vm726_vm0, %v12735_v49  ;;  %v14336_v49 = vld [vmem:[#allocation6_spill] sm:$0xff] }
 0x1ec   : > { %10589 = vmatprep.mubr.msk.f32.mxu0 %vm726_vm0, %v7189_v0  ;;  %vm14337_vm5 = vnez %v14336_v49  ;;  %v14378_v0 = vld [vmem:[#allocation110_spill] sm:$0xff]  ;;  %v14387_v49 = vld [vmem:[#allocation119_spill] sm:$0xff] }
 0x1ed   : > { %10122 = vmatmul.mubr.msk.f32.gmra.mrb[26].mxu1 %vm726_vm0, %v3475_v3  ;;  %v3510_v39 = vsel %vm14337_vm5, %v3478_v12, 0.0  ;;  %v7193_v40 = vsel %vm14337_vm5, %v7161_v28, 0.0  ;;  %v14379_v3 = vld [vmem:[#allocation111_spill] sm:$0xff]  ;;  %v14384_v12 = vld [vmem:[#allocation116_spill] sm:$0xff]  ;;  %v14385_v28 = vld [vmem:[#allocation117_spill] sm:$0xff]  ;;  %vm14419_vm5 = vnez %v14302_v26 }
 0x1ee   : > { %10124 = vmatprep.mubr.msk.f32.mxu1 %vm726_vm0, %v3508_v41  ;;  %v14381_v41 = vld [vmem:[#allocation113_spill] sm:$0xff]  ;;  %v4280_v26 = vld [vmem:[#allocation2 + $0xe2] sm:$0xff] }
 0x1ef   : > { %10590 = vmatmul.mubr.msk.f32.gmra.mrb[26].mxu0 %vm726_vm0, %v14335_v57  ;;  %v14386_v57 = vld [vmem:[#allocation118_spill] sm:$0xff] }
 0x1f0   : > { %10592 = vmatprep.mubr.msk.f32.mxu0 %vm726_vm0, %v7191_v44  ;;  %v14383_v44 = vld [vmem:[#allocation115_spill] sm:$0xff] }
 0x1f1   : > { %10125 = vmatmul.mubr.msk.f32.gmra.mrb[28].mxu1 %vm726_vm0, %v14338_v62  ;;  %v14390_v62 = vld [vmem:[#allocation122_spill] sm:$0xff] }
 0x1f2   : > { %10127 = vmatprep.mubr.msk.f32.mxu1 %vm726_vm0, %v3510_v39  ;;  %v14388_v39 = vld [vmem:[#allocation120_spill] sm:$0xff] }
 0x1f3   : > { %10593 = vmatmul.mubr.msk.f32.gmra.mrb[28].mxu0 %vm726_vm0, %v14339_v2  ;;  %v14391_v2 = vld [vmem:[#allocation123_spill] sm:$0xff] }
 0x1f4   : > { %10595 = vmatprep.mubr.msk.f32.mxu0 %vm726_vm0, %v7193_v40  ;;  %v14389_v40 = vld [vmem:[#allocation121_spill] sm:$0xff] }
 0x1f5   : > { %10128 = vmatmul.mubr.msk.f32.gmra.mrb[30].mxu1 %vm726_vm0, %v3479_v21  ;;  %v14392_v21 = vld [vmem:[#allocation124_spill] sm:$0xff] }
 0x1f6   : > { %10134 = vmatprep.mubr.msk.f32.mxu1 %vm726_vm0, %v14340_v30  ;;  %v14394_v30 = vld [vmem:[#allocation126_spill] sm:$0xff] }
 0x1f7   : > { %10596 = vmatmul.mubr.msk.f32.gmra.mrb[30].mxu0 %vm726_vm0, %v7162_v24  ;;  %v14393_v24 = vld [vmem:[#allocation125_spill] sm:$0xff] }
 0x1f8   : > { %10602 = vmatprep.mubr.msk.f32.mxu0 %vm726_vm0, %v14341_v63  ;;  %v14395_v63 = vld [vmem:[#allocation127_spill] sm:$0xff] }
 0x1f9   : > { %10135 = vmatmul.mubr.msk.f32.vlgmr.msra.gmra.mrb[0].mxu1 %vm726_vm0, %v14342_v33  ;;  %v14396_v33 = vld [vmem:[#allocation128_spill] sm:$0xff] }
 0x1fa   : > { %10737 = vmatpush3.bf16.msra.mxu1 %v13289_v20  ;;  %10137 = vmatprep.mubr.msk.f32.mxu1 %vm726_vm0, %v14344_v16  ;;  %v14349_v20 = vld [vmem:[#allocation81_spill] sm:$0xff] }
 0x1fb   : > { %10603 = vmatmul.mubr.msk.f32.vlgmr.msra.gmra.mrb[0].mxu0 %vm726_vm0, %v14343_v11  ;;  %v14397_v11 = vld [vmem:[#allocation129_spill] sm:$0xff] }
 0x1fc   : > { %10773 = vmatpush3.bf16.msra.mxu0 %v13295_v37  ;;  %10605 = vmatprep.mubr.msk.f32.mxu0 %vm726_vm0, %v14345_v14  ;;  %v14351_v37 = vld [vmem:[#allocation83_spill] sm:$0xff]  ;;  %v3898_v16 = vld [vmem:[#allocation2 + $0x111] sm:$0xff]  ;;  %v7581_v14 = vld [vmem:[#allocation3 + $0x111] sm:$0xff] }
 0x1fd   : > { %10138 = vmatmul.mubr.msk.f32.gmra.mrb[2].mxu1 %vm726_vm0, %v14346_v9  ;;  %v14398_v9 = vld [vmem:[#allocation130_spill] sm:$0xff] }
 0x1fe   : > { %10140 = vmatprep.mubr.msk.f32.mxu1 %vm726_vm0, %v14348_v58  ;;  %v3899_v58 = vld [vmem:[#allocation2 + $0x119] sm:$0xff] }
 0x1ff   : > { %10606 = vmatmul.mubr.msk.f32.gmra.mrb[2].mxu0 %vm726_vm0, %v14347_v45  ;;  %v14399_v45 = vld [vmem:[#allocation131_spill] sm:$0xff] }
 0x200   : > { %10608 = vmatprep.mubr.msk.f32.mxu0 %vm726_vm0, %v14349_v20  ;;  %v7582_v20 = vld [vmem:[#allocation3 + $0x119] sm:$0xff] }
 0x201   : > { %10141 = vmatmul.mubr.msk.f32.gmra.mrb[4].mxu1 %vm726_vm0, %v14350_v31  ;;  %v4289_v31 = vsel %vm14400_vm6, %v13060_v60, 0.0 }
 0x202   : > { %10143 = vmatprep.mubr.msk.f32.mxu1 %vm726_vm0, %v14352_v18  ;;  %v4259_v18 = vld [vmem:[#allocation2 + $0x3a] sm:$0xff] }
 0x203   : > { %10609 = vmatmul.mubr.msk.f32.gmra.mrb[4].mxu0 %vm726_vm0, %v14351_v37  ;;  %v7972_v37 = vsel %vm14400_vm6, %v13064_v23, 0.0  ;;  %v4261_v23 = vld [vmem:[#allocation2 + $0x4a] sm:$0xff]  ;;  %vm14420_vm6 = vnez %v14308_v4  ;;  %v4282_v4 = vld [vmem:[#allocation2 + $0xf2] sm:$0xff] }
 0x204   : > { %10611 = vmatprep.mubr.msk.f32.mxu0 %vm726_vm0, %v14353_v43  ;;  %v7941_v43 = vld [vmem:[#allocation3 + $0x32] sm:$0xff] }
 0x205   : > { %10144 = vmatmul.mubr.msk.f32.gmra.mrb[6].mxu1 %vm726_vm0, %v14354_v10  ;;  %v7942_v10 = vld [vmem:[#allocation3 + $0x3a] sm:$0xff] }
 0x206   : > { %10146 = vmatprep.mubr.msk.f32.mxu1 %vm726_vm0, %v14356_v27  ;;  %v7943_v27 = vld [vmem:[#allocation3 + $0x42] sm:$0xff] }
 0x207   : > { %10612 = vmatmul.mubr.msk.f32.gmra.mrb[6].mxu0 %vm726_vm0, %v14355_v50  ;;  %v14401_v50 = vld [vmem:[#allocation9_spill] sm:$0xff] }
 0x208   : > { %10614 = vmatprep.mubr.msk.f32.mxu0 %vm726_vm0, %v14357_v61  ;;  %v7944_v61 = vld [vmem:[#allocation3 + $0x4a] sm:$0xff] }
 0x209   : > { %10147 = vmatmul.mubr.msk.f32.gmra.mrb[8].mxu1 %vm726_vm0, %v14358_v29  ;;  %v14404_v29 = vld [vmem:[#allocation11_spill] sm:$0xff] }
 0x20a   : > { %10149 = vmatprep.mubr.msk.f32.mxu1 %vm726_vm0, %v14360_v36  ;;  %vm14405_vm8 = vnez %v14404_v29  ;;  %v7962_v29 = vld [vmem:[#allocation3 + $0xda] sm:$0xff] }
 0x20b   : > { %10615 = vmatmul.mubr.msk.f32.gmra.mrb[8].mxu0 %vm726_vm0, %v14359_v1  ;;  %v4293_v1 = vsel %vm14405_vm8, %v4261_v23, 0.0  ;;  %v7976_v36 = vsel %vm14405_vm8, %v7944_v61, 0.0  ;;  %v7961_v61 = vld [vmem:[#allocation3 + $0xd2] sm:$0xff] }
 0x20c   : > { %10617 = vmatprep.mubr.msk.f32.mxu0 %vm726_vm0, %v14361_v5  ;;  %v4262_v5 = vld [vmem:[#allocation2 + $0x52] sm:$0xff] }
 0x20d   : > { %10150 = vmatmul.mubr.msk.f32.gmra.mrb[10].mxu1 %vm726_vm0, %v14362_v52  ;;  %v4263_v52 = vld [vmem:[#allocation2 + $0x5a] sm:$0xff] }
 0x20e   : > { %10152 = vmatprep.mubr.msk.f32.mxu1 %vm726_vm0, %v14364_v42  ;;  %v7946_v42 = vld [vmem:[#allocation3 + $0x5a] sm:$0xff] }
 0x20f   : > { %10618 = vmatmul.mubr.msk.f32.gmra.mrb[10].mxu0 %vm726_vm0, %v14363_v13  ;;  %v7945_v13 = vld [vmem:[#allocation3 + $0x52] sm:$0xff] }
 0x210   : > { %10620 = vmatprep.mubr.msk.f32.mxu0 %vm726_vm0, %v14365_v8  ;;  %v14406_v8 = vld [vmem:[#allocation12_spill] sm:$0xff] }
 0x211   : > { %10153 = vmatmul.mubr.msk.f32.gmra.mrb[12].mxu1 %vm726_vm0, %v14366_v15  ;;  %vm14407_vm9 = vnez %v14406_v8 }
 0x212   : > { %10155 = vmatprep.mubr.msk.f32.mxu1 %vm726_vm0, %v14368_v51  ;;  %v4295_v15 = vsel %vm14407_vm9, %v4263_v52, 0.0  ;;  %v4264_v51 = vld [vmem:[#allocation2 + $0x62] sm:$0xff]  ;;  %v7963_v52 = vld [vmem:[#allocation3 + $0xe2] sm:$0xff] }
 0x213   : > { %10621 = vmatmul.mubr.msk.f32.gmra.mrb[12].mxu0 %vm726_vm0, %v14367_v32  ;;  %v7978_v32 = vsel %vm14407_vm9, %v7946_v42, 0.0 }
 0x214   : > { %10623 = vmatprep.mubr.msk.f32.mxu0 %vm726_vm0, %v14369_v17  ;;  %v4265_v17 = vld [vmem:[#allocation2 + $0x6a] sm:$0xff] }
 0x215   : > { %10156 = vmatmul.mubr.msk.f32.gmra.mrb[14].mxu1 %vm726_vm0, %v14370_v54  ;;  %v7947_v54 = vld [vmem:[#allocation3 + $0x62] sm:$0xff] }
 0x216   : > { %10158 = vmatprep.mubr.msk.f32.mxu1 %vm726_vm0, %v14372_v59  ;;  %v14408_v59 = vld [vmem:[#allocation16_spill] sm:$0xff] }
 0x217   : > { %10624 = vmatmul.mubr.msk.f32.gmra.mrb[14].mxu0 %vm726_vm0, %v14371_v46  ;;  %v7948_v46 = vld [vmem:[#allocation3 + $0x6a] sm:$0xff]  ;;  %vm14409_vm10 = vnez %v14408_v59 }
 0x218   : > { %10626 = vmatprep.mubr.msk.f32.mxu0 %vm726_vm0, %v14373_v25  ;;  %v4297_v25 = vsel %vm14409_vm10, %v4265_v17, 0.0 }
 0x219   : > { %10159 = vmatmul.mubr.msk.f32.gmra.mrb[16].mxu1 %vm726_vm0, %v14374_v48  ;;  %v7980_v48 = vsel %vm14409_vm10, %v7948_v46, 0.0 }
 0x21a   : > { %10161 = vmatprep.mubr.msk.f32.mxu1 %vm726_vm0, %v14376_v6  ;;  %v4267_v6 = vld [vmem:[#allocation2 + $0x7a] sm:$0xff] }
 0x21b   : > { %10627 = vmatmul.mubr.msk.f32.gmra.mrb[16].mxu0 %vm726_vm0, %v14375_v56  ;;  %v4266_v56 = vld [vmem:[#allocation2 + $0x72] sm:$0xff] }
 0x21c   : > { %10629 = vmatprep.mubr.msk.f32.mxu0 %vm726_vm0, %v14377_v35  ;;  %v7949_v35 = vld [vmem:[#allocation3 + $0x72] sm:$0xff] }
 0x21d   : > { %10162 = vmatmul.mubr.msk.f32.gmra.mrb[18].mxu1 %vm726_vm0, %v14378_v0  ;;  %v7950_v0 = vld [vmem:[#allocation3 + $0x7a] sm:$0xff] }
 0x21e   : > { %10164 = vmatprep.mubr.msk.f32.mxu1 %vm726_vm0, %v14380_v19 }
 0x21f   : > { %10630 = vmatmul.mubr.msk.f32.gmra.mrb[18].mxu0 %vm726_vm0, %v14379_v3  ;;  %v14410_v3 = vld [vmem:[#allocation21_spill] sm:$0xff] }
 0x220   : > { %10632 = vmatprep.mubr.msk.f32.mxu0 %vm726_vm0, %v14381_v41  ;;  %vm14411_vm11 = vnez %v14410_v3  ;;  %v7969_v3 = vld [vmem:[#allocation3 + $0x112] sm:$0xff] }
 0x221   : > { %10165 = vmatmul.mubr.msk.f32.gmra.mrb[20].mxu1 %vm726_vm0, %v14382_v47  ;;  %v4299_v19 = vsel %vm14411_vm11, %v4267_v6, 0.0  ;;  %v7982_v41 = vsel %vm14411_vm11, %v7950_v0, 0.0  ;;  %v4268_v47 = vld [vmem:[#allocation2 + $0x82] sm:$0xff]  ;;  %v4287_v0 = vld [vmem:[#allocation2 + $0x11a] sm:$0xff] }
 0x222   : > { %10167 = vmatprep.mubr.msk.f32.mxu1 %vm726_vm0, %v14384_v12  ;;  %v7951_v12 = vld [vmem:[#allocation3 + $0x82] sm:$0xff] }
 0x223   : > { %10633 = vmatmul.mubr.msk.f32.gmra.mrb[20].mxu0 %vm726_vm0, %v14383_v44  ;;  %v4269_v44 = vld [vmem:[#allocation2 + $0x8a] sm:$0xff] }
 0x224   : > { %10635 = vmatprep.mubr.msk.f32.mxu0 %vm726_vm0, %v14385_v28  ;;  %v7952_v28 = vld [vmem:[#allocation3 + $0x8a] sm:$0xff] }
 0x225   : > { %10168 = vmatmul.mubr.msk.f32.gmra.mrb[22].mxu1 %vm726_vm0, %v14386_v57  ;;  %v14412_v57 = vld [vmem:[#allocation26_spill] sm:$0xff] }
 0x226   : > { %10170 = vmatprep.mubr.msk.f32.mxu1 %vm726_vm0, %v14388_v39  ;;  %vm14413_vm1 = vnez %v14412_v57  ;;  %v13714_v57 = vld [vmem:[%s13825_s4] ss:$0 sm:$0xff] }
 0x227   : > { %10636 = vmatmul.mubr.msk.f32.gmra.mrb[22].mxu0 %vm726_vm0, %v14387_v49  ;;  %v4301_v49 = vsel %vm14413_vm1, %v4269_v44, 0.0  ;;  %v7984_v39 = vsel %vm14413_vm1, %v7952_v28, 0.0 }
 0x228   : > { %10638 = vmatprep.mubr.msk.f32.mxu0 %vm726_vm0, %v14389_v40  ;;  %v4270_v40 = vld [vmem:[#allocation2 + $0x92] sm:$0xff] }
 0x229   : > { %10171 = vmatmul.mubr.msk.f32.gmra.mrb[24].mxu1 %vm726_vm0, %v14390_v62  ;;  %v4271_v62 = vld [vmem:[#allocation2 + $0x9a] sm:$0xff] }
 0x22a   : > { %10173 = vmatprep.mubr.msk.f32.mxu1 %vm726_vm0, %v14392_v21  ;;  %v7954_v21 = vld [vmem:[#allocation3 + $0x9a] sm:$0xff] }
 0x22b   : > { %10639 = vmatmul.mubr.msk.f32.gmra.mrb[24].mxu0 %vm726_vm0, %v14391_v2  ;;  %v7953_v2 = vld [vmem:[#allocation3 + $0x92] sm:$0xff] }
 0x22c   : > { %10641 = vmatprep.mubr.msk.f32.mxu0 %vm726_vm0, %v14393_v24  ;;  %v14414_v24 = vld [vmem:[#allocation31_spill] sm:$0xff] }
 0x22d   : > { %10174 = vmatmul.mubr.msk.f32.gmra.mrb[26].mxu1 %vm726_vm0, %v14394_v30  ;;  %vm14415_vm2 = vnez %v14414_v24 }
 0x22e   : > { %10176 = vmatprep.mubr.msk.f32.mxu1 %vm726_vm0, %v14396_v33  ;;  %v4303_v30 = vsel %vm14415_vm2, %v4271_v62, 0.0  ;;  %v4272_v33 = vld [vmem:[#allocation2 + $0xa2] sm:$0xff] }
 0x22f   : > { %10642 = vmatmul.mubr.msk.f32.gmra.mrb[26].mxu0 %vm726_vm0, %v14395_v63  ;;  %v7986_v63 = vsel %vm14415_vm2, %v7954_v21, 0.0 }
 0x230   : > { %10644 = vmatprep.mubr.msk.f32.mxu0 %vm726_vm0, %v14397_v11  ;;  %v4273_v11 = vld [vmem:[#allocation2 + $0xaa] sm:$0xff] }
 0x231   : > { %10177 = vmatmul.mubr.msk.f32.gmra.mrb[28].mxu1 %vm726_vm0, %v14398_v9  ;;  %v14416_v9 = vld [vmem:[#allocation36_spill] sm:$0xff] }
 0x232   : > { %10179 = vmatprep.mubr.msk.f32.mxu1 %vm726_vm0, %v3898_v16  ;;  %v7955_v16 = vld [vmem:[#allocation3 + $0xa2] sm:$0xff]  ;;  %vm14417_vm3 = vnez %v14416_v9 }
 0x233   : > { %10645 = vmatmul.mubr.msk.f32.gmra.mrb[28].mxu0 %vm726_vm0, %v14399_v45  ;;  %v4305_v45 = vsel %vm14417_vm3, %v4273_v11, 0.0 }
 0x234   : > { %10647 = vmatprep.mubr.msk.f32.mxu0 %vm726_vm0, %v7581_v14  ;;  %v7956_v14 = vld [vmem:[#allocation3 + $0xaa] sm:$0xff] }
 0x235   : > { %10180 = vmatmul.mubr.msk.f32.gmra.mrb[30].mxu1 %vm726_vm0, %v3899_v58  ;;  %v7988_v58 = vsel %vm14417_vm3, %v7956_v14, 0.0 }
 0x236   : > { %10186 = vmatprep.mubr.msk.f32.mxu1 %vm726_vm0, %v13062_v22  ;;  %v14402_v22 = vld [vmem:[#allocation10_spill] sm:$0xff] }
 0x237   : > { %10648 = vmatmul.mubr.msk.f32.gmra.mrb[30].mxu0 %vm726_vm0, %v7582_v20  ;;  %vm14403_vm7 = vnez %v14402_v22  ;;  %v4274_v20 = vld [vmem:[#allocation2 + $0xb2] sm:$0xff]  ;;  %v4277_v22 = vld [vmem:[#allocation2 + $0xca] sm:$0xff] }
 0x238   : > { %10654 = vmatprep.mubr.msk.f32.mxu0 %vm726_vm0, %v13069_v34  ;;  %v4291_v60 = vsel %vm14403_vm7, %v4259_v18, 0.0  ;;  %v7974_v34 = vsel %vm14403_vm7, %v7942_v10, 0.0  ;;  %v7958_v18 = vld [vmem:[#allocation3 + $0xba] sm:$0xff] }
 0x239   : > { %10187 = vmatmul.mubr.msk.f32.vlgmr.msra.gmra.mrb[0].mxu1 %vm726_vm0, %v4289_v31  ;;  %v4275_v31 = vld [vmem:[#allocation2 + $0xba] sm:$0xff]  ;;  %v7990_v10 = vsel %vm14418_vm4, %v7958_v18, 0.0 }
 0x23a   : > { %10189 = vmatprep.mubr.msk.f32.mxu1 %vm726_vm0, %v14401_v50  ;;  %v4276_v50 = vld [vmem:[#allocation2 + $0xc2] sm:$0xff] }
 0x23b   : > { %10655 = vmatmul.mubr.msk.f32.vlgmr.msra.gmra.mrb[0].mxu0 %vm726_vm0, %v7972_v37  ;;  %v7957_v37 = vld [vmem:[#allocation3 + $0xb2] sm:$0xff] }
 0x23c   : > { %10657 = vmatprep.mubr.msk.f32.mxu0 %vm726_vm0, %v7941_v43  ;;  %v4307_v43 = vsel %vm14418_vm4, %v4275_v31, 0.0 }
 0x23d   : > { %10190 = vmatmul.mubr.msk.f32.gmra.mrb[2].mxu1 %vm726_vm0, %v4291_v60  ;;  %v7959_v60 = vld [vmem:[#allocation3 + $0xc2] sm:$0xff] }
 0x23e   : > { %10192 = vmatprep.mubr.msk.f32.mxu1 %vm726_vm0, %v4260_v53  ;;  %v4309_v53 = vsel %vm14419_vm5, %v4277_v22, 0.0 }
 0x23f   : > { %10658 = vmatmul.mubr.msk.f32.gmra.mrb[2].mxu0 %vm726_vm0, %v7974_v34  ;;  %v7960_v34 = vld [vmem:[#allocation3 + $0xca] sm:$0xff] }
 0x240   : > { %10660 = vmatprep.mubr.msk.f32.mxu0 %vm726_vm0, %v7943_v27  ;;  %v7992_v23 = vsel %vm14419_vm5, %v7960_v34, 0.0  ;;  %v4279_v27 = vld [vmem:[#allocation2 + $0xda] sm:$0xff] }
 0x241   : > { %10193 = vmatmul.mubr.msk.f32.gmra.mrb[4].mxu1 %vm726_vm0, %v4293_v1  ;;  %v4311_v1 = vsel %vm14420_vm6, %v4279_v27, 0.0 }
 0x242   : > { %10195 = vmatprep.mubr.msk.f32.mxu1 %vm726_vm0, %v4262_v5  ;;  %v4281_v5 = vld [vmem:[#allocation2 + $0xea] sm:$0xff] }
 0x243   : > { %10661 = vmatmul.mubr.msk.f32.gmra.mrb[4].mxu0 %vm726_vm0, %v7976_v36  ;;  %v7994_v36 = vsel %vm14420_vm6, %v7962_v29, 0.0  ;;  %v4313_v42 = vsel %vm14313_vm13, %v4281_v5, 0.0 }
 0x244   : > { %10663 = vmatprep.mubr.msk.f32.mxu0 %vm726_vm0, %v7945_v13  ;;  %v7964_v13 = vld [vmem:[#allocation3 + $0xea] sm:$0xff] }
 0x245   : > { %10196 = vmatmul.mubr.msk.f32.gmra.mrb[6].mxu1 %vm726_vm0, %v4295_v15  ;;  %v7996_v8 = vsel %vm14313_vm13, %v7964_v13, 0.0  ;;  %v4283_v15 = vld [vmem:[#allocation2 + $0xfa] sm:$0xff] }
 0x246   : > { %10198 = vmatprep.mubr.msk.f32.mxu1 %vm726_vm0, %v4264_v51  ;;  %v7966_v51 = vld [vmem:[#allocation3 + $0xfa] sm:$0xff] }
 0x247   : > { %10664 = vmatmul.mubr.msk.f32.gmra.mrb[6].mxu0 %vm726_vm0, %v7978_v32  ;;  %v7965_v32 = vld [vmem:[#allocation3 + $0xf2] sm:$0xff]  ;;  %v7998_v46 = vsel %vm14318_vm12, %v7966_v51, 0.0 }
 0x248   : > { %10666 = vmatprep.mubr.msk.f32.mxu0 %vm726_vm0, %v7947_v54  ;;  %v4315_v54 = vsel %vm14318_vm12, %v4283_v15, 0.0 }
 0x249   : > { %10199 = vmatmul.mubr.msk.f32.gmra.mrb[8].mxu1 %vm726_vm0, %v4297_v25  ;;  %v4317_v25 = vsel %vm12453_vm15, %v14422_v55, 0.0 }
 0x24a   : > { %10201 = vmatprep.mubr.msk.f32.mxu1 %vm726_vm0, %v4266_v56  ;;  %v14425_v56 = vld [vmem:[#allocation15_spill] sm:$0xff] }
 0x24b   : > { %10667 = vmatmul.mubr.msk.f32.gmra.mrb[8].mxu0 %vm726_vm0, %v7980_v48  ;;  %v14424_v48 = vld [vmem:[#allocation14_spill] sm:$0xff]  ;;  %v8000_v6 = vsel %vm12453_vm15, %v14425_v56, 0.0 }
 0x24c   : > { %10669 = vmatprep.mubr.msk.f32.mxu0 %vm726_vm0, %v7949_v35  ;;  %v4286_v35 = vld [vmem:[#allocation2 + $0x112] sm:$0xff] }
 0x24d   : > { %10202 = vmatmul.mubr.msk.f32.gmra.mrb[10].mxu1 %vm726_vm0, %v4299_v19  ;;  %v7970_v19 = vld [vmem:[#allocation3 + $0x11a] sm:$0xff] }
 0x24e   : > { %10204 = vmatprep.mubr.msk.f32.mxu1 %vm726_vm0, %v4268_v47  ;;  %v8002_v47 = vsel %vm12477_vm14, %v7970_v19, 0.0 }
 0x24f   : > { %10670 = vmatmul.mubr.msk.f32.gmra.mrb[10].mxu0 %vm726_vm0, %v7982_v41  ;;  %v4319_v41 = vsel %vm12477_vm14, %v4287_v0, 0.0 }
 0x250   : > { %10672 = vmatprep.mubr.msk.f32.mxu0 %vm726_vm0, %v7951_v12 }
 0x251   : > { %10205 = vmatmul.mubr.msk.f32.gmra.mrb[12].mxu1 %vm726_vm0, %v4301_v49 }
 0x252   : > { %10207 = vmatprep.mubr.msk.f32.mxu1 %vm726_vm0, %v4270_v40 }
 0x253   : > { %10673 = vmatmul.mubr.msk.f32.gmra.mrb[12].mxu0 %vm726_vm0, %v7984_v39 }
 0x254   : > { %10675 = vmatprep.mubr.msk.f32.mxu0 %vm726_vm0, %v7953_v2 }
 0x255   : > { %10208 = vmatmul.mubr.msk.f32.gmra.mrb[14].mxu1 %vm726_vm0, %v4303_v30 }
 0x256   : > { %10210 = vmatprep.mubr.msk.f32.mxu1 %vm726_vm0, %v4272_v33 }
 0x257   : > { %10676 = vmatmul.mubr.msk.f32.gmra.mrb[14].mxu0 %vm726_vm0, %v7986_v63 }
 0x258   : > { %10678 = vmatprep.mubr.msk.f32.mxu0 %vm726_vm0, %v7955_v16 }
 0x259   : > { %10211 = vmatmul.mubr.msk.f32.gmra.mrb[16].mxu1 %vm726_vm0, %v4305_v45 }
 0x25a   : > { %10213 = vmatprep.mubr.msk.f32.mxu1 %vm726_vm0, %v4274_v20 }
 0x25b   : > { %10679 = vmatmul.mubr.msk.f32.gmra.mrb[16].mxu0 %vm726_vm0, %v7988_v58 }
 0x25c   : > { %10681 = vmatprep.mubr.msk.f32.mxu0 %vm726_vm0, %v7957_v37 }
 0x25d   : > { %10214 = vmatmul.mubr.msk.f32.gmra.mrb[18].mxu1 %vm726_vm0, %v4307_v43 }
 0x25e   : > { %10216 = vmatprep.mubr.msk.f32.mxu1 %vm726_vm0, %v4276_v50 }
 0x25f   : > { %10682 = vmatmul.mubr.msk.f32.gmra.mrb[18].mxu0 %vm726_vm0, %v7990_v10 }
 0x260   : > { %10684 = vmatprep.mubr.msk.f32.mxu0 %vm726_vm0, %v7959_v60 }
 0x261   : > { %10217 = vmatmul.mubr.msk.f32.gmra.mrb[20].mxu1 %vm726_vm0, %v4309_v53 }
 0x262   : > { %10219 = vmatprep.mubr.msk.f32.mxu1 %vm726_vm0, %v4278_v7 }
 0x263   : > { %10685 = vmatmul.mubr.msk.f32.gmra.mrb[20].mxu0 %vm726_vm0, %v7992_v23 }
 0x264   : > { %10687 = vmatprep.mubr.msk.f32.mxu0 %vm726_vm0, %v7961_v61 }
 0x265   : > { %10220 = vmatmul.mubr.msk.f32.gmra.mrb[22].mxu1 %vm726_vm0, %v4311_v1 }
 0x266   : > { %10222 = vmatprep.mubr.msk.f32.mxu1 %vm726_vm0, %v4280_v26 }
 0x267   : > { %10688 = vmatmul.mubr.msk.f32.gmra.mrb[22].mxu0 %vm726_vm0, %v7994_v36 }
 0x268   : > { %10690 = vmatprep.mubr.msk.f32.mxu0 %vm726_vm0, %v7963_v52 }
 0x269   : > { %10223 = vmatmul.mubr.msk.f32.gmra.mrb[24].mxu1 %vm726_vm0, %v4313_v42 }
 0x26a   : > { %10225 = vmatprep.mubr.msk.f32.mxu1 %vm726_vm0, %v4282_v4 }
 0x26b   : > { %10691 = vmatmul.mubr.msk.f32.gmra.mrb[24].mxu0 %vm726_vm0, %v7996_v8 }
 0x26c   : > { %10693 = vmatprep.mubr.msk.f32.mxu0 %vm726_vm0, %v7965_v32 }
 0x26d   : > { %10226 = vmatmul.mubr.msk.f32.gmra.mrb[26].mxu1 %vm726_vm0, %v4315_v54 }
 0x26e   : > { %10228 = vmatprep.mubr.msk.f32.mxu1 %vm726_vm0, %v13246_v38 }
 0x26f   : > { %10694 = vmatmul.mubr.msk.f32.gmra.mrb[26].mxu0 %vm726_vm0, %v7998_v46 }
 0x270   : > { %10696 = vmatprep.mubr.msk.f32.mxu0 %vm726_vm0, %v14424_v48 }
 0x271   : > { %10229 = vmatmul.mubr.msk.f32.gmra.mrb[28].mxu1 %vm726_vm0, %v4317_v25 }
 0x272   : > { %10231 = vmatprep.mubr.msk.f32.mxu1 %vm726_vm0, %v4286_v35 }
 0x273   : > { %10697 = vmatmul.mubr.msk.f32.gmra.mrb[28].mxu0 %vm726_vm0, %v8000_v6 }
 0x274   : > { %10699 = vmatprep.mubr.msk.f32.mxu0 %vm726_vm0, %v7969_v3 }
 0x275   : > { %10232 = vmatmul.mubr.msk.f32.gmra.mrb[30].mxu1 %vm726_vm0, %v4319_v41 }
 0x277   : > { %10700 = vmatmul.mubr.msk.f32.gmra.mrb[30].mxu0 %vm726_vm0, %v8002_v47 }
 0x30c   : > { %v10188_v44 = vpop.f32.mrb[0].mxu1 }
 0x30d   : > { %v4485_v12 = vpop.f32.mrb[1].mxu1 }
 0x30e   : > { %v10656_v28 = vpop.f32.mrb[0].mxu0 }
 0x30f   : > { %v10774_v49 = vadd.f32 %v10656_v28, %v10188_v44  ;;  %v8168_v39 = vpop.f32.mrb[1].mxu0 }
 0x310   : > { %v10775_v40 = vadd.f32 %v8168_v39, %v4485_v12  ;;  %v10191_v2 = vpop.f32.mrb[2].mxu1 }
 0x311   : > { %v8367_v62 = vadd.f32 %v10774_v49, %v13714_v57  ;;  %v4495_v24 = vpop.f32.mrb[3].mxu1 }
 0x312   : > { %v8366_v21 = vadd.f32 %v10775_v40, %v13714_v57  ;;  %v10659_v30 = vpop.f32.mrb[2].mxu0 }
 0x313   : > { %v8399_v63 = vmax.f32 %v8367_v62, 0.0  ;;  %v10776_v33 = vadd.f32 %v10659_v30, %v10191_v2  ;;  %v8178_v11 = vpop.f32.mrb[3].mxu0 }
 0x314   : > { %v8398_v16 = vmax.f32 %v8366_v21, 0.0  ;;  %v10777_v14 = vadd.f32 %v8178_v11, %v4495_v24  ;;  %v10194_v45 = vpop.f32.mrb[4].mxu1 }
 0x315   : > { %8431 = vst.msk [vmem:[%s13721_s9 + $0x8] sm:$0xff] %vm726_vm0, %v8399_v63  ;;  %v8369_v9 = vadd.f32 %v10776_v33, %v13714_v57  ;;  %v4505_v20 = vpop.f32.mrb[5].mxu1 }
 0x316   : > { %8430 = vst.msk [vmem:[%s13721_s9] sm:$0xff] %vm726_vm0, %v8398_v16  ;;  %v8368_v58 = vadd.f32 %v10777_v14, %v13714_v57  ;;  %v10662_v31 = vpop.f32.mrb[4].mxu0 }
 0x317   : > { %v8401_v37 = vmax.f32 %v8369_v9, 0.0  ;;  %v10778_v18 = vadd.f32 %v10662_v31, %v10194_v45  ;;  %v8188_v43 = vpop.f32.mrb[5].mxu0 }
 0x318   : > { %v8400_v10 = vmax.f32 %v8368_v58, 0.0  ;;  %v10779_v50 = vadd.f32 %v8188_v43, %v4505_v20  ;;  %v10197_v60 = vpop.f32.mrb[6].mxu1 }
 0x319   : > { %8433 = vst.msk [vmem:[%s13721_s9 + $0x18] sm:$0xff] %vm726_vm0, %v8401_v37  ;;  %v8371_v22 = vadd.f32 %v10778_v18, %v13714_v57  ;;  %v4515_v53 = vpop.f32.mrb[7].mxu1 }
 0x31a   : > { %8432 = vst.msk [vmem:[%s13721_s9 + $0x10] sm:$0xff] %vm726_vm0, %v8400_v10  ;;  %v8370_v34 = vadd.f32 %v10779_v50, %v13714_v57  ;;  %v10665_v23 = vpop.f32.mrb[6].mxu0 }
 0x31b   : > { %v8403_v7 = vmax.f32 %v8371_v22, 0.0  ;;  %v10780_v27 = vadd.f32 %v10665_v23, %v10197_v60  ;;  %v8198_v61 = vpop.f32.mrb[7].mxu0 }
 0x31c   : > { %v8402_v29 = vmax.f32 %v8370_v34, 0.0  ;;  %v10781_v1 = vadd.f32 %v8198_v61, %v4515_v53  ;;  %v10200_v26 = vpop.f32.mrb[8].mxu1 }
 0x31d   : > { %8435 = vst.msk [vmem:[%s13721_s9 + $0x28] sm:$0xff] %vm726_vm0, %v8403_v7  ;;  %v8373_v36 = vadd.f32 %v10780_v27, %v13714_v57  ;;  %v4525_v52 = vpop.f32.mrb[9].mxu1 }
 0x31e   : > { %8434 = vst.msk [vmem:[%s13721_s9 + $0x20] sm:$0xff] %vm726_vm0, %v8402_v29  ;;  %v8372_v5 = vadd.f32 %v10781_v1, %v13714_v57  ;;  %v10668_v13 = vpop.f32.mrb[8].mxu0 }
 0x31f   : > { %v8405_v42 = vmax.f32 %v8373_v36, 0.0  ;;  %v10782_v8 = vadd.f32 %v10668_v13, %v10200_v26  ;;  %v8208_v4 = vpop.f32.mrb[9].mxu0 }
 0x320   : > { %v8404_v15 = vmax.f32 %v8372_v5, 0.0  ;;  %v10783_v32 = vadd.f32 %v8208_v4, %v4525_v52  ;;  %v10203_v17 = vpop.f32.mrb[10].mxu1 }
 0x321   : > { %8437 = vst.msk [vmem:[%s13721_s9 + $0x38] sm:$0xff] %vm726_vm0, %v8405_v42  ;;  %v8375_v51 = vadd.f32 %v10782_v8, %v13714_v57  ;;  %v4535_v46 = vpop.f32.mrb[11].mxu1 }
 0x322   : > { %8436 = vst.msk [vmem:[%s13721_s9 + $0x30] sm:$0xff] %vm726_vm0, %v8404_v15  ;;  %v8374_v54 = vadd.f32 %v10783_v32, %v13714_v57  ;;  %v10671_v55 = vpop.f32.mrb[10].mxu0 }
 0x323   : > { %v8407_v59 = vmax.f32 %v8375_v51, 0.0  ;;  %v10784_v25 = vadd.f32 %v10671_v55, %v10203_v17  ;;  %v8218_v48 = vpop.f32.mrb[11].mxu0 }
 0x324   : > { %v8406_v56 = vmax.f32 %v8374_v54, 0.0  ;;  %v10785_v6 = vadd.f32 %v8218_v48, %v4535_v46  ;;  %v10206_v0 = vpop.f32.mrb[12].mxu1 }
 0x325   : > { %8439 = vst.msk [vmem:[%s13721_s9 + $0x48] sm:$0xff] %vm726_vm0, %v8407_v59  ;;  %v8377_v35 = vadd.f32 %v10784_v25, %v13714_v57  ;;  %v4545_v19 = vpop.f32.mrb[13].mxu1 }
 0x326   : > { %8438 = vst.msk [vmem:[%s13721_s9 + $0x40] sm:$0xff] %vm726_vm0, %v8406_v56  ;;  %v8376_v3 = vadd.f32 %v10785_v6, %v13714_v57  ;;  %v10674_v38 = vpop.f32.mrb[12].mxu0 }
 0x327   : > { %v8409_v41 = vmax.f32 %v8377_v35, 0.0  ;;  %v10786_v47 = vadd.f32 %v10674_v38, %v10206_v0  ;;  %v8228_v44 = vpop.f32.mrb[13].mxu0 }
 0x328   : > { %v8408_v12 = vmax.f32 %v8376_v3, 0.0  ;;  %v10787_v28 = vadd.f32 %v8228_v44, %v4545_v19  ;;  %v10209_v39 = vpop.f32.mrb[14].mxu1 }
 0x329   : > { %8441 = vst.msk [vmem:[%s13721_s9 + $0x58] sm:$0xff] %vm726_vm0, %v8409_v41  ;;  %v8379_v49 = vadd.f32 %v10786_v47, %v13714_v57  ;;  %v4555_v62 = vpop.f32.mrb[15].mxu1 }
 0x32a   : > { %8440 = vst.msk [vmem:[%s13721_s9 + $0x50] sm:$0xff] %vm726_vm0, %v8408_v12  ;;  %v8378_v40 = vadd.f32 %v10787_v28, %v13714_v57  ;;  %v10677_v2 = vpop.f32.mrb[14].mxu0 }
 0x32b   : > { %v8411_v21 = vmax.f32 %v8379_v49, 0.0  ;;  %v10788_v24 = vadd.f32 %v10677_v2, %v10209_v39  ;;  %v8238_v30 = vpop.f32.mrb[15].mxu0 }
 0x32c   : > { %v8410_v63 = vmax.f32 %v8378_v40, 0.0  ;;  %v10789_v33 = vadd.f32 %v8238_v30, %v4555_v62  ;;  %v10212_v16 = vpop.f32.mrb[16].mxu1 }
 0x32d   : > { %8443 = vst.msk [vmem:[%s13721_s9 + $0x68] sm:$0xff] %vm726_vm0, %v8411_v21  ;;  %v8381_v11 = vadd.f32 %v10788_v24, %v13714_v57  ;;  %v4565_v9 = vpop.f32.mrb[17].mxu1 }
 0x32e   : > { %8442 = vst.msk [vmem:[%s13721_s9 + $0x60] sm:$0xff] %vm726_vm0, %v8410_v63  ;;  %v8380_v14 = vadd.f32 %v10789_v33, %v13714_v57  ;;  %v10680_v45 = vpop.f32.mrb[16].mxu0 }
 0x32f   : > { %v8413_v58 = vmax.f32 %v8381_v11, 0.0  ;;  %v10790_v20 = vadd.f32 %v10680_v45, %v10212_v16  ;;  %v8248_v31 = vpop.f32.mrb[17].mxu0 }
 0x330   : > { %v8412_v37 = vmax.f32 %v8380_v14, 0.0  ;;  %v10791_v18 = vadd.f32 %v8248_v31, %v4565_v9  ;;  %v10215_v10 = vpop.f32.mrb[18].mxu1 }
 0x331   : > { %8445 = vst.msk [vmem:[%s13721_s9 + $0x78] sm:$0xff] %vm726_vm0, %v8413_v58  ;;  %v8383_v43 = vadd.f32 %v10790_v20, %v13714_v57  ;;  %v4575_v22 = vpop.f32.mrb[19].mxu1 }
 0x332   : > { %8444 = vst.msk [vmem:[%s13721_s9 + $0x70] sm:$0xff] %vm726_vm0, %v8412_v37  ;;  %v8382_v50 = vadd.f32 %v10791_v18, %v13714_v57  ;;  %v10683_v60 = vpop.f32.mrb[18].mxu0 }
 0x333   : > { %v8415_v34 = vmax.f32 %v8383_v43, 0.0  ;;  %v10792_v53 = vadd.f32 %v10683_v60, %v10215_v10  ;;  %v8258_v23 = vpop.f32.mrb[19].mxu0 }
 0x334   : > { %v8414_v7 = vmax.f32 %v8382_v50, 0.0  ;;  %v10793_v27 = vadd.f32 %v8258_v23, %v4575_v22  ;;  %v10218_v29 = vpop.f32.mrb[20].mxu1 }
 0x335   : > { %8447 = vst.msk [vmem:[%s13721_s9 + $0x88] sm:$0xff] %vm726_vm0, %v8415_v34  ;;  %v8385_v61 = vadd.f32 %v10792_v53, %v13714_v57  ;;  %v4585_v36 = vpop.f32.mrb[21].mxu1 }
 0x336   : > { %8446 = vst.msk [vmem:[%s13721_s9 + $0x80] sm:$0xff] %vm726_vm0, %v8414_v7  ;;  %v8384_v1 = vadd.f32 %v10793_v27, %v13714_v57  ;;  %v10686_v26 = vpop.f32.mrb[20].mxu0 }
 0x337   : > { %v8417_v5 = vmax.f32 %v8385_v61, 0.0  ;;  %v10794_v52 = vadd.f32 %v10686_v26, %v10218_v29  ;;  %v8268_v13 = vpop.f32.mrb[21].mxu0 }
 0x338   : > { %v8416_v42 = vmax.f32 %v8384_v1, 0.0  ;;  %v10795_v8 = vadd.f32 %v8268_v13, %v4585_v36  ;;  %v10221_v15 = vpop.f32.mrb[22].mxu1 }
 0x339   : > { %8449 = vst.msk [vmem:[%s13721_s9 + $0x98] sm:$0xff] %vm726_vm0, %v8417_v5  ;;  %v8387_v4 = vadd.f32 %v10794_v52, %v13714_v57  ;;  %v4595_v51 = vpop.f32.mrb[23].mxu1 }
 0x33a   : > { %8448 = vst.msk [vmem:[%s13721_s9 + $0x90] sm:$0xff] %vm726_vm0, %v8416_v42  ;;  %v8386_v32 = vadd.f32 %v10795_v8, %v13714_v57  ;;  %v10689_v17 = vpop.f32.mrb[22].mxu0 }
 0x33b   : > { %v8419_v54 = vmax.f32 %v8387_v4, 0.0  ;;  %v10796_v46 = vadd.f32 %v10689_v17, %v10221_v15  ;;  %v8278_v55 = vpop.f32.mrb[23].mxu0 }
 0x33c   : > { %v8418_v59 = vmax.f32 %v8386_v32, 0.0  ;;  %v10797_v25 = vadd.f32 %v8278_v55, %v4595_v51  ;;  %v10224_v56 = vpop.f32.mrb[24].mxu1 }
 0x33d   : > { %8451 = vst.msk [vmem:[%s13721_s9 + $0xa8] sm:$0xff] %vm726_vm0, %v8419_v54  ;;  %v8389_v48 = vadd.f32 %v10796_v46, %v13714_v57  ;;  %v4605_v35 = vpop.f32.mrb[25].mxu1 }
 0x33e   : > { %8450 = vst.msk [vmem:[%s13721_s9 + $0xa0] sm:$0xff] %vm726_vm0, %v8418_v59  ;;  %v8388_v6 = vadd.f32 %v10797_v25, %v13714_v57  ;;  %v10692_v0 = vpop.f32.mrb[24].mxu0 }
 0x33f   : > { %v8421_v3 = vmax.f32 %v8389_v48, 0.0  ;;  %v10798_v19 = vadd.f32 %v10692_v0, %v10224_v56  ;;  %v8288_v38 = vpop.f32.mrb[25].mxu0 }
 0x340   : > { %v8420_v41 = vmax.f32 %v8388_v6, 0.0  ;;  %v10799_v47 = vadd.f32 %v8288_v38, %v4605_v35  ;;  %v10227_v12 = vpop.f32.mrb[26].mxu1 }
 0x341   : > { %8453 = vst.msk [vmem:[%s13721_s9 + $0xb8] sm:$0xff] %vm726_vm0, %v8421_v3  ;;  %v8391_v44 = vadd.f32 %v10798_v19, %v13714_v57  ;;  %v4615_v49 = vpop.f32.mrb[27].mxu1 }
 0x342   : > { %8452 = vst.msk [vmem:[%s13721_s9 + $0xb0] sm:$0xff] %vm726_vm0, %v8420_v41  ;;  %v8390_v28 = vadd.f32 %v10799_v47, %v13714_v57  ;;  %v10695_v39 = vpop.f32.mrb[26].mxu0 }
 0x343   : > { %v8423_v40 = vmax.f32 %v8391_v44, 0.0  ;;  %v10800_v62 = vadd.f32 %v10695_v39, %v10227_v12  ;;  %v8298_v2 = vpop.f32.mrb[27].mxu0 }
 0x344   : > { %v8422_v21 = vmax.f32 %v8390_v28, 0.0  ;;  %v10801_v24 = vadd.f32 %v8298_v2, %v4615_v49  ;;  %v10230_v63 = vpop.f32.mrb[28].mxu1 }
 0x345   : > { %8455 = vst.msk [vmem:[%s13721_s9 + $0xc8] sm:$0xff] %vm726_vm0, %v8423_v40  ;;  %v8393_v30 = vadd.f32 %v10800_v62, %v13714_v57  ;;  %v4625_v11 = vpop.f32.mrb[29].mxu1 }
 0x346   : > { %8454 = vst.msk [vmem:[%s13721_s9 + $0xc0] sm:$0xff] %vm726_vm0, %v8422_v21  ;;  %v8392_v33 = vadd.f32 %v10801_v24, %v13714_v57  ;;  %v10698_v16 = vpop.f32.mrb[28].mxu0 }
 0x347   : > { %v8425_v14 = vmax.f32 %v8393_v30, 0.0  ;;  %v10802_v9 = vadd.f32 %v10698_v16, %v10230_v63  ;;  %v8308_v45 = vpop.f32.mrb[29].mxu0 }
 0x348   : > { %v8424_v58 = vmax.f32 %v8392_v33, 0.0  ;;  %v10803_v20 = vadd.f32 %v8308_v45, %v4625_v11  ;;  %v10233_v37 = vpop.f32.mrb[30].mxu1 }
 0x349   : > { %8457 = vst.msk [vmem:[%s13721_s9 + $0xd8] sm:$0xff] %vm726_vm0, %v8425_v14  ;;  %v8395_v31 = vadd.f32 %v10802_v9, %v13714_v57  ;;  %v4635_v43 = vpop.f32.mrb[31].mxu1 }
 0x34a   : > { %8456 = vst.msk [vmem:[%s13721_s9 + $0xd0] sm:$0xff] %vm726_vm0, %v8424_v58  ;;  %v8394_v18 = vadd.f32 %v10803_v20, %v13714_v57  ;;  %v10701_v10 = vpop.f32.mrb[30].mxu0 }
 0x34b   : > { %v8427_v50 = vmax.f32 %v8395_v31, 0.0  ;;  %v10804_v22 = vadd.f32 %v10701_v10, %v10233_v37  ;;  %v8318_v60 = vpop.f32.mrb[31].mxu0 }
 0x34c   : > { %v8426_v34 = vmax.f32 %v8394_v18, 0.0  ;;  %v10805_v53 = vadd.f32 %v8318_v60, %v4635_v43 }
 0x34d   : > { %8459 = vst.msk [vmem:[%s13721_s9 + $0xe8] sm:$0xff] %vm726_vm0, %v8427_v50  ;;  %v8397_v23 = vadd.f32 %v10804_v22, %v13714_v57 }
 0x34e   : > { %8458 = vst.msk [vmem:[%s13721_s9 + $0xe0] sm:$0xff] %vm726_vm0, %v8426_v34  ;;  %v8396_v7 = vadd.f32 %v10805_v53, %v13714_v57 }
 0x34f   : > { %v8429_v27 = vmax.f32 %v8397_v23, 0.0 }
 0x350   : > { %v8428_v61 = vmax.f32 %v8396_v7, 0.0 }
 0x351   : > { %8461 = vst.msk [vmem:[%s13721_s9 + $0xf8] sm:$0xff] %vm726_vm0, %v8429_v27 }
 0x352   : > { %8460 = vst.msk [vmem:[%s13721_s9 + $0xf0] sm:$0xff] %vm726_vm0, %v8428_v61 }
 0x353 PF: > { %s15_s18 = sadd.s32 1, %s11333_s18  }
 0x354   : > { %p12_p4 = scmp.ge.s32.totalorder %s15_s18, 4  }
 0x356   :  { %14 = sbr.rel (!%p12_p4) target bundleno = 1 (0x1), region = 89 }

</bundles_post_ra>
